<compile_context>
chip_gen: v6e
topology: v6e:2x2x1
jax: 0.10.0
libtpu: 0.0.40
codegen_flags: <defaults>
</compile_context>

<pallas_src>
import functools

import numpy as np

import jax
import jax.numpy as jnp
from jax.experimental import pallas as pl
from jax.experimental.pallas import tpu as pltpu


# ----------------------------- Pallas kernel ------------------------------- #

def _inception_resnet_c_kernel(x_ref, w0_ref, a0_ref, w1a_ref, a1a_ref,
                               w1b_ref, a1b_ref, w1c_ref, a1c_ref,
                               mw_ref, mh_ref, wf0_ref, wf1_ref, bias_ref,
                               o_ref, *, activation, shift_h):
    f32 = jnp.float32
    bf16 = jnp.bfloat16

    x32 = x_ref[...]                      # (tm, Cp) f32 -- exact residual path
    xb = x32.astype(bf16)                 # single bf16 copy feeding the MXU

    def affine(acc, a_ref):
        # folded BatchNorm (eval-mode running stats, eps=1e-3) + ReLU, in f32
        return jnp.maximum(acc * a_ref[0:1, :] + a_ref[1:2, :], 0.0)

    # branch_0 and branch_1[0]: 1x1 conv + BN + ReLU, sharing the resident x.
    # b0 only ever feeds matmuls -> emit it directly in bf16.
    b0 = affine(jnp.dot(xb, w0_ref[...], preferred_element_type=f32), a0_ref).astype(bf16)
    b1 = affine(jnp.dot(xb, w1a_ref[...], preferred_element_type=f32), a1a_ref)

    def conv3tap(vf, w3_ref, a_ref, m_ref, shift):
        # 3-tap conv along one spatial axis of the row-flattened activation:
        #   out[p] = v[p-shift] @ W[0] + v[p] @ W[1] + v[p+shift] @ W[2]
        # Shifted copies come from an XLU roll of the resident activation (no MXU work);
        # conv zero-padding and intra-tile image boundaries are a (tm, 1) VPU mask.
        # Rolls are done in f32 (robust sublane rotate); the per-tap bf16 casts are tiny.
        n_rows = vf.shape[0]
        vb = vf.astype(bf16)
        acc = jnp.dot(vb, w3_ref[1], preferred_element_type=f32)            # center tap
        lo = (pltpu.roll(vf, shift=shift, axis=0) * m_ref[:, 0:1]).astype(bf16)
        acc = acc + jnp.dot(lo, w3_ref[0], preferred_element_type=f32)      # -1 tap
        hi = (pltpu.roll(vf, shift=n_rows - shift, axis=0) * m_ref[:, 1:2]).astype(bf16)
        acc = acc + jnp.dot(hi, w3_ref[2], preferred_element_type=f32)      # +1 tap
        return affine(acc, a_ref)

    b1 = conv3tap(b1, w1b_ref, a1b_ref, mw_ref, 1)          # (1,3) conv along W: 192 -> 224
    b1 = conv3tap(b1, w1c_ref, a1c_ref, mh_ref, shift_h)    # (3,1) conv along H: 224 -> 256

    # final 1x1 conv over cat(b0, b1): K split into two accumulating matmuls.
    # `scale` is folded into wf0/wf1/bias at prep time, so the epilogue is add (+ReLU) only.
    acc = jnp.dot(b0, wf0_ref[...], preferred_element_type=f32)
    acc = acc + jnp.dot(b1.astype(bf16), wf1_ref[...], preferred_element_type=f32)
    y = x32 + acc + bias_ref[...]
    if activation:
        y = jnp.maximum(y, 0.0)
    o_ref[...] = y


# ----------------------------- one-time parameter prep --------------------- #

def _choose_tile_rows(N, H, W, max_rows=256):
    """Rows per M-tile: whole images only (so the spatial convs never need halos),
    capped at max_rows.  Prefer an even grid >= 2 so v7x's two TensorCores both get work;
    otherwise fall back to the largest whole-image tile that fits."""
    hw = H * W
    # pass 1: largest tile with an even grid of at least 2 steps
    for ipt in range(N, 0, -1):
        rows = ipt * hw
        if N % ipt or rows % 8 or rows > max_rows:
            continue
        grid = N // ipt
        if grid >= 2 and grid % 2 == 0:
            return rows
    # pass 2: largest whole-image tile that fits (grid may be 1 / odd)
    for ipt in range(N, 0, -1):
        rows = ipt * hw
        if N % ipt == 0 and rows % 8 == 0 and rows <= max_rows:
            return rows
    # tiny / awkward shapes: single tile covering everything (full-extent block is legal)
    return N * hw


def _boundary_masks(tm, H, W):
    """(tm, 2) 0/1 masks for the (1,3) and (3,1) convs.

    Column 0 masks the '-1' tap (valid iff w>0 resp. h>0), column 1 the '+1' tap
    (valid iff w<W-1 resp. h<H-1).  Because tiles always start on an image boundary,
    these masks also kill any wrap-around / cross-image rows brought in by the roll."""
    idx = np.arange(tm)
    w = idx % W
    h = (idx // W) % H
    mw = np.stack([(w > 0), (w < W - 1)], axis=1).astype(np.float32)
    mh = np.stack([(h > 0), (h < H - 1)], axis=1).astype(np.float32)
    return mw, mh


def prepare_params(p, in_channels, N, H, W, *, scale=1.0, eps=1e-3):
    """Hoisted out of the forward: weight transposes, BN fold, channel padding, bf16 casts,
    scale folding and boundary-mask construction."""
    C = in_channels
    Cp = pl.cdiv(C, 128) * 128
    tm = _choose_tile_rows(N, H, W)

    def fold_bn(gamma, beta, mean, var):
        s = gamma / jnp.sqrt(var + eps)
        t = beta - mean * s
        return jnp.stack([s, t]).astype(jnp.float32)            # (2, Cout)

    def w1x1(w, rows):                                           # (Co,Ci,1,1) -> (rows, Co) bf16
        m = jnp.transpose(w[:, :, 0, 0], (1, 0))
        m = jnp.pad(m, ((0, rows - m.shape[0]), (0, 0)))
        return m.astype(jnp.bfloat16)

    # final 1x1 conv (448 -> 2080): fold the residual scale into weights + bias.
    wf = jnp.transpose(p["conv_w"][:, :, 0, 0], (1, 0)) * scale   # (448, C)
    wf = jnp.pad(wf, ((0, 0), (0, Cp - C)))                       # (448, Cp)
    mw, mh = _boundary_masks(tm, H, W)

    return {
        "w0": w1x1(p["b0_w"], Cp), "a0": fold_bn(*p["b0_bn"]),
        "w1a": w1x1(p["b1a_w"], Cp), "a1a": fold_bn(*p["b1a_bn"]),
        # (1,3) conv: (224,192,1,3) -> (3, 192, 224); taps kw-indexed
        "w1b": jnp.transpose(p["b1b_w"][:, :, 0, :], (2, 1, 0)).astype(jnp.bfloat16),
        "a1b": fold_bn(*p["b1b_bn"]),
        # (3,1) conv: (256,224,3,1) -> (3, 224, 256); taps kh-indexed
        "w1c": jnp.transpose(p["b1c_w"][:, :, :, 0], (2, 1, 0)).astype(jnp.bfloat16),
        "a1c": fold_bn(*p["b1c_bn"]),
        "wf0": wf[:192].astype(jnp.bfloat16),                     # rows for branch_0 channels
        "wf1": wf[192:].astype(jnp.bfloat16),                     # rows for branch_1 channels
        "bias": (jnp.pad(p["conv_b"], (0, Cp - C)) * scale).reshape(1, Cp).astype(jnp.float32),
        "mw": jnp.asarray(mw, jnp.float32),
        "mh": jnp.asarray(mh, jnp.float32),
    }


# ----------------------------- forward ------------------------------------- #

def inception_resnet_c_rows(x_rows, prep, *, img_w, activation=True):
    """Fast path: activation already in channels-last (M, Cp) layout (M = N*H*W rows of
    whole images, Cp = channels padded to a multiple of 128).  No HBM layout copies."""
    M, Cp = x_rows.shape
    tm = prep["mw"].shape[0]
    assert M % tm == 0, "row tile must evenly divide N*H*W"
    grid_m = M // tm

    consts = (prep["w0"], prep["a0"], prep["w1a"], prep["a1a"],
              prep["w1b"], prep["a1b"], prep["w1c"], prep["a1c"],
              prep["mw"], prep["mh"], prep["wf0"], prep["wf1"], prep["bias"])

    def cspec(arr):   # constant (untiled) operand; constant index_map -> fetched once
        nd = arr.ndim
        return pl.BlockSpec(arr.shape, lambda i, _n=nd: (0,) * _n)

    # VMEM budget from measured need (tile I/O double-buffers + constants (worst-case
    # double-buffered) + f32 temps), not a blanket limit -- matters on v7x's 64 MiB VMEM.
    const_bytes = sum(int(a.size) * a.dtype.itemsize for a in consts)
    vmem_need = 2 * const_bytes + 10 * tm * Cp * 4 + (8 << 20)
    vmem_limit = int(min(max(vmem_need, 32 << 20), 100 << 20))

    kernel = functools.partial(_inception_resnet_c_kernel,
                               activation=bool(activation), shift_h=int(img_w))

    return pl.pallas_call(
        kernel,
        out_shape=jax.ShapeDtypeStruct((M, Cp), jnp.float32),
        grid=(grid_m,),
        in_specs=[pl.BlockSpec((tm, Cp), lambda i: (i, 0))] + [cspec(a) for a in consts],
        out_specs=pl.BlockSpec((tm, Cp), lambda i: (i, 0)),
        compiler_params=pltpu.CompilerParams(
            dimension_semantics=("parallel",),
            vmem_limit_bytes=vmem_limit),
    )(x_rows, *consts)


def inception_resnet_c(x_nchw, prep, *, activation=True):
    """PyTorch-compatible NCHW entry point.  The transpose/pad round trips here are exactly
    the HBM traffic the perf review flags; when the surrounding network keeps (N*H*W, Cp)
    channels-last activations, call inception_resnet_c_rows directly and skip them."""
    N, C, H, W = x_nchw.shape
    Cp = prep["bias"].shape[1]
    M = N * H * W

    x = jnp.transpose(x_nchw, (0, 2, 3, 1)).reshape(M, C).astype(jnp.float32)
    x = jnp.pad(x, ((0, 0), (0, Cp - C)))
    out = inception_resnet_c_rows(x, prep, img_w=W, activation=activation)
    out = out[:, :C].reshape(N, H, W, C)
    return jnp.transpose(out, (0, 3, 1, 2))            # back to NCHW


# ----------------------------- deterministic params ------------------------ #

def init_params(key, in_channels):
    ks = jax.random.split(key, 10)

    def conv_w(k, cout, cin, kh, kw):
        return jax.random.normal(k, (cout, cin, kh, kw), jnp.float32) * 0.05

    def bn(k, c):
        k1, k2, k3, k4 = jax.random.split(k, 4)
        gamma = jax.random.uniform(k1, (c,), jnp.float32, 0.5, 1.5)
        beta = jax.random.normal(k2, (c,), jnp.float32) * 0.1
        mean = jax.random.normal(k3, (c,), jnp.float32) * 0.1
        var = jax.random.uniform(k4, (c,), jnp.float32, 0.5, 1.5)
        return gamma, beta, mean, var

    return {
        "b0_w": conv_w(ks[0], 192, in_channels, 1, 1), "b0_bn": bn(ks[1], 192),
        "b1a_w": conv_w(ks[2], 192, in_channels, 1, 1), "b1a_bn": bn(ks[3], 192),
        "b1b_w": conv_w(ks[4], 224, 192, 1, 3), "b1b_bn": bn(ks[5], 224),
        "b1c_w": conv_w(ks[6], 256, 224, 3, 1), "b1c_bn": bn(ks[7], 256),
        "conv_w": conv_w(ks[8], 2080, 448, 1, 1),
        "conv_b": jax.random.normal(ks[9], (2080,), jnp.float32) * 0.1,
    }


# ----------------------------- NumPy reference (loose check) --------------- #

def _numpy_reference(x, p, scale, activation, eps=1e-3):
    def conv2d(inp, w, bias=None, pad=(0, 0)):
        n, ci, h, wd = inp.shape
        co, _, kh, kw = w.shape
        ph, pw = pad
        xp = np.pad(inp, ((0, 0), (0, 0), (ph, ph), (pw, pw)))
        out = np.zeros((n, co, h, wd), np.float32)
        for i in range(kh):
            for j in range(kw):
                patch = xp[:, :, i:i + h, j:j + wd]
                out += np.einsum("nchw,oc->nohw", patch, w[:, :, i, j],
                                 optimize=True).astype(np.float32)
        if bias is not None:
            out += bias.reshape(1, co, 1, 1)
        return out

    def bn_relu(inp, bn):
        gamma, beta, mean, var = (np.asarray(t, np.float32) for t in bn)
        y = (inp - mean.reshape(1, -1, 1, 1)) / np.sqrt(var.reshape(1, -1, 1, 1) + eps)
        y = y * gamma.reshape(1, -1, 1, 1) + beta.reshape(1, -1, 1, 1)
        return np.maximum(y, 0.0)

    g = lambda k: np.asarray(p[k], np.float32)
    b0 = bn_relu(conv2d(x, g("b0_w")), p["b0_bn"])
    b1 = bn_relu(conv2d(x, g("b1a_w")), p["b1a_bn"])
    b1 = bn_relu(conv2d(b1, g("b1b_w"), pad=(0, 1)), p["b1b_bn"])
    b1 = bn_relu(conv2d(b1, g("b1c_w"), pad=(1, 0)), p["b1c_bn"])
    xres = conv2d(np.concatenate([b0, b1], axis=1), g("conv_w"), g("conv_b"))
    out = x + scale * xres
    return np.maximum(out, 0.0) if activation else out


# ----------------------------- main ---------------------------------------- #

if __name__ == "__main__":
    key = jax.random.PRNGKey(0)
    kx, kp = jax.random.split(key)

    # in_channels must be 2080 so the residual add x + scale*x_res is well formed
    # (exactly as the PyTorch module requires); spatial/batch kept small.
    N, C, H, W = 2, 2080, 8, 8
    x = jax.random.normal(kx, (N, C, H, W), jnp.float32)
    params = init_params(kp, C)

    scale, activation = 0.2, True
    # one-time weight prep (transposes / BN fold / padding / scale fold / bf16) hoisted out
    prep = prepare_params(params, C, N, H, W, scale=scale)

    fwd = jax.jit(functools.partial(inception_resnet_c, activation=activation))
    out = fwd(x, prep)
    jax.block_until_ready(out)
    assert out.shape == (N, C, H, W)
    assert out.dtype == jnp.float32

    # loose correctness check (kernel uses bf16 matmuls with f32 accumulation)
    ref = _numpy_reference(np.asarray(x, np.float32), params, scale=scale,
                           activation=activation)
    rel_l2 = float(np.linalg.norm(np.asarray(out) - ref) / np.linalg.norm(ref))
    assert rel_l2 < 5e-2, f"relative L2 error too large: {rel_l2}"

    print("KERNEL_OK")
</pallas_src>

<mosaic_0001>
module attributes {stable_mosaic.version = 11 : i64} {
  func.func @_inception_resnet_c_kernel(%arg0: i32, %arg1: memref<64x2176xf32, #tpu.memory_space<vmem>>, %arg2: memref<2176x192xbf16, #tpu.memory_space<vmem>>, %arg3: memref<2x192xf32, #tpu.memory_space<vmem>>, %arg4: memref<2176x192xbf16, #tpu.memory_space<vmem>>, %arg5: memref<2x192xf32, #tpu.memory_space<vmem>>, %arg6: memref<3x192x224xbf16, #tpu.memory_space<vmem>>, %arg7: memref<2x224xf32, #tpu.memory_space<vmem>>, %arg8: memref<3x224x256xbf16, #tpu.memory_space<vmem>>, %arg9: memref<2x256xf32, #tpu.memory_space<vmem>>, %arg10: memref<64x2xf32, #tpu.memory_space<vmem>>, %arg11: memref<64x2xf32, #tpu.memory_space<vmem>>, %arg12: memref<192x2176xbf16, #tpu.memory_space<vmem>>, %arg13: memref<256x2176xbf16, #tpu.memory_space<vmem>>, %arg14: memref<1x2176xf32, #tpu.memory_space<vmem>>, %arg15: memref<64x2176xf32, #tpu.memory_space<vmem>>) attributes {dimension_semantics = [#tpu.dimension_semantics<parallel>], iteration_bounds = array<i64: 2>, scalar_prefetch = 0 : i64, scratch_operands = 0 : i64, tpu.core_type = #tpu.core_type<tc>, window_params = [{transform_indices = @transform_0, window_bounds = array<i64: 64, 2176>}, {pipeline_mode = #tpu.pipeline_mode<synchronous>, transform_indices = @transform_1, window_bounds = array<i64: 2176, 192>}, {pipeline_mode = #tpu.pipeline_mode<synchronous>, transform_indices = @transform_2, window_bounds = array<i64: 2, 192>}, {pipeline_mode = #tpu.pipeline_mode<synchronous>, transform_indices = @transform_3, window_bounds = array<i64: 2176, 192>}, {pipeline_mode = #tpu.pipeline_mode<synchronous>, transform_indices = @transform_4, window_bounds = array<i64: 2, 192>}, {pipeline_mode = #tpu.pipeline_mode<synchronous>, transform_indices = @transform_5, window_bounds = array<i64: 3, 192, 224>}, {pipeline_mode = #tpu.pipeline_mode<synchronous>, transform_indices = @transform_6, window_bounds = array<i64: 2, 224>}, {pipeline_mode = #tpu.pipeline_mode<synchronous>, transform_indices = @transform_7, window_bounds = array<i64: 3, 224, 256>}, {pipeline_mode = #tpu.pipeline_mode<synchronous>, transform_indices = @transform_8, window_bounds = array<i64: 2, 256>}, {pipeline_mode = #tpu.pipeline_mode<synchronous>, transform_indices = @transform_9, window_bounds = array<i64: 64, 2>}, {pipeline_mode = #tpu.pipeline_mode<synchronous>, transform_indices = @transform_10, window_bounds = array<i64: 64, 2>}, {pipeline_mode = #tpu.pipeline_mode<synchronous>, transform_indices = @transform_11, window_bounds = array<i64: 192, 2176>}, {pipeline_mode = #tpu.pipeline_mode<synchronous>, transform_indices = @transform_12, window_bounds = array<i64: 256, 2176>}, {pipeline_mode = #tpu.pipeline_mode<synchronous>, transform_indices = @transform_13, window_bounds = array<i64: 1, 2176>}, {transform_indices = @transform_14, window_bounds = array<i64: 64, 2176>}]} {
    %c0 = arith.constant 0 : index
    %c0_0 = arith.constant 0 : index
    %0 = vector.load %arg1[%c0, %c0_0] : memref<64x2176xf32, #tpu.memory_space<vmem>>, vector<64x2176xf32>
    %1 = arith.truncf %0 : vector<64x2176xf32> to vector<64x2176xbf16>
    %c0_1 = arith.constant 0 : index
    %c0_2 = arith.constant 0 : index
    %2 = vector.load %arg2[%c0_1, %c0_2] : memref<2176x192xbf16, #tpu.memory_space<vmem>>, vector<2176x192xbf16>
    %cst = arith.constant dense<0.000000e+00> : vector<64x192xf32>
    %3 = tpu.matmul %1, %2, %cst {dimension_numbers = #tpu.dot_dimension_numbers<[1], [0], [0], [1], [0, 0, 1, 1], [], []>} : vector<64x2176xbf16>, vector<2176x192xbf16>, vector<64x192xf32> -> vector<64x192xf32>
    %c0_3 = arith.constant 0 : index
    %c0_4 = arith.constant 0 : index
    %4 = vector.load %arg3[%c0_3, %c0_4] : memref<2x192xf32, #tpu.memory_space<vmem>>, vector<1x192xf32>
    %5 = vector.broadcast %4 : vector<1x192xf32> to vector<64x192xf32>
    %6 = arith.mulf %3, %5 : vector<64x192xf32>
    %c1 = arith.constant 1 : index
    %c0_5 = arith.constant 0 : index
    %7 = vector.load %arg3[%c1, %c0_5] : memref<2x192xf32, #tpu.memory_space<vmem>>, vector<1x192xf32>
    %8 = vector.broadcast %7 : vector<1x192xf32> to vector<64x192xf32>
    %9 = arith.addf %6, %8 : vector<64x192xf32>
    %cst_6 = arith.constant 0.000000e+00 : f32
    %10 = vector.broadcast %cst_6 : f32 to vector<64x192xf32>
    %11 = arith.maximumf %9, %10 : vector<64x192xf32>
    %12 = arith.truncf %11 : vector<64x192xf32> to vector<64x192xbf16>
    %c0_7 = arith.constant 0 : index
    %c0_8 = arith.constant 0 : index
    %13 = vector.load %arg4[%c0_7, %c0_8] : memref<2176x192xbf16, #tpu.memory_space<vmem>>, vector<2176x192xbf16>
    %cst_9 = arith.constant dense<0.000000e+00> : vector<64x192xf32>
    %14 = tpu.matmul %1, %13, %cst_9 {dimension_numbers = #tpu.dot_dimension_numbers<[1], [0], [0], [1], [0, 0, 1, 1], [], []>} : vector<64x2176xbf16>, vector<2176x192xbf16>, vector<64x192xf32> -> vector<64x192xf32>
    %c0_10 = arith.constant 0 : index
    %c0_11 = arith.constant 0 : index
    %15 = vector.load %arg5[%c0_10, %c0_11] : memref<2x192xf32, #tpu.memory_space<vmem>>, vector<1x192xf32>
    %16 = vector.broadcast %15 : vector<1x192xf32> to vector<64x192xf32>
    %17 = arith.mulf %14, %16 : vector<64x192xf32>
    %c1_12 = arith.constant 1 : index
    %c0_13 = arith.constant 0 : index
    %18 = vector.load %arg5[%c1_12, %c0_13] : memref<2x192xf32, #tpu.memory_space<vmem>>, vector<1x192xf32>
    %19 = vector.broadcast %18 : vector<1x192xf32> to vector<64x192xf32>
    %20 = arith.addf %17, %19 : vector<64x192xf32>
    %cst_14 = arith.constant 0.000000e+00 : f32
    %21 = vector.broadcast %cst_14 : f32 to vector<64x192xf32>
    %22 = arith.maximumf %20, %21 : vector<64x192xf32>
    %23 = arith.truncf %22 : vector<64x192xf32> to vector<64x192xbf16>
    %c1_15 = arith.constant 1 : index
    %c0_16 = arith.constant 0 : index
    %c0_17 = arith.constant 0 : index
    %24 = vector.load %arg6[%c1_15, %c0_16, %c0_17] : memref<3x192x224xbf16, #tpu.memory_space<vmem>>, vector<1x192x224xbf16>
    %25 = vector.shape_cast %24 : vector<1x192x224xbf16> to vector<192x224xbf16>
    %cst_18 = arith.constant dense<0.000000e+00> : vector<64x224xf32>
    %26 = tpu.matmul %23, %25, %cst_18 {dimension_numbers = #tpu.dot_dimension_numbers<[1], [0], [0], [1], [0, 0, 1, 1], [], []>} : vector<64x192xbf16>, vector<192x224xbf16>, vector<64x224xf32> -> vector<64x224xf32>
    %c1_i32 = arith.constant 1 : i32
    %27 = tpu.dynamic_rotate %22 by %c1_i32 dim 0 : vector<64x192xf32>, i32 -> vector<64x192xf32>
    %c0_19 = arith.constant 0 : index
    %c0_20 = arith.constant 0 : index
    %28 = vector.load %arg10[%c0_19, %c0_20] : memref<64x2xf32, #tpu.memory_space<vmem>>, vector<64x1xf32>
    %29 = vector.broadcast %28 : vector<64x1xf32> to vector<64x192xf32>
    %30 = arith.mulf %27, %29 : vector<64x192xf32>
    %31 = arith.truncf %30 : vector<64x192xf32> to vector<64x192xbf16>
    %c0_21 = arith.constant 0 : index
    %c0_22 = arith.constant 0 : index
    %c0_23 = arith.constant 0 : index
    %32 = vector.load %arg6[%c0_21, %c0_22, %c0_23] : memref<3x192x224xbf16, #tpu.memory_space<vmem>>, vector<1x192x224xbf16>
    %33 = vector.shape_cast %32 : vector<1x192x224xbf16> to vector<192x224xbf16>
    %cst_24 = arith.constant dense<0.000000e+00> : vector<64x224xf32>
    %34 = tpu.matmul %31, %33, %cst_24 {dimension_numbers = #tpu.dot_dimension_numbers<[1], [0], [0], [1], [0, 0, 1, 1], [], []>} : vector<64x192xbf16>, vector<192x224xbf16>, vector<64x224xf32> -> vector<64x224xf32>
    %35 = arith.addf %26, %34 : vector<64x224xf32>
    %c63_i32 = arith.constant 63 : i32
    %36 = tpu.dynamic_rotate %22 by %c63_i32 dim 0 : vector<64x192xf32>, i32 -> vector<64x192xf32>
    %c0_25 = arith.constant 0 : index
    %c1_26 = arith.constant 1 : index
    %37 = vector.load %arg10[%c0_25, %c1_26] : memref<64x2xf32, #tpu.memory_space<vmem>>, vector<64x1xf32>
    %38 = vector.broadcast %37 : vector<64x1xf32> to vector<64x192xf32>
    %39 = arith.mulf %36, %38 : vector<64x192xf32>
    %40 = arith.truncf %39 : vector<64x192xf32> to vector<64x192xbf16>
    %c2 = arith.constant 2 : index
    %c0_27 = arith.constant 0 : index
    %c0_28 = arith.constant 0 : index
    %41 = vector.load %arg6[%c2, %c0_27, %c0_28] : memref<3x192x224xbf16, #tpu.memory_space<vmem>>, vector<1x192x224xbf16>
    %42 = vector.shape_cast %41 : vector<1x192x224xbf16> to vector<192x224xbf16>
    %cst_29 = arith.constant dense<0.000000e+00> : vector<64x224xf32>
    %43 = tpu.matmul %40, %42, %cst_29 {dimension_numbers = #tpu.dot_dimension_numbers<[1], [0], [0], [1], [0, 0, 1, 1], [], []>} : vector<64x192xbf16>, vector<192x224xbf16>, vector<64x224xf32> -> vector<64x224xf32>
    %44 = arith.addf %35, %43 : vector<64x224xf32>
    %c0_30 = arith.constant 0 : index
    %c0_31 = arith.constant 0 : index
    %45 = vector.load %arg7[%c0_30, %c0_31] : memref<2x224xf32, #tpu.memory_space<vmem>>, vector<1x224xf32>
    %46 = vector.broadcast %45 : vector<1x224xf32> to vector<64x224xf32>
    %47 = arith.mulf %44, %46 : vector<64x224xf32>
    %c1_32 = arith.constant 1 : index
    %c0_33 = arith.constant 0 : index
    %48 = vector.load %arg7[%c1_32, %c0_33] : memref<2x224xf32, #tpu.memory_space<vmem>>, vector<1x224xf32>
    %49 = vector.broadcast %48 : vector<1x224xf32> to vector<64x224xf32>
    %50 = arith.addf %47, %49 : vector<64x224xf32>
    %cst_34 = arith.constant 0.000000e+00 : f32
    %51 = vector.broadcast %cst_34 : f32 to vector<64x224xf32>
    %52 = arith.maximumf %50, %51 : vector<64x224xf32>
    %53 = arith.truncf %52 : vector<64x224xf32> to vector<64x224xbf16>
    %c1_35 = arith.constant 1 : index
    %c0_36 = arith.constant 0 : index
    %c0_37 = arith.constant 0 : index
    %54 = vector.load %arg8[%c1_35, %c0_36, %c0_37] : memref<3x224x256xbf16, #tpu.memory_space<vmem>>, vector<1x224x256xbf16>
    %55 = vector.shape_cast %54 : vector<1x224x256xbf16> to vector<224x256xbf16>
    %cst_38 = arith.constant dense<0.000000e+00> : vector<64x256xf32>
    %56 = tpu.matmul %53, %55, %cst_38 {dimension_numbers = #tpu.dot_dimension_numbers<[1], [0], [0], [1], [0, 0, 1, 1], [], []>} : vector<64x224xbf16>, vector<224x256xbf16>, vector<64x256xf32> -> vector<64x256xf32>
    %c8_i32 = arith.constant 8 : i32
    %57 = tpu.dynamic_rotate %52 by %c8_i32 dim 0 : vector<64x224xf32>, i32 -> vector<64x224xf32>
    %c0_39 = arith.constant 0 : index
    %c0_40 = arith.constant 0 : index
    %58 = vector.load %arg11[%c0_39, %c0_40] : memref<64x2xf32, #tpu.memory_space<vmem>>, vector<64x1xf32>
    %59 = vector.broadcast %58 : vector<64x1xf32> to vector<64x224xf32>
    %60 = arith.mulf %57, %59 : vector<64x224xf32>
    %61 = arith.truncf %60 : vector<64x224xf32> to vector<64x224xbf16>
    %c0_41 = arith.constant 0 : index
    %c0_42 = arith.constant 0 : index
    %c0_43 = arith.constant 0 : index
    %62 = vector.load %arg8[%c0_41, %c0_42, %c0_43] : memref<3x224x256xbf16, #tpu.memory_space<vmem>>, vector<1x224x256xbf16>
    %63 = vector.shape_cast %62 : vector<1x224x256xbf16> to vector<224x256xbf16>
    %cst_44 = arith.constant dense<0.000000e+00> : vector<64x256xf32>
    %64 = tpu.matmul %61, %63, %cst_44 {dimension_numbers = #tpu.dot_dimension_numbers<[1], [0], [0], [1], [0, 0, 1, 1], [], []>} : vector<64x224xbf16>, vector<224x256xbf16>, vector<64x256xf32> -> vector<64x256xf32>
    %65 = arith.addf %56, %64 : vector<64x256xf32>
    %c56_i32 = arith.constant 56 : i32
    %66 = tpu.dynamic_rotate %52 by %c56_i32 dim 0 : vector<64x224xf32>, i32 -> vector<64x224xf32>
    %c0_45 = arith.constant 0 : index
    %c1_46 = arith.constant 1 : index
    %67 = vector.load %arg11[%c0_45, %c1_46] : memref<64x2xf32, #tpu.memory_space<vmem>>, vector<64x1xf32>
    %68 = vector.broadcast %67 : vector<64x1xf32> to vector<64x224xf32>
    %69 = arith.mulf %66, %68 : vector<64x224xf32>
    %70 = arith.truncf %69 : vector<64x224xf32> to vector<64x224xbf16>
    %c2_47 = arith.constant 2 : index
    %c0_48 = arith.constant 0 : index
    %c0_49 = arith.constant 0 : index
    %71 = vector.load %arg8[%c2_47, %c0_48, %c0_49] : memref<3x224x256xbf16, #tpu.memory_space<vmem>>, vector<1x224x256xbf16>
    %72 = vector.shape_cast %71 : vector<1x224x256xbf16> to vector<224x256xbf16>
    %cst_50 = arith.constant dense<0.000000e+00> : vector<64x256xf32>
    %73 = tpu.matmul %70, %72, %cst_50 {dimension_numbers = #tpu.dot_dimension_numbers<[1], [0], [0], [1], [0, 0, 1, 1], [], []>} : vector<64x224xbf16>, vector<224x256xbf16>, vector<64x256xf32> -> vector<64x256xf32>
    %74 = arith.addf %65, %73 : vector<64x256xf32>
    %c0_51 = arith.constant 0 : index
    %c0_52 = arith.constant 0 : index
    %75 = vector.load %arg9[%c0_51, %c0_52] : memref<2x256xf32, #tpu.memory_space<vmem>>, vector<1x256xf32>
    %76 = vector.broadcast %75 : vector<1x256xf32> to vector<64x256xf32>
    %77 = arith.mulf %74, %76 : vector<64x256xf32>
    %c1_53 = arith.constant 1 : index
    %c0_54 = arith.constant 0 : index
    %78 = vector.load %arg9[%c1_53, %c0_54] : memref<2x256xf32, #tpu.memory_space<vmem>>, vector<1x256xf32>
    %79 = vector.broadcast %78 : vector<1x256xf32> to vector<64x256xf32>
    %80 = arith.addf %77, %79 : vector<64x256xf32>
    %cst_55 = arith.constant 0.000000e+00 : f32
    %81 = vector.broadcast %cst_55 : f32 to vector<64x256xf32>
    %82 = arith.maximumf %80, %81 : vector<64x256xf32>
    %c0_56 = arith.constant 0 : index
    %c0_57 = arith.constant 0 : index
    %83 = vector.load %arg12[%c0_56, %c0_57] : memref<192x2176xbf16, #tpu.memory_space<vmem>>, vector<192x2176xbf16>
    %cst_58 = arith.constant dense<0.000000e+00> : vector<64x2176xf32>
    %84 = tpu.matmul %12, %83, %cst_58 {dimension_numbers = #tpu.dot_dimension_numbers<[1], [0], [0], [1], [0, 0, 1, 1], [], []>} : vector<64x192xbf16>, vector<192x2176xbf16>, vector<64x2176xf32> -> vector<64x2176xf32>
    %85 = arith.truncf %82 : vector<64x256xf32> to vector<64x256xbf16>
    %c0_59 = arith.constant 0 : index
    %c0_60 = arith.constant 0 : index
    %86 = vector.load %arg13[%c0_59, %c0_60] : memref<256x2176xbf16, #tpu.memory_space<vmem>>, vector<256x2176xbf16>
    %cst_61 = arith.constant dense<0.000000e+00> : vector<64x2176xf32>
    %87 = tpu.matmul %85, %86, %cst_61 {dimension_numbers = #tpu.dot_dimension_numbers<[1], [0], [0], [1], [0, 0, 1, 1], [], []>} : vector<64x256xbf16>, vector<256x2176xbf16>, vector<64x2176xf32> -> vector<64x2176xf32>
    %88 = arith.addf %84, %87 : vector<64x2176xf32>
    %89 = arith.addf %0, %88 : vector<64x2176xf32>
    %c0_62 = arith.constant 0 : index
    %c0_63 = arith.constant 0 : index
    %90 = vector.load %arg14[%c0_62, %c0_63] : memref<1x2176xf32, #tpu.memory_space<vmem>>, vector<1x2176xf32>
    %91 = vector.broadcast %90 : vector<1x2176xf32> to vector<64x2176xf32>
    %92 = arith.addf %89, %91 : vector<64x2176xf32>
    %cst_64 = arith.constant 0.000000e+00 : f32
    %93 = vector.broadcast %cst_64 : f32 to vector<64x2176xf32>
    %94 = arith.maximumf %92, %93 : vector<64x2176xf32>
    %c0_65 = arith.constant 0 : index
    %c0_66 = arith.constant 0 : index
    %95 = vector.load %arg15[%c0_65, %c0_66] : memref<64x2176xf32, #tpu.memory_space<vmem>>, vector<64x2176xf32>
    tpu.vector_store %arg15[%c0_65, %c0_66], %94 {strides = array<i32>} : memref<64x2176xf32, #tpu.memory_space<vmem>>, vector<64x2176xf32>,
    return
  }
  func.func @transform_0(%arg0: i32) -> (i32, i32) {
    %c0_i32 = arith.constant 0 : i32
    %c0_i32_0 = arith.constant 0 : i32
    return %arg0, %c0_i32 : i32, i32
  }
  func.func @transform_1(%arg0: i32) -> (i32, i32) {
    %c0_i32 = arith.constant 0 : i32
    %c0_i32_0 = arith.constant 0 : i32
    %c0_i32_1 = arith.constant 0 : i32
    return %c0_i32, %c0_i32_0 : i32, i32
  }
  func.func @transform_2(%arg0: i32) -> (i32, i32) {
    %c0_i32 = arith.constant 0 : i32
    %c0_i32_0 = arith.constant 0 : i32
    %c0_i32_1 = arith.constant 0 : i32
    return %c0_i32, %c0_i32_0 : i32, i32
  }
  func.func @transform_3(%arg0: i32) -> (i32, i32) {
    %c0_i32 = arith.constant 0 : i32
    %c0_i32_0 = arith.constant 0 : i32
    %c0_i32_1 = arith.constant 0 : i32
    return %c0_i32, %c0_i32_0 : i32, i32
  }
  func.func @transform_4(%arg0: i32) -> (i32, i32) {
    %c0_i32 = arith.constant 0 : i32
    %c0_i32_0 = arith.constant 0 : i32
    %c0_i32_1 = arith.constant 0 : i32
    return %c0_i32, %c0_i32_0 : i32, i32
  }
  func.func @transform_5(%arg0: i32) -> (i32, i32, i32) {
    %c0_i32 = arith.constant 0 : i32
    %c0_i32_0 = arith.constant 0 : i32
    %c0_i32_1 = arith.constant 0 : i32
    %c0_i32_2 = arith.constant 0 : i32
    return %c0_i32, %c0_i32_0, %c0_i32_1 : i32, i32, i32
  }
  func.func @transform_6(%arg0: i32) -> (i32, i32) {
    %c0_i32 = arith.constant 0 : i32
    %c0_i32_0 = arith.constant 0 : i32
    %c0_i32_1 = arith.constant 0 : i32
    return %c0_i32, %c0_i32_0 : i32, i32
  }
  func.func @transform_7(%arg0: i32) -> (i32, i32, i32) {
    %c0_i32 = arith.constant 0 : i32
    %c0_i32_0 = arith.constant 0 : i32
    %c0_i32_1 = arith.constant 0 : i32
    %c0_i32_2 = arith.constant 0 : i32
    return %c0_i32, %c0_i32_0, %c0_i32_1 : i32, i32, i32
  }
  func.func @transform_8(%arg0: i32) -> (i32, i32) {
    %c0_i32 = arith.constant 0 : i32
    %c0_i32_0 = arith.constant 0 : i32
    %c0_i32_1 = arith.constant 0 : i32
    return %c0_i32, %c0_i32_0 : i32, i32
  }
  func.func @transform_9(%arg0: i32) -> (i32, i32) {
    %c0_i32 = arith.constant 0 : i32
    %c0_i32_0 = arith.constant 0 : i32
    %c0_i32_1 = arith.constant 0 : i32
    return %c0_i32, %c0_i32_0 : i32, i32
  }
  func.func @transform_10(%arg0: i32) -> (i32, i32) {
    %c0_i32 = arith.constant 0 : i32
    %c0_i32_0 = arith.constant 0 : i32
    %c0_i32_1 = arith.constant 0 : i32
    return %c0_i32, %c0_i32_0 : i32, i32
  }
  func.func @transform_11(%arg0: i32) -> (i32, i32) {
    %c0_i32 = arith.constant 0 : i32
    %c0_i32_0 = arith.constant 0 : i32
    %c0_i32_1 = arith.constant 0 : i32
    return %c0_i32, %c0_i32_0 : i32, i32
  }
  func.func @transform_12(%arg0: i32) -> (i32, i32) {
    %c0_i32 = arith.constant 0 : i32
    %c0_i32_0 = arith.constant 0 : i32
    %c0_i32_1 = arith.constant 0 : i32
    return %c0_i32, %c0_i32_0 : i32, i32
  }
  func.func @transform_13(%arg0: i32) -> (i32, i32) {
    %c0_i32 = arith.constant 0 : i32
    %c0_i32_0 = arith.constant 0 : i32
    %c0_i32_1 = arith.constant 0 : i32
    return %c0_i32, %c0_i32_0 : i32, i32
  }
  func.func @transform_14(%arg0: i32) -> (i32, i32) {
    %c0_i32 = arith.constant 0 : i32
    %c0_i32_0 = arith.constant 0 : i32
    return %arg0, %c0_i32 : i32, i32
  }
}

</mosaic_0001>

<bundles_post_ra>
// kernel: inception_resnet_c.1
= control target key start
LH: loop header
LB: loop body
LE: loop exit
PB: predicated region body
PF: predicated region fallthrough
CT: control target
= control target key end

     0   :  { %19 = vsyncpa [#allocation3], 0  ;;  %s22408_s0 = inlined_call_operand.vmem [shape: f32[128,2176], index: 0, kind: input, shape index: {}]   ;;  %s22409_s1 = inlined_call_operand.vmem [shape: bf16[2176,192], index: 1, kind: input, shape index: {}]   ;;  %s22410_s2 = inlined_call_operand.vmem [shape: f32[2,192], index: 2, kind: input, shape index: {}]   ;;  %s22411_s3 = inlined_call_operand.vmem [shape: bf16[2176,192], index: 3, kind: input, shape index: {}]   ;;  %s22412_s4 = inlined_call_operand.vmem [shape: f32[2,192], index: 4, kind: input, shape index: {}]   ;;  %s22413_s5 = inlined_call_operand.vmem [shape: bf16[3,192,224], index: 5, kind: input, shape index: {}]   ;;  %s22414_s6 = inlined_call_operand.vmem [shape: f32[2,224], index: 6, kind: input, shape index: {}]   ;;  %s22415_s7 = inlined_call_operand.vmem [shape: bf16[3,224,256], index: 7, kind: input, shape index: {}]   ;;  %s22416_s8 = inlined_call_operand.vmem [shape: f32[2,256], index: 8, kind: input, shape index: {}]   ;;  %s22417_s9 = inlined_call_operand.vmem [shape: f32[64,2], index: 9, kind: input, shape index: {}]   ;;  %s22418_s10 = inlined_call_operand.vmem [shape: f32[64,2], index: 10, kind: input, shape index: {}]   ;;  %s22419_s11 = inlined_call_operand.vmem [shape: bf16[192,2176], index: 11, kind: input, shape index: {}]   ;;  %s22420_s12 = inlined_call_operand.vmem [shape: bf16[256,2176], index: 12, kind: input, shape index: {}]   ;;  %s22421_s13 = inlined_call_operand.vmem [shape: f32[1,2176], index: 13, kind: input, shape index: {}]   ;;  %s22422_s14 = inlined_call_operand.hbm [shape: f32[128,2176], index: 14, kind: output, shape index: {}]  }
   0x1   :  { %21 = vsyncpa [#allocation3 + $0x1], 0  ;;  %s15801_s29 = smov 0   ;;  %s15803_s30 = smov 0  }
   0x2   :  { %s15805_s15 = smov 0   ;;  %s15807_s16 = smov 0  }
   0x3 LB: > { %22472 = sst [smem:[#allocation5_spill]] %s15707_s29  ;;  %s15822_s17 = sadd.s32 4294967295, %s15719_s16   ;;  %s15719_s16 = sphi %s15807_s16, %s22881_s16   ;;  %s15715_s15 = sphi %s15805_s15, %s22883_s15   ;;  %s15711_s30 = sphi %s15803_s30, %s22885_s30   ;;  %s15707_s29 = sphi %s15801_s29, %s22884_s29  }
   0x4   : > { %22473 = sst [smem:[#allocation6_spill]] %s15715_s15  ;;  %s12321_s18 = sadd.s32 4294967294, %s15719_s16  }
   0x5   : > { %s15826_s19 = sadd.s32 1, %s15719_s16   ;;  %s333_s20 = sadd.s32 1, %s15715_s15 }
   0x6   : > { %22474 = sst [smem:[#allocation7_spill]] %s15826_s19  ;;  %s330_s21 = ssub.s32 %s15719_s16, %s15826_s19 }
   0x7   : > { %p343_p0 = scmp.ne.s32.totalorder %s15715_s15, %s15711_s30  ;;  %p331_p1 = scmp.eq.s32.totalorder %s330_s21, 0 }
   0x8   : > { %p344_p2 = scmp.eq.s32.totalorder %s15822_s17, 1  ;;  %p349_p3 = scmp.ne.s32.totalorder %s15711_s30, %s15707_s29 }
   0x9   : > { %p350_p4 = scmp.eq.s32.totalorder %s12321_s18, 1  ;;  %p12324_p7 = scmp.ge.s32.totalorder %s15719_s16, 1 }
   0xa   : > { %s15837_s22 = scalar_select %p331_p1, %s15715_s15, %s333_s20  }
   0xb   : > { %p15839_p5 = por %p344_p2, %p343_p0  ;;  %p15843_p6 = por %p350_p4, %p349_p3 }
   0xc   : > { %22475 = sst [smem:[#allocation8_spill]] %s15837_s22  ;;  %p417_p8 = scmp.lt.s32.totalorder %s15719_s16, 3 }
   0xd   : > { %s22477_s24 = scalar_select %p15843_p6, 1, 0 }
   0xe   : > { %p418_p9 = pnand %p12324_p7, %p417_p8 }
   0xf   : > { %22478 = sst [smem:[#allocation9_spill]] %s22477_s24 }
  0x10   : > { %421 = sbr.rel (%p418_p9) target bundleno = 2044 (0x7fc), region = 76 }
  0x15   : > { %v13771_v0 = vld [vmem:[%s22409_s1 + $0x74] ss:$8 sps:$4 sm:$0xff]   ;;  %v13775_v2 = vld [vmem:[%s22409_s1 + $0x70] ss:$8 sps:$4 sm:$0xff]   ;;  %v13777_v4 = vld [vmem:[%s22409_s1 + $0x64] ss:$8 sps:$4 sm:$0xff]  }
  0x16   : > { %v13773_v1 = vld [vmem:[%s22409_s1 + $0x174] ss:$8 sps:$4 sm:$0xff]   ;;  %2309 = vmatprep.subr.bf16.mxu0 %v13771_v0  ;;  %v13776_v3 = vld [vmem:[%s22409_s1 + $0x170] ss:$8 sps:$4 sm:$0xff]   ;;  %v13779_v5 = vld [vmem:[%s22409_s1 + $0x164] ss:$8 sps:$4 sm:$0xff]  }
  0x17   : > { %2382 = vmatprep.subr.bf16.mxu1 %v13773_v1  ;;  %2310 = vmatpush1.bf16.msra.mxu0 %v13775_v2  ;;  %v13781_v6 = vld [vmem:[%s22409_s1 + $0x60] ss:$8 sps:$4 sm:$0xff]   ;;  %v13783_v8 = vld [vmem:[%s22409_s1 + $0x54] ss:$8 sps:$4 sm:$0xff]   ;;  %v13787_v10 = vld [vmem:[%s22409_s1 + $0x50] ss:$8 sps:$4 sm:$0xff]  }
  0x18   : > { %2383 = vmatpush1.bf16.msra.mxu1 %v13776_v3  ;;  %2311 = vmatprep.subr.bf16.mxu0 %v13777_v4  ;;  %v13782_v7 = vld [vmem:[%s22409_s1 + $0x160] ss:$8 sps:$4 sm:$0xff]   ;;  %v13785_v9 = vld [vmem:[%s22409_s1 + $0x154] ss:$8 sps:$4 sm:$0xff]   ;;  %v13788_v11 = vld [vmem:[%s22409_s1 + $0x150] ss:$8 sps:$4 sm:$0xff]  }
  0x19   : > { %2384 = vmatprep.subr.bf16.mxu1 %v13779_v5  ;;  %v13789_v12 = vld [vmem:[%s22409_s1 + $0x44] ss:$8 sps:$4 sm:$0xff]   ;;  %v13793_v14 = vld [vmem:[%s22409_s1 + $0x40] ss:$8 sps:$4 sm:$0xff]   ;;  %v13795_v16 = vld [vmem:[%s22409_s1 + $0x34] ss:$8 sps:$4 sm:$0xff]  }
  0x1a   : > { %v13791_v13 = vld [vmem:[%s22409_s1 + $0x144] ss:$8 sps:$4 sm:$0xff]   ;;  %v13794_v15 = vld [vmem:[%s22409_s1 + $0x140] ss:$8 sps:$4 sm:$0xff]   ;;  %v13797_v17 = vld [vmem:[%s22409_s1 + $0x134] ss:$8 sps:$4 sm:$0xff]  }
  0x1b   : > { %2312 = vmatpush1.bf16.msra.mxu0 %v13781_v6  ;;  %v13799_v18 = vld [vmem:[%s22409_s1 + $0x30] ss:$8 sps:$4 sm:$0xff]   ;;  %v13801_v20 = vld [vmem:[%s22409_s1 + $0x24] ss:$8 sps:$4 sm:$0xff]   ;;  %v13805_v22 = vld [vmem:[%s22409_s1 + $0x20] ss:$8 sps:$4 sm:$0xff]  }
  0x1c   : > { %2385 = vmatpush1.bf16.msra.mxu1 %v13782_v7  ;;  %2313 = vmatprep.subr.bf16.mxu0 %v13783_v8  ;;  %v13800_v19 = vld [vmem:[%s22409_s1 + $0x130] ss:$8 sps:$4 sm:$0xff]   ;;  %v13803_v21 = vld [vmem:[%s22409_s1 + $0x124] ss:$8 sps:$4 sm:$0xff]   ;;  %v13806_v23 = vld [vmem:[%s22409_s1 + $0x120] ss:$8 sps:$4 sm:$0xff]  }
  0x1d   : > { %2386 = vmatprep.subr.bf16.mxu1 %v13785_v9  ;;  %v13807_v24 = vld [vmem:[%s22409_s1 + $0x14] ss:$8 sps:$4 sm:$0xff]   ;;  %v13811_v26 = vld [vmem:[%s22409_s1 + $0x10] ss:$8 sps:$4 sm:$0xff]   ;;  %v13813_v28 = vld [vmem:[%s22409_s1 + $0x4] ss:$8 sps:$4 sm:$0xff]  }
  0x1e   : > { %v13809_v25 = vld [vmem:[%s22409_s1 + $0x114] ss:$8 sps:$4 sm:$0xff]   ;;  %v13812_v27 = vld [vmem:[%s22409_s1 + $0x110] ss:$8 sps:$4 sm:$0xff]   ;;  %s12325_s15 = sshll.u32 %s15822_s17, 3  ;;  %vm5693_vm2 = vcmask 523264  }
  0x1f   : > { %2314 = vmatpush1.bf16.msra.mxu0 %v13787_v10  ;;  %v13815_v29 = vld [vmem:[%s22409_s1 + $0x104] ss:$8 sps:$4 sm:$0xff]   ;;  %v13817_v30 = vld [vmem:[%s22409_s1] ss:$8 sps:$4 sm:$0xff]   ;;  %p465_p10 = scmp.lt.s32.totalorder %s12325_s15, 15  ;;  %vm6669_vm3 = vcmask 785408  }
  0x20   : > { %2387 = vmatpush1.bf16.msra.mxu1 %v13788_v11  ;;  %2315 = vmatprep.subr.bf16.mxu0 %v13789_v12  ;;  %v13818_v31 = vld [vmem:[%s22409_s1 + $0x100] ss:$8 sps:$4 sm:$0xff]   ;;  %v13819_v32 = vld [vmem:[%s22409_s1 + $0xf4] ss:$8 sps:$4 sm:$0xff]   ;;  %v13823_v34 = vld [vmem:[%s22409_s1 + $0xf0] ss:$8 sps:$4 sm:$0xff]  }
  0x21   : > { %2388 = vmatprep.subr.bf16.mxu1 %v13791_v13  ;;  %v13821_v33 = vld [vmem:[%s22409_s1 + $0x1f4] ss:$8 sps:$4 sm:$0xff]   ;;  %v13824_v35 = vld [vmem:[%s22409_s1 + $0x1f0] ss:$8 sps:$4 sm:$0xff]   ;;  %s22887_s15 = smov (!%p465_p10, %s12325_s15), 15  ;;  %s461_s19 = sand.u32 1, %s15711_s30  }
  0x22   : > { %v13825_v36 = vld [vmem:[%s22409_s1 + $0xe4] ss:$8 sps:$4 sm:$0xff]   ;;  %v13829_v38 = vld [vmem:[%s22409_s1 + $0xe0] ss:$8 sps:$4 sm:$0xff]   ;;  %s13718_s25 = smul.u32 136, %s22887_s15  ;;  %s15723_s27 = smov [#allocation2]  }
  0x23   : > { %2316 = vmatpush1.bf16.msra.mxu0 %v13793_v14  ;;  %v13827_v37 = vld [vmem:[%s22409_s1 + $0x1e4] ss:$8 sps:$4 sm:$0xff]   ;;  %v13830_v39 = vld [vmem:[%s22409_s1 + $0x1e0] ss:$8 sps:$4 sm:$0xff]   ;;  %v13831_v40 = vld [vmem:[%s22409_s1 + $0xd4] ss:$8 sps:$4 sm:$0xff]  }
  0x24   : > { %2389 = vmatpush1.bf16.msra.mxu1 %v13794_v15  ;;  %2317 = vmatprep.subr.bf16.mxu0 %v13795_v16  ;;  %v13833_v41 = vld [vmem:[%s22409_s1 + $0x1d4] ss:$8 sps:$4 sm:$0xff]   ;;  %v13835_v42 = vld [vmem:[%s22409_s1 + $0xd0] ss:$8 sps:$4 sm:$0xff]   ;;  %s15985_s29 = scalar_lea.vmem %s22408_s0, %s13718_s25  ;;  %v13837_v44 = vld [vmem:[%s22409_s1 + $0xc4] ss:$8 sps:$4 sm:$0xff]  }
  0x25   : > { %2390 = vmatprep.subr.bf16.mxu1 %v13797_v17  ;;  %v13836_v43 = vld [vmem:[%s22409_s1 + $0x1d0] ss:$8 sps:$4 sm:$0xff]   ;;  %v13839_v45 = vld [vmem:[%s22409_s1 + $0x1c4] ss:$8 sps:$4 sm:$0xff]   ;;  %v13841_v50 = vld [vmem:[%s22409_s1 + $0xc0] ss:$8 sps:$4 sm:$0xff]  }
  0x26   : > { %v474_v46 = vld [vmem:[%s15985_s29 + $0x8] sm:$0xff]  ;;  %v491_v47 = vld [vmem:[%s15985_s29 + $0x90] sm:$0xff]  ;;  %v476_v48 = vld [vmem:[%s15985_s29 + $0x18] sm:$0xff]  ;;  %s13717_s24 = smul.u32 1088, %s461_s19  ;;  %s15663_s28 = sshll.u32 %s15723_s27, 4  ;;  %s15664_s28 = int_to_ptr.vmem [resolvable:$false] %s15663_s28 }
  0x27   : > { %2318 = vmatpush1.bf16.msra.mxu0 %v13799_v18  ;;  %v493_v49 = vld [vmem:[%s15985_s29 + $0xa0] sm:$0xff]  ;;  %v13843_v52 = vld [vmem:[%s22409_s1 + $0xb4] ss:$8 sps:$4 sm:$0xff]   ;;  %v16006_v53 = vpack.c.bf16 %v491_v47, %v474_v46  ;;  %v13847_v56 = vld [vmem:[%s22409_s1 + $0xb0] ss:$8 sps:$4 sm:$0xff]   ;;  %s13719_s25 = smul.u32 17408, %s15822_s17 }
  0x28   : > { %2391 = vmatpush1.bf16.msra.mxu1 %v13800_v19  ;;  %2319 = vmatprep.subr.bf16.mxu0 %v13801_v20  ;;  %v13842_v51 = vld [vmem:[%s22409_s1 + $0x1c0] ss:$8 sps:$4 sm:$0xff]   ;;  %v16008_v54 = vpack.c.bf16 %v493_v49, %v476_v48  ;;  %v13845_v55 = vld [vmem:[%s22409_s1 + $0x1b4] ss:$8 sps:$4 sm:$0xff]   ;;  %v13848_v57 = vld [vmem:[%s22409_s1 + $0x1b0] ss:$8 sps:$4 sm:$0xff]  }
  0x29   : > { %2392 = vmatprep.subr.bf16.mxu1 %v13803_v21  ;;  %2341 = vmatprep.mubr.bf16.mxu0 %v16006_v53  ;;  %v13849_v58 = vld [vmem:[%s22409_s1 + $0xa4] ss:$8 sps:$4 sm:$0xff]   ;;  %v13853_v60 = vld [vmem:[%s22409_s1 + $0xa0] ss:$8 sps:$4 sm:$0xff]   ;;  %v13855_v62 = vld [vmem:[%s22409_s1 + $0x94] ss:$8 sps:$4 sm:$0xff]  }
  0x2a   : > { %2414 = vmatprep.mubr.bf16.mxu1 %v16008_v54  ;;  %v13851_v59 = vld [vmem:[%s22409_s1 + $0x1a4] ss:$8 sps:$4 sm:$0xff]   ;;  %v13854_v61 = vld [vmem:[%s22409_s1 + $0x1a0] ss:$8 sps:$4 sm:$0xff]   ;;  %v13857_v63 = vld [vmem:[%s22409_s1 + $0x194] ss:$8 sps:$4 sm:$0xff]  }
  0x2b   : > { %2320 = vmatpush1.bf16.msra.mxu0 %v13805_v22  ;;  %v13859_v0 = vld [vmem:[%s22409_s1 + $0x90] ss:$8 sps:$4 sm:$0xff]   ;;  %v13861_v2 = vld [vmem:[%s22409_s1 + $0x84] ss:$8 sps:$4 sm:$0xff]   ;;  %v13865_v4 = vld [vmem:[%s22409_s1 + $0x80] ss:$8 sps:$4 sm:$0xff]  }
  0x2c   : > { %2393 = vmatpush1.bf16.msra.mxu1 %v13806_v23  ;;  %2321 = vmatprep.subr.bf16.mxu0 %v13807_v24  ;;  %v13860_v1 = vld [vmem:[%s22409_s1 + $0x190] ss:$8 sps:$4 sm:$0xff]   ;;  %v13863_v3 = vld [vmem:[%s22409_s1 + $0x184] ss:$8 sps:$4 sm:$0xff]   ;;  %v13866_v5 = vld [vmem:[%s22409_s1 + $0x180] ss:$8 sps:$4 sm:$0xff]  }
  0x2d   : > { %2394 = vmatprep.subr.bf16.mxu1 %v13809_v25  ;;  %v473_v6 = vld [vmem:[%s15985_s29] sm:$0xff]  ;;  %v490_v7 = vld [vmem:[%s15985_s29 + $0x88] sm:$0xff]  ;;  %v475_v8 = vld [vmem:[%s15985_s29 + $0x10] sm:$0xff]  ;;  %s21724_s26 = scalar_lea.vmem [#allocation2], %s13717_s24  ;;  %s22361_s24 = scalar_lea.hbm %s22422_s14, %s13719_s25 }
  0x2e   : > { %v492_v9 = vld [vmem:[%s15985_s29 + $0x98] sm:$0xff]  ;;  %v16067_v12 = vpack.c.bf16 %v490_v7, %v473_v6  ;;  %v13875_v16 = vld [vmem:[%s22409_s1 + $0x264] ss:$8 sps:$4 sm:$0xff]   ;;  %v13873_v18 = vld [vmem:[%s22409_s1 + $0x260] ss:$8 sps:$4 sm:$0xff]   ;;  %s12259_s22 = sshll.u32 %s21724_s26, 4  ;;  %s22363_s22 = int_to_ptr.vmem [resolvable:$true] %s12259_s22 }
  0x2f   : > { %2322 = vmatpush1.bf16.msra.mxu0 %v13811_v26  ;;  %v13869_v10 = vld [vmem:[%s22409_s1 + $0x274] ss:$8 sps:$4 sm:$0xff]   ;;  %v16069_v13 = vpack.c.bf16 %v492_v9, %v475_v8  ;;  %v13867_v14 = vld [vmem:[%s22409_s1 + $0x270] ss:$8 sps:$4 sm:$0xff]   ;;  %v13878_v17 = vld [vmem:[%s22409_s1 + $0x364] ss:$8 sps:$4 sm:$0xff]   ;;  %p15666_p0 = scmp.lt.s32.totalorder %s22363_s22, %s15664_s28 }
  0x30   : > { %2395 = vmatpush1.bf16.msra.mxu1 %v13812_v27  ;;  %2323 = vmatprep.subr.bf16.mxu0 %v13813_v28  ;;  %v13872_v11 = vld [vmem:[%s22409_s1 + $0x374] ss:$8 sps:$4 sm:$0xff]   ;;  %v13870_v15 = vld [vmem:[%s22409_s1 + $0x370] ss:$8 sps:$4 sm:$0xff]   ;;  %v13876_v19 = vld [vmem:[%s22409_s1 + $0x360] ss:$8 sps:$4 sm:$0xff]  }
  0x31   : > { %2396 = vmatprep.subr.bf16.mxu1 %v13815_v29  ;;  %v13881_v20 = vld [vmem:[%s22409_s1 + $0x254] ss:$8 sps:$4 sm:$0xff]   ;;  %v525_v23 = vld [vmem:[%s15985_s29 + $0x1a0] sm:$0xff]  ;;  %v13879_v24 = vld [vmem:[%s22409_s1 + $0x250] ss:$8 sps:$4 sm:$0xff]   ;;  %s22368_s17 = scalar_lea.sflag [#allocation3], %s461_s19 }
  0x32   : > { %v13884_v21 = vld [vmem:[%s22409_s1 + $0x354] ss:$8 sps:$4 sm:$0xff]   ;;  %v13882_v25 = vld [vmem:[%s22409_s1 + $0x350] ss:$8 sps:$4 sm:$0xff]   ;;  %v510_v27 = vld [vmem:[%s15985_s29 + $0x128] sm:$0xff]  ;;  %s15665_s18 = scalar_lea.vmem %s15664_s28, 34816 }
  0x33   : > { %2324 = vmatpush1.bf16.msra.mxu0 %v13817_v30  ;;  %v508_v22 = vld [vmem:[%s15985_s29 + $0x118] sm:$0xff]  ;;  %v527_v28 = vld [vmem:[%s15985_s29 + $0x1b0] sm:$0xff]  ;;  %v561_v48 = vld [vmem:[%s15985_s29 + $0x2c0] sm:$0xff] }
  0x34   : > { %2397 = vmatpush1.bf16.msra.mxu1 %v13818_v31  ;;  %2325 = vmatprep.subr.bf16.mxu0 %v13819_v32  ;;  %v16105_v26 = vpack.c.bf16 %v525_v23, %v508_v22  ;;  %v507_v29 = vld [vmem:[%s15985_s29 + $0x110] sm:$0xff]  ;;  %v16110_v30 = vpack.c.bf16 %v527_v28, %v510_v27  ;;  %v524_v31 = vld [vmem:[%s15985_s29 + $0x198] sm:$0xff]  ;;  %v509_v32 = vld [vmem:[%s15985_s29 + $0x120] sm:$0xff] }
  0x35   : > { %2398 = vmatprep.subr.bf16.mxu1 %v13821_v33  ;;  %v526_v33 = vld [vmem:[%s15985_s29 + $0x1a8] sm:$0xff]  ;;  %v544_v47 = vld [vmem:[%s15985_s29 + $0x238] sm:$0xff]  ;;  %v541_v49 = vld [vmem:[%s15985_s29 + $0x220] sm:$0xff] }
  0x36   : > { %v595_v6 = vld [vmem:[%s15985_s29 + $0x3d0] sm:$0xff]  ;;  %v592_v9 = vld [vmem:[%s15985_s29 + $0x3b8] sm:$0xff]  ;;  %v13923_v28 = vld [vmem:[%s22409_s1 + $0x2e4] ss:$8 sps:$4 sm:$0xff]  }
  0x37   : > { %2326 = vmatpush2.bf16.msra.mxu0 %v13823_v34  ;;  %v13887_v34 = vld [vmem:[%s22409_s1 + $0x244] ss:$8 sps:$4 sm:$0xff]   ;;  %v575_v7 = vld [vmem:[%s15985_s29 + $0x330] sm:$0xff]  ;;  %v480_v27 = vld [vmem:[%s15985_s29 + $0x38] sm:$0xff] }
  0x38   : > { %2399 = vmatpush2.bf16.msra.mxu1 %v13824_v35  ;;  %2327 = vmatprep.subr.bf16.mxu0 %v13825_v36  ;;  %v16118_v35 = vpack.c.bf16 %v524_v31, %v507_v29  ;;  %v16120_v36 = vpack.c.bf16 %v526_v33, %v509_v32  ;;  %v13915_v22 = vld [vmem:[%s22409_s1 + $0x2f0] ss:$8 sps:$4 sm:$0xff]   ;;  %v13926_v29 = vld [vmem:[%s22409_s1 + $0x3e4] ss:$8 sps:$4 sm:$0xff]  }
  0x39   : > { %2400 = vmatprep.subr.bf16.mxu1 %v13827_v37  ;;  %v13890_v37 = vld [vmem:[%s22409_s1 + $0x344] ss:$8 sps:$4 sm:$0xff]   ;;  %v13918_v23 = vld [vmem:[%s22409_s1 + $0x3f0] ss:$8 sps:$4 sm:$0xff]  }
  0x3a   : > { %v497_v32 = vld [vmem:[%s15985_s29 + $0xc0] sm:$0xff] }
  0x3b   : > { %2328 = vmatpush2.bf16.msra.mxu0 %v13829_v38  ;;  %v13885_v38 = vld [vmem:[%s22409_s1 + $0x240] ss:$8 sps:$4 sm:$0xff]   ;;  %v16247_v33 = vpack.c.bf16 %v497_v32, %v480_v27  ;;  %v511_v32 = vld [vmem:[%s15985_s29 + $0x130] sm:$0xff] }
  0x3c   : > { %2401 = vmatpush2.bf16.msra.mxu1 %v13830_v39  ;;  %2329 = vmatprep.subr.bf16.mxu0 %v13831_v40  ;;  %v13888_v39 = vld [vmem:[%s22409_s1 + $0x340] ss:$8 sps:$4 sm:$0xff]   ;;  %v13893_v40 = vld [vmem:[%s22409_s1 + $0x234] ss:$8 sps:$4 sm:$0xff]  }
  0x3d   : > { %2402 = vmatprep.subr.bf16.mxu1 %v13833_v41  ;;  %v13896_v41 = vld [vmem:[%s22409_s1 + $0x334] ss:$8 sps:$4 sm:$0xff]   ;;  %v13969_v27 = vld [vmem:[%s22409_s1 + $0x460] ss:$8 sps:$4 sm:$0xff]  }
  0x3f   : > { %2330 = vmatpush2.bf16.msra.mxu0 %v13835_v42  ;;  %v542_v42 = vld [vmem:[%s15985_s29 + $0x228] sm:$0xff] }
  0x40   : > { %2403 = vmatpush2.bf16.msra.mxu1 %v13836_v43  ;;  %2331 = vmatprep.subr.bf16.mxu0 %v13837_v44  ;;  %v559_v43 = vld [vmem:[%s15985_s29 + $0x2b0] sm:$0xff] }
  0x41   : > { %2404 = vmatprep.subr.bf16.mxu1 %v13839_v45  ;;  %v13891_v44 = vld [vmem:[%s22409_s1 + $0x230] ss:$8 sps:$4 sm:$0xff]   ;;  %v16149_v46 = vpack.c.bf16 %v559_v43, %v542_v42  ;;  %v13935_v42 = vld [vmem:[%s22409_s1 + $0x2c4] ss:$8 sps:$4 sm:$0xff]  }
  0x42   : > { %v13894_v45 = vld [vmem:[%s22409_s1 + $0x330] ss:$8 sps:$4 sm:$0xff]   ;;  %v13938_v43 = vld [vmem:[%s22409_s1 + $0x3c4] ss:$8 sps:$4 sm:$0xff]  }
  0x43   : > { %2332 = vmatpush2.bf16.msra.mxu0 %v13841_v50  ;;  %v16154_v50 = vpack.c.bf16 %v561_v48, %v544_v47  ;;  %v13941_v47 = vld [vmem:[%s22409_s1 + $0x2b4] ss:$8 sps:$4 sm:$0xff]  }
  0x44   : > { %2405 = vmatpush2.bf16.msra.mxu1 %v13842_v51  ;;  %2333 = vmatprep.subr.bf16.mxu0 %v13843_v52  ;;  %v558_v51 = vld [vmem:[%s15985_s29 + $0x2a8] sm:$0xff]  ;;  %v543_v52 = vld [vmem:[%s15985_s29 + $0x230] sm:$0xff] }
  0x45   : > { %2406 = vmatprep.subr.bf16.mxu1 %v13845_v55  ;;  %v560_v55 = vld [vmem:[%s15985_s29 + $0x2b8] sm:$0xff] }
  0x46   : > { %v13944_v48 = vld [vmem:[%s22409_s1 + $0x3b4] ss:$8 sps:$4 sm:$0xff]  }
  0x47   : > { %2334 = vmatpush2.bf16.msra.mxu0 %v13847_v56  ;;  %v13899_v56 = vld [vmem:[%s22409_s1 + $0x224] ss:$8 sps:$4 sm:$0xff]  }
  0x48   : > { %2407 = vmatpush2.bf16.msra.mxu1 %v13848_v57  ;;  %2335 = vmatprep.subr.bf16.mxu0 %v13849_v58  ;;  %v16162_v57 = vpack.c.bf16 %v558_v51, %v541_v49  ;;  %v16164_v58 = vpack.c.bf16 %v560_v55, %v543_v52  ;;  %v13939_v49 = vld [vmem:[%s22409_s1 + $0x2b0] ss:$8 sps:$4 sm:$0xff]   ;;  %v13947_v52 = vld [vmem:[%s22409_s1 + $0x2a4] ss:$8 sps:$4 sm:$0xff]  }
  0x49   : > { %2408 = vmatprep.subr.bf16.mxu1 %v13851_v59  ;;  %v13902_v59 = vld [vmem:[%s22409_s1 + $0x324] ss:$8 sps:$4 sm:$0xff]   ;;  %v13942_v51 = vld [vmem:[%s22409_s1 + $0x3b0] ss:$8 sps:$4 sm:$0xff]  }
  0x4a   : > { %v13950_v55 = vld [vmem:[%s22409_s1 + $0x3a4] ss:$8 sps:$4 sm:$0xff]  }
  0x4b   : > { %2336 = vmatpush2.bf16.msra.mxu0 %v13853_v60  ;;  %v13897_v60 = vld [vmem:[%s22409_s1 + $0x220] ss:$8 sps:$4 sm:$0xff]  }
  0x4c   : > { %2409 = vmatpush2.bf16.msra.mxu1 %v13854_v61  ;;  %2337 = vmatprep.subr.bf16.mxu0 %v13855_v62  ;;  %v13900_v61 = vld [vmem:[%s22409_s1 + $0x320] ss:$8 sps:$4 sm:$0xff]   ;;  %v13905_v62 = vld [vmem:[%s22409_s1 + $0x214] ss:$8 sps:$4 sm:$0xff]  }
  0x4d   : > { %2410 = vmatprep.subr.bf16.mxu1 %v13857_v63  ;;  %v13908_v63 = vld [vmem:[%s22409_s1 + $0x314] ss:$8 sps:$4 sm:$0xff]  }
  0x4f   : > { %2338 = vmatpush2.bf16.msra.mxu0 %v13859_v0  ;;  %v576_v0 = vld [vmem:[%s15985_s29 + $0x338] sm:$0xff] }
  0x50   : > { %2411 = vmatpush2.bf16.msra.mxu1 %v13860_v1  ;;  %2339 = vmatprep.subr.bf16.mxu0 %v13861_v2  ;;  %v593_v1 = vld [vmem:[%s15985_s29 + $0x3c0] sm:$0xff]  ;;  %v13903_v2 = vld [vmem:[%s22409_s1 + $0x210] ss:$8 sps:$4 sm:$0xff]  }
  0x51   : > { %2412 = vmatprep.subr.bf16.mxu1 %v13863_v3  ;;  %v13906_v3 = vld [vmem:[%s22409_s1 + $0x310] ss:$8 sps:$4 sm:$0xff]  }
  0x53   : > { %2340 = vmatpush2.bf16.msra.mxu0 %v13865_v4  ;;  %v16193_v4 = vpack.c.bf16 %v593_v1, %v576_v0  ;;  %v13959_v0 = vld [vmem:[%s22409_s1 + $0x284] ss:$8 sps:$4 sm:$0xff]  }
  0x54   : > { %2413 = vmatpush2.bf16.msra.mxu1 %v13866_v5  ;;  %2455 = vmatprep.subr.bf16.mxu0 %v13869_v10  ;;  %v578_v5 = vld [vmem:[%s15985_s29 + $0x348] sm:$0xff]  ;;  %v577_v10 = vld [vmem:[%s15985_s29 + $0x340] sm:$0xff] }
  0x55   : > { %2528 = vmatprep.subr.bf16.mxu1 %v13872_v11  ;;  %v16198_v8 = vpack.c.bf16 %v595_v6, %v578_v5  ;;  %v594_v11 = vld [vmem:[%s15985_s29 + $0x3c8] sm:$0xff]  ;;  %v477_v5 = vld [vmem:[%s15985_s29 + $0x20] sm:$0xff] }
  0x56   : > { %2342 = vmatmul.mubr.bf16.vlgmr.msra.gmra.mxu0 %v16067_v12  ;;  %v13962_v1 = vld [vmem:[%s22409_s1 + $0x384] ss:$8 sps:$4 sm:$0xff]  }
  0x57   : > { %2415 = vmatmul.mubr.bf16.vlgmr.msra.gmra.mxu1 %v16069_v13  ;;  %2456 = vmatpush1.bf16.msra.mxu0 %v13867_v14  ;;  %v13911_v14 = vld [vmem:[%s22409_s1 + $0x204] ss:$8 sps:$4 sm:$0xff]  }
  0x58   : > { %2529 = vmatpush1.bf16.msra.mxu1 %v13870_v15  ;;  %2457 = vmatprep.subr.bf16.mxu0 %v13875_v16  ;;  %v16206_v15 = vpack.c.bf16 %v592_v9, %v575_v7  ;;  %v16208_v16 = vpack.c.bf16 %v594_v11, %v577_v10  ;;  %v494_v6 = vld [vmem:[%s15985_s29 + $0xa8] sm:$0xff]  ;;  %v479_v7 = vld [vmem:[%s15985_s29 + $0x30] sm:$0xff]  ;;  %v496_v9 = vld [vmem:[%s15985_s29 + $0xb8] sm:$0xff] }
  0x59   : > { %2530 = vmatprep.subr.bf16.mxu1 %v13878_v17  ;;  %2351 = vmatprep.mubr.bf16.mxu0 %v16105_v26  ;;  %v13914_v17 = vld [vmem:[%s22409_s1 + $0x304] ss:$8 sps:$4 sm:$0xff]   ;;  %v13965_v10 = vld [vmem:[%s22409_s1 + $0x474] ss:$8 sps:$4 sm:$0xff]  }
  0x5a   : > { %2424 = vmatprep.mubr.bf16.mxu1 %v16110_v30  ;;  %v13968_v11 = vld [vmem:[%s22409_s1 + $0x574] ss:$8 sps:$4 sm:$0xff]  }
  0x5b   : > { %2458 = vmatpush1.bf16.msra.mxu0 %v13873_v18  ;;  %v13909_v18 = vld [vmem:[%s22409_s1 + $0x200] ss:$8 sps:$4 sm:$0xff]  }
  0x5c   : > { %2531 = vmatpush1.bf16.msra.mxu1 %v13876_v19  ;;  %2459 = vmatprep.subr.bf16.mxu0 %v13881_v20  ;;  %v13912_v19 = vld [vmem:[%s22409_s1 + $0x300] ss:$8 sps:$4 sm:$0xff]   ;;  %v13917_v20 = vld [vmem:[%s22409_s1 + $0x2f4] ss:$8 sps:$4 sm:$0xff]  }
  0x5d   : > { %2532 = vmatprep.subr.bf16.mxu1 %v13884_v21  ;;  %v13920_v21 = vld [vmem:[%s22409_s1 + $0x3f4] ss:$8 sps:$4 sm:$0xff]  }
  0x5e   : > { %2352 = vmatmul.mubr.bf16.gmra.mxu0 %v16118_v35 }
  0x5f   : > { %2425 = vmatmul.mubr.bf16.gmra.mxu1 %v16120_v36  ;;  %2460 = vmatpush1.bf16.msra.mxu0 %v13879_v24  ;;  %v478_v24 = vld [vmem:[%s15985_s29 + $0x28] sm:$0xff] }
  0x60   : > { %2533 = vmatpush1.bf16.msra.mxu1 %v13882_v25  ;;  %2461 = vmatprep.subr.bf16.mxu0 %v13887_v34  ;;  %v495_v25 = vld [vmem:[%s15985_s29 + $0xb0] sm:$0xff]  ;;  %v13921_v34 = vld [vmem:[%s22409_s1 + $0x2e0] ss:$8 sps:$4 sm:$0xff]  }
  0x61   : > { %2534 = vmatprep.subr.bf16.mxu1 %v13890_v37  ;;  %2361 = vmatprep.mubr.bf16.mxu0 %v16149_v46  ;;  %v16244_v31 = vpack.c.bf16 %v495_v25, %v478_v24  ;;  %v13924_v37 = vld [vmem:[%s22409_s1 + $0x3e0] ss:$8 sps:$4 sm:$0xff]   ;;  %v13971_v24 = vld [vmem:[%s22409_s1 + $0x464] ss:$8 sps:$4 sm:$0xff]  }
  0x62   : > { %2434 = vmatprep.mubr.bf16.mxu1 %v16154_v50  ;;  %v13974_v25 = vld [vmem:[%s22409_s1 + $0x564] ss:$8 sps:$4 sm:$0xff]  }
  0x63   : > { %2462 = vmatpush1.bf16.msra.mxu0 %v13885_v38  ;;  %v13929_v38 = vld [vmem:[%s22409_s1 + $0x2d4] ss:$8 sps:$4 sm:$0xff]  }
  0x64   : > { %2535 = vmatpush1.bf16.msra.mxu1 %v13888_v39  ;;  %2463 = vmatprep.subr.bf16.mxu0 %v13893_v40  ;;  %v13932_v39 = vld [vmem:[%s22409_s1 + $0x3d4] ss:$8 sps:$4 sm:$0xff]   ;;  %v13927_v40 = vld [vmem:[%s22409_s1 + $0x2d0] ss:$8 sps:$4 sm:$0xff]  }
  0x65   : > { %2536 = vmatprep.subr.bf16.mxu1 %v13896_v41  ;;  %v13930_v41 = vld [vmem:[%s22409_s1 + $0x3d0] ss:$8 sps:$4 sm:$0xff]  }
  0x66   : > { %2362 = vmatmul.mubr.bf16.gmra.mxu0 %v16162_v57 }
  0x67   : > { %2435 = vmatmul.mubr.bf16.gmra.mxu1 %v16164_v58  ;;  %2464 = vmatpush1.bf16.msra.mxu0 %v13891_v44  ;;  %v13933_v44 = vld [vmem:[%s22409_s1 + $0x2c0] ss:$8 sps:$4 sm:$0xff]  }
  0x68   : > { %2537 = vmatpush1.bf16.msra.mxu1 %v13894_v45  ;;  %2465 = vmatprep.subr.bf16.mxu0 %v13899_v56  ;;  %v13936_v45 = vld [vmem:[%s22409_s1 + $0x3c0] ss:$8 sps:$4 sm:$0xff]  }
  0x69   : > { %2538 = vmatprep.subr.bf16.mxu1 %v13902_v59  ;;  %2371 = vmatprep.mubr.bf16.mxu0 %v16193_v4  ;;  %v13945_v56 = vld [vmem:[%s22409_s1 + $0x2a0] ss:$8 sps:$4 sm:$0xff]  }
  0x6a   : > { %2444 = vmatprep.mubr.bf16.mxu1 %v16198_v8  ;;  %v13948_v59 = vld [vmem:[%s22409_s1 + $0x3a0] ss:$8 sps:$4 sm:$0xff]  }
  0x6b   : > { %2466 = vmatpush1.bf16.msra.mxu0 %v13897_v60  ;;  %v13953_v60 = vld [vmem:[%s22409_s1 + $0x294] ss:$8 sps:$4 sm:$0xff]  }
  0x6c   : > { %2539 = vmatpush1.bf16.msra.mxu1 %v13900_v61  ;;  %2467 = vmatprep.subr.bf16.mxu0 %v13905_v62  ;;  %v13956_v61 = vld [vmem:[%s22409_s1 + $0x394] ss:$8 sps:$4 sm:$0xff]   ;;  %v13951_v62 = vld [vmem:[%s22409_s1 + $0x290] ss:$8 sps:$4 sm:$0xff]  }
  0x6d   : > { %2540 = vmatprep.subr.bf16.mxu1 %v13908_v63  ;;  %v13954_v63 = vld [vmem:[%s22409_s1 + $0x390] ss:$8 sps:$4 sm:$0xff]  }
  0x6e   : > { %2372 = vmatmul.mubr.bf16.gmra.mxu0 %v16206_v15 }
  0x6f   : > { %2445 = vmatmul.mubr.bf16.gmra.mxu1 %v16208_v16  ;;  %2468 = vmatpush1.bf16.msra.mxu0 %v13903_v2  ;;  %v13957_v2 = vld [vmem:[%s22409_s1 + $0x280] ss:$8 sps:$4 sm:$0xff]  }
  0x70   : > { %2541 = vmatpush1.bf16.msra.mxu1 %v13906_v3  ;;  %2469 = vmatprep.subr.bf16.mxu0 %v13911_v14  ;;  %v13960_v3 = vld [vmem:[%s22409_s1 + $0x380] ss:$8 sps:$4 sm:$0xff]   ;;  %v13963_v14 = vld [vmem:[%s22409_s1 + $0x470] ss:$8 sps:$4 sm:$0xff]  }
  0x71   : > { %2542 = vmatprep.subr.bf16.mxu1 %v13914_v17  ;;  %2487 = vmatprep.mubr.bf16.mxu0 %v16244_v31  ;;  %v13966_v17 = vld [vmem:[%s22409_s1 + $0x570] ss:$8 sps:$4 sm:$0xff]  }
  0x72   : > { %2560 = vmatprep.mubr.bf16.mxu1 %v16247_v33 }
  0x73   : > { %2470 = vmatpush1.bf16.msra.mxu0 %v13909_v18  ;;  %v512_v18 = vld [vmem:[%s15985_s29 + $0x138] sm:$0xff] }
  0x74   : > { %2543 = vmatpush1.bf16.msra.mxu1 %v13912_v19  ;;  %2471 = vmatprep.subr.bf16.mxu0 %v13917_v20  ;;  %v529_v19 = vld [vmem:[%s15985_s29 + $0x1c0] sm:$0xff]  ;;  %v16347_v20 = vpack.c.bf16 %v494_v6, %v477_v5  ;;  %v13987_v5 = vld [vmem:[%s22409_s1 + $0x430] ss:$8 sps:$4 sm:$0xff]  }
  0x75   : > { %2544 = vmatprep.subr.bf16.mxu1 %v13920_v21  ;;  %v16349_v21 = vpack.c.bf16 %v496_v9, %v479_v7  ;;  %v13990_v6 = vld [vmem:[%s22409_s1 + $0x530] ss:$8 sps:$4 sm:$0xff]   ;;  %v597_v9 = vld [vmem:[%s15985_s29 + $0x3e0] sm:$0xff] }
  0x76   : > { %v580_v7 = vld [vmem:[%s15985_s29 + $0x358] sm:$0xff] }
  0x77   : > { %2472 = vmatpush2.bf16.msra.mxu0 %v13915_v22  ;;  %v514_v22 = vld [vmem:[%s15985_s29 + $0x148] sm:$0xff] }
  0x78   : > { %2545 = vmatpush2.bf16.msra.mxu1 %v13918_v23  ;;  %2473 = vmatprep.subr.bf16.mxu0 %v13923_v28  ;;  %v531_v23 = vld [vmem:[%s15985_s29 + $0x1d0] sm:$0xff]  ;;  %v13972_v28 = vld [vmem:[%s22409_s1 + $0x560] ss:$8 sps:$4 sm:$0xff]  }
  0x79   : > { %2546 = vmatprep.subr.bf16.mxu1 %v13926_v29  ;;  %v16365_v29 = vpack.c.bf16 %v529_v19, %v512_v18  ;;  %v13995_v18 = vld [vmem:[%s22409_s1 + $0x424] ss:$8 sps:$4 sm:$0xff]  }
  0x7a   : > { %v13998_v19 = vld [vmem:[%s22409_s1 + $0x524] ss:$8 sps:$4 sm:$0xff]  }
  0x7b   : > { %2474 = vmatpush2.bf16.msra.mxu0 %v13921_v34  ;;  %v528_v34 = vld [vmem:[%s15985_s29 + $0x1b8] sm:$0xff] }
  0x7c   : > { %2547 = vmatpush2.bf16.msra.mxu1 %v13924_v37  ;;  %2475 = vmatprep.subr.bf16.mxu0 %v13929_v38  ;;  %v16369_v37 = vpack.c.bf16 %v531_v23, %v514_v22  ;;  %v13977_v38 = vld [vmem:[%s22409_s1 + $0x454] ss:$8 sps:$4 sm:$0xff]   ;;  %v13993_v22 = vld [vmem:[%s22409_s1 + $0x420] ss:$8 sps:$4 sm:$0xff]  }
  0x7d   : > { %2548 = vmatprep.subr.bf16.mxu1 %v13932_v39  ;;  %v513_v39 = vld [vmem:[%s15985_s29 + $0x140] sm:$0xff] }
  0x7e   : > { %v13996_v23 = vld [vmem:[%s22409_s1 + $0x520] ss:$8 sps:$4 sm:$0xff]  }
  0x7f   : > { %2476 = vmatpush2.bf16.msra.mxu0 %v13927_v40  ;;  %v530_v40 = vld [vmem:[%s15985_s29 + $0x1c8] sm:$0xff] }
  0x80   : > { %2549 = vmatpush2.bf16.msra.mxu1 %v13930_v41  ;;  %2477 = vmatprep.subr.bf16.mxu0 %v13935_v42  ;;  %v13980_v41 = vld [vmem:[%s22409_s1 + $0x554] ss:$8 sps:$4 sm:$0xff]   ;;  %v13975_v42 = vld [vmem:[%s22409_s1 + $0x450] ss:$8 sps:$4 sm:$0xff]  }
  0x81   : > { %2550 = vmatprep.subr.bf16.mxu1 %v13938_v43  ;;  %v13978_v43 = vld [vmem:[%s22409_s1 + $0x550] ss:$8 sps:$4 sm:$0xff]  }
  0x83   : > { %2478 = vmatpush2.bf16.msra.mxu0 %v13933_v44  ;;  %v546_v44 = vld [vmem:[%s15985_s29 + $0x248] sm:$0xff] }
  0x84   : > { %2551 = vmatpush2.bf16.msra.mxu1 %v13936_v45  ;;  %2479 = vmatprep.subr.bf16.mxu0 %v13941_v47  ;;  %v563_v45 = vld [vmem:[%s15985_s29 + $0x2d0] sm:$0xff]  ;;  %v16391_v47 = vpack.c.bf16 %v528_v34, %v511_v32  ;;  %v581_v32 = vld [vmem:[%s15985_s29 + $0x360] sm:$0xff]  ;;  %v598_v34 = vld [vmem:[%s15985_s29 + $0x3e8] sm:$0xff] }
  0x85   : > { %2552 = vmatprep.subr.bf16.mxu1 %v13944_v48  ;;  %v16393_v48 = vpack.c.bf16 %v530_v40, %v513_v39  ;;  %v14004_v39 = vld [vmem:[%s22409_s1 + $0x514] ss:$8 sps:$4 sm:$0xff]   ;;  %v13999_v40 = vld [vmem:[%s22409_s1 + $0x410] ss:$8 sps:$4 sm:$0xff]  }
  0x87   : > { %2480 = vmatpush2.bf16.msra.mxu0 %v13939_v49  ;;  %v548_v49 = vld [vmem:[%s15985_s29 + $0x258] sm:$0xff] }
  0x88   : > { %2553 = vmatpush2.bf16.msra.mxu1 %v13942_v51  ;;  %2481 = vmatprep.subr.bf16.mxu0 %v13947_v52  ;;  %v565_v51 = vld [vmem:[%s15985_s29 + $0x2e0] sm:$0xff] }
  0x89   : > { %2554 = vmatprep.subr.bf16.mxu1 %v13950_v55  ;;  %v13983_v52 = vld [vmem:[%s22409_s1 + $0x444] ss:$8 sps:$4 sm:$0xff]  }
  0x8a   : > { %v13986_v55 = vld [vmem:[%s22409_s1 + $0x544] ss:$8 sps:$4 sm:$0xff]  }
  0x8b   : > { %2482 = vmatpush2.bf16.msra.mxu0 %v13945_v56  ;;  %v13981_v56 = vld [vmem:[%s22409_s1 + $0x440] ss:$8 sps:$4 sm:$0xff]  }
  0x8c   : > { %2555 = vmatpush2.bf16.msra.mxu1 %v13948_v59  ;;  %2483 = vmatprep.subr.bf16.mxu0 %v13953_v60  ;;  %v13984_v59 = vld [vmem:[%s22409_s1 + $0x540] ss:$8 sps:$4 sm:$0xff]   ;;  %v16409_v60 = vpack.c.bf16 %v563_v45, %v546_v44  ;;  %v16480_v44 = vpack.c.bf16 %v598_v34, %v581_v32  ;;  %v499_v45 = vld [vmem:[%s15985_s29 + $0xd0] sm:$0xff] }
  0x8d   : > { %2556 = vmatprep.subr.bf16.mxu1 %v13956_v61  ;;  %v545_v61 = vld [vmem:[%s15985_s29 + $0x240] sm:$0xff]  ;;  %v14037_v34 = vld [vmem:[%s22409_s1 + $0x4b4] ss:$8 sps:$4 sm:$0xff]  }
  0x8e   : > { %v14032_v32 = vld [vmem:[%s22409_s1 + $0x5c0] ss:$8 sps:$4 sm:$0xff]  }
  0x8f   : > { %2484 = vmatpush2.bf16.msra.mxu0 %v13951_v62  ;;  %v562_v62 = vld [vmem:[%s15985_s29 + $0x2c8] sm:$0xff] }
  0x90   : > { %2557 = vmatpush2.bf16.msra.mxu1 %v13954_v63  ;;  %2485 = vmatprep.subr.bf16.mxu0 %v13959_v0  ;;  %v16413_v63 = vpack.c.bf16 %v565_v51, %v548_v49  ;;  %v13989_v0 = vld [vmem:[%s22409_s1 + $0x434] ss:$8 sps:$4 sm:$0xff]   ;;  %v501_v51 = vld [vmem:[%s15985_s29 + $0xe0] sm:$0xff] }
  0x91   : > { %2558 = vmatprep.subr.bf16.mxu1 %v13962_v1  ;;  %v547_v1 = vld [vmem:[%s15985_s29 + $0x250] sm:$0xff]  ;;  %v484_v49 = vld [vmem:[%s15985_s29 + $0x58] sm:$0xff] }
  0x93   : > { %2486 = vmatpush2.bf16.msra.mxu0 %v13957_v2  ;;  %v564_v2 = vld [vmem:[%s15985_s29 + $0x2d8] sm:$0xff] }
  0x94   : > { %2559 = vmatpush2.bf16.msra.mxu1 %v13960_v3  ;;  %2601 = vmatprep.subr.bf16.mxu0 %v13965_v10  ;;  %v13992_v3 = vld [vmem:[%s22409_s1 + $0x534] ss:$8 sps:$4 sm:$0xff]   ;;  %v16435_v10 = vpack.c.bf16 %v562_v62, %v545_v61  ;;  %v14005_v61 = vld [vmem:[%s22409_s1 + $0x400] ss:$8 sps:$4 sm:$0xff]  }
  0x95   : > { %2674 = vmatprep.subr.bf16.mxu1 %v13968_v11  ;;  %v16437_v11 = vpack.c.bf16 %v564_v2, %v547_v1  ;;  %v14008_v62 = vld [vmem:[%s22409_s1 + $0x500] ss:$8 sps:$4 sm:$0xff]   ;;  %v14016_v1 = vld [vmem:[%s22409_s1 + $0x5f4] ss:$8 sps:$4 sm:$0xff]   ;;  %v14011_v2 = vld [vmem:[%s22409_s1 + $0x4f0] ss:$8 sps:$4 sm:$0xff]  }
  0x96   : > { %2488 = vmatmul.mubr.bf16.vlgmr.msra.gmra.mxu0 %v16347_v20 }
  0x97   : > { %2561 = vmatmul.mubr.bf16.vlgmr.msra.gmra.mxu1 %v16349_v21  ;;  %2602 = vmatpush1.bf16.msra.mxu0 %v13963_v14  ;;  %v582_v14 = vld [vmem:[%s15985_s29 + $0x368] sm:$0xff] }
  0x98   : > { %2675 = vmatpush1.bf16.msra.mxu1 %v13966_v17  ;;  %2603 = vmatprep.subr.bf16.mxu0 %v13971_v24  ;;  %v599_v17 = vld [vmem:[%s15985_s29 + $0x3f0] sm:$0xff]  ;;  %v16453_v24 = vpack.c.bf16 %v597_v9, %v580_v7  ;;  %v22428_v7 = vmov 0   ;;  %v14017_v9 = vld [vmem:[%s22409_s1 + $0x4e0] ss:$8 sps:$4 sm:$0xff]  }
  0x99   : > { %2676 = vmatprep.subr.bf16.mxu1 %v13974_v25  ;;  %2497 = vmatprep.mubr.bf16.mxu0 %v16365_v29  ;;  %v579_v25 = vld [vmem:[%s15985_s29 + $0x350] sm:$0xff] }
  0x9a   : > { %2570 = vmatprep.mubr.bf16.mxu1 %v16369_v37  ;;  %13763 = vset.pattern.permute.xlu0 %v22428_v7 }
  0x9b   : > { %2604 = vmatpush1.bf16.msra.mxu0 %v13969_v27  ;;  %v16456_v27 = vpack.c.bf16 %v599_v17, %v582_v14  ;;  %13764 = vset.pattern.permute.xlu1 %v22428_v7  ;;  %v14020_v14 = vld [vmem:[%s22409_s1 + $0x5e0] ss:$8 sps:$4 sm:$0xff]   ;;  %v14025_v17 = vld [vmem:[%s22409_s1 + $0x4d4] ss:$8 sps:$4 sm:$0xff]   ;;  %v14106_v7 = vld [vmem:[%s22409_s1 + $0x704] ss:$8 sps:$4 sm:$0xff]  }
  0x9c   : > { %2677 = vmatpush1.bf16.msra.mxu1 %v13972_v28  ;;  %2605 = vmatprep.subr.bf16.mxu0 %v13977_v38  ;;  %v596_v28 = vld [vmem:[%s15985_s29 + $0x3d8] sm:$0xff] }
  0x9d   : > { %2678 = vmatprep.subr.bf16.mxu1 %v13980_v41  ;;  %v14001_v38 = vld [vmem:[%s22409_s1 + $0x414] ss:$8 sps:$4 sm:$0xff]   ;;  %v14002_v41 = vld [vmem:[%s22409_s1 + $0x510] ss:$8 sps:$4 sm:$0xff]  }
  0x9e   : > { %2498 = vmatmul.mubr.bf16.gmra.mxu0 %v16391_v47 }
  0x9f   : > { %2571 = vmatmul.mubr.bf16.gmra.mxu1 %v16393_v48  ;;  %2606 = vmatpush1.bf16.msra.mxu0 %v13975_v42  ;;  %v482_v42 = vld [vmem:[%s15985_s29 + $0x48] sm:$0xff] }
  0xa0   : > { %2679 = vmatpush1.bf16.msra.mxu1 %v13978_v43  ;;  %2607 = vmatprep.subr.bf16.mxu0 %v13983_v52  ;;  %v16478_v43 = vpack.c.bf16 %v596_v28, %v579_v25  ;;  %v14007_v52 = vld [vmem:[%s22409_s1 + $0x404] ss:$8 sps:$4 sm:$0xff]   ;;  %v14029_v28 = vld [vmem:[%s22409_s1 + $0x4c0] ss:$8 sps:$4 sm:$0xff]  }
  0xa1   : > { %2680 = vmatprep.subr.bf16.mxu1 %v13986_v55  ;;  %2507 = vmatprep.mubr.bf16.mxu0 %v16409_v60  ;;  %v14010_v55 = vld [vmem:[%s22409_s1 + $0x504] ss:$8 sps:$4 sm:$0xff]  }
  0xa2   : > { %2580 = vmatprep.mubr.bf16.mxu1 %v16413_v63  ;;  %v14034_v25 = vld [vmem:[%s22409_s1 + $0x5c4] ss:$8 sps:$4 sm:$0xff]  }
  0xa3   : > { %2608 = vmatpush1.bf16.msra.mxu0 %v13981_v56  ;;  %v16491_v56 = vpack.c.bf16 %v499_v45, %v482_v42  ;;  %v14046_v42 = vld [vmem:[%s22409_s1 + $0x5a4] ss:$8 sps:$4 sm:$0xff]   ;;  %v14041_v45 = vld [vmem:[%s22409_s1 + $0x4a0] ss:$8 sps:$4 sm:$0xff]  }
  0xa4   : > { %2681 = vmatpush1.bf16.msra.mxu1 %v13984_v59  ;;  %2609 = vmatprep.subr.bf16.mxu0 %v13989_v0  ;;  %v16493_v59 = vpack.c.bf16 %v501_v51, %v484_v49  ;;  %v14013_v0 = vld [vmem:[%s22409_s1 + $0x4f4] ss:$8 sps:$4 sm:$0xff]   ;;  %v14044_v49 = vld [vmem:[%s22409_s1 + $0x5a0] ss:$8 sps:$4 sm:$0xff]  }
  0xa5   : > { %2682 = vmatprep.subr.bf16.mxu1 %v13992_v3  ;;  %v14014_v3 = vld [vmem:[%s22409_s1 + $0x5f0] ss:$8 sps:$4 sm:$0xff]   ;;  %v14049_v51 = vld [vmem:[%s22409_s1 + $0x494] ss:$8 sps:$4 sm:$0xff]  }
  0xa6   : > { %2508 = vmatmul.mubr.bf16.gmra.mxu0 %v16435_v10 }
  0xa7   : > { %2581 = vmatmul.mubr.bf16.gmra.mxu1 %v16437_v11  ;;  %2610 = vmatpush1.bf16.msra.mxu0 %v13987_v5  ;;  %v14019_v5 = vld [vmem:[%s22409_s1 + $0x4e4] ss:$8 sps:$4 sm:$0xff]  }
  0xa8   : > { %2683 = vmatpush1.bf16.msra.mxu1 %v13990_v6  ;;  %2611 = vmatprep.subr.bf16.mxu0 %v13995_v18  ;;  %v14022_v6 = vld [vmem:[%s22409_s1 + $0x5e4] ss:$8 sps:$4 sm:$0xff]   ;;  %v14028_v18 = vld [vmem:[%s22409_s1 + $0x5d4] ss:$8 sps:$4 sm:$0xff]  }
  0xa9   : > { %2684 = vmatprep.subr.bf16.mxu1 %v13998_v19  ;;  %2517 = vmatprep.mubr.bf16.mxu0 %v16453_v24  ;;  %v14023_v19 = vld [vmem:[%s22409_s1 + $0x4d0] ss:$8 sps:$4 sm:$0xff]  }
  0xaa   : > { %2590 = vmatprep.mubr.bf16.mxu1 %v16456_v27 }
  0xab   : > { %2612 = vmatpush1.bf16.msra.mxu0 %v13993_v22  ;;  %v14026_v22 = vld [vmem:[%s22409_s1 + $0x5d0] ss:$8 sps:$4 sm:$0xff]  }
  0xac   : > { %2685 = vmatpush1.bf16.msra.mxu1 %v13996_v23  ;;  %2613 = vmatprep.subr.bf16.mxu0 %v14001_v38  ;;  %v14031_v23 = vld [vmem:[%s22409_s1 + $0x4c4] ss:$8 sps:$4 sm:$0xff]   ;;  %v14040_v38 = vld [vmem:[%s22409_s1 + $0x5b4] ss:$8 sps:$4 sm:$0xff]  }
  0xad   : > { %2686 = vmatprep.subr.bf16.mxu1 %v14004_v39  ;;  %v14035_v39 = vld [vmem:[%s22409_s1 + $0x4b0] ss:$8 sps:$4 sm:$0xff]  }
  0xae   : > { %2518 = vmatmul.mubr.bf16.gmra.mxu0 %v16478_v43 }
  0xaf   : > { %2591 = vmatmul.mubr.bf16.gmra.mxu1 %v16480_v44  ;;  %2614 = vmatpush1.bf16.msra.mxu0 %v13999_v40  ;;  %v14038_v40 = vld [vmem:[%s22409_s1 + $0x5b0] ss:$8 sps:$4 sm:$0xff]  }
  0xb0   : > { %2687 = vmatpush1.bf16.msra.mxu1 %v14002_v41  ;;  %2615 = vmatprep.subr.bf16.mxu0 %v14007_v52  ;;  %v14043_v41 = vld [vmem:[%s22409_s1 + $0x4a4] ss:$8 sps:$4 sm:$0xff]   ;;  %v14052_v52 = vld [vmem:[%s22409_s1 + $0x594] ss:$8 sps:$4 sm:$0xff]  }
  0xb1   : > { %2688 = vmatprep.subr.bf16.mxu1 %v14010_v55  ;;  %2633 = vmatprep.mubr.bf16.mxu0 %v16491_v56  ;;  %v14047_v55 = vld [vmem:[%s22409_s1 + $0x490] ss:$8 sps:$4 sm:$0xff]  }
  0xb2   : > { %2706 = vmatprep.mubr.bf16.mxu1 %v16493_v59 }
  0xb3   : > { %2616 = vmatpush1.bf16.msra.mxu0 %v14005_v61  ;;  %v14050_v61 = vld [vmem:[%s22409_s1 + $0x590] ss:$8 sps:$4 sm:$0xff]  }
  0xb4   : > { %2689 = vmatpush1.bf16.msra.mxu1 %v14008_v62  ;;  %2617 = vmatprep.subr.bf16.mxu0 %v14013_v0  ;;  %v14055_v62 = vld [vmem:[%s22409_s1 + $0x484] ss:$8 sps:$4 sm:$0xff]  }
  0xb5   : > { %2690 = vmatprep.subr.bf16.mxu1 %v14016_v1  ;;  %v14058_v0 = vld [vmem:[%s22409_s1 + $0x584] ss:$8 sps:$4 sm:$0xff]   ;;  %v14053_v1 = vld [vmem:[%s22409_s1 + $0x480] ss:$8 sps:$4 sm:$0xff]  }
  0xb7   : > { %2618 = vmatpush2.bf16.msra.mxu0 %v14011_v2  ;;  %v14056_v2 = vld [vmem:[%s22409_s1 + $0x580] ss:$8 sps:$4 sm:$0xff]  }
  0xb8   : > { %2691 = vmatpush2.bf16.msra.mxu1 %v14014_v3  ;;  %2619 = vmatprep.subr.bf16.mxu0 %v14019_v5  ;;  %v481_v3 = vld [vmem:[%s15985_s29 + $0x40] sm:$0xff]  ;;  %v498_v5 = vld [vmem:[%s15985_s29 + $0xc8] sm:$0xff] }
  0xb9   : > { %2692 = vmatprep.subr.bf16.mxu1 %v14022_v6  ;;  %v483_v6 = vld [vmem:[%s15985_s29 + $0x50] sm:$0xff] }
  0xbb   : > { %2620 = vmatpush2.bf16.msra.mxu0 %v14017_v9  ;;  %v500_v9 = vld [vmem:[%s15985_s29 + $0xd8] sm:$0xff] }
  0xbc   : > { %2693 = vmatpush2.bf16.msra.mxu1 %v14020_v14  ;;  %2621 = vmatprep.subr.bf16.mxu0 %v14025_v17  ;;  %v14061_v14 = vld [vmem:[%s22409_s1 + $0x674] ss:$8 sps:$4 sm:$0xff]  }
  0xbd   : > { %2694 = vmatprep.subr.bf16.mxu1 %v14028_v18  ;;  %v14064_v17 = vld [vmem:[%s22409_s1 + $0x774] ss:$8 sps:$4 sm:$0xff]   ;;  %v14059_v18 = vld [vmem:[%s22409_s1 + $0x670] ss:$8 sps:$4 sm:$0xff]  }
  0xbf   : > { %2622 = vmatpush2.bf16.msra.mxu0 %v14023_v19  ;;  %v14062_v19 = vld [vmem:[%s22409_s1 + $0x770] ss:$8 sps:$4 sm:$0xff]  }
  0xc0   : > { %2695 = vmatpush2.bf16.msra.mxu1 %v14026_v22  ;;  %2623 = vmatprep.subr.bf16.mxu0 %v14031_v23  ;;  %v516_v22 = vld [vmem:[%s15985_s29 + $0x158] sm:$0xff]  ;;  %v533_v23 = vld [vmem:[%s15985_s29 + $0x1e0] sm:$0xff] }
  0xc1   : > { %2696 = vmatprep.subr.bf16.mxu1 %v14034_v25  ;;  %v16621_v25 = vpack.c.bf16 %v498_v5, %v481_v3  ;;  %v567_v3 = vld [vmem:[%s15985_s29 + $0x2f0] sm:$0xff] }
  0xc3   : > { %2624 = vmatpush2.bf16.msra.mxu0 %v14029_v28  ;;  %v16623_v28 = vpack.c.bf16 %v500_v9, %v483_v6  ;;  %v552_v9 = vld [vmem:[%s15985_s29 + $0x278] sm:$0xff] }
  0xc4   : > { %2697 = vmatpush2.bf16.msra.mxu1 %v14032_v32  ;;  %2625 = vmatprep.subr.bf16.mxu0 %v14037_v34  ;;  %v518_v32 = vld [vmem:[%s15985_s29 + $0x168] sm:$0xff]  ;;  %v535_v34 = vld [vmem:[%s15985_s29 + $0x1f0] sm:$0xff] }
  0xc5   : > { %2698 = vmatprep.subr.bf16.mxu1 %v14040_v38  ;;  %22479 = vst [vmem:[#allocation10_spill] sm:$0xff] %v16623_v28  ;;  %v14067_v38 = vld [vmem:[%s22409_s1 + $0x664] ss:$8 sps:$4 sm:$0xff]  }
  0xc7   : > { %2626 = vmatpush2.bf16.msra.mxu0 %v14035_v39  ;;  %v14070_v39 = vld [vmem:[%s22409_s1 + $0x764] ss:$8 sps:$4 sm:$0xff]  }
  0xc8   : > { %2699 = vmatpush2.bf16.msra.mxu1 %v14038_v40  ;;  %2627 = vmatprep.subr.bf16.mxu0 %v14043_v41  ;;  %v14065_v40 = vld [vmem:[%s22409_s1 + $0x660] ss:$8 sps:$4 sm:$0xff]  }
  0xc9   : > { %2700 = vmatprep.subr.bf16.mxu1 %v14046_v42  ;;  %v14068_v41 = vld [vmem:[%s22409_s1 + $0x760] ss:$8 sps:$4 sm:$0xff]   ;;  %v16639_v42 = vpack.c.bf16 %v533_v23, %v516_v22 }
  0xcb   : > { %2628 = vmatpush2.bf16.msra.mxu0 %v14041_v45  ;;  %v515_v45 = vld [vmem:[%s15985_s29 + $0x150] sm:$0xff] }
  0xcc   : > { %2701 = vmatpush2.bf16.msra.mxu1 %v14044_v49  ;;  %2629 = vmatprep.subr.bf16.mxu0 %v14049_v51  ;;  %v532_v49 = vld [vmem:[%s15985_s29 + $0x1d8] sm:$0xff]  ;;  %v16643_v51 = vpack.c.bf16 %v535_v34, %v518_v32  ;;  %v14080_v32 = vld [vmem:[%s22409_s1 + $0x740] ss:$8 sps:$4 sm:$0xff]  }
  0xcd   : > { %2702 = vmatprep.subr.bf16.mxu1 %v14052_v52  ;;  %v14073_v52 = vld [vmem:[%s22409_s1 + $0x654] ss:$8 sps:$4 sm:$0xff]   ;;  %v16665_v5 = vpack.c.bf16 %v532_v49, %v515_v45  ;;  %v549_v34 = vld [vmem:[%s15985_s29 + $0x260] sm:$0xff]  ;;  %v14083_v49 = vld [vmem:[%s22409_s1 + $0x630] ss:$8 sps:$4 sm:$0xff]  }
  0xce   : > { %22480 = vst [vmem:[#allocation11_spill] sm:$0xff] %v16643_v51  ;;  %v14088_v45 = vld [vmem:[%s22409_s1 + $0x734] ss:$8 sps:$4 sm:$0xff]  }
  0xcf   : > { %2630 = vmatpush2.bf16.msra.mxu0 %v14047_v55  ;;  %v517_v55 = vld [vmem:[%s15985_s29 + $0x160] sm:$0xff] }
  0xd0   : > { %2703 = vmatpush2.bf16.msra.mxu1 %v14050_v61  ;;  %2631 = vmatprep.subr.bf16.mxu0 %v14055_v62  ;;  %v534_v61 = vld [vmem:[%s15985_s29 + $0x1e8] sm:$0xff]  ;;  %v14076_v62 = vld [vmem:[%s22409_s1 + $0x754] ss:$8 sps:$4 sm:$0xff]  }
  0xd1   : > { %2704 = vmatprep.subr.bf16.mxu1 %v14058_v0  ;;  %v14071_v0 = vld [vmem:[%s22409_s1 + $0x650] ss:$8 sps:$4 sm:$0xff]   ;;  %v16667_v6 = vpack.c.bf16 %v534_v61, %v517_v55  ;;  %v601_v61 = vld [vmem:[%s15985_s29 + $0x400] sm:$0xff] }
  0xd2   : > { %v584_v55 = vld [vmem:[%s15985_s29 + $0x378] sm:$0xff] }
  0xd3   : > { %2632 = vmatpush2.bf16.msra.mxu0 %v14053_v1  ;;  %v14074_v1 = vld [vmem:[%s22409_s1 + $0x750] ss:$8 sps:$4 sm:$0xff]   ;;  %22481 = vst [vmem:[#allocation12_spill] sm:$0xff] %v16667_v6 }
  0xd4   : > { %2705 = vmatpush2.bf16.msra.mxu1 %v14056_v2  ;;  %2747 = vmatprep.subr.bf16.mxu0 %v14061_v14  ;;  %v550_v2 = vld [vmem:[%s15985_s29 + $0x268] sm:$0xff]  ;;  %v569_v14 = vld [vmem:[%s15985_s29 + $0x300] sm:$0xff] }
  0xd5   : > { %2820 = vmatprep.subr.bf16.mxu1 %v14064_v17  ;;  %v14079_v17 = vld [vmem:[%s22409_s1 + $0x644] ss:$8 sps:$4 sm:$0xff]   ;;  %v16680_v22 = vpack.c.bf16 %v567_v3, %v550_v2  ;;  %v16682_v23 = vpack.c.bf16 %v569_v14, %v552_v9  ;;  %v603_v2 = vld [vmem:[%s15985_s29 + $0x410] sm:$0xff]  ;;  %v14089_v14 = vld [vmem:[%s22409_s1 + $0x620] ss:$8 sps:$4 sm:$0xff]  }
  0xd6   : > { %2634 = vmatmul.mubr.bf16.vlgmr.msra.gmra.mxu0 %v16621_v25  ;;  %v14091_v3 = vld [vmem:[%s22409_s1 + $0x624] ss:$8 sps:$4 sm:$0xff]  }
  0xd7   : > { %2707 = vmatmul.mubr.bf16.vlgmr.msra.gmra.mxu1 %v16623_v28  ;;  %2748 = vmatpush1.bf16.msra.mxu0 %v14059_v18  ;;  %v14082_v18 = vld [vmem:[%s22409_s1 + $0x744] ss:$8 sps:$4 sm:$0xff]   ;;  %22482 = vst [vmem:[#allocation13_spill] sm:$0xff] %v16680_v22  ;;  %22483 = vst [vmem:[#allocation14_spill] sm:$0xff] %v16682_v23 }
  0xd8   : > { %2821 = vmatpush1.bf16.msra.mxu1 %v14062_v19  ;;  %2749 = vmatprep.subr.bf16.mxu0 %v14067_v38  ;;  %v14077_v19 = vld [vmem:[%s22409_s1 + $0x640] ss:$8 sps:$4 sm:$0xff]   ;;  %v14094_v9 = vld [vmem:[%s22409_s1 + $0x724] ss:$8 sps:$4 sm:$0xff]  }
  0xd9   : > { %2822 = vmatprep.subr.bf16.mxu1 %v14070_v39  ;;  %2643 = vmatprep.mubr.bf16.mxu0 %v16639_v42  ;;  %v566_v38 = vld [vmem:[%s15985_s29 + $0x2e8] sm:$0xff]  ;;  %v14085_v39 = vld [vmem:[%s22409_s1 + $0x634] ss:$8 sps:$4 sm:$0xff]  }
  0xda   : > { %2716 = vmatprep.mubr.bf16.mxu1 %v16643_v51 }
  0xdb   : > { %2750 = vmatpush1.bf16.msra.mxu0 %v14065_v40  ;;  %v551_v40 = vld [vmem:[%s15985_s29 + $0x270] sm:$0xff] }
  0xdc   : > { %2823 = vmatpush1.bf16.msra.mxu1 %v14068_v41  ;;  %2751 = vmatprep.subr.bf16.mxu0 %v14073_v52  ;;  %v568_v41 = vld [vmem:[%s15985_s29 + $0x2f8] sm:$0xff] }
  0xdd   : > { %2824 = vmatprep.subr.bf16.mxu1 %v14076_v62  ;;  %v14086_v52 = vld [vmem:[%s22409_s1 + $0x730] ss:$8 sps:$4 sm:$0xff]   ;;  %v16709_v62 = vpack.c.bf16 %v566_v38, %v549_v34  ;;  %v14097_v38 = vld [vmem:[%s22409_s1 + $0x614] ss:$8 sps:$4 sm:$0xff]  }
  0xde   : > { %2644 = vmatmul.mubr.bf16.gmra.mxu0 %v16665_v5  ;;  %v600_v34 = vld [vmem:[%s15985_s29 + $0x3f8] sm:$0xff] }
  0xdf   : > { %2717 = vmatmul.mubr.bf16.gmra.mxu1 %v16667_v6  ;;  %2752 = vmatpush1.bf16.msra.mxu0 %v14071_v0  ;;  %22484 = vst [vmem:[#allocation15_spill] sm:$0xff] %v16709_v62  ;;  %v16711_v0 = vpack.c.bf16 %v568_v41, %v551_v40  ;;  %v602_v40 = vld [vmem:[%s15985_s29 + $0x408] sm:$0xff]  ;;  %v14100_v41 = vld [vmem:[%s22409_s1 + $0x714] ss:$8 sps:$4 sm:$0xff]   ;;  %v521_v6 = vld [vmem:[%s15985_s29 + $0x180] sm:$0xff] }
  0xe0   : > { %2825 = vmatpush1.bf16.msra.mxu1 %v14074_v1  ;;  %2753 = vmatprep.subr.bf16.mxu0 %v14079_v17  ;;  %v586_v1 = vld [vmem:[%s15985_s29 + $0x388] sm:$0xff] }
  0xe1   : > { %2826 = vmatprep.subr.bf16.mxu1 %v14082_v18  ;;  %2653 = vmatprep.mubr.bf16.mxu0 %v16680_v22  ;;  %22485 = vst [vmem:[#allocation16_spill] sm:$0xff] %v16711_v0  ;;  %v14092_v17 = vld [vmem:[%s22409_s1 + $0x720] ss:$8 sps:$4 sm:$0xff]   ;;  %v16727_v18 = vpack.c.bf16 %v601_v61, %v584_v55  ;;  %v14098_v55 = vld [vmem:[%s22409_s1 + $0x710] ss:$8 sps:$4 sm:$0xff]  }
  0xe2   : > { %2726 = vmatprep.mubr.bf16.mxu1 %v16682_v23  ;;  %v14169_v23 = vld [vmem:[%s22409_s1 + $0x854] ss:$8 sps:$4 sm:$0xff]  }
  0xe3   : > { %2754 = vmatpush1.bf16.msra.mxu0 %v14077_v19  ;;  %22486 = vst [vmem:[#allocation17_spill] sm:$0xff] %v16727_v18  ;;  %v583_v19 = vld [vmem:[%s15985_s29 + $0x370] sm:$0xff] }
  0xe4   : > { %2827 = vmatpush1.bf16.msra.mxu1 %v14080_v32  ;;  %2755 = vmatprep.subr.bf16.mxu0 %v14085_v39  ;;  %v16730_v32 = vpack.c.bf16 %v603_v2, %v586_v1  ;;  %v585_v39 = vld [vmem:[%s15985_s29 + $0x380] sm:$0xff]  ;;  %v503_v1 = vld [vmem:[%s15985_s29 + $0xf0] sm:$0xff]  ;;  %v488_v2 = vld [vmem:[%s15985_s29 + $0x78] sm:$0xff] }
  0xe5   : > { %2828 = vmatprep.subr.bf16.mxu1 %v14088_v45  ;;  %v14095_v45 = vld [vmem:[%s22409_s1 + $0x610] ss:$8 sps:$4 sm:$0xff]   ;;  %v16754_v61 = vpack.c.bf16 %v602_v40, %v585_v39 }
  0xe6   : > { %22487 = vst [vmem:[#allocation18_spill] sm:$0xff] %v16730_v32  ;;  %2654 = vmatmul.mubr.bf16.gmra.mxu0 %v16709_v62  ;;  %v14107_v39 = vld [vmem:[%s22409_s1 + $0x6f0] ss:$8 sps:$4 sm:$0xff]  }
  0xe7   : > { %2727 = vmatmul.mubr.bf16.gmra.mxu1 %v16711_v0  ;;  %2756 = vmatpush1.bf16.msra.mxu0 %v14083_v49  ;;  %v486_v49 = vld [vmem:[%s15985_s29 + $0x68] sm:$0xff]  ;;  %22489 = vst [vmem:[#allocation20_spill] sm:$0xff] %v16754_v61  ;;  %v14110_v40 = vld [vmem:[%s22409_s1 + $0x7f0] ss:$8 sps:$4 sm:$0xff]  }
  0xe8   : > { %2829 = vmatpush1.bf16.msra.mxu1 %v14086_v52  ;;  %2757 = vmatprep.subr.bf16.mxu0 %v14091_v3  ;;  %v16752_v52 = vpack.c.bf16 %v600_v34, %v583_v19  ;;  %v505_v3 = vld [vmem:[%s15985_s29 + $0x100] sm:$0xff]  ;;  %v14109_v34 = vld [vmem:[%s22409_s1 + $0x6f4] ss:$8 sps:$4 sm:$0xff]  }
  0xe9   : > { %2830 = vmatprep.subr.bf16.mxu1 %v14094_v9  ;;  %2663 = vmatprep.mubr.bf16.mxu0 %v16727_v18  ;;  %v14103_v9 = vld [vmem:[%s22409_s1 + $0x604] ss:$8 sps:$4 sm:$0xff]   ;;  %v16767_v19 = vpack.c.bf16 %v505_v3, %v488_v2  ;;  %v14119_v2 = vld [vmem:[%s22409_s1 + $0x6d0] ss:$8 sps:$4 sm:$0xff]  }
  0xea   : > { %2736 = vmatprep.mubr.bf16.mxu1 %v16730_v32  ;;  %22488 = vst [vmem:[#allocation19_spill] sm:$0xff] %v16752_v52  ;;  %v16765_v32 = vpack.c.bf16 %v503_v1, %v486_v49  ;;  %v14121_v49 = vld [vmem:[%s22409_s1 + $0x6d4] ss:$8 sps:$4 sm:$0xff]   ;;  %v14122_v3 = vld [vmem:[%s22409_s1 + $0x7d0] ss:$8 sps:$4 sm:$0xff]  }
  0xeb   : > { %2758 = vmatpush1.bf16.msra.mxu0 %v14089_v14  ;;  %22491 = vst [vmem:[#allocation22_spill] sm:$0xff] %v16767_v19  ;;  %v14101_v14 = vld [vmem:[%s22409_s1 + $0x600] ss:$8 sps:$4 sm:$0xff]   ;;  %v14124_v1 = vld [vmem:[%s22409_s1 + $0x7d4] ss:$8 sps:$4 sm:$0xff]  }
  0xec   : > { %2831 = vmatpush1.bf16.msra.mxu1 %v14092_v17  ;;  %2759 = vmatprep.subr.bf16.mxu0 %v14097_v38  ;;  %22490 = vst [vmem:[#allocation21_spill] sm:$0xff] %v16765_v32  ;;  %v14104_v17 = vld [vmem:[%s22409_s1 + $0x700] ss:$8 sps:$4 sm:$0xff]   ;;  %v14112_v38 = vld [vmem:[%s22409_s1 + $0x7f4] ss:$8 sps:$4 sm:$0xff]  }
  0xed   : > { %2832 = vmatprep.subr.bf16.mxu1 %v14100_v41  ;;  %v14118_v41 = vld [vmem:[%s22409_s1 + $0x7e4] ss:$8 sps:$4 sm:$0xff]  }
  0xee   : > { %2664 = vmatmul.mubr.bf16.gmra.mxu0 %v16752_v52  ;;  %v14166_v0 = vld [vmem:[%s22411_s3 + $0x64] ss:$8 sps:$4 sm:$0xff]  }
  0xef   : > { %2737 = vmatmul.mubr.bf16.gmra.mxu1 %v16754_v61  ;;  %2760 = vmatpush1.bf16.msra.mxu0 %v14095_v45  ;;  %v14113_v45 = vld [vmem:[%s22409_s1 + $0x6e0] ss:$8 sps:$4 sm:$0xff]   ;;  %v14163_v61 = vld [vmem:[%s22409_s1 + $0x864] ss:$8 sps:$4 sm:$0xff]  }
  0xf0   : > { %2833 = vmatpush1.bf16.msra.mxu1 %v14098_v55  ;;  %2761 = vmatprep.subr.bf16.mxu0 %v14103_v9  ;;  %v14116_v55 = vld [vmem:[%s22409_s1 + $0x7e0] ss:$8 sps:$4 sm:$0xff]   ;;  %v14127_v9 = vld [vmem:[%s22409_s1 + $0x6c4] ss:$8 sps:$4 sm:$0xff]  }
  0xf1   : > { %2834 = vmatprep.subr.bf16.mxu1 %v14106_v7  ;;  %2779 = vmatprep.mubr.bf16.mxu0 %v16765_v32  ;;  %v14115_v7 = vld [vmem:[%s22409_s1 + $0x6e4] ss:$8 sps:$4 sm:$0xff]  }
  0xf2   : > { %2852 = vmatprep.mubr.bf16.mxu1 %v16767_v19  ;;  %v539_v19 = vld [vmem:[%s15985_s29 + $0x210] sm:$0xff] }
  0xf3   : > { %2762 = vmatpush1.bf16.msra.mxu0 %v14101_v14  ;;  %v14130_v14 = vld [vmem:[%s22409_s1 + $0x7c4] ss:$8 sps:$4 sm:$0xff]  }
  0xf4   : > { %2835 = vmatpush1.bf16.msra.mxu1 %v14104_v17  ;;  %2763 = vmatprep.subr.bf16.mxu0 %v14109_v34  ;;  %v14125_v17 = vld [vmem:[%s22409_s1 + $0x6c0] ss:$8 sps:$4 sm:$0xff]  }
  0xf5   : > { %2836 = vmatprep.subr.bf16.mxu1 %v14112_v38  ;;  %v14128_v34 = vld [vmem:[%s22409_s1 + $0x7c0] ss:$8 sps:$4 sm:$0xff]   ;;  %v14133_v38 = vld [vmem:[%s22409_s1 + $0x6b4] ss:$8 sps:$4 sm:$0xff]  }
  0xf7   : > { %2764 = vmatpush2.bf16.msra.mxu0 %v14107_v39  ;;  %v14136_v39 = vld [vmem:[%s22409_s1 + $0x7b4] ss:$8 sps:$4 sm:$0xff]  }
  0xf8   : > { %2837 = vmatpush2.bf16.msra.mxu1 %v14110_v40  ;;  %2765 = vmatprep.subr.bf16.mxu0 %v14115_v7  ;;  %v14131_v40 = vld [vmem:[%s22409_s1 + $0x6b0] ss:$8 sps:$4 sm:$0xff]  }
  0xf9   : > { %2838 = vmatprep.subr.bf16.mxu1 %v14118_v41  ;;  %v14134_v7 = vld [vmem:[%s22409_s1 + $0x7b0] ss:$8 sps:$4 sm:$0xff]   ;;  %v14139_v41 = vld [vmem:[%s22409_s1 + $0x6a4] ss:$8 sps:$4 sm:$0xff]  }
  0xfb   : > { %2766 = vmatpush2.bf16.msra.mxu0 %v14113_v45  ;;  %v14142_v45 = vld [vmem:[%s22409_s1 + $0x7a4] ss:$8 sps:$4 sm:$0xff]  }
  0xfc   : > { %2839 = vmatpush2.bf16.msra.mxu1 %v14116_v55  ;;  %2767 = vmatprep.subr.bf16.mxu0 %v14121_v49  ;;  %v14137_v55 = vld [vmem:[%s22409_s1 + $0x6a0] ss:$8 sps:$4 sm:$0xff]  }
  0xfd   : > { %2840 = vmatprep.subr.bf16.mxu1 %v14124_v1  ;;  %v14140_v49 = vld [vmem:[%s22409_s1 + $0x7a0] ss:$8 sps:$4 sm:$0xff]   ;;  %v14145_v1 = vld [vmem:[%s22409_s1 + $0x694] ss:$8 sps:$4 sm:$0xff]  }
  0xff   : > { %2768 = vmatpush2.bf16.msra.mxu0 %v14119_v2  ;;  %v14148_v2 = vld [vmem:[%s22409_s1 + $0x794] ss:$8 sps:$4 sm:$0xff]  }
 0x100   : > { %2841 = vmatpush2.bf16.msra.mxu1 %v14122_v3  ;;  %2769 = vmatprep.subr.bf16.mxu0 %v14127_v9  ;;  %v14143_v3 = vld [vmem:[%s22409_s1 + $0x690] ss:$8 sps:$4 sm:$0xff]  }
 0x101   : > { %2842 = vmatprep.subr.bf16.mxu1 %v14130_v14  ;;  %v14146_v9 = vld [vmem:[%s22409_s1 + $0x790] ss:$8 sps:$4 sm:$0xff]   ;;  %v14151_v14 = vld [vmem:[%s22409_s1 + $0x684] ss:$8 sps:$4 sm:$0xff]  }
 0x103   : > { %2770 = vmatpush2.bf16.msra.mxu0 %v14125_v17  ;;  %v14154_v17 = vld [vmem:[%s22409_s1 + $0x784] ss:$8 sps:$4 sm:$0xff]  }
 0x104   : > { %2843 = vmatpush2.bf16.msra.mxu1 %v14128_v34  ;;  %2771 = vmatprep.subr.bf16.mxu0 %v14133_v38  ;;  %v14149_v34 = vld [vmem:[%s22409_s1 + $0x680] ss:$8 sps:$4 sm:$0xff]  }
 0x105   : > { %2844 = vmatprep.subr.bf16.mxu1 %v14136_v39  ;;  %v14152_v38 = vld [vmem:[%s22409_s1 + $0x780] ss:$8 sps:$4 sm:$0xff]  }
 0x106   : > { %v485_v39 = vld [vmem:[%s15985_s29 + $0x60] sm:$0xff] }
 0x107   : > { %2772 = vmatpush2.bf16.msra.mxu0 %v14131_v40  ;;  %v502_v40 = vld [vmem:[%s15985_s29 + $0xe8] sm:$0xff] }
 0x108   : > { %2845 = vmatpush2.bf16.msra.mxu1 %v14134_v7  ;;  %2773 = vmatprep.subr.bf16.mxu0 %v14139_v41  ;;  %v487_v7 = vld [vmem:[%s15985_s29 + $0x70] sm:$0xff]  ;;  %v504_v41 = vld [vmem:[%s15985_s29 + $0xf8] sm:$0xff] }
 0x109   : > { %2846 = vmatprep.subr.bf16.mxu1 %v14142_v45  ;;  %v14157_v45 = vld [vmem:[%s22409_s1 + $0x874] ss:$8 sps:$4 sm:$0xff]  }
 0x10b   : > { %2774 = vmatpush2.bf16.msra.mxu0 %v14137_v55  ;;  %v14160_v55 = vld [vmem:[%s22411_s3 + $0x74] ss:$8 sps:$4 sm:$0xff]  }
 0x10c   : > { %2847 = vmatpush2.bf16.msra.mxu1 %v14140_v49  ;;  %2775 = vmatprep.subr.bf16.mxu0 %v14145_v1  ;;  %v14155_v49 = vld [vmem:[%s22409_s1 + $0x870] ss:$8 sps:$4 sm:$0xff]  }
 0x10d   : > { %2848 = vmatprep.subr.bf16.mxu1 %v14148_v2  ;;  %v14158_v1 = vld [vmem:[%s22411_s3 + $0x70] ss:$8 sps:$4 sm:$0xff]  }
 0x10e   : > { %v520_v2 = vld [vmem:[%s15985_s29 + $0x178] sm:$0xff] }
 0x10f   : > { %2776 = vmatpush2.bf16.msra.mxu0 %v14143_v3  ;;  %v537_v3 = vld [vmem:[%s15985_s29 + $0x200] sm:$0xff] }
 0x110   : > { %2849 = vmatpush2.bf16.msra.mxu1 %v14146_v9  ;;  %2777 = vmatprep.subr.bf16.mxu0 %v14151_v14  ;;  %v16893_v9 = vpack.c.bf16 %v502_v40, %v485_v39  ;;  %v16895_v14 = vpack.c.bf16 %v504_v41, %v487_v7  ;;  %v14161_v39 = vld [vmem:[%s22409_s1 + $0x860] ss:$8 sps:$4 sm:$0xff]   ;;  %v519_v40 = vld [vmem:[%s15985_s29 + $0x170] sm:$0xff]  ;;  %v536_v7 = vld [vmem:[%s15985_s29 + $0x1f8] sm:$0xff] }
 0x111   : > { %2850 = vmatprep.subr.bf16.mxu1 %v14154_v17  ;;  %v522_v17 = vld [vmem:[%s15985_s29 + $0x188] sm:$0xff] }
 0x112   : > { %22492 = vst [vmem:[#allocation23_spill] sm:$0xff] %v16893_v9  ;;  %22493 = vst [vmem:[#allocation24_spill] sm:$0xff] %v16895_v14  ;;  %v16915_v41 = vpack.c.bf16 %v539_v19, %v522_v17  ;;  %v14172_v17 = vld [vmem:[%s22411_s3 + $0x54] ss:$8 sps:$4 sm:$0xff]  }
 0x113   : > { %2778 = vmatpush2.bf16.msra.mxu0 %v14149_v34  ;;  %v14164_v34 = vld [vmem:[%s22411_s3 + $0x60] ss:$8 sps:$4 sm:$0xff]  }
 0x114   : > { %2851 = vmatpush2.bf16.msra.mxu1 %v14152_v38  ;;  %2893 = vmatprep.subr.bf16.mxu0 %v14157_v45  ;;  %v16911_v38 = vpack.c.bf16 %v537_v3, %v520_v2  ;;  %22495 = vst [vmem:[#allocation26_spill] sm:$0xff] %v16915_v41  ;;  %v538_v2 = vld [vmem:[%s15985_s29 + $0x208] sm:$0xff] }
 0x115   : > { %4679 = vmatprep.subr.bf16.mxu1 %v14160_v55 }
 0x116   : > { %22494 = vst [vmem:[#allocation25_spill] sm:$0xff] %v16911_v38  ;;  %v2343_v45 = vpop.f32.mrf.mxu0  ;;  %2780 = vmatmul.mubr.bf16.vlgmr.msra.gmra.mxu0 %v16893_v9  ;;  %v16941_v9 = vpack.c.bf16 %v536_v7, %v519_v40  ;;  %v553_v7 = vld [vmem:[%s15985_s29 + $0x280] sm:$0xff] }
 0x117   : > { %v2416_v55 = vpop.f32.mrf.mxu1  ;;  %2853 = vmatmul.mubr.bf16.vlgmr.msra.gmra.mxu1 %v16895_v14  ;;  %2894 = vmatpush1.bf16.msra.mxu0 %v14155_v49  ;;  %v14167_v49 = vld [vmem:[%s22409_s1 + $0x850] ss:$8 sps:$4 sm:$0xff]  }
 0x118   : > { %v16923_v51 = vadd.f32 %v2416_v55, %v2343_v45  ;;  %4680 = vmatpush1.bf16.msra.mxu1 %v14158_v1  ;;  %v2345_v19 = vpop.f32.mrf.mxu0  ;;  %2895 = vmatprep.subr.bf16.mxu0 %v14163_v61  ;;  %v14170_v1 = vld [vmem:[%s22411_s3 + $0x50] ss:$8 sps:$4 sm:$0xff]   ;;  %v554_v61 = vld [vmem:[%s15985_s29 + $0x288] sm:$0xff]  ;;  %22496 = vst [vmem:[#allocation27_spill] sm:$0xff] %v16941_v9 }
 0x119   : > { %v2418_v3 = vpop.f32.mrf.mxu1  ;;  %4681 = vmatprep.subr.bf16.mxu1 %v14166_v0  ;;  %2789 = vmatprep.mubr.bf16.mxu0 %v16911_v38  ;;  %v571_v0 = vld [vmem:[%s15985_s29 + $0x310] sm:$0xff]  ;;  %v573_v38 = vld [vmem:[%s15985_s29 + $0x320] sm:$0xff] }
 0x11a   : > { %v16929_v14 = vadd.f32 %v2418_v3, %v2345_v19  ;;  %2862 = vmatprep.mubr.bf16.mxu1 %v16915_v41  ;;  %v2347_v45 = vpop.f32.mrf.mxu0  ;;  %v16943_v19 = vpack.c.bf16 %v538_v2, %v521_v6  ;;  %v556_v3 = vld [vmem:[%s15985_s29 + $0x298] sm:$0xff]  ;;  %v14175_v41 = vld [vmem:[%s22409_s1 + $0x844] ss:$8 sps:$4 sm:$0xff]   ;;  %v16965_v40 = vpack.c.bf16 %v571_v0, %v554_v61 }
 0x11b   : > { %v2420_v55 = vpop.f32.mrf.mxu1  ;;  %2896 = vmatpush1.bf16.msra.mxu0 %v14161_v39  ;;  %v14178_v6 = vld [vmem:[%s22411_s3 + $0x44] ss:$8 sps:$4 sm:$0xff]   ;;  %v14173_v39 = vld [vmem:[%s22409_s1 + $0x840] ss:$8 sps:$4 sm:$0xff]   ;;  %v572_v61 = vld [vmem:[%s15985_s29 + $0x318] sm:$0xff] }
 0x11c   : > { %22497 = vst [vmem:[#allocation28_spill] sm:$0xff] %v16943_v19  ;;  %v16947_v28 = vadd.f32 %v2420_v55, %v2347_v45  ;;  %4682 = vmatpush1.bf16.msra.mxu1 %v14164_v34  ;;  %v16952_v32 = vpop.f32.mrf.mxu0  ;;  %2897 = vmatprep.subr.bf16.mxu0 %v14169_v23  ;;  %v14176_v34 = vld [vmem:[%s22411_s3 + $0x40] ss:$8 sps:$4 sm:$0xff]   ;;  %22500 = vst [vmem:[#allocation31_spill] sm:$0xff] %v16965_v40  ;;  %v16969_v45 = vpack.c.bf16 %v573_v38, %v556_v3  ;;  %v14181_v23 = vld [vmem:[%s22409_s1 + $0x834] ss:$8 sps:$4 sm:$0xff]  }
 0x11d   : > { %22498 = vst [vmem:[#allocation29_spill] sm:$0xff] %v16952_v32  ;;  %v16954_v52 = vpop.f32.mrf.mxu1  ;;  %4683 = vmatprep.subr.bf16.mxu1 %v14172_v17  ;;  %v570_v2 = vld [vmem:[%s15985_s29 + $0x308] sm:$0xff]  ;;  %v555_v17 = vld [vmem:[%s15985_s29 + $0x290] sm:$0xff] }
 0x11e   : > { %22499 = vst [vmem:[#allocation30_spill] sm:$0xff] %v16954_v52  ;;  %22501 = vst [vmem:[#allocation32_spill] sm:$0xff] %v16969_v45  ;;  %2790 = vmatmul.mubr.bf16.gmra.mxu0 %v16941_v9  ;;  %v2353_v55 = vpop.f32.mrf.mxu0  ;;  %v14184_v38 = vld [vmem:[%s22411_s3 + $0x34] ss:$8 sps:$4 sm:$0xff]   ;;  %v590_v9 = vld [vmem:[%s15985_s29 + $0x3a8] sm:$0xff] }
 0x11f   : > { %2863 = vmatmul.mubr.bf16.gmra.mxu1 %v16943_v19  ;;  %v2426_v52 = vpop.f32.mrf.mxu1  ;;  %2898 = vmatpush1.bf16.msra.mxu0 %v14167_v49  ;;  %v14179_v49 = vld [vmem:[%s22409_s1 + $0x830] ss:$8 sps:$4 sm:$0xff]   ;;  %v16997_v19 = vpack.c.bf16 %v572_v61, %v555_v17  ;;  %v14193_v61 = vld [vmem:[%s22409_s1 + $0x814] ss:$8 sps:$4 sm:$0xff]  }
 0x120   : > { %4684 = vmatpush1.bf16.msra.mxu1 %v14170_v1  ;;  %v16978_v0 = vadd.f32 %v2426_v52, %v2353_v55  ;;  %2899 = vmatprep.subr.bf16.mxu0 %v14175_v41  ;;  %v2355_v3 = vpop.f32.mrf.mxu0  ;;  %v14182_v52 = vld [vmem:[%s22411_s3 + $0x30] ss:$8 sps:$4 sm:$0xff]   ;;  %v605_v1 = vld [vmem:[%s15985_s29 + $0x420] sm:$0xff]  ;;  %v16995_v55 = vpack.c.bf16 %v570_v2, %v553_v7 }
 0x121   : > { %4685 = vmatprep.subr.bf16.mxu1 %v14178_v6  ;;  %v2428_v32 = vpop.f32.mrf.mxu1  ;;  %2799 = vmatprep.mubr.bf16.mxu0 %v16965_v40  ;;  %v588_v41 = vld [vmem:[%s15985_s29 + $0x398] sm:$0xff]  ;;  %22503 = vst [vmem:[#allocation34_spill] sm:$0xff] %v16997_v19  ;;  %v607_v40 = vld [vmem:[%s15985_s29 + $0x430] sm:$0xff] }
 0x122   : > { %2872 = vmatprep.mubr.bf16.mxu1 %v16969_v45  ;;  %v16993_v6 = vadd.f32 %v2428_v32, %v2355_v3  ;;  %22502 = vst [vmem:[#allocation33_spill] sm:$0xff] %v16995_v55  ;;  %v2357_v18 = vpop.f32.mrf.mxu0  ;;  %v14187_v45 = vld [vmem:[%s22409_s1 + $0x824] ss:$8 sps:$4 sm:$0xff]   ;;  %v17023_v17 = vpack.c.bf16 %v607_v40, %v590_v9  ;;  %v14196_v9 = vld [vmem:[%s22411_s3 + $0x14] ss:$8 sps:$4 sm:$0xff]  }
 0x123   : > { %v2430_v62 = vpop.f32.mrf.mxu1  ;;  %2900 = vmatpush1.bf16.msra.mxu0 %v14173_v39  ;;  %v14190_v32 = vld [vmem:[%s22411_s3 + $0x24] ss:$8 sps:$4 sm:$0xff]   ;;  %v14185_v39 = vld [vmem:[%s22409_s1 + $0x820] ss:$8 sps:$4 sm:$0xff]  }
 0x124   : > { %4686 = vmatpush1.bf16.msra.mxu1 %v14176_v34  ;;  %v17004_v22 = vadd.f32 %v2430_v62, %v2357_v18  ;;  %2901 = vmatprep.subr.bf16.mxu0 %v14181_v23  ;;  %v17009_v7 = vpop.f32.mrf.mxu0  ;;  %v14188_v62 = vld [vmem:[%s22411_s3 + $0x20] ss:$8 sps:$4 sm:$0xff]   ;;  %v17019_v18 = vpack.c.bf16 %v605_v1, %v588_v41  ;;  %v587_v34 = vld [vmem:[%s15985_s29 + $0x390] sm:$0xff]  ;;  %v604_v23 = vld [vmem:[%s15985_s29 + $0x418] sm:$0xff]  ;;  %22506 = vst [vmem:[#allocation37_spill] sm:$0xff] %v17023_v17 }
 0x125   : > { %4687 = vmatprep.subr.bf16.mxu1 %v14184_v38  ;;  %22504 = vst [vmem:[#allocation35_spill] sm:$0xff] %v17009_v7  ;;  %v17011_v2 = vpop.f32.mrf.mxu1  ;;  %v589_v38 = vld [vmem:[%s15985_s29 + $0x3a0] sm:$0xff]  ;;  %v606_v7 = vld [vmem:[%s15985_s29 + $0x428] sm:$0xff] }
 0x126   : > { %22505 = vst [vmem:[#allocation36_spill] sm:$0xff] %v17011_v2  ;;  %2800 = vmatmul.mubr.bf16.gmra.mxu0 %v16995_v55  ;;  %v2363_v3 = vpop.f32.mrf.mxu0  ;;  %v17041_v55 = vpack.c.bf16 %v604_v23, %v587_v34  ;;  %v14199_v34 = vld [vmem:[%s22409_s1 + $0x804] ss:$8 sps:$4 sm:$0xff]  }
 0x127   : > { %2873 = vmatmul.mubr.bf16.gmra.mxu1 %v16997_v19  ;;  %v2436_v2 = vpop.f32.mrf.mxu1  ;;  %2902 = vmatpush1.bf16.msra.mxu0 %v14179_v49  ;;  %v14191_v49 = vld [vmem:[%s22409_s1 + $0x810] ss:$8 sps:$4 sm:$0xff]  }
 0x128   : > { %4688 = vmatpush1.bf16.msra.mxu1 %v14182_v52  ;;  %v17032_v41 = vadd.f32 %v2436_v2, %v2363_v3  ;;  %2903 = vmatprep.subr.bf16.mxu0 %v14187_v45  ;;  %v2365_v40 = vpop.f32.mrf.mxu0  ;;  %22507 = vst [vmem:[#allocation38_spill] sm:$0xff] %v17041_v55  ;;  %v14194_v45 = vld [vmem:[%s22411_s3 + $0x10] ss:$8 sps:$4 sm:$0xff]   ;;  %v17049_v52 = vpack.c.bf16 %v606_v7, %v589_v38  ;;  %v14202_v3 = vld [vmem:[%s22411_s3 + $0x4] ss:$8 sps:$4 sm:$0xff]  }
 0x129   : > { %4689 = vmatprep.subr.bf16.mxu1 %v14190_v32  ;;  %v2438_v1 = vpop.f32.mrf.mxu1  ;;  %2809 = vmatprep.mubr.bf16.mxu0 %v17019_v18 }
 0x12a   : > { %2882 = vmatprep.mubr.bf16.mxu1 %v17023_v17  ;;  %v17039_v19 = vadd.f32 %v2438_v1, %v2365_v40  ;;  %22508 = vst [vmem:[#allocation39_spill] sm:$0xff] %v17049_v52  ;;  %v2367_v32 = vpop.f32.mrf.mxu0  ;;  %v22511_v17 = vmov 0  }
 0x12b   : > { %v2440_v2 = vpop.f32.mrf.mxu1  ;;  %2904 = vmatpush1.bf16.msra.mxu0 %v14185_v39  ;;  %v14197_v39 = vld [vmem:[%s22409_s1 + $0x800] ss:$8 sps:$4 sm:$0xff]  }
 0x12c   : > { %4690 = vmatpush1.bf16.msra.mxu1 %v14188_v62  ;;  %v17054_v23 = vadd.f32 %v2440_v2, %v2367_v32  ;;  %2905 = vmatprep.subr.bf16.mxu0 %v14193_v61  ;;  %v17059_v7 = vpop.f32.mrf.mxu0  ;;  %v14200_v62 = vld [vmem:[%s22411_s3] ss:$8 sps:$4 sm:$0xff]   ;;  %v14205_v32 = vld [vmem:[%s22411_s3 + $0xf4] ss:$8 sps:$4 sm:$0xff]  }
 0x12d   : > { %4691 = vmatprep.subr.bf16.mxu1 %v14196_v9  ;;  %22509 = vst [vmem:[#allocation40_spill] sm:$0xff] %v17059_v7  ;;  %v17061_v38 = vpop.f32.mrf.mxu1  ;;  %v489_v61 = vld [vmem:[%s15985_s29 + $0x80] sm:$0xff]  ;;  %v506_v9 = vld [vmem:[%s15985_s29 + $0x108] sm:$0xff] }
 0x12e   : > { %22510 = vst [vmem:[#allocation41_spill] sm:$0xff] %v17061_v38  ;;  %2810 = vmatmul.mubr.bf16.gmra.mxu0 %v17041_v55  ;;  %v2373_v40 = vpop.f32.mrf.mxu0  ;;  %v14208_v38 = vld [vmem:[%s22411_s3 + $0x174] ss:$8 sps:$4 sm:$0xff]  }
 0x12f   : > { %2883 = vmatmul.mubr.bf16.gmra.mxu1 %v17049_v52  ;;  %v2446_v1 = vpop.f32.mrf.mxu1  ;;  %2906 = vmatpush1.bf16.msra.mxu0 %v14191_v49  ;;  %v17085_v49 = vpack.c.bf16 %v506_v9, %v489_v61  ;;  %v14209_v61 = vld [vmem:[%s22411_s3 + $0xe0] ss:$8 sps:$4 sm:$0xff]   ;;  %v540_v9 = vld [vmem:[%s15985_s29 + $0x218] sm:$0xff] }
 0x130   : > { %4692 = vmatpush1.bf16.msra.mxu1 %v14194_v45  ;;  %v17076_v2 = vadd.f32 %v2446_v1, %v2373_v40  ;;  %2907 = vmatprep.subr.bf16.mxu0 %v14199_v34  ;;  %v2375_v7 = vpop.f32.mrf.mxu0  ;;  %v14203_v45 = vld [vmem:[%s22411_s3 + $0xf0] ss:$8 sps:$4 sm:$0xff]   ;;  %v14220_v1 = vld [vmem:[%s22411_s3 + $0x154] ss:$8 sps:$4 sm:$0xff]  }
 0x131   : > { %4693 = vmatprep.subr.bf16.mxu1 %v14202_v3  ;;  %v2448_v52 = vpop.f32.mrf.mxu1  ;;  %2925 = vmatprep.mubr.bf16.mxu0 %v22511_v17  ;;  %v14206_v34 = vld [vmem:[%s22411_s3 + $0x170] ss:$8 sps:$4 sm:$0xff]  }
 0x132   : > { %v17082_v55 = vadd.f32 %v2448_v52, %v2375_v7  ;;  %4711 = vmatprep.mubr.bf16.mxu1 %v16006_v53  ;;  %v2377_v3 = vpop.f32.mrf.mxu0  ;;  %v14211_v53 = vld [vmem:[%s22411_s3 + $0xe4] ss:$8 sps:$4 sm:$0xff]  }
 0x133   : > { %v2450_v40 = vpop.f32.mrf.mxu1  ;;  %2908 = vmatpush1.bf16.msra.mxu0 %v14197_v39  ;;  %v14214_v7 = vld [vmem:[%s22411_s3 + $0x164] ss:$8 sps:$4 sm:$0xff]   ;;  %v14212_v39 = vld [vmem:[%s22411_s3 + $0x160] ss:$8 sps:$4 sm:$0xff]  }
 0x134   : > { %4694 = vmatpush1.bf16.msra.mxu1 %v14200_v62  ;;  %v17096_v52 = vadd.f32 %v2450_v40, %v2377_v3  ;;  %4752 = vmatprep.subr.bf16.mxu0 %v14208_v38  ;;  %v523_v62 = vld [vmem:[%s15985_s29 + $0x190] sm:$0xff]  ;;  %v14223_v3 = vld [vmem:[%s22411_s3 + $0xc4] ss:$8 sps:$4 sm:$0xff]  }
 0x135   : > { %4695 = vmatprep.subr.bf16.mxu1 %v14205_v32  ;;  %v14217_v38 = vld [vmem:[%s22411_s3 + $0xd4] ss:$8 sps:$4 sm:$0xff]   ;;  %v17117_v32 = vpack.c.bf16 %v540_v9, %v523_v62  ;;  %v14226_v40 = vld [vmem:[%s22411_s3 + $0x144] ss:$8 sps:$4 sm:$0xff]  }
 0x136   : > { %2926 = vmatmul.mubr.bf16.vlgmr.msra.gmra.mxu0 %v17085_v49  ;;  %v14229_v62 = vld [vmem:[%s22411_s3 + $0xb4] ss:$8 sps:$4 sm:$0xff]  }
 0x137   : > { %4753 = vmatpush1.bf16.msra.mxu0 %v14206_v34  ;;  %2935 = vmatprep.mubr.bf16.mxu0 %v22511_v17  ;;  %22512 = vst [vmem:[#allocation42_spill] sm:$0xff] %v17117_v32  ;;  %v14218_v34 = vld [vmem:[%s22411_s3 + $0x150] ss:$8 sps:$4 sm:$0xff]   ;;  %v14232_v9 = vld [vmem:[%s22411_s3 + $0x134] ss:$8 sps:$4 sm:$0xff]  }
 0x138   : > { %4696 = vmatpush2.bf16.msra.mxu1 %v14203_v45  ;;  %4754 = vmatprep.subr.bf16.mxu0 %v14214_v7  ;;  %v14215_v45 = vld [vmem:[%s22411_s3 + $0xd0] ss:$8 sps:$4 sm:$0xff]   ;;  %v14224_v7 = vld [vmem:[%s22411_s3 + $0x140] ss:$8 sps:$4 sm:$0xff]  }
 0x139   : > { %4697 = vmatprep.subr.bf16.mxu1 %v14211_v53  ;;  %v14221_v53 = vld [vmem:[%s22411_s3 + $0xc0] ss:$8 sps:$4 sm:$0xff]  }
 0x13b   : > { %4755 = vmatpush1.bf16.msra.mxu0 %v14212_v39  ;;  %v574_v39 = vld [vmem:[%s15985_s29 + $0x328] sm:$0xff] }
 0x13c   : > { %4698 = vmatpush2.bf16.msra.mxu1 %v14209_v61  ;;  %4756 = vmatprep.subr.bf16.mxu0 %v14220_v1  ;;  %v557_v61 = vld [vmem:[%s15985_s29 + $0x2a0] sm:$0xff]  ;;  %v14227_v1 = vld [vmem:[%s22411_s3 + $0xb0] ss:$8 sps:$4 sm:$0xff]  }
 0x13d   : > { %4699 = vmatprep.subr.bf16.mxu1 %v14217_v38  ;;  %v17147_v38 = vpack.c.bf16 %v574_v39, %v557_v61  ;;  %v14236_v61 = vld [vmem:[%s22411_s3 + $0x120] ss:$8 sps:$4 sm:$0xff]   ;;  %v14241_v39 = vld [vmem:[%s22411_s3 + $0x94] ss:$8 sps:$4 sm:$0xff]  }
 0x13e   : > { %2936 = vmatmul.mubr.bf16.gmra.mxu0 %v17117_v32 }
 0x13f   : > { %4757 = vmatpush1.bf16.msra.mxu0 %v14218_v34  ;;  %2945 = vmatprep.mubr.bf16.mxu0 %v22511_v17  ;;  %22513 = vst [vmem:[#allocation43_spill] sm:$0xff] %v17147_v38  ;;  %v14235_v34 = vld [vmem:[%s22411_s3 + $0xa4] ss:$8 sps:$4 sm:$0xff]  }
 0x140   : > { %4700 = vmatpush2.bf16.msra.mxu1 %v14215_v45  ;;  %4758 = vmatprep.subr.bf16.mxu0 %v14226_v40  ;;  %v14230_v45 = vld [vmem:[%s22411_s3 + $0x130] ss:$8 sps:$4 sm:$0xff]   ;;  %v14233_v40 = vld [vmem:[%s22411_s3 + $0xa0] ss:$8 sps:$4 sm:$0xff]  }
 0x141   : > { %4701 = vmatprep.subr.bf16.mxu1 %v14223_v3  ;;  %v14238_v3 = vld [vmem:[%s22411_s3 + $0x124] ss:$8 sps:$4 sm:$0xff]  }
 0x143   : > { %4759 = vmatpush1.bf16.msra.mxu0 %v14224_v7  ;;  %v608_v7 = vld [vmem:[%s15985_s29 + $0x438] sm:$0xff] }
 0x144   : > { %4702 = vmatpush2.bf16.msra.mxu1 %v14221_v53  ;;  %4760 = vmatprep.subr.bf16.mxu0 %v14232_v9  ;;  %v591_v53 = vld [vmem:[%s15985_s29 + $0x3b0] sm:$0xff] }
 0x145   : > { %4703 = vmatprep.subr.bf16.mxu1 %v14229_v62  ;;  %v14244_v62 = vld [vmem:[%s22411_s3 + $0x114] ss:$8 sps:$4 sm:$0xff]   ;;  %v17177_v9 = vpack.c.bf16 %v608_v7, %v591_v53  ;;  %v14251_v7 = vld [vmem:[%s22411_s3 + $0x1f0] ss:$8 sps:$4 sm:$0xff]  }
 0x146   : > { %2946 = vmatmul.mubr.bf16.gmra.mxu0 %v17147_v38  ;;  %v14239_v38 = vld [vmem:[%s22411_s3 + $0x90] ss:$8 sps:$4 sm:$0xff]   ;;  %v14256_v53 = vld [vmem:[%s22411_s3 + $0x274] ss:$8 sps:$4 sm:$0xff]  }
 0x147   : > { %4761 = vmatpush1.bf16.msra.mxu0 %v14230_v45  ;;  %2955 = vmatprep.mubr.bf16.mxu0 %v22511_v17  ;;  %22514 = vst [vmem:[#allocation44_spill] sm:$0xff] %v17177_v9  ;;  %v14247_v45 = vld [vmem:[%s22411_s3 + $0x84] ss:$8 sps:$4 sm:$0xff]  }
 0x148   : > { %4704 = vmatpush2.bf16.msra.mxu1 %v14227_v1  ;;  %4762 = vmatprep.subr.bf16.mxu0 %v14238_v3  ;;  %v14242_v1 = vld [vmem:[%s22411_s3 + $0x110] ss:$8 sps:$4 sm:$0xff]   ;;  %v14245_v3 = vld [vmem:[%s22411_s3 + $0x80] ss:$8 sps:$4 sm:$0xff]  }
 0x149   : > { %4705 = vmatprep.subr.bf16.mxu1 %v14235_v34  ;;  %v14250_v34 = vld [vmem:[%s22411_s3 + $0x104] ss:$8 sps:$4 sm:$0xff]  }
 0x14b   : > { %4763 = vmatpush1.bf16.msra.mxu0 %v14236_v61  ;;  %v14253_v61 = vld [vmem:[%s22411_s3 + $0x1f4] ss:$8 sps:$4 sm:$0xff]  }
 0x14c   : > { %4706 = vmatpush2.bf16.msra.mxu1 %v14233_v40  ;;  %4764 = vmatprep.subr.bf16.mxu0 %v14244_v62  ;;  %v14248_v40 = vld [vmem:[%s22411_s3 + $0x100] ss:$8 sps:$4 sm:$0xff]   ;;  %v17214_v62 = vpop.f32.mrf.mxu0 }
 0x14d   : > { %4707 = vmatprep.subr.bf16.mxu1 %v14241_v39  ;;  %v14259_v39 = vld [vmem:[%s22411_s3 + $0x1e4] ss:$8 sps:$4 sm:$0xff]   ;;  %22515 = vst [vmem:[#allocation45_spill] sm:$0xff] %v17214_v62 }
 0x14e   : > { %2956 = vmatmul.mubr.bf16.gmra.mxu0 %v17177_v9 }
 0x14f   : > { %4765 = vmatpush1.bf16.msra.mxu0 %v14242_v1  ;;  %4784 = vmatprep.mubr.bf16.mxu0 %v16008_v54  ;;  %v17216_v1 = vpop.f32.mrf.mxu1  ;;  %v14262_v54 = vld [vmem:[%s22411_s3 + $0x264] ss:$8 sps:$4 sm:$0xff]  }
 0x150   : > { %4708 = vmatpush2.bf16.msra.mxu1 %v14239_v38  ;;  %4766 = vmatprep.subr.bf16.mxu0 %v14250_v34  ;;  %v14254_v38 = vld [vmem:[%s22411_s3 + $0x270] ss:$8 sps:$4 sm:$0xff]   ;;  %22516 = vst [vmem:[#allocation46_spill] sm:$0xff] %v17216_v1 }
 0x151   : > { %4709 = vmatprep.subr.bf16.mxu1 %v14247_v45 }
 0x153   : > { %4767 = vmatpush1.bf16.msra.mxu0 %v14248_v40  ;;  %v14260_v40 = vld [vmem:[%s22411_s3 + $0x260] ss:$8 sps:$4 sm:$0xff]  }
 0x154   : > { %4710 = vmatpush2.bf16.msra.mxu1 %v14245_v3  ;;  %4768 = vmatprep.subr.bf16.mxu0 %v14253_v61  ;;  %v14257_v3 = vld [vmem:[%s22411_s3 + $0x1e0] ss:$8 sps:$4 sm:$0xff]   ;;  %v14265_v61 = vld [vmem:[%s22411_s3 + $0x1d4] ss:$8 sps:$4 sm:$0xff]  }
 0x155   : > { %4825 = vmatprep.subr.bf16.mxu1 %v14256_v53 }
 0x156   : > { %v2489_v45 = vpop.f32.mrf.mxu0 }
 0x157   : > { %v2562_v34 = vpop.f32.mrf.mxu1  ;;  %4712 = vmatmul.mubr.bf16.vlgmr.msra.gmra.mxu1 %v16067_v12  ;;  %v2490_v1 = vadd.f32 %v2489_v45, %v16923_v51  ;;  %4769 = vmatpush2.bf16.msra.mxu0 %v14251_v7  ;;  %v14268_v12 = vld [vmem:[%s22411_s3 + $0x254] ss:$8 sps:$4 sm:$0xff]  }
 0x158   : > { %4826 = vmatpush1.bf16.msra.mxu1 %v14254_v38  ;;  %v2491_v53 = vpop.f32.mrf.mxu0  ;;  %4770 = vmatprep.subr.bf16.mxu0 %v14259_v39  ;;  %v14263_v38 = vld [vmem:[%s22411_s3 + $0x1d0] ss:$8 sps:$4 sm:$0xff]  }
 0x159   : > { %v2564_v62 = vpop.f32.mrf.mxu1  ;;  %4827 = vmatprep.subr.bf16.mxu1 %v14262_v54  ;;  %v17235_v9 = vadd.f32 %v2562_v34, %v2490_v1  ;;  %v2492_v32 = vadd.f32 %v2491_v53, %v16929_v14  ;;  %4721 = vmatprep.mubr.bf16.mxu1 %v16105_v26  ;;  %v14266_v39 = vld [vmem:[%s22411_s3 + $0x250] ss:$8 sps:$4 sm:$0xff]   ;;  %v14271_v26 = vld [vmem:[%s22411_s3 + $0x1c4] ss:$8 sps:$4 sm:$0xff]   ;;  %v14277_v53 = vld [vmem:[%s22411_s3 + $0x1b4] ss:$8 sps:$4 sm:$0xff]  }
 0x15a   : > { %v2493_v51 = vpop.f32.mrf.mxu0  ;;  %v14274_v34 = vld [vmem:[%s22411_s3 + $0x244] ss:$8 sps:$4 sm:$0xff]  }
 0x15b   : > { %v2566_v7 = vpop.f32.mrf.mxu1  ;;  %v17245_v54 = vadd.f32 %v2564_v62, %v2492_v32  ;;  %v2494_v45 = vadd.f32 %v2493_v51, %v16947_v28  ;;  %4771 = vmatpush2.bf16.msra.mxu0 %v14257_v3  ;;  %v14269_v3 = vld [vmem:[%s22411_s3 + $0x1c0] ss:$8 sps:$4 sm:$0xff]  }
 0x15c   : > { %4828 = vmatpush1.bf16.msra.mxu1 %v14260_v40  ;;  %v17251_v14 = vpop.f32.mrf.mxu0  ;;  %4772 = vmatprep.subr.bf16.mxu0 %v14265_v61  ;;  %v14272_v40 = vld [vmem:[%s22411_s3 + $0x240] ss:$8 sps:$4 sm:$0xff]  }
 0x15d   : > { %22517 = vst [vmem:[#allocation47_spill] sm:$0xff] %v17251_v14  ;;  %v17253_v1 = vpop.f32.mrf.mxu1  ;;  %4829 = vmatprep.subr.bf16.mxu1 %v14268_v12  ;;  %v17258_v32 = vadd.f32 %v2566_v7, %v2494_v45  ;;  %v14280_v7 = vld [vmem:[%s22411_s3 + $0x234] ss:$8 sps:$4 sm:$0xff]  }
 0x15e   : > { %22518 = vst [vmem:[#allocation48_spill] sm:$0xff] %v17253_v1  ;;  %v2499_v62 = vpop.f32.mrf.mxu0 }
 0x15f   : > { %v2572_v28 = vpop.f32.mrf.mxu1  ;;  %4722 = vmatmul.mubr.bf16.gmra.mxu1 %v16118_v35  ;;  %v2500_v61 = vadd.f32 %v2499_v62, %v16978_v0  ;;  %4773 = vmatpush2.bf16.msra.mxu0 %v14263_v38  ;;  %v14275_v38 = vld [vmem:[%s22411_s3 + $0x1b0] ss:$8 sps:$4 sm:$0xff]  }
 0x160   : > { %4830 = vmatpush1.bf16.msra.mxu1 %v14266_v39  ;;  %v2501_v12 = vpop.f32.mrf.mxu0  ;;  %4774 = vmatprep.subr.bf16.mxu0 %v14271_v26  ;;  %v14278_v39 = vld [vmem:[%s22411_s3 + $0x230] ss:$8 sps:$4 sm:$0xff]  }
 0x161   : > { %v2574_v51 = vpop.f32.mrf.mxu1  ;;  %4831 = vmatprep.subr.bf16.mxu1 %v14274_v34  ;;  %v2502_v45 = vadd.f32 %v2501_v12, %v16993_v6  ;;  %v17275_v1 = vadd.f32 %v2572_v28, %v2500_v61  ;;  %4731 = vmatprep.mubr.bf16.mxu1 %v16149_v46  ;;  %v14283_v46 = vld [vmem:[%s22411_s3 + $0x1a4] ss:$8 sps:$4 sm:$0xff]  }
 0x162   : > { %v2503_v35 = vpop.f32.mrf.mxu0  ;;  %v14286_v28 = vld [vmem:[%s22411_s3 + $0x224] ss:$8 sps:$4 sm:$0xff]  }
 0x163   : > { %v2576_v0 = vpop.f32.mrf.mxu1  ;;  %v2504_v26 = vadd.f32 %v2503_v35, %v17004_v22  ;;  %v17285_v34 = vadd.f32 %v2574_v51, %v2502_v45  ;;  %4775 = vmatpush2.bf16.msra.mxu0 %v14269_v3  ;;  %v14281_v3 = vld [vmem:[%s22411_s3 + $0x1a0] ss:$8 sps:$4 sm:$0xff]   ;;  %v14289_v51 = vld [vmem:[%s22411_s3 + $0x194] ss:$8 sps:$4 sm:$0xff]  }
 0x164   : > { %4832 = vmatpush1.bf16.msra.mxu1 %v14272_v40  ;;  %v17290_v6 = vpop.f32.mrf.mxu0  ;;  %4776 = vmatprep.subr.bf16.mxu0 %v14277_v53  ;;  %v14284_v40 = vld [vmem:[%s22411_s3 + $0x220] ss:$8 sps:$4 sm:$0xff]   ;;  %v14292_v35 = vld [vmem:[%s22411_s3 + $0x214] ss:$8 sps:$4 sm:$0xff]  }
 0x165   : > { %22519 = vst [vmem:[#allocation49_spill] sm:$0xff] %v17290_v6  ;;  %v17292_v62 = vpop.f32.mrf.mxu1  ;;  %4833 = vmatprep.subr.bf16.mxu1 %v14280_v7  ;;  %v17297_v61 = vadd.f32 %v2576_v0, %v2504_v26 }
 0x166   : > { %22520 = vst [vmem:[#allocation50_spill] sm:$0xff] %v17292_v62  ;;  %v2509_v22 = vpop.f32.mrf.mxu0 }
 0x167   : > { %v2582_v12 = vpop.f32.mrf.mxu1  ;;  %4732 = vmatmul.mubr.bf16.gmra.mxu1 %v16162_v57  ;;  %v2510_v53 = vadd.f32 %v2509_v22, %v17032_v41  ;;  %4777 = vmatpush2.bf16.msra.mxu0 %v14275_v38  ;;  %v14287_v38 = vld [vmem:[%s22411_s3 + $0x190] ss:$8 sps:$4 sm:$0xff]  }
 0x168   : > { %4834 = vmatpush1.bf16.msra.mxu1 %v14278_v39  ;;  %v2511_v7 = vpop.f32.mrf.mxu0  ;;  %4778 = vmatprep.subr.bf16.mxu0 %v14283_v46  ;;  %v14290_v39 = vld [vmem:[%s22411_s3 + $0x210] ss:$8 sps:$4 sm:$0xff]  }
 0x169   : > { %v2584_v45 = vpop.f32.mrf.mxu1  ;;  %4835 = vmatprep.subr.bf16.mxu1 %v14286_v28  ;;  %v2512_v0 = vadd.f32 %v2511_v7, %v17039_v19  ;;  %v17314_v26 = vadd.f32 %v2582_v12, %v2510_v53  ;;  %4741 = vmatprep.mubr.bf16.mxu1 %v16193_v4  ;;  %v14295_v4 = vld [vmem:[%s22411_s3 + $0x184] ss:$8 sps:$4 sm:$0xff]  }
 0x16a   : > { %v2513_v57 = vpop.f32.mrf.mxu0  ;;  %v14298_v12 = vld [vmem:[%s22411_s3 + $0x204] ss:$8 sps:$4 sm:$0xff]  }
 0x16b   : > { %v2586_v41 = vpop.f32.mrf.mxu1  ;;  %v2514_v46 = vadd.f32 %v2513_v57, %v17054_v23  ;;  %v17324_v28 = vadd.f32 %v2584_v45, %v2512_v0  ;;  %4779 = vmatpush2.bf16.msra.mxu0 %v14281_v3  ;;  %v14293_v3 = vld [vmem:[%s22411_s3 + $0x180] ss:$8 sps:$4 sm:$0xff]   ;;  %v14301_v45 = vld [vmem:[%s22411_s3 + $0x2f4] ss:$8 sps:$4 sm:$0xff]  }
 0x16c   : > { %4836 = vmatpush1.bf16.msra.mxu1 %v14284_v40  ;;  %v17329_v19 = vpop.f32.mrf.mxu0  ;;  %4780 = vmatprep.subr.bf16.mxu0 %v14289_v51  ;;  %v14296_v40 = vld [vmem:[%s22411_s3 + $0x200] ss:$8 sps:$4 sm:$0xff]   ;;  %v14304_v57 = vld [vmem:[%s22411_s3 + $0x374] ss:$8 sps:$4 sm:$0xff]  }
 0x16d   : > { %22521 = vst [vmem:[#allocation51_spill] sm:$0xff] %v17329_v19  ;;  %v17331_v22 = vpop.f32.mrf.mxu1  ;;  %4837 = vmatprep.subr.bf16.mxu1 %v14292_v35  ;;  %v17336_v53 = vadd.f32 %v2586_v41, %v2514_v46 }
 0x16e   : > { %22522 = vst [vmem:[#allocation52_spill] sm:$0xff] %v17331_v22  ;;  %v2519_v23 = vpop.f32.mrf.mxu0 }
 0x16f   : > { %v2592_v7 = vpop.f32.mrf.mxu1  ;;  %4742 = vmatmul.mubr.bf16.gmra.mxu1 %v16206_v15  ;;  %v2520_v51 = vadd.f32 %v2519_v23, %v17076_v2  ;;  %4781 = vmatpush2.bf16.msra.mxu0 %v14287_v38  ;;  %v14299_v38 = vld [vmem:[%s22411_s3 + $0x2f0] ss:$8 sps:$4 sm:$0xff]  }
 0x170   : > { %4838 = vmatpush1.bf16.msra.mxu1 %v14290_v39  ;;  %v2521_v35 = vpop.f32.mrf.mxu0  ;;  %4782 = vmatprep.subr.bf16.mxu0 %v14295_v4  ;;  %v14302_v39 = vld [vmem:[%s22411_s3 + $0x370] ss:$8 sps:$4 sm:$0xff]  }
 0x171   : > { %v2594_v0 = vpop.f32.mrf.mxu1  ;;  %4839 = vmatprep.subr.bf16.mxu1 %v14298_v12  ;;  %v2522_v41 = vadd.f32 %v2521_v35, %v17082_v55  ;;  %v17353_v46 = vadd.f32 %v2592_v7, %v2520_v51  ;;  %4857 = vmatprep.mubr.bf16.mxu1 %v16244_v31  ;;  %v14307_v31 = vld [vmem:[%s22411_s3 + $0x2e4] ss:$8 sps:$4 sm:$0xff]   ;;  %v14308_v7 = vld [vmem:[%s22411_s3 + $0x360] ss:$8 sps:$4 sm:$0xff]   ;;  %v14314_v51 = vld [vmem:[%s22411_s3 + $0x350] ss:$8 sps:$4 sm:$0xff]  }
 0x172   : > { %v2523_v15 = vpop.f32.mrf.mxu0  ;;  %v14310_v55 = vld [vmem:[%s22411_s3 + $0x364] ss:$8 sps:$4 sm:$0xff]   ;;  %v14317_v35 = vld [vmem:[%s22411_s3 + $0x2c0] ss:$8 sps:$4 sm:$0xff]  }
 0x173   : > { %v2596_v2 = vpop.f32.mrf.mxu1  ;;  %v2524_v4 = vadd.f32 %v2523_v15, %v17096_v52  ;;  %v17363_v12 = vadd.f32 %v2594_v0, %v2522_v41  ;;  %4783 = vmatpush2.bf16.msra.mxu0 %v14293_v3  ;;  %v14305_v52 = vld [vmem:[%s22411_s3 + $0x2e0] ss:$8 sps:$4 sm:$0xff]   ;;  %v14313_v3 = vld [vmem:[%s22411_s3 + $0x2d4] ss:$8 sps:$4 sm:$0xff]   ;;  %v14323_v41 = vld [vmem:[%s22411_s3 + $0x2b0] ss:$8 sps:$4 sm:$0xff]  }
 0x174   : > { %4840 = vmatpush1.bf16.msra.mxu1 %v14296_v40  ;;  %4898 = vmatprep.subr.bf16.mxu0 %v14304_v57  ;;  %v14311_v40 = vld [vmem:[%s22411_s3 + $0x2d0] ss:$8 sps:$4 sm:$0xff]   ;;  %v14320_v0 = vld [vmem:[%s22411_s3 + $0x340] ss:$8 sps:$4 sm:$0xff]   ;;  %v14325_v57 = vld [vmem:[%s22411_s3 + $0x2b4] ss:$8 sps:$4 sm:$0xff]  }
 0x175   : > { %4841 = vmatprep.subr.bf16.mxu1 %v14301_v45  ;;  %v17371_v23 = vadd.f32 %v2596_v2, %v2524_v4  ;;  %v14319_v45 = vld [vmem:[%s22411_s3 + $0x2c4] ss:$8 sps:$4 sm:$0xff]   ;;  %v14326_v15 = vld [vmem:[%s22411_s3 + $0x330] ss:$8 sps:$4 sm:$0xff]   ;;  %v14337_v4 = vld [vmem:[%s22411_s3 + $0x294] ss:$8 sps:$4 sm:$0xff]  }
 0x176   : > { %4785 = vmatmul.mubr.bf16.vlgmr.msra.gmra.mxu0 %v16069_v13  ;;  %v14316_v13 = vld [vmem:[%s22411_s3 + $0x354] ss:$8 sps:$4 sm:$0xff]   ;;  %v14331_v2 = vld [vmem:[%s22411_s3 + $0x2a4] ss:$8 sps:$4 sm:$0xff]  }
 0x177   : > { %4899 = vmatpush1.bf16.msra.mxu0 %v14302_v39  ;;  %4794 = vmatprep.mubr.bf16.mxu0 %v16110_v30  ;;  %v14322_v30 = vld [vmem:[%s22411_s3 + $0x344] ss:$8 sps:$4 sm:$0xff]   ;;  %v14332_v39 = vld [vmem:[%s22411_s3 + $0x320] ss:$8 sps:$4 sm:$0xff]  }
 0x178   : > { %4842 = vmatpush2.bf16.msra.mxu1 %v14299_v38  ;;  %4900 = vmatprep.subr.bf16.mxu0 %v14310_v55  ;;  %v14329_v38 = vld [vmem:[%s22411_s3 + $0x2a0] ss:$8 sps:$4 sm:$0xff]   ;;  %v14338_v55 = vld [vmem:[%s22411_s3 + $0x310] ss:$8 sps:$4 sm:$0xff]  }
 0x179   : > { %4843 = vmatprep.subr.bf16.mxu1 %v14307_v31  ;;  %v14335_v31 = vld [vmem:[%s22411_s3 + $0x290] ss:$8 sps:$4 sm:$0xff]  }
 0x17b   : > { %4901 = vmatpush1.bf16.msra.mxu0 %v14308_v7  ;;  %v14341_v7 = vld [vmem:[%s22411_s3 + $0x280] ss:$8 sps:$4 sm:$0xff]  }
 0x17c   : > { %4844 = vmatpush2.bf16.msra.mxu1 %v14305_v52  ;;  %4902 = vmatprep.subr.bf16.mxu0 %v14316_v13  ;;  %v14343_v52 = vld [vmem:[%s22411_s3 + $0x284] ss:$8 sps:$4 sm:$0xff]   ;;  %v14349_v13 = vld [vmem:[%s22411_s3 + $0x3f4] ss:$8 sps:$4 sm:$0xff]  }
 0x17d   : > { %4845 = vmatprep.subr.bf16.mxu1 %v14313_v3  ;;  %v14344_v3 = vld [vmem:[%s22411_s3 + $0x300] ss:$8 sps:$4 sm:$0xff]  }
 0x17e   : > { %4795 = vmatmul.mubr.bf16.gmra.mxu0 %v16120_v36  ;;  %v14328_v36 = vld [vmem:[%s22411_s3 + $0x334] ss:$8 sps:$4 sm:$0xff]  }
 0x17f   : > { %4903 = vmatpush1.bf16.msra.mxu0 %v14314_v51  ;;  %4804 = vmatprep.mubr.bf16.mxu0 %v16154_v50  ;;  %v14334_v50 = vld [vmem:[%s22411_s3 + $0x324] ss:$8 sps:$4 sm:$0xff]   ;;  %v14350_v51 = vld [vmem:[%s22411_s3 + $0x470] ss:$8 sps:$4 sm:$0xff]  }
 0x180   : > { %4846 = vmatpush2.bf16.msra.mxu1 %v14311_v40  ;;  %4904 = vmatprep.subr.bf16.mxu0 %v14322_v30  ;;  %v14347_v40 = vld [vmem:[%s22411_s3 + $0x3f0] ss:$8 sps:$4 sm:$0xff]   ;;  %v17473_v30 = vpop.f32.mrf.mxu1 }
 0x181   : > { %4847 = vmatprep.subr.bf16.mxu1 %v14319_v45  ;;  %v17471_v45 = vpop.f32.mrf.mxu0  ;;  %22524 = vst [vmem:[#allocation54_spill] sm:$0xff] %v17473_v30  ;;  %v14649_v30 = vld [vmem:[%s22413_s5 + $0xb4] ss:$8 sps:$4 sm:$0xff]  }
 0x182   : > { %22523 = vst [vmem:[#allocation53_spill] sm:$0xff] %v17471_v45 }
 0x183   : > { %4905 = vmatpush1.bf16.msra.mxu0 %v14320_v0 }
 0x184   : > { %4848 = vmatpush2.bf16.msra.mxu1 %v14317_v35  ;;  %4906 = vmatprep.subr.bf16.mxu0 %v14328_v36  ;;  %v14358_v35 = vld [vmem:[%s22411_s3 + $0x464] ss:$8 sps:$4 sm:$0xff]  }
 0x185   : > { %4849 = vmatprep.subr.bf16.mxu1 %v14325_v57 }
 0x186   : > { %4805 = vmatmul.mubr.bf16.gmra.mxu0 %v16164_v58  ;;  %v14340_v58 = vld [vmem:[%s22411_s3 + $0x314] ss:$8 sps:$4 sm:$0xff]  }
 0x187   : > { %4907 = vmatpush1.bf16.msra.mxu0 %v14326_v15  ;;  %4814 = vmatprep.mubr.bf16.mxu0 %v16198_v8  ;;  %v14346_v8 = vld [vmem:[%s22411_s3 + $0x304] ss:$8 sps:$4 sm:$0xff]   ;;  %v14356_v15 = vld [vmem:[%s22411_s3 + $0x460] ss:$8 sps:$4 sm:$0xff]  }
 0x188   : > { %4850 = vmatpush2.bf16.msra.mxu1 %v14323_v41  ;;  %4908 = vmatprep.subr.bf16.mxu0 %v14334_v50  ;;  %v14353_v41 = vld [vmem:[%s22411_s3 + $0x3e0] ss:$8 sps:$4 sm:$0xff]  }
 0x189   : > { %4851 = vmatprep.subr.bf16.mxu1 %v14331_v2 }
 0x18b   : > { %4909 = vmatpush1.bf16.msra.mxu0 %v14332_v39 }
 0x18c   : > { %4852 = vmatpush2.bf16.msra.mxu1 %v14329_v38  ;;  %4910 = vmatprep.subr.bf16.mxu0 %v14340_v58 }
 0x18d   : > { %4853 = vmatprep.subr.bf16.mxu1 %v14337_v4  ;;  %v14359_v4 = vld [vmem:[%s22411_s3 + $0x3d0] ss:$8 sps:$4 sm:$0xff]  }
 0x18e   : > { %4815 = vmatmul.mubr.bf16.gmra.mxu0 %v16208_v16  ;;  %v14352_v16 = vld [vmem:[%s22411_s3 + $0x474] ss:$8 sps:$4 sm:$0xff]  }
 0x18f   : > { %4911 = vmatpush1.bf16.msra.mxu0 %v14338_v55  ;;  %4930 = vmatprep.mubr.bf16.mxu0 %v16247_v33  ;;  %v14355_v33 = vld [vmem:[%s22411_s3 + $0x3e4] ss:$8 sps:$4 sm:$0xff]   ;;  %v14362_v55 = vld [vmem:[%s22411_s3 + $0x450] ss:$8 sps:$4 sm:$0xff]  }
 0x190   : > { %4854 = vmatpush2.bf16.msra.mxu1 %v14335_v31  ;;  %4912 = vmatprep.subr.bf16.mxu0 %v14346_v8 }
 0x191   : > { %4855 = vmatprep.subr.bf16.mxu1 %v14343_v52 }
 0x193   : > { %4913 = vmatpush1.bf16.msra.mxu0 %v14344_v3 }
 0x194   : > { %4856 = vmatpush2.bf16.msra.mxu1 %v14341_v7  ;;  %4914 = vmatprep.subr.bf16.mxu0 %v14349_v13 }
 0x195   : > { %4971 = vmatprep.subr.bf16.mxu1 %v14352_v16 }
 0x196   : > { %v2635_v0 = vpop.f32.mrf.mxu0 }
 0x197   : > { %v2708_v57 = vpop.f32.mrf.mxu1  ;;  %4858 = vmatmul.mubr.bf16.vlgmr.msra.gmra.mxu1 %v16347_v20  ;;  %v2636_v36 = vadd.f32 %v2635_v0, %v17235_v9  ;;  %4915 = vmatpush2.bf16.msra.mxu0 %v14347_v40  ;;  %v14361_v20 = vld [vmem:[%s22411_s3 + $0x3d4] ss:$8 sps:$4 sm:$0xff]   ;;  %v14365_v40 = vld [vmem:[%s22411_s3 + $0x3c0] ss:$8 sps:$4 sm:$0xff]  }
 0x198   : > { %4972 = vmatpush1.bf16.msra.mxu1 %v14350_v51  ;;  %v2637_v2 = vpop.f32.mrf.mxu0  ;;  %4916 = vmatprep.subr.bf16.mxu0 %v14355_v33  ;;  %v14364_v9 = vld [vmem:[%s22411_s3 + $0x454] ss:$8 sps:$4 sm:$0xff]   ;;  %v14368_v51 = vld [vmem:[%s22411_s3 + $0x440] ss:$8 sps:$4 sm:$0xff]  }
 0x199   : > { %v2710_v50 = vpop.f32.mrf.mxu1  ;;  %4973 = vmatprep.subr.bf16.mxu1 %v14358_v35  ;;  %v17495_v38 = vadd.f32 %v2708_v57, %v2636_v36  ;;  %v2638_v39 = vadd.f32 %v2637_v2, %v17245_v54  ;;  %4867 = vmatprep.mubr.bf16.mxu1 %v16365_v29  ;;  %v14367_v29 = vld [vmem:[%s22411_s3 + $0x3c4] ss:$8 sps:$4 sm:$0xff]   ;;  %v14376_v57 = vld [vmem:[%s22411_s3 + $0x434] ss:$8 sps:$4 sm:$0xff]  }
 0x19a   : > { %v2639_v58 = vpop.f32.mrf.mxu0  ;;  %v14370_v54 = vld [vmem:[%s22411_s3 + $0x444] ss:$8 sps:$4 sm:$0xff]  }
 0x19b   : > { %v2712_v31 = vpop.f32.mrf.mxu1  ;;  %v17505_v52 = vadd.f32 %v2710_v50, %v2638_v39  ;;  %v2640_v8 = vadd.f32 %v2639_v58, %v17258_v32  ;;  %4917 = vmatpush2.bf16.msra.mxu0 %v14353_v41 }
 0x19c   : > { %4974 = vmatpush1.bf16.msra.mxu1 %v14356_v15  ;;  %v17514_v7 = vpop.f32.mrf.mxu0  ;;  %4918 = vmatprep.subr.bf16.mxu0 %v14361_v20  ;;  %v14374_v15 = vld [vmem:[%s22411_s3 + $0x430] ss:$8 sps:$4 sm:$0xff]   ;;  %v14379_v20 = vld [vmem:[%s22411_s3 + $0x3a4] ss:$8 sps:$4 sm:$0xff]  }
 0x19d   : > { %22525 = vst [vmem:[#allocation55_spill] sm:$0xff] %v17514_v7  ;;  %v17516_v3 = vpop.f32.mrf.mxu1  ;;  %4975 = vmatprep.subr.bf16.mxu1 %v14364_v9  ;;  %v17518_v13 = vadd.f32 %v2712_v31, %v2640_v8  ;;  %v14380_v8 = vld [vmem:[%s22411_s3 + $0x420] ss:$8 sps:$4 sm:$0xff]  }
 0x19e   : > { %22526 = vst [vmem:[#allocation56_spill] sm:$0xff] %v17516_v3  ;;  %v2645_v16 = vpop.f32.mrf.mxu0 }
 0x19f   : > { %4868 = vmatmul.mubr.bf16.gmra.mxu1 %v16391_v47  ;;  %v2718_v32 = vpop.f32.mrf.mxu1  ;;  %v2646_v33 = vadd.f32 %v2645_v16, %v17275_v1  ;;  %4919 = vmatpush2.bf16.msra.mxu0 %v14359_v4  ;;  %v14373_v47 = vld [vmem:[%s22411_s3 + $0x3b4] ss:$8 sps:$4 sm:$0xff]   ;;  %v14371_v1 = vld [vmem:[%s22411_s3 + $0x3b0] ss:$8 sps:$4 sm:$0xff]  }
 0x1a0   : > { %4976 = vmatpush1.bf16.msra.mxu1 %v14362_v55  ;;  %v2647_v35 = vpop.f32.mrf.mxu0  ;;  %4920 = vmatprep.subr.bf16.mxu0 %v14367_v29 }
 0x1a1   : > { %v2720_v0 = vpop.f32.mrf.mxu1  ;;  %4977 = vmatprep.subr.bf16.mxu1 %v14370_v54  ;;  %v2648_v36 = vadd.f32 %v2647_v35, %v17285_v34  ;;  %v17535_v41 = vadd.f32 %v2718_v32, %v2646_v33  ;;  %4877 = vmatprep.mubr.bf16.mxu1 %v16409_v60  ;;  %v14382_v34 = vld [vmem:[%s22411_s3 + $0x424] ss:$8 sps:$4 sm:$0xff]   ;;  %v14388_v32 = vld [vmem:[%s22411_s3 + $0x414] ss:$8 sps:$4 sm:$0xff]   ;;  %v14386_v33 = vld [vmem:[%s22411_s3 + $0x410] ss:$8 sps:$4 sm:$0xff]  }
 0x1a2   : > { %v2649_v2 = vpop.f32.mrf.mxu0 }
 0x1a3   : > { %v2722_v50 = vpop.f32.mrf.mxu1  ;;  %v2650_v60 = vadd.f32 %v2649_v2, %v17297_v61  ;;  %v17551_v9 = vadd.f32 %v2720_v0, %v2648_v36  ;;  %4921 = vmatpush2.bf16.msra.mxu0 %v14365_v40  ;;  %v14377_v61 = vld [vmem:[%s22411_s3 + $0x3a0] ss:$8 sps:$4 sm:$0xff]  }
 0x1a4   : > { %4978 = vmatpush1.bf16.msra.mxu1 %v14368_v51  ;;  %v17553_v39 = vpop.f32.mrf.mxu0  ;;  %4922 = vmatprep.subr.bf16.mxu0 %v14373_v47  ;;  %v14391_v47 = vld [vmem:[%s22411_s3 + $0x384] ss:$8 sps:$4 sm:$0xff]  }
 0x1a5   : > { %22527 = vst [vmem:[#allocation57_spill] sm:$0xff] %v17553_v39  ;;  %v17555_v4 = vpop.f32.mrf.mxu1  ;;  %4979 = vmatprep.subr.bf16.mxu1 %v14376_v57  ;;  %v17557_v58 = vadd.f32 %v2722_v50, %v2650_v60 }
 0x1a6   : > { %22528 = vst [vmem:[#allocation58_spill] sm:$0xff] %v17555_v4  ;;  %v2655_v31 = vpop.f32.mrf.mxu0 }
 0x1a7   : > { %4878 = vmatmul.mubr.bf16.gmra.mxu1 %v16435_v10  ;;  %v2728_v55 = vpop.f32.mrf.mxu1  ;;  %v2656_v29 = vadd.f32 %v2655_v31, %v17314_v26  ;;  %4923 = vmatpush2.bf16.msra.mxu0 %v14371_v1  ;;  %v14385_v10 = vld [vmem:[%s22411_s3 + $0x394] ss:$8 sps:$4 sm:$0xff]   ;;  %v14383_v26 = vld [vmem:[%s22411_s3 + $0x390] ss:$8 sps:$4 sm:$0xff]  }
 0x1a8   : > { %4980 = vmatpush1.bf16.msra.mxu1 %v14374_v15  ;;  %v2657_v54 = vpop.f32.mrf.mxu0  ;;  %4924 = vmatprep.subr.bf16.mxu0 %v14379_v20  ;;  %v14392_v20 = vld [vmem:[%s22411_s3 + $0x400] ss:$8 sps:$4 sm:$0xff]  }
 0x1a9   : > { %v2730_v16 = vpop.f32.mrf.mxu1  ;;  %4981 = vmatprep.subr.bf16.mxu1 %v14382_v34  ;;  %v2658_v40 = vadd.f32 %v2657_v54, %v17324_v28  ;;  %v17574_v51 = vadd.f32 %v2728_v55, %v2656_v29  ;;  %4887 = vmatprep.mubr.bf16.mxu1 %v16453_v24  ;;  %v14394_v28 = vld [vmem:[%s22411_s3 + $0x404] ss:$8 sps:$4 sm:$0xff]   ;;  %v14400_v55 = vld [vmem:[%s22411_s3 + $0x574] ss:$8 sps:$4 sm:$0xff]   ;;  %v14398_v29 = vld [vmem:[%s22411_s3 + $0x570] ss:$8 sps:$4 sm:$0xff]  }
 0x1aa   : > { %v2659_v35 = vpop.f32.mrf.mxu0 }
 0x1ab   : > { %v2732_v0 = vpop.f32.mrf.mxu1  ;;  %v2660_v24 = vadd.f32 %v2659_v35, %v17336_v53  ;;  %v17590_v57 = vadd.f32 %v2730_v16, %v2658_v40  ;;  %4925 = vmatpush2.bf16.msra.mxu0 %v14377_v61  ;;  %v14389_v53 = vld [vmem:[%s22411_s3 + $0x380] ss:$8 sps:$4 sm:$0xff]   ;;  %v14412_v35 = vld [vmem:[%s22411_s3 + $0x554] ss:$8 sps:$4 sm:$0xff]  }
 0x1ac   : > { %4982 = vmatpush1.bf16.msra.mxu1 %v14380_v8  ;;  %v17592_v36 = vpop.f32.mrf.mxu0  ;;  %4926 = vmatprep.subr.bf16.mxu0 %v14385_v10  ;;  %v14403_v10 = vld [vmem:[%s22411_s3 + $0x4e4] ss:$8 sps:$4 sm:$0xff]  }
 0x1ad   : > { %22529 = vst [vmem:[#allocation59_spill] sm:$0xff] %v17592_v36  ;;  %v17594_v1 = vpop.f32.mrf.mxu1  ;;  %4983 = vmatprep.subr.bf16.mxu1 %v14388_v32  ;;  %v17596_v15 = vadd.f32 %v2732_v0, %v2660_v24  ;;  %v14407_v0 = vld [vmem:[%s22411_s3 + $0x4d0] ss:$8 sps:$4 sm:$0xff]   ;;  %v14416_v24 = vld [vmem:[%s22411_s3 + $0x540] ss:$8 sps:$4 sm:$0xff]  }
 0x1ae   : > { %22530 = vst [vmem:[#allocation60_spill] sm:$0xff] %v17594_v1  ;;  %v2665_v2 = vpop.f32.mrf.mxu0  ;;  %v14647_v1 = vld [vmem:[%s22413_s5 + $0xb0] ss:$8 sps:$4 sm:$0xff]  }
 0x1af   : > { %4888 = vmatmul.mubr.bf16.gmra.mxu1 %v16478_v43  ;;  %v2738_v50 = vpop.f32.mrf.mxu1  ;;  %v2666_v34 = vadd.f32 %v2665_v2, %v17353_v46  ;;  %4927 = vmatpush2.bf16.msra.mxu0 %v14383_v26  ;;  %v14397_v43 = vld [vmem:[%s22411_s3 + $0x4f4] ss:$8 sps:$4 sm:$0xff]   ;;  %v14395_v46 = vld [vmem:[%s22411_s3 + $0x4f0] ss:$8 sps:$4 sm:$0xff]  }
 0x1b0   : > { %4984 = vmatpush1.bf16.msra.mxu1 %v14386_v33  ;;  %v2667_v60 = vpop.f32.mrf.mxu0  ;;  %4928 = vmatprep.subr.bf16.mxu0 %v14391_v47  ;;  %v14404_v33 = vld [vmem:[%s22411_s3 + $0x560] ss:$8 sps:$4 sm:$0xff]   ;;  %v14415_v47 = vld [vmem:[%s22411_s3 + $0x4c4] ss:$8 sps:$4 sm:$0xff]   ;;  %v14421_v2 = vld [vmem:[%s22411_s3 + $0x4b4] ss:$8 sps:$4 sm:$0xff]  }
 0x1b1   : > { %v2740_v31 = vpop.f32.mrf.mxu1  ;;  %4985 = vmatprep.subr.bf16.mxu1 %v14394_v28  ;;  %v2668_v61 = vadd.f32 %v2667_v60, %v17363_v12  ;;  %v17613_v8 = vadd.f32 %v2738_v50, %v2666_v34  ;;  %5003 = vmatprep.mubr.bf16.mxu1 %v16491_v56  ;;  %v14406_v12 = vld [vmem:[%s22411_s3 + $0x564] ss:$8 sps:$4 sm:$0xff]   ;;  %v14401_v56 = vld [vmem:[%s22411_s3 + $0x4e0] ss:$8 sps:$4 sm:$0xff]   ;;  %v14424_v50 = vld [vmem:[%s22411_s3 + $0x534] ss:$8 sps:$4 sm:$0xff]  }
 0x1b2   : > { %v2669_v54 = vpop.f32.mrf.mxu0  ;;  %v14418_v28 = vld [vmem:[%s22411_s3 + $0x544] ss:$8 sps:$4 sm:$0xff]   ;;  %v14428_v60 = vld [vmem:[%s22411_s3 + $0x520] ss:$8 sps:$4 sm:$0xff]  }
 0x1b3   : > { %v2742_v16 = vpop.f32.mrf.mxu1  ;;  %v2670_v32 = vadd.f32 %v2669_v54, %v17371_v23  ;;  %v17629_v40 = vadd.f32 %v2740_v31, %v2668_v61  ;;  %4929 = vmatpush2.bf16.msra.mxu0 %v14389_v53  ;;  %v14409_v23 = vld [vmem:[%s22411_s3 + $0x4d4] ss:$8 sps:$4 sm:$0xff]   ;;  %v14419_v53 = vld [vmem:[%s22411_s3 + $0x4b0] ss:$8 sps:$4 sm:$0xff]   ;;  %v14430_v34 = vld [vmem:[%s22411_s3 + $0x524] ss:$8 sps:$4 sm:$0xff]  }
 0x1b4   : > { %4986 = vmatpush1.bf16.msra.mxu1 %v14392_v20  ;;  %5044 = vmatprep.subr.bf16.mxu0 %v14400_v55  ;;  %v14427_v20 = vld [vmem:[%s22411_s3 + $0x4a4] ss:$8 sps:$4 sm:$0xff]   ;;  %v14433_v31 = vld [vmem:[%s22411_s3 + $0x494] ss:$8 sps:$4 sm:$0xff]   ;;  %v14431_v55 = vld [vmem:[%s22411_s3 + $0x490] ss:$8 sps:$4 sm:$0xff]  }
 0x1b5   : > { %4987 = vmatprep.subr.bf16.mxu1 %v14397_v43  ;;  %v17631_v26 = vadd.f32 %v2742_v16, %v2670_v32  ;;  %v14436_v43 = vld [vmem:[%s22411_s3 + $0x514] ss:$8 sps:$4 sm:$0xff]   ;;  %v14439_v61 = vld [vmem:[%s22411_s3 + $0x484] ss:$8 sps:$4 sm:$0xff]  }
 0x1b6   : > { %4931 = vmatmul.mubr.bf16.vlgmr.msra.gmra.mxu0 %v16349_v21  ;;  %v14410_v21 = vld [vmem:[%s22411_s3 + $0x550] ss:$8 sps:$4 sm:$0xff]   ;;  %v14445_v54 = vld [vmem:[%s22411_s3 + $0x5f4] ss:$8 sps:$4 sm:$0xff]   ;;  %v14454_v32 = vld [vmem:[%s22411_s3 + $0x664] ss:$8 sps:$4 sm:$0xff]  }
 0x1b7   : > { %5045 = vmatpush1.bf16.msra.mxu0 %v14398_v29  ;;  %4940 = vmatprep.mubr.bf16.mxu0 %v16369_v37  ;;  %v14413_v37 = vld [vmem:[%s22411_s3 + $0x4c0] ss:$8 sps:$4 sm:$0xff]   ;;  %v14448_v16 = vld [vmem:[%s22411_s3 + $0x674] ss:$8 sps:$4 sm:$0xff]  }
 0x1b8   : > { %4988 = vmatpush2.bf16.msra.mxu1 %v14395_v46  ;;  %5046 = vmatprep.subr.bf16.mxu0 %v14406_v12  ;;  %v14442_v46 = vld [vmem:[%s22411_s3 + $0x504] ss:$8 sps:$4 sm:$0xff]   ;;  %v14440_v29 = vld [vmem:[%s22411_s3 + $0x500] ss:$8 sps:$4 sm:$0xff]  }
 0x1b9   : > { %4989 = vmatprep.subr.bf16.mxu1 %v14403_v10  ;;  %v14443_v10 = vld [vmem:[%s22411_s3 + $0x5f0] ss:$8 sps:$4 sm:$0xff]   ;;  %v14451_v12 = vld [vmem:[%s22411_s3 + $0x5e4] ss:$8 sps:$4 sm:$0xff]  }
 0x1bb   : > { %5047 = vmatpush1.bf16.msra.mxu0 %v14404_v33  ;;  %v17739_v33 = vpop.f32.mrf.mxu1 }
 0x1bc   : > { %4990 = vmatpush2.bf16.msra.mxu1 %v14401_v56  ;;  %5048 = vmatprep.subr.bf16.mxu0 %v14412_v35  ;;  %v17737_v56 = vpop.f32.mrf.mxu0  ;;  %22532 = vst [vmem:[#allocation62_spill] sm:$0xff] %v17739_v33 }
 0x1bd   : > { %4991 = vmatprep.subr.bf16.mxu1 %v14409_v23  ;;  %22531 = vst [vmem:[#allocation61_spill] sm:$0xff] %v17737_v56  ;;  %v14452_v23 = vld [vmem:[%s22411_s3 + $0x660] ss:$8 sps:$4 sm:$0xff]  }
 0x1be   : > { %4941 = vmatmul.mubr.bf16.gmra.mxu0 %v16393_v48  ;;  %v14422_v48 = vld [vmem:[%s22411_s3 + $0x530] ss:$8 sps:$4 sm:$0xff]   ;;  %v14638_v56 = vld [vmem:[%s22413_s5 + $0x20] ss:$8 sps:$4 sm:$0xff]  }
 0x1bf   : > { %5049 = vmatpush1.bf16.msra.mxu0 %v14410_v21  ;;  %4950 = vmatprep.mubr.bf16.mxu0 %v16413_v63  ;;  %v14425_v63 = vld [vmem:[%s22411_s3 + $0x4a0] ss:$8 sps:$4 sm:$0xff]   ;;  %v14457_v21 = vld [vmem:[%s22411_s3 + $0x5d4] ss:$8 sps:$4 sm:$0xff]  }
 0x1c0   : > { %4992 = vmatpush2.bf16.msra.mxu1 %v14407_v0  ;;  %5050 = vmatprep.subr.bf16.mxu0 %v14418_v28 }
 0x1c1   : > { %4993 = vmatprep.subr.bf16.mxu1 %v14415_v47  ;;  %v14460_v47 = vld [vmem:[%s22411_s3 + $0x654] ss:$8 sps:$4 sm:$0xff]  }
 0x1c3   : > { %5051 = vmatpush1.bf16.msra.mxu0 %v14416_v24 }
 0x1c4   : > { %4994 = vmatpush2.bf16.msra.mxu1 %v14413_v37  ;;  %5052 = vmatprep.subr.bf16.mxu0 %v14424_v50  ;;  %v14455_v50 = vld [vmem:[%s22411_s3 + $0x5d0] ss:$8 sps:$4 sm:$0xff]  }
 0x1c5   : > { %4995 = vmatprep.subr.bf16.mxu1 %v14421_v2 }
 0x1c6   : > { %4951 = vmatmul.mubr.bf16.gmra.mxu0 %v16437_v11  ;;  %v14434_v11 = vld [vmem:[%s22411_s3 + $0x510] ss:$8 sps:$4 sm:$0xff]  }
 0x1c7   : > { %5053 = vmatpush1.bf16.msra.mxu0 %v14422_v48  ;;  %4960 = vmatprep.mubr.bf16.mxu0 %v16456_v27  ;;  %v14437_v27 = vld [vmem:[%s22411_s3 + $0x480] ss:$8 sps:$4 sm:$0xff]  }
 0x1c8   : > { %4996 = vmatpush2.bf16.msra.mxu1 %v14419_v53  ;;  %5054 = vmatprep.subr.bf16.mxu0 %v14430_v34 }
 0x1c9   : > { %4997 = vmatprep.subr.bf16.mxu1 %v14427_v20  ;;  %v14463_v20 = vld [vmem:[%s22411_s3 + $0x5c4] ss:$8 sps:$4 sm:$0xff]  }
 0x1cb   : > { %5055 = vmatpush1.bf16.msra.mxu0 %v14428_v60 }
 0x1cc   : > { %4998 = vmatpush2.bf16.msra.mxu1 %v14425_v63  ;;  %5056 = vmatprep.subr.bf16.mxu0 %v14436_v43  ;;  %v14461_v43 = vld [vmem:[%s22411_s3 + $0x5c0] ss:$8 sps:$4 sm:$0xff]  }
 0x1cd   : > { %4999 = vmatprep.subr.bf16.mxu1 %v14433_v31 }
 0x1ce   : > { %4961 = vmatmul.mubr.bf16.gmra.mxu0 %v16480_v44  ;;  %v14446_v44 = vld [vmem:[%s22411_s3 + $0x670] ss:$8 sps:$4 sm:$0xff]  }
 0x1cf   : > { %5057 = vmatpush1.bf16.msra.mxu0 %v14434_v11  ;;  %5076 = vmatprep.mubr.bf16.mxu0 %v16493_v59  ;;  %v14449_v59 = vld [vmem:[%s22411_s3 + $0x5e0] ss:$8 sps:$4 sm:$0xff]  }
 0x1d0   : > { %5000 = vmatpush2.bf16.msra.mxu1 %v14431_v55  ;;  %5058 = vmatprep.subr.bf16.mxu0 %v14442_v46  ;;  %v14464_v55 = vld [vmem:[%s22411_s3 + $0x640] ss:$8 sps:$4 sm:$0xff]   ;;  %v14472_v46 = vld [vmem:[%s22411_s3 + $0x634] ss:$8 sps:$4 sm:$0xff]  }
 0x1d1   : > { %5001 = vmatprep.subr.bf16.mxu1 %v14439_v61  ;;  %v14469_v61 = vld [vmem:[%s22411_s3 + $0x5b4] ss:$8 sps:$4 sm:$0xff]  }
 0x1d3   : > { %5059 = vmatpush1.bf16.msra.mxu0 %v14440_v29 }
 0x1d4   : > { %5002 = vmatpush2.bf16.msra.mxu1 %v14437_v27  ;;  %5060 = vmatprep.subr.bf16.mxu0 %v14445_v54 }
 0x1d5   : > { %5117 = vmatprep.subr.bf16.mxu1 %v14448_v16 }
 0x1d6   : > { %v2781_v35 = vpop.f32.mrf.mxu0 }
 0x1d7   : > { %v2854_v0 = vpop.f32.mrf.mxu1  ;;  %5004 = vmatmul.mubr.bf16.vlgmr.msra.gmra.mxu1 %v16621_v25  ;;  %v2782_v28 = vadd.f32 %v2781_v35, %v17495_v38  ;;  %5061 = vmatpush2.bf16.msra.mxu0 %v14443_v10  ;;  %v14458_v38 = vld [vmem:[%s22411_s3 + $0x650] ss:$8 sps:$4 sm:$0xff]  }
 0x1d8   : > { %5118 = vmatpush1.bf16.msra.mxu1 %v14446_v44  ;;  %v2783_v37 = vpop.f32.mrf.mxu0  ;;  %5062 = vmatprep.subr.bf16.mxu0 %v14451_v12  ;;  %v22535_v10 = vld [vmem:[#allocation13_spill] sm:$0xff] }
 0x1d9   : > { %v2856_v24 = vpop.f32.mrf.mxu1  ;;  %5119 = vmatprep.subr.bf16.mxu1 %v14454_v32  ;;  %v17755_v2 = vadd.f32 %v2854_v0, %v2782_v28  ;;  %v2784_v25 = vadd.f32 %v2783_v37, %v17505_v52  ;;  %5013 = vmatprep.mubr.bf16.mxu1 %v16639_v42  ;;  %v14466_v52 = vld [vmem:[%s22411_s3 + $0x644] ss:$8 sps:$4 sm:$0xff]   ;;  %v14467_v44 = vld [vmem:[%s22411_s3 + $0x5b0] ss:$8 sps:$4 sm:$0xff]   ;;  %v14473_v28 = vld [vmem:[%s22411_s3 + $0x5a0] ss:$8 sps:$4 sm:$0xff]  }
 0x1da   : > { %v2785_v53 = vpop.f32.mrf.mxu0 }
 0x1db   : > { %v2858_v48 = vpop.f32.mrf.mxu1  ;;  %v17771_v34 = vadd.f32 %v2856_v24, %v2784_v25  ;;  %v2786_v42 = vadd.f32 %v2785_v53, %v17518_v13  ;;  %5063 = vmatpush2.bf16.msra.mxu0 %v14449_v59  ;;  %v14475_v59 = vld [vmem:[%s22411_s3 + $0x5a4] ss:$8 sps:$4 sm:$0xff]  }
 0x1dc   : > { %5120 = vmatpush1.bf16.msra.mxu1 %v14452_v23  ;;  %v17774_v63 = vpop.f32.mrf.mxu0  ;;  %5064 = vmatprep.subr.bf16.mxu0 %v14457_v21  ;;  %v22538_v24 = vld [vmem:[#allocation15_spill] sm:$0xff] }
 0x1dd   : > { %22533 = vst [vmem:[#allocation63_spill] sm:$0xff] %v17774_v63  ;;  %v17776_v60 = vpop.f32.mrf.mxu1  ;;  %5121 = vmatprep.subr.bf16.mxu1 %v14460_v47  ;;  %v17778_v31 = vadd.f32 %v2858_v48, %v2786_v42 }
 0x1de   : > { %22534 = vst [vmem:[#allocation64_spill] sm:$0xff] %v17776_v60  ;;  %v2791_v11 = vpop.f32.mrf.mxu0 }
 0x1df   : > { %5014 = vmatmul.mubr.bf16.gmra.mxu1 %v16665_v5  ;;  %v2864_v13 = vpop.f32.mrf.mxu1  ;;  %v2792_v27 = vadd.f32 %v2791_v11, %v17535_v41  ;;  %5065 = vmatpush2.bf16.msra.mxu0 %v14455_v50  ;;  %v14470_v41 = vld [vmem:[%s22411_s3 + $0x630] ss:$8 sps:$4 sm:$0xff]   ;;  %v14481_v50 = vld [vmem:[%s22411_s3 + $0x594] ss:$8 sps:$4 sm:$0xff]   ;;  %v2968_v11 = vlaneseq }
 0x1e0   : > { %5122 = vmatpush1.bf16.msra.mxu1 %v14458_v38  ;;  %v2793_v29 = vpop.f32.mrf.mxu0  ;;  %5066 = vmatprep.subr.bf16.mxu0 %v14463_v20  ;;  %v14484_v38 = vld [vmem:[%s22411_s3 + $0x614] ss:$8 sps:$4 sm:$0xff]  }
 0x1e1   : > { %v2866_v54 = vpop.f32.mrf.mxu1  ;;  %5123 = vmatprep.subr.bf16.mxu1 %v14466_v52  ;;  %v2794_v16 = vadd.f32 %v2793_v29, %v17551_v9  ;;  %v17795_v5 = vadd.f32 %v2864_v13, %v2792_v27  ;;  %5023 = vmatprep.mubr.bf16.mxu1 %v22535_v10  ;;  %v14478_v9 = vld [vmem:[%s22411_s3 + $0x624] ss:$8 sps:$4 sm:$0xff]  }
 0x1e2   : > { %v2795_v12 = vpop.f32.mrf.mxu0 }
 0x1e3   : > { %v2868_v32 = vpop.f32.mrf.mxu1  ;;  %v2796_v23 = vadd.f32 %v2795_v12, %v17557_v58  ;;  %v17811_v35 = vadd.f32 %v2866_v54, %v2794_v16  ;;  %5067 = vmatpush2.bf16.msra.mxu0 %v14461_v43  ;;  %v14476_v58 = vld [vmem:[%s22411_s3 + $0x620] ss:$8 sps:$4 sm:$0xff]   ;;  %v22539_v43 = vld [vmem:[#allocation17_spill] sm:$0xff] }
 0x1e4   : > { %5124 = vmatpush1.bf16.msra.mxu1 %v14464_v55  ;;  %v17813_v0 = vpop.f32.mrf.mxu0  ;;  %5068 = vmatprep.subr.bf16.mxu0 %v14469_v61  ;;  %v14479_v55 = vld [vmem:[%s22411_s3 + $0x590] ss:$8 sps:$4 sm:$0xff]  }
 0x1e5   : > { %22536 = vst [vmem:[#allocation13_spill] sm:$0xff] %v17813_v0  ;;  %v17815_v21 = vpop.f32.mrf.mxu1  ;;  %5125 = vmatprep.subr.bf16.mxu1 %v14472_v46  ;;  %v17817_v47 = vadd.f32 %v2868_v32, %v2796_v23  ;;  %v14487_v46 = vld [vmem:[%s22411_s3 + $0x584] ss:$8 sps:$4 sm:$0xff]   ;;  %v14496_v23 = vld [vmem:[%s22411_s3 + $0x774] ss:$8 sps:$4 sm:$0xff]  }
 0x1e6   : > { %22537 = vst [vmem:[#allocation65_spill] sm:$0xff] %v17815_v21  ;;  %v2801_v37 = vpop.f32.mrf.mxu0  ;;  %v22543_v32 = vld [vmem:[#allocation19_spill] sm:$0xff] }
 0x1e7   : > { %5024 = vmatmul.mubr.bf16.gmra.mxu1 %v22538_v24  ;;  %v2874_v25 = vpop.f32.mrf.mxu1  ;;  %v2802_v53 = vadd.f32 %v2801_v37, %v17574_v51  ;;  %5069 = vmatpush2.bf16.msra.mxu0 %v14467_v44  ;;  %v14482_v51 = vld [vmem:[%s22411_s3 + $0x610] ss:$8 sps:$4 sm:$0xff]   ;;  %v14485_v44 = vld [vmem:[%s22411_s3 + $0x580] ss:$8 sps:$4 sm:$0xff]  }
 0x1e8   : > { %5126 = vmatpush1.bf16.msra.mxu1 %v14470_v41  ;;  %v2803_v48 = vpop.f32.mrf.mxu0  ;;  %5070 = vmatprep.subr.bf16.mxu0 %v14475_v59  ;;  %v17864_v41 = vshrl.u32 %v2968_v11, 7  ;;  %v2966_v24 = vld [vmem:[%s22410_s2] ss:$2 sm:$0x3] }
 0x1e9   : > { %v2876_v20 = vpop.f32.mrf.mxu1  ;;  %5127 = vmatprep.subr.bf16.mxu1 %v14478_v9  ;;  %v2804_v52 = vadd.f32 %v2803_v48, %v17590_v57  ;;  %v17834_v42 = vadd.f32 %v2874_v25, %v2802_v53  ;;  %5033 = vmatprep.mubr.bf16.mxu1 %v22539_v43  ;;  %v14490_v57 = vld [vmem:[%s22411_s3 + $0x604] ss:$8 sps:$4 sm:$0xff]   ;;  %v14493_v9 = vld [vmem:[%s22411_s3 + $0x6f4] ss:$8 sps:$4 sm:$0xff]   ;;  %v14494_v53 = vld [vmem:[%s22411_s3 + $0x770] ss:$8 sps:$4 sm:$0xff]  }
 0x1ea   : > { %v2805_v13 = vpop.f32.mrf.mxu0  ;;  %22542 = vst [vmem:[#allocation66_spill] sm:$0xff] %v17864_v41  ;;  %v22545_v48 = vld [vmem:[#allocation21_spill] sm:$0xff]  ;;  %v14502_v43 = vld [vmem:[%s22411_s3 + $0x764] ss:$8 sps:$4 sm:$0xff]  }
 0x1eb   : > { %v2878_v61 = vpop.f32.mrf.mxu1  ;;  %v2806_v27 = vadd.f32 %v2805_v13, %v17596_v15  ;;  %v17850_v29 = vadd.f32 %v2876_v20, %v2804_v52  ;;  %5071 = vmatpush2.bf16.msra.mxu0 %v14473_v28  ;;  %v14488_v15 = vld [vmem:[%s22411_s3 + $0x600] ss:$8 sps:$4 sm:$0xff]  }
 0x1ec   : > { %5128 = vmatpush1.bf16.msra.mxu1 %v14476_v58  ;;  %v17852_v54 = vpop.f32.mrf.mxu0  ;;  %5072 = vmatprep.subr.bf16.mxu0 %v14481_v50  ;;  %v12599_v13 = vld [vmem:[%s22410_s2 + $0x1] ss:$2 sm:$0x3] }
 0x1ed   : > { %22540 = vst [vmem:[#allocation15_spill] sm:$0xff] %v17852_v54  ;;  %v17854_v16 = vpop.f32.mrf.mxu1  ;;  %5129 = vmatprep.subr.bf16.mxu1 %v14484_v38  ;;  %v17856_v10 = vadd.f32 %v2878_v61, %v2806_v27  ;;  %v17881_v38 = vsub.s32 0, %v17864_v41 }
 0x1ee   : > { %22541 = vst [vmem:[#allocation17_spill] sm:$0xff] %v17854_v16  ;;  %v2811_v12 = vpop.f32.mrf.mxu0 }
 0x1ef   : > { %5034 = vmatmul.mubr.bf16.gmra.mxu1 %v22543_v32  ;;  %v2884_v59 = vpop.f32.mrf.mxu1  ;;  %v2812_v28 = vadd.f32 %v2811_v12, %v17613_v8  ;;  %5073 = vmatpush2.bf16.msra.mxu0 %v14479_v55  ;;  %22544 = vst [vmem:[#allocation19_spill] sm:$0xff] %v17881_v38  ;;  %v14491_v8 = vld [vmem:[%s22411_s3 + $0x6f0] ss:$8 sps:$4 sm:$0xff]   ;;  %v14508_v12 = vld [vmem:[%s22411_s3 + $0x754] ss:$8 sps:$4 sm:$0xff]  }
 0x1f0   : > { %5130 = vmatpush1.bf16.msra.mxu1 %v14482_v51  ;;  %v2813_v58 = vpop.f32.mrf.mxu0  ;;  %5074 = vmatprep.subr.bf16.mxu0 %v14487_v46  ;;  %v17907_v46 = vrot.slane %v2966_v24, %v17881_v38 }
 0x1f1   : > { %v2886_v37 = vpop.f32.mrf.mxu1  ;;  %5131 = vmatprep.subr.bf16.mxu1 %v14490_v57  ;;  %v2814_v25 = vadd.f32 %v2813_v58, %v17629_v40  ;;  %v17878_v50 = vadd.f32 %v2884_v59, %v2812_v28  ;;  %5149 = vmatprep.mubr.bf16.mxu1 %v22545_v48  ;;  %v14499_v40 = vld [vmem:[%s22411_s3 + $0x6e4] ss:$8 sps:$4 sm:$0xff]   ;;  %v14500_v57 = vld [vmem:[%s22411_s3 + $0x760] ss:$8 sps:$4 sm:$0xff]  }
 0x1f2   : > { %v2815_v20 = vpop.f32.mrf.mxu0  ;;  %v22549_v58 = vld [vmem:[#allocation11_spill] sm:$0xff] }
 0x1f3   : > { %v2888_v52 = vpop.f32.mrf.mxu1  ;;  %v2816_v55 = vadd.f32 %v2815_v20, %v17631_v26  ;;  %v17897_v51 = vadd.f32 %v2886_v37, %v2814_v25  ;;  %5075 = vmatpush2.bf16.msra.mxu0 %v14485_v44  ;;  %v14497_v26 = vld [vmem:[%s22411_s3 + $0x6e0] ss:$8 sps:$4 sm:$0xff]   ;;  %v14503_v37 = vld [vmem:[%s22411_s3 + $0x6d0] ss:$8 sps:$4 sm:$0xff]   ;;  %v14511_v25 = vld [vmem:[%s22411_s3 + $0x6c4] ss:$8 sps:$4 sm:$0xff]  }
 0x1f4   : > { %5132 = vmatpush1.bf16.msra.mxu1 %v14488_v15  ;;  %v17899_v11 = vpop.f32.mrf.mxu0  ;;  %5190 = vmatprep.subr.bf16.mxu0 %v14496_v23  ;;  %v22547_v44 = vld [vmem:[#allocation10_spill] sm:$0xff]  ;;  %v14505_v15 = vld [vmem:[%s22411_s3 + $0x6d4] ss:$8 sps:$4 sm:$0xff]   ;;  %v17925_v23 = vrot.slane %v12599_v13, %v17881_v38 }
 0x1f5   : > { %22546 = vst [vmem:[#allocation21_spill] sm:$0xff] %v17899_v11  ;;  %5133 = vmatprep.subr.bf16.mxu1 %v14493_v9  ;;  %v17904_v61 = vadd.f32 %v2888_v52, %v2816_v55  ;;  %v22551_v55 = vld [vmem:[#allocation12_spill] sm:$0xff]  ;;  %v14626_v11 = vld [vmem:[%s22413_s5 + $0x40] ss:$8 sps:$4 sm:$0xff]  }
 0x1f6   : > { %v2927_v27 = vpop.f32.mrf.mxu0  ;;  %5077 = vmatmul.mubr.bf16.vlgmr.msra.gmra.mxu0 %v22547_v44  ;;  %v14517_v13 = vld [vmem:[%s22411_s3 + $0x6b4] ss:$8 sps:$4 sm:$0xff]  }
 0x1f7   : > { %v2928_v32 = vadd.f32 %v2927_v27, %v17755_v2  ;;  %5191 = vmatpush1.bf16.msra.mxu0 %v14494_v53  ;;  %5086 = vmatprep.mubr.bf16.mxu0 %v22549_v58  ;;  %v14506_v2 = vld [vmem:[%s22411_s3 + $0x750] ss:$8 sps:$4 sm:$0xff]   ;;  %v17947_v53 = vld [vmem:[%s22417_s9] sm:$0xff] }
 0x1f8   : > { %5134 = vmatpush2.bf16.msra.mxu1 %v14491_v8  ;;  %v2929_v59 = vpop.f32.mrf.mxu0  ;;  %5192 = vmatprep.subr.bf16.mxu0 %v14502_v43  ;;  %v17972_v44 = vld [vmem:[%s22417_s9 + $0x10] sm:$0xff] }
 0x1f9   : > { %5135 = vmatprep.subr.bf16.mxu1 %v14499_v40  ;;  %v2978_v9 = vmul.f32 %v17907_v46, %v2928_v32  ;;  %v17928_v28 = vadd.f32 %v2929_v59, %v17771_v34  ;;  %v14514_v34 = vld [vmem:[%s22411_s3 + $0x744] ss:$8 sps:$4 sm:$0xff]   ;;  %v14509_v40 = vld [vmem:[%s22411_s3 + $0x6c0] ss:$8 sps:$4 sm:$0xff]   ;;  %5487 = vperm.xlu0 %13763, %v17947_v53   ;;  %v14515_v58 = vld [vmem:[%s22411_s3 + $0x6b0] ss:$8 sps:$4 sm:$0xff]  }
 0x1fa   : > { %v2931_v24 = vpop.f32.mrf.mxu0  ;;  %5497 = vperm.xlu1 %13764, %v17972_v44  }
 0x1fb   : > { %22548 = vst [vmem:[#allocation10_spill] sm:$0xff] %v17928_v28  ;;  %v2932_v8 = vadd.f32 %v2931_v24, %v17778_v31  ;;  %5193 = vmatpush1.bf16.msra.mxu0 %v14500_v57  ;;  %v3007_v20 = vadd.f32 %v17925_v23, %v2978_v9  ;;  %v14512_v31 = vld [vmem:[%s22411_s3 + $0x740] ss:$8 sps:$4 sm:$0xff]  }
 0x1fc   : > { %5136 = vmatpush2.bf16.msra.mxu1 %v14497_v26  ;;  %v17949_v48 = vpop.f32.mrf.mxu0  ;;  %5194 = vmatprep.subr.bf16.mxu0 %v14508_v12  ;;  %v14520_v26 = vld [vmem:[%s22411_s3 + $0x734] ss:$8 sps:$4 sm:$0xff]  }
 0x1fd   : > { %22550 = vst [vmem:[#allocation11_spill] sm:$0xff] %v17949_v48  ;;  %5137 = vmatprep.subr.bf16.mxu1 %v14505_v15  ;;  %v2980_v52 = vmul.f32 %v17907_v46, %v2932_v8  ;;  %v17977_v15 = vld [vmem:[%s22417_s9 + $0x8] sm:$0xff]  ;;  %v3023_v32 = vmax.f32 %v3007_v20, 0.0  ;;  %v18003_v8 = vld [vmem:[%s22417_s9 + $0x18] sm:$0xff]  ;;  %v18008_v20 = vld [vmem:[%s22417_s9 + $0x20] sm:$0xff] }
 0x1fe   : > { %v2937_v43 = vpop.f32.mrf.mxu0  ;;  %5087 = vmatmul.mubr.bf16.gmra.mxu0 %v22551_v55  ;;  %5492 = vperm.xlu0 %13763, %v17977_v15  }
 0x1ff   : > { %v3009_v57 = vadd.f32 %v17925_v23, %v2980_v52  ;;  %v2938_v27 = vadd.f32 %v2937_v43, %v17795_v5  ;;  %5195 = vmatpush1.bf16.msra.mxu0 %v14506_v2  ;;  %v22553_v5 = vld [vmem:[#allocation14_spill] sm:$0xff]  ;;  %5502 = vperm.xlu1 %13764, %v18003_v8  }
 0x200   : > { %5138 = vmatpush2.bf16.msra.mxu1 %v14503_v37  ;;  %v2939_v12 = vpop.f32.mrf.mxu0  ;;  %5196 = vmatprep.subr.bf16.mxu0 %v14514_v34  ;;  %v14518_v37 = vld [vmem:[%s22411_s3 + $0x730] ss:$8 sps:$4 sm:$0xff]  }
 0x201   : > { %5139 = vmatprep.subr.bf16.mxu1 %v14511_v25  ;;  %v3025_v59 = vmax.f32 %v3009_v57, 0.0  ;;  %v17980_v9 = vadd.f32 %v2939_v12, %v17811_v35  ;;  %5096 = vmatprep.mubr.bf16.mxu0 %v22553_v5  ;;  %v2982_v2 = vmul.f32 %v17907_v46, %v2938_v27  ;;  %v14523_v35 = vld [vmem:[%s22411_s3 + $0x6a4] ss:$8 sps:$4 sm:$0xff]  }
 0x202   : > { %v2941_v24 = vpop.f32.mrf.mxu0  ;;  %v14526_v25 = vld [vmem:[%s22411_s3 + $0x724] ss:$8 sps:$4 sm:$0xff]   ;;  %5507 = vperm.xlu0 %13763, %v18008_v20  }
 0x203   : > { %22552 = vst [vmem:[#allocation12_spill] sm:$0xff] %v17980_v9  ;;  %v17998_v34 = vpack.c.bf16 %v3025_v59, %v3023_v32  ;;  %5197 = vmatpush1.bf16.msra.mxu0 %v14512_v31  ;;  %v2942_v52 = vadd.f32 %v2941_v24, %v17817_v47  ;;  %v14524_v31 = vld [vmem:[%s22411_s3 + $0x720] ss:$8 sps:$4 sm:$0xff]   ;;  %v3011_v55 = vadd.f32 %v17925_v23, %v2982_v2  ;;  %v22556_v47 = vld [vmem:[#allocation16_spill] sm:$0xff] }
 0x204   : > { %5140 = vmatpush2.bf16.msra.mxu1 %v14509_v40  ;;  %v18011_v43 = vpop.f32.mrf.mxu0  ;;  %5198 = vmatprep.subr.bf16.mxu0 %v14520_v26  ;;  %v14521_v40 = vld [vmem:[%s22411_s3 + $0x6a0] ss:$8 sps:$4 sm:$0xff]   ;;  %v14532_v26 = vld [vmem:[%s22411_s3 + $0x714] ss:$8 sps:$4 sm:$0xff]   ;;  %v14632_v9 = vld [vmem:[%s22413_s5 + $0x30] ss:$8 sps:$4 sm:$0xff]  }
 0x205   : > { %22554 = vst [vmem:[#allocation14_spill] sm:$0xff] %v17998_v34  ;;  %22555 = vst [vmem:[#allocation67_spill] sm:$0xff] %v18011_v43  ;;  %5141 = vmatprep.subr.bf16.mxu1 %v14517_v13  ;;  %v2984_v57 = vmul.f32 %v17907_v46, %v2942_v52  ;;  %v14529_v13 = vld [vmem:[%s22411_s3 + $0x694] ss:$8 sps:$4 sm:$0xff]   ;;  %v18034_v32 = vld [vmem:[%s22417_s9 + $0x28] sm:$0xff] }
 0x206   : > { %v2947_v27 = vpop.f32.mrf.mxu0  ;;  %5097 = vmatmul.mubr.bf16.gmra.mxu0 %v22556_v47  ;;  %v18039_v59 = vld [vmem:[%s22417_s9 + $0x30] sm:$0xff]  ;;  %5512 = vperm.xlu1 %13764, %v18034_v32  }
 0x207   : > { %v2948_v12 = vadd.f32 %v2947_v27, %v17834_v42  ;;  %5199 = vmatpush1.bf16.msra.mxu0 %v14518_v37  ;;  %v3013_v5 = vadd.f32 %v17925_v23, %v2984_v57  ;;  %v14527_v37 = vld [vmem:[%s22411_s3 + $0x690] ss:$8 sps:$4 sm:$0xff]   ;;  %v3027_v57 = vmax.f32 %v3011_v55, 0.0  ;;  %v14538_v27 = vld [vmem:[%s22411_s3 + $0x704] ss:$8 sps:$4 sm:$0xff]   ;;  %5517 = vperm.xlu0 %13763, %v18039_v59  }
 0x208   : > { %5142 = vmatpush2.bf16.msra.mxu1 %v14515_v58  ;;  %v2949_v2 = vpop.f32.mrf.mxu0  ;;  %5200 = vmatprep.subr.bf16.mxu0 %v14526_v25  ;;  %v22558_v58 = vld [vmem:[#allocation18_spill] sm:$0xff]  ;;  %v14530_v52 = vld [vmem:[%s22411_s3 + $0x710] ss:$8 sps:$4 sm:$0xff]  }
 0x209   : > { %5143 = vmatprep.subr.bf16.mxu1 %v14523_v35  ;;  %v2986_v24 = vmul.f32 %v17907_v46, %v2948_v12  ;;  %v18044_v42 = vadd.f32 %v2949_v2, %v17850_v29  ;;  %5106 = vmatprep.mubr.bf16.mxu0 %v22558_v58  ;;  %v3029_v35 = vmax.f32 %v3013_v5, 0.0  ;;  %v14535_v29 = vld [vmem:[%s22411_s3 + $0x684] ss:$8 sps:$4 sm:$0xff]   ;;  %v18065_v55 = vld [vmem:[%s22417_s9 + $0x38] sm:$0xff] }
 0x20a   : > { %v2951_v25 = vpop.f32.mrf.mxu0  ;;  %5522 = vperm.xlu1 %13764, %v18065_v55  }
 0x20b   : > { %22557 = vst [vmem:[#allocation16_spill] sm:$0xff] %v18044_v42  ;;  %v2952_v47 = vadd.f32 %v2951_v25, %v17856_v10  ;;  %5201 = vmatpush1.bf16.msra.mxu0 %v14524_v31  ;;  %v18067_v12 = vpack.c.bf16 %v3029_v35, %v3027_v57  ;;  %v3015_v2 = vadd.f32 %v17925_v23, %v2986_v24  ;;  %v14533_v10 = vld [vmem:[%s22411_s3 + $0x680] ss:$8 sps:$4 sm:$0xff]   ;;  %v22561_v31 = vld [vmem:[#allocation20_spill] sm:$0xff] }
 0x20c   : > { %5144 = vmatpush2.bf16.msra.mxu1 %v14521_v40  ;;  %v18069_v5 = vpop.f32.mrf.mxu0  ;;  %5202 = vmatprep.subr.bf16.mxu0 %v14532_v26  ;;  %v14536_v57 = vld [vmem:[%s22411_s3 + $0x700] ss:$8 sps:$4 sm:$0xff]   ;;  %v22461_v26 = vmov 1   ;;  %v14541_v25 = vld [vmem:[%s22411_s3 + $0x7f4] ss:$8 sps:$4 sm:$0xff]  }
 0x20d   : > { %22559 = vst [vmem:[#allocation18_spill] sm:$0xff] %v18067_v12  ;;  %22560 = vst [vmem:[#allocation68_spill] sm:$0xff] %v18069_v5  ;;  %5145 = vmatprep.subr.bf16.mxu1 %v14529_v13  ;;  %v2988_v58 = vmul.f32 %v17907_v46, %v2952_v47  ;;  %v14544_v13 = vld [vmem:[%s22411_s3 + $0x874] ss:$8 sps:$4 sm:$0xff]   ;;  %13765 = vset.pattern.permute.xlu0 %v22461_v26  ;;  %v14637_v5 = vld [vmem:[%s22413_s5 + $0x144] ss:$8 sps:$4 sm:$0xff]  }
 0x20e   : > { %v2957_v40 = vpop.f32.mrf.mxu0  ;;  %5107 = vmatmul.mubr.bf16.gmra.mxu0 %v22561_v31  ;;  %v3031_v31 = vmax.f32 %v3015_v2, 0.0  ;;  %6018 = vperm.xlu0 %13765, %v17947_v53   ;;  %v14547_v53 = vld [vmem:[%s22411_s3 + $0x7e4] ss:$8 sps:$4 sm:$0xff]  }
 0x20f   : > { %v3017_v24 = vadd.f32 %v17925_v23, %v2988_v58  ;;  %v2958_v35 = vadd.f32 %v2957_v40, %v17878_v50  ;;  %5203 = vmatpush1.bf16.msra.mxu0 %v14530_v52  ;;  %v14542_v50 = vld [vmem:[%s22411_s3 + $0x870] ss:$8 sps:$4 sm:$0xff]   ;;  %13766 = vset.pattern.permute.xlu1 %v22461_v26 }
 0x210   : > { %5146 = vmatpush2.bf16.msra.mxu1 %v14527_v37  ;;  %v2959_v47 = vpop.f32.mrf.mxu0  ;;  %5204 = vmatprep.subr.bf16.mxu0 %v14538_v27  ;;  %v22563_v37 = vld [vmem:[#allocation22_spill] sm:$0xff] }
 0x211   : > { %5147 = vmatprep.subr.bf16.mxu1 %v14535_v29  ;;  %v3033_v12 = vmax.f32 %v3017_v24, 0.0  ;;  %v2990_v34 = vmul.f32 %v17907_v46, %v2958_v35  ;;  %v18092_v42 = vadd.f32 %v2959_v47, %v17897_v51  ;;  %5222 = vmatprep.mubr.bf16.mxu0 %v22563_v37  ;;  %v14539_v29 = vld [vmem:[%s22411_s3 + $0x7f0] ss:$8 sps:$4 sm:$0xff]   ;;  %v14550_v27 = vld [vmem:[%s22411_s3 + $0x864] ss:$8 sps:$4 sm:$0xff]  }
 0x212   : > { %v2961_v52 = vpop.f32.mrf.mxu0  ;;  %v14548_v24 = vld [vmem:[%s22411_s3 + $0x860] ss:$8 sps:$4 sm:$0xff]   ;;  %6022 = vperm.xlu1 %13766, %v17977_v15   ;;  %6030 = vperm.xlu0 %13765, %v18003_v8   ;;  %v14553_v15 = vld [vmem:[%s22411_s3 + $0x7d4] ss:$8 sps:$4 sm:$0xff]   ;;  %v14554_v8 = vld [vmem:[%s22411_s3 + $0x850] ss:$8 sps:$4 sm:$0xff]  }
 0x213   : > { %22562 = vst [vmem:[#allocation20_spill] sm:$0xff] %v18092_v42  ;;  %v18106_v51 = vpack.c.bf16 %v3033_v12, %v3031_v31  ;;  %v2962_v2 = vadd.f32 %v2961_v52, %v17904_v61  ;;  %5205 = vmatpush1.bf16.msra.mxu0 %v14536_v57  ;;  %v3019_v58 = vadd.f32 %v17925_v23, %v2990_v34  ;;  %v22565_v12 = vld [vmem:[#allocation23_spill] sm:$0xff]  ;;  %v22566_v34 = vld [vmem:[#allocation25_spill] sm:$0xff]  ;;  %v18131_v57 = vpop.f32.mrf.mxu1 }
 0x214   : > { %5148 = vmatpush2.bf16.msra.mxu1 %v14533_v10  ;;  %5206 = vmatprep.subr.bf16.mxu0 %v14541_v25  ;;  %v14545_v61 = vld [vmem:[%s22411_s3 + $0x7e0] ss:$8 sps:$4 sm:$0xff]   ;;  %v14556_v10 = vld [vmem:[%s22411_s3 + $0x854] ss:$8 sps:$4 sm:$0xff]   ;;  %22567 = vst [vmem:[#allocation23_spill] sm:$0xff] %v18131_v57 }
 0x215   : > { %22564 = vst [vmem:[#allocation22_spill] sm:$0xff] %v18106_v51  ;;  %5263 = vmatprep.subr.bf16.mxu1 %v14544_v13  ;;  %v2992_v40 = vmul.f32 %v17907_v46, %v2962_v2  ;;  %v3035_v13 = vmax.f32 %v3019_v58, 0.0  ;;  %v14551_v25 = vld [vmem:[%s22411_s3 + $0x7d0] ss:$8 sps:$4 sm:$0xff]   ;;  %v14562_v47 = vld [vmem:[%s22411_s3 + $0x844] ss:$8 sps:$4 sm:$0xff]  }
 0x216   : > { %6026 = vperm.xlu1 %13766, %v17972_v44   ;;  %6038 = vperm.xlu0 %13765, %v18034_v32   ;;  %v14560_v44 = vld [vmem:[%s22411_s3 + $0x840] ss:$8 sps:$4 sm:$0xff]   ;;  %v14566_v2 = vld [vmem:[%s22411_s3 + $0x830] ss:$8 sps:$4 sm:$0xff]   ;;  %v14574_v58 = vld [vmem:[%s22411_s3 + $0x824] ss:$8 sps:$4 sm:$0xff]  }
 0x217   : > { %5150 = vmatmul.mubr.bf16.vlgmr.msra.gmra.mxu1 %v22565_v12  ;;  %v3021_v46 = vadd.f32 %v17925_v23, %v2992_v40  ;;  %5207 = vmatpush2.bf16.msra.mxu0 %v14539_v29  ;;  %v18137_v23 = vpop.f32.mrf.mxu1  ;;  %v22569_v52 = vld [vmem:[#allocation27_spill] sm:$0xff]  ;;  %v14568_v29 = vld [vmem:[%s22411_s3 + $0x834] ss:$8 sps:$4 sm:$0xff]  }
 0x218   : > { %5264 = vmatpush1.bf16.msra.mxu1 %v14542_v50  ;;  %5159 = vmatprep.mubr.bf16.mxu1 %v22566_v34  ;;  %v14559_v50 = vld [vmem:[%s22411_s3 + $0x7c4] ss:$8 sps:$4 sm:$0xff]   ;;  %v14557_v32 = vld [vmem:[%s22411_s3 + $0x7c0] ss:$8 sps:$4 sm:$0xff]   ;;  %v22571_v12 = vld [vmem:[#allocation33_spill] sm:$0xff] }
 0x219   : > { %5265 = vmatprep.subr.bf16.mxu1 %v14550_v27  ;;  %v3037_v35 = vmax.f32 %v3021_v46, 0.0  ;;  %5208 = vmatprep.subr.bf16.mxu0 %v14547_v53  ;;  %v18155_v37 = vpop.f32.mrf.mxu1  ;;  %v22570_v27 = vld [vmem:[#allocation31_spill] sm:$0xff]  ;;  %v14577_v46 = vld [vmem:[%s22411_s3 + $0x794] ss:$8 sps:$4 sm:$0xff]  }
 0x21a   : > { %6034 = vperm.xlu1 %13766, %v18008_v20   ;;  %6046 = vperm.xlu0 %13765, %v18065_v55   ;;  %v14565_v20 = vld [vmem:[%s22411_s3 + $0x7b4] ss:$8 sps:$4 sm:$0xff]   ;;  %v14563_v55 = vld [vmem:[%s22411_s3 + $0x7b0] ss:$8 sps:$4 sm:$0xff]   ;;  %v14571_v40 = vld [vmem:[%s22411_s3 + $0x7a4] ss:$8 sps:$4 sm:$0xff]  }
 0x21b   : > { %v18146_v31 = vpack.c.bf16 %v3037_v35, %v3035_v13  ;;  %5209 = vmatpush2.bf16.msra.mxu0 %v14545_v61  ;;  %v4717_v53 = vpop.f32.mrf.mxu1  ;;  %v14569_v61 = vld [vmem:[%s22411_s3 + $0x7a0] ss:$8 sps:$4 sm:$0xff]   ;;  %v14575_v13 = vld [vmem:[%s22411_s3 + $0x790] ss:$8 sps:$4 sm:$0xff]   ;;  %v14583_v35 = vld [vmem:[%s22411_s3 + $0x784] ss:$8 sps:$4 sm:$0xff]  }
 0x21c   : > { %5266 = vmatpush1.bf16.msra.mxu1 %v14548_v24  ;;  %5210 = vmatprep.subr.bf16.mxu0 %v14553_v15  ;;  %v14578_v15 = vld [vmem:[%s22411_s3 + $0x810] ss:$8 sps:$4 sm:$0xff]  }
 0x21d   : > { %22568 = vst [vmem:[#allocation25_spill] sm:$0xff] %v18146_v31  ;;  %5267 = vmatprep.subr.bf16.mxu1 %v14556_v10  ;;  %v18187_v24 = vpop.f32.mrf.mxu1  ;;  %v14580_v10 = vld [vmem:[%s22411_s3 + $0x814] ss:$8 sps:$4 sm:$0xff]  }
 0x21e   : > { %6042 = vperm.xlu1 %13766, %v18039_v59   ;;  %13768 = vset.pattern.permute.xlu0 %v22511_v17  ;;  %v14572_v59 = vld [vmem:[%s22411_s3 + $0x820] ss:$8 sps:$4 sm:$0xff]  }
 0x21f   : > { %5160 = vmatmul.mubr.bf16.gmra.mxu1 %v22569_v52  ;;  %5211 = vmatpush2.bf16.msra.mxu0 %v14551_v25  ;;  %v4723_v34 = vpop.f32.mrf.mxu1  ;;  %v14584_v25 = vld [vmem:[%s22411_s3 + $0x800] ss:$8 sps:$4 sm:$0xff]   ;;  %v18220_v52 = vpop.f32.mrf.mxu0 }
 0x220   : > { %5268 = vmatpush1.bf16.msra.mxu1 %v14554_v8  ;;  %5169 = vmatprep.mubr.bf16.mxu1 %v22570_v27  ;;  %22573 = vst [vmem:[#allocation27_spill] sm:$0xff] %v18220_v52  ;;  %v14625_v52 = vld [vmem:[%s22413_s5 + $0x164] ss:$8 sps:$4 sm:$0xff]  }
 0x221   : > { %5269 = vmatprep.subr.bf16.mxu1 %v14562_v47  ;;  %5212 = vmatprep.subr.bf16.mxu0 %v14559_v50  ;;  %v4725_v8 = vpop.f32.mrf.mxu1  ;;  %v22572_v47 = vld [vmem:[#allocation38_spill] sm:$0xff] }
 0x222   : > { %13767 = vset.pattern.permute.xlu1 %v22511_v17  ;;  %v14581_v50 = vld [vmem:[%s22411_s3 + $0x780] ss:$8 sps:$4 sm:$0xff]  }
 0x223   : > { %5213 = vmatpush2.bf16.msra.mxu0 %v14557_v32 }
 0x224   : > { %5270 = vmatpush1.bf16.msra.mxu1 %v14560_v44  ;;  %5214 = vmatprep.subr.bf16.mxu0 %v14565_v20  ;;  %v4727_v44 = vpop.f32.mrf.mxu1  ;;  %v22574_v20 = vld [vmem:[#allocation24_spill] sm:$0xff] }
 0x225   : > { %5271 = vmatprep.subr.bf16.mxu1 %v14568_v29 }
 0x226   : > { %v18222_v32 = vpop.f32.mrf.mxu1 }
 0x227   : > { %5170 = vmatmul.mubr.bf16.gmra.mxu1 %v22571_v12  ;;  %5215 = vmatpush2.bf16.msra.mxu0 %v14563_v55  ;;  %v22575_v55 = vld [vmem:[#allocation26_spill] sm:$0xff] }
 0x228   : > { %5272 = vmatpush1.bf16.msra.mxu1 %v14566_v2  ;;  %5179 = vmatprep.mubr.bf16.mxu1 %v17019_v18  ;;  %v14586_v18 = vld [vmem:[%s22411_s3 + $0x804] ss:$8 sps:$4 sm:$0xff]  }
 0x229   : > { %5273 = vmatprep.subr.bf16.mxu1 %v14574_v58  ;;  %5216 = vmatprep.subr.bf16.mxu0 %v14571_v40  ;;  %v4733_v58 = vpop.f32.mrf.mxu1 }
 0x22b   : > { %5217 = vmatpush2.bf16.msra.mxu0 %v14569_v61 }
 0x22c   : > { %5274 = vmatpush1.bf16.msra.mxu1 %v14572_v59  ;;  %5218 = vmatprep.subr.bf16.mxu0 %v14577_v46 }
 0x22d   : > { %5275 = vmatprep.subr.bf16.mxu1 %v14580_v10  ;;  %v4735_v10 = vpop.f32.mrf.mxu1 }
 0x22f   : > { %5180 = vmatmul.mubr.bf16.gmra.mxu1 %v22572_v47  ;;  %5219 = vmatpush2.bf16.msra.mxu0 %v14575_v13 }
 0x230   : > { %5276 = vmatpush1.bf16.msra.mxu1 %v14578_v15  ;;  %5295 = vmatprep.mubr.bf16.mxu1 %v22511_v17  ;;  %v22576_v15 = vld [vmem:[#allocation42_spill] sm:$0xff] }
 0x231   : > { %5277 = vmatprep.subr.bf16.mxu1 %v14586_v18  ;;  %5220 = vmatprep.subr.bf16.mxu0 %v14583_v35  ;;  %v22578_v18 = vld [vmem:[#allocation32_spill] sm:$0xff]  ;;  %v4737_v35 = vpop.f32.mrf.mxu1 }
 0x233   : > { %5221 = vmatpush2.bf16.msra.mxu0 %v14581_v50 }
 0x234   : > { %5278 = vmatpush1.bf16.msra.mxu1 %v14584_v25 }
 0x236   : > { %v4786_v29 = vpop.f32.mrf.mxu0  ;;  %5223 = vmatmul.mubr.bf16.vlgmr.msra.gmra.mxu0 %v22574_v20  ;;  %v22579_v20 = vld [vmem:[#allocation43_spill] sm:$0xff] }
 0x237   : > { %5296 = vmatmul.mubr.bf16.vlgmr.msra.gmra.mxu1 %v17085_v49  ;;  %v4787_v27 = vadd.f32 %v4786_v29, %v18137_v23  ;;  %5232 = vmatprep.mubr.bf16.mxu0 %v22575_v55  ;;  %v22577_v23 = vld [vmem:[#allocation28_spill] sm:$0xff] }
 0x238   : > { %5305 = vmatprep.mubr.bf16.mxu1 %v22511_v17  ;;  %v4788_v2 = vpop.f32.mrf.mxu0 }
 0x239   : > { %v4789_v40 = vadd.f32 %v4788_v2, %v18155_v37 }
 0x23a   : > { %v4790_v59 = vpop.f32.mrf.mxu0 }
 0x23b   : > { %v4791_v12 = vadd.f32 %v4790_v59, %v4717_v53  ;;  %v18238_v53 = vpop.f32.mrf.mxu1 }
 0x23c   : > { %v18230_v61 = vpop.f32.mrf.mxu0 }
 0x23d   : > { %v4743_v59 = vpop.f32.mrf.mxu1 }
 0x23e   : > { %v4796_v46 = vpop.f32.mrf.mxu0  ;;  %5233 = vmatmul.mubr.bf16.gmra.mxu0 %v22577_v23 }
 0x23f   : > { %5306 = vmatmul.mubr.bf16.gmra.mxu1 %v22576_v15  ;;  %v4797_v49 = vadd.f32 %v4796_v46, %v4723_v34  ;;  %5242 = vmatprep.mubr.bf16.mxu0 %v22578_v18  ;;  %v22580_v34 = vld [vmem:[#allocation34_spill] sm:$0xff]  ;;  %v22581_v46 = vld [vmem:[#allocation37_spill] sm:$0xff] }
 0x240   : > { %5315 = vmatprep.mubr.bf16.mxu1 %v22511_v17  ;;  %v4798_v13 = vpop.f32.mrf.mxu0 }
 0x241   : > { %v4799_v25 = vadd.f32 %v4798_v13, %v4725_v8 }
 0x242   : > { %v4800_v47 = vpop.f32.mrf.mxu0 }
 0x243   : > { %v4801_v37 = vadd.f32 %v4800_v47, %v4727_v44  ;;  %v4745_v44 = vpop.f32.mrf.mxu1  ;;  %v22582_v47 = vld [vmem:[#allocation44_spill] sm:$0xff] }
 0x244   : > { %v18236_v50 = vpop.f32.mrf.mxu0 }
 0x246   : > { %v4806_v29 = vpop.f32.mrf.mxu0  ;;  %5243 = vmatmul.mubr.bf16.gmra.mxu0 %v22580_v34 }
 0x247   : > { %5316 = vmatmul.mubr.bf16.gmra.mxu1 %v22579_v20  ;;  %v4807_v2 = vadd.f32 %v4806_v29, %v4733_v58  ;;  %5252 = vmatprep.mubr.bf16.mxu0 %v22581_v46  ;;  %v22583_v20 = vld [vmem:[#allocation39_spill] sm:$0xff]  ;;  %v4747_v58 = vpop.f32.mrf.mxu1 }
 0x248   : > { %5325 = vmatprep.mubr.bf16.mxu1 %v22511_v17  ;;  %v4808_v55 = vpop.f32.mrf.mxu0 }
 0x249   : > { %v4809_v15 = vadd.f32 %v4808_v55, %v4735_v10  ;;  %v18248_v51 = vpop.f32.mrf.mxu1 }
 0x24a   : > { %v4810_v8 = vpop.f32.mrf.mxu0 }
 0x24b   : > { %v4811_v23 = vadd.f32 %v4810_v8, %v4737_v35  ;;  %v14589_v8 = vld [vmem:[%s22413_s5 + $0x134] ss:$8 sps:$4 sm:$0xff]  }
 0x24c   : > { %v18244_v13 = vpop.f32.mrf.mxu0  ;;  %5911 = vmatprep.subr.bf16.mxu1 %v14589_v8 }
 0x24e   : > { %v4816_v18 = vpop.f32.mrf.mxu0  ;;  %5253 = vmatmul.mubr.bf16.gmra.mxu0 %v22583_v20 }
 0x24f   : > { %5326 = vmatmul.mubr.bf16.gmra.mxu1 %v22582_v47  ;;  %v4817_v26 = vadd.f32 %v4816_v18, %v4743_v59  ;;  %v14587_v18 = vld [vmem:[%s22413_s5 + $0x130] ss:$8 sps:$4 sm:$0xff]   ;;  %v14590_v47 = vld [vmem:[%s22413_s5 + $0x120] ss:$8 sps:$4 sm:$0xff]  }
 0x250   : > { %v4818_v29 = vpop.f32.mrf.mxu0  ;;  %5912 = vmatpush1.bf16.msra.mxu1 %v14587_v18  ;;  %v14596_v18 = vld [vmem:[%s22413_s5 + $0x100] ss:$8 sps:$4 sm:$0xff]  }
 0x251   : > { %v4819_v34 = vadd.f32 %v4818_v29, %v4745_v44  ;;  %v14595_v29 = vld [vmem:[%s22413_s5 + $0x114] ss:$8 sps:$4 sm:$0xff]  }
 0x252   : > { %v4820_v17 = vpop.f32.mrf.mxu0 }
 0x253   : > { %v4821_v31 = vadd.f32 %v4820_v17, %v4747_v58 }
 0x254   : > { %v18322_v42 = vpop.f32.mrf.mxu0 }
 0x257   : > { %v4859_v46 = vpop.f32.mrf.mxu1 }
 0x258   : > { %v18250_v10 = vadd.f32 %v4859_v46, %v4787_v27  ;;  %v14592_v27 = vld [vmem:[%s22413_s5 + $0x124] ss:$8 sps:$4 sm:$0xff]  }
 0x259   : > { %v4861_v35 = vpop.f32.mrf.mxu1  ;;  %5913 = vmatprep.subr.bf16.mxu1 %v14592_v27 }
 0x25a   : > { %v18252_v55 = vadd.f32 %v4861_v35, %v4789_v40  ;;  %5914 = vmatpush1.bf16.msra.mxu1 %v14590_v47  ;;  %v14593_v35 = vld [vmem:[%s22413_s5 + $0x110] ss:$8 sps:$4 sm:$0xff]   ;;  %v14601_v47 = vld [vmem:[%s22413_s5 + $0xf4] ss:$8 sps:$4 sm:$0xff]  }
 0x25b   : > { %v4863_v59 = vpop.f32.mrf.mxu1  ;;  %5915 = vmatprep.subr.bf16.mxu1 %v14595_v29  ;;  %v14599_v29 = vld [vmem:[%s22413_s5 + $0xf0] ss:$8 sps:$4 sm:$0xff]  }
 0x25c   : > { %v18260_v44 = vadd.f32 %v4863_v59, %v4791_v12 }
 0x25d   : > { %v18262_v17 = vpop.f32.mrf.mxu1 }
 0x25e   : > { %5916 = vmatpush1.bf16.msra.mxu1 %v14593_v35 }
 0x25f   : > { %v4869_v40 = vpop.f32.mrf.mxu1 }
 0x260   : > { %v18270_v20 = vadd.f32 %v4869_v40, %v4797_v49  ;;  %v14598_v49 = vld [vmem:[%s22413_s5 + $0x104] ss:$8 sps:$4 sm:$0xff]  }
 0x261   : > { %v4871_v58 = vpop.f32.mrf.mxu1  ;;  %5917 = vmatprep.subr.bf16.mxu1 %v14598_v49  ;;  %v14602_v49 = vld [vmem:[%s22413_s5 + $0xe0] ss:$8 sps:$4 sm:$0xff]  }
 0x262   : > { %v18272_v12 = vadd.f32 %v4871_v58, %v4799_v25  ;;  %5918 = vmatpush1.bf16.msra.mxu1 %v14596_v18 }
 0x263   : > { %v4873_v46 = vpop.f32.mrf.mxu1  ;;  %5919 = vmatprep.subr.bf16.mxu1 %v14601_v47 }
 0x264   : > { %v18280_v8 = vadd.f32 %v4873_v46, %v4801_v37 }
 0x265   : > { %v18282_v59 = vpop.f32.mrf.mxu1 }
 0x266   : > { %5920 = vmatpush1.bf16.msra.mxu1 %v14599_v29 }
 0x267   : > { %v4879_v25 = vpop.f32.mrf.mxu1 }
 0x268   : > { %v18290_v27 = vadd.f32 %v4879_v25, %v4807_v2  ;;  %v14604_v2 = vld [vmem:[%s22413_s5 + $0xe4] ss:$8 sps:$4 sm:$0xff]  }
 0x269   : > { %v4881_v40 = vpop.f32.mrf.mxu1  ;;  %5921 = vmatprep.subr.bf16.mxu1 %v14604_v2 }
 0x26a   : > { %v18292_v37 = vadd.f32 %v4881_v40, %v4809_v15  ;;  %5922 = vmatpush1.bf16.msra.mxu1 %v14602_v49  ;;  %v14607_v40 = vld [vmem:[%s22413_s5 + $0xd4] ss:$8 sps:$4 sm:$0xff]  }
 0x26b   : > { %v4883_v58 = vpop.f32.mrf.mxu1  ;;  %5923 = vmatprep.subr.bf16.mxu1 %v14607_v40 }
 0x26c   : > { %v18300_v46 = vadd.f32 %v4883_v58, %v4811_v23  ;;  %v14605_v58 = vld [vmem:[%s22413_s5 + $0xd0] ss:$8 sps:$4 sm:$0xff]  }
 0x26d   : > { %v18302_v35 = vpop.f32.mrf.mxu1 }
 0x26e   : > { %5924 = vmatpush1.bf16.msra.mxu1 %v14605_v58  ;;  %v14617_v58 = vld [vmem:[%s22413_s5 + $0x170] ss:$8 sps:$4 sm:$0xff]  }
 0x26f   : > { %v4889_v15 = vpop.f32.mrf.mxu1 }
 0x270   : > { %v18310_v25 = vadd.f32 %v4889_v15, %v4817_v26  ;;  %v14610_v26 = vld [vmem:[%s22413_s5 + $0x74] ss:$8 sps:$4 sm:$0xff]   ;;  %v14608_v15 = vld [vmem:[%s22413_s5 + $0x70] ss:$8 sps:$4 sm:$0xff]  }
 0x271   : > { %v4891_v18 = vpop.f32.mrf.mxu1  ;;  %5706 = vmatprep.subr.bf16.mxu0 %v14610_v26  ;;  %v14619_v26 = vld [vmem:[%s22413_s5 + $0x174] ss:$8 sps:$4 sm:$0xff]  }
 0x272   : > { %v18312_v23 = vadd.f32 %v4891_v18, %v4819_v34  ;;  %v14613_v34 = vld [vmem:[%s22413_s5 + $0xc4] ss:$8 sps:$4 sm:$0xff]   ;;  %5707 = vmatpush1.bf16.msra.mxu0 %v14608_v15 }
 0x273   : > { %v4893_v47 = vpop.f32.mrf.mxu1  ;;  %5925 = vmatprep.subr.bf16.mxu1 %v14613_v34  ;;  %v14616_v18 = vld [vmem:[%s22413_s5 + $0x64] ss:$8 sps:$4 sm:$0xff]  }
 0x274   : > { %v18320_v29 = vadd.f32 %v4893_v47, %v4821_v31  ;;  %v14611_v31 = vld [vmem:[%s22413_s5 + $0xc0] ss:$8 sps:$4 sm:$0xff]   ;;  %5708 = vmatprep.subr.bf16.mxu0 %v14616_v18  ;;  %v14620_v18 = vld [vmem:[%s22413_s5 + $0x50] ss:$8 sps:$4 sm:$0xff]  }
 0x275   : > { %5926 = vmatpush1.bf16.msra.mxu1 %v14611_v31  ;;  %v14614_v47 = vld [vmem:[%s22413_s5 + $0x60] ss:$8 sps:$4 sm:$0xff]   ;;  %v14622_v31 = vld [vmem:[%s22413_s5 + $0x54] ss:$8 sps:$4 sm:$0xff]  }
 0x276   : > { %v18330_v2 = vpop.f32.mrf.mxu0  ;;  %5935 = vmatprep.subr.bf16.mxu1 %v14619_v26  ;;  %5709 = vmatpush1.bf16.msra.mxu0 %v14614_v47  ;;  %v14623_v47 = vld [vmem:[%s22413_s5 + $0x160] ss:$8 sps:$4 sm:$0xff]  }
 0x277   : > { %5710 = vmatprep.subr.bf16.mxu0 %v14622_v31 }
 0x278   : > { %v18338_v49 = vpop.f32.mrf.mxu0 }
 0x279   : > { %5936 = vmatpush2.bf16.msra.mxu1 %v14617_v58 }
 0x27a   : > { %v18343_v40 = vpop.f32.mrf.mxu0  ;;  %5937 = vmatprep.subr.bf16.mxu1 %v14625_v52  ;;  %5711 = vmatpush1.bf16.msra.mxu0 %v14620_v18  ;;  %v14629_v52 = vld [vmem:[%s22413_s5 + $0x150] ss:$8 sps:$4 sm:$0xff]  }
 0x27c   : > { %v18354_v34 = vpop.f32.mrf.mxu0 }
 0x27d   : > { %5938 = vmatpush2.bf16.msra.mxu1 %v14623_v47  ;;  %v14634_v47 = vld [vmem:[%s22413_s5 + $0x34] ss:$8 sps:$4 sm:$0xff]  }
 0x27e   : > { %v4942_v15 = vpop.f32.mrf.mxu0 }
 0x27f   : > { %v4943_v57 = vadd.f32 %v4942_v15, %v18270_v20  ;;  %v14628_v20 = vld [vmem:[%s22413_s5 + $0x44] ss:$8 sps:$4 sm:$0xff]   ;;  %v14631_v15 = vld [vmem:[%s22413_s5 + $0x154] ss:$8 sps:$4 sm:$0xff]  }
 0x280   : > { %v18369_v58 = vpop.f32.mrf.mxu0  ;;  %5712 = vmatprep.subr.bf16.mxu0 %v14628_v20  ;;  %5939 = vmatprep.subr.bf16.mxu1 %v14631_v15 }
 0x281   : > { %5713 = vmatpush1.bf16.msra.mxu0 %v14626_v11  ;;  %5940 = vmatpush2.bf16.msra.mxu1 %v14629_v52  ;;  %v14635_v11 = vld [vmem:[%s22413_s5 + $0x140] ss:$8 sps:$4 sm:$0xff]  }
 0x282   : > { %v18371_v26 = vpop.f32.mrf.mxu0  ;;  %5714 = vmatprep.subr.bf16.mxu0 %v14634_v47  ;;  %5941 = vmatprep.subr.bf16.mxu1 %v14637_v5  ;;  %v14641_v5 = vld [vmem:[%s22413_s5 + $0x10] ss:$8 sps:$4 sm:$0xff]   ;;  %v18419_v47 = vpop.f32.mrf.mxu1 }
 0x284   : > { %v18385_v31 = vpop.f32.mrf.mxu0 }
 0x285   : > { %5715 = vmatpush1.bf16.msra.mxu0 %v14632_v9  ;;  %5942 = vmatpush2.bf16.msra.mxu1 %v14635_v11  ;;  %v14643_v9 = vld [vmem:[%s22413_s5 + $0x14] ss:$8 sps:$4 sm:$0xff]  }
 0x286   : > { %v4952_v18 = vpop.f32.mrf.mxu0 }
 0x287   : > { %v4953_v33 = vadd.f32 %v4952_v18, %v18290_v27  ;;  %v14640_v27 = vld [vmem:[%s22413_s5 + $0x24] ss:$8 sps:$4 sm:$0xff]  }
 0x288   : > { %v18400_v20 = vpop.f32.mrf.mxu0  ;;  %5716 = vmatprep.subr.bf16.mxu0 %v14640_v27  ;;  %v14644_v27 = vld [vmem:[%s22413_s5] ss:$8 sps:$4 sm:$0xff]  }
 0x289   : > { %5717 = vmatpush1.bf16.msra.mxu0 %v14638_v56  ;;  %v14646_v56 = vld [vmem:[%s22413_s5 + $0x4] ss:$8 sps:$4 sm:$0xff]  }
 0x28a   : > { %v18402_v15 = vpop.f32.mrf.mxu0  ;;  %5718 = vmatprep.subr.bf16.mxu0 %v14643_v9 }
 0x28c   : > { %v18404_v52 = vpop.f32.mrf.mxu0 }
 0x28d   : > { %5719 = vmatpush1.bf16.msra.mxu0 %v14641_v5 }
 0x28e   : > { %v4962_v16 = vpop.f32.mrf.mxu0  ;;  %5720 = vmatprep.subr.bf16.mxu0 %v14646_v56  ;;  %v14652_v56 = vld [vmem:[%s22413_s5 + $0xa4] ss:$8 sps:$4 sm:$0xff]  }
 0x28f   : > { %v4963_v18 = vadd.f32 %v4962_v16, %v18310_v25 }
 0x291   : > { %5721 = vmatpush1.bf16.msra.mxu0 %v14644_v27  ;;  %v14650_v27 = vld [vmem:[%s22413_s5 + $0xa0] ss:$8 sps:$4 sm:$0xff]  }
 0x292   : > { %5730 = vmatprep.subr.bf16.mxu0 %v14649_v30  ;;  %v14653_v30 = vld [vmem:[%s22413_s5 + $0x90] ss:$8 sps:$4 sm:$0xff]  }
 0x295   : > { %5731 = vmatpush2.bf16.msra.mxu0 %v14647_v1  ;;  %v14655_v1 = vld [vmem:[%s22413_s5 + $0x94] ss:$8 sps:$4 sm:$0xff]  }
 0x296   : > { %5732 = vmatprep.subr.bf16.mxu0 %v14652_v56  ;;  %v14656_v56 = vld [vmem:[%s22413_s5 + $0x80] ss:$8 sps:$4 sm:$0xff]  }
 0x297   : > { %v18421_v11 = vpop.f32.mrf.mxu1 }
 0x299   : > { %v18423_v16 = vpop.f32.mrf.mxu1  ;;  %5733 = vmatpush2.bf16.msra.mxu0 %v14650_v27 }
 0x29a   : > { %5734 = vmatprep.subr.bf16.mxu0 %v14655_v1  ;;  %v18478_v1 = vpop.f32.mrf.mxu0 }
 0x29b   : > { %v18428_v25 = vpop.f32.mrf.mxu1 }
 0x29c   : > { %v18482_v4 = vpop.f32.mrf.mxu0 }
 0x29d   : > { %v18433_v54 = vpop.f32.mrf.mxu1  ;;  %5735 = vmatpush2.bf16.msra.mxu0 %v14653_v30 }
 0x29e   : > { %v18484_v19 = vpop.f32.mrf.mxu0 }
 0x29f   : > { %v5015_v9 = vpop.f32.mrf.mxu1 }
 0x2a0   : > { %v18435_v5 = vadd.f32 %v5015_v9, %v4943_v57 }
 0x2a1   : > { %v18440_v43 = vpop.f32.mrf.mxu1 }
 0x2a2   : > { %22584 = vst [vmem:[#allocation31_spill] sm:$0xff] %v18435_v5 }
 0x2a3   : > { %v18445_v21 = vpop.f32.mrf.mxu1 }
 0x2a5   : > { %v18450_v57 = vpop.f32.mrf.mxu1 }
 0x2a7   : > { %v5025_v9 = vpop.f32.mrf.mxu1 }
 0x2a8   : > { %v18455_v45 = vadd.f32 %v5025_v9, %v4953_v33  ;;  %v14658_v33 = vld [vmem:[%s22413_s5 + $0x84] ss:$8 sps:$4 sm:$0xff]   ;;  %v14661_v9 = vld [vmem:[%s22413_s5 + $0x1f4] ss:$8 sps:$4 sm:$0xff]  }
 0x2a9   : > { %v18463_v36 = vpop.f32.mrf.mxu1  ;;  %5736 = vmatprep.subr.bf16.mxu0 %v14658_v33 }
 0x2aa   : > { %22585 = vst [vmem:[#allocation33_spill] sm:$0xff] %v18455_v45  ;;  %5737 = vmatpush2.bf16.msra.mxu0 %v14656_v56 }
 0x2ab   : > { %v18465_v0 = vpop.f32.mrf.mxu1  ;;  %6230 = vmatprep.subr.bf16.mxu0 %v14661_v9 }
 0x2ad   : > { %v18473_v27 = vpop.f32.mrf.mxu1 }
 0x2af   : > { %v5035_v22 = vpop.f32.mrf.mxu1 }
 0x2b0   : > { %v18480_v30 = vadd.f32 %v5035_v22, %v4963_v18 }
 0x2b1   : > { %v18494_v48 = vpop.f32.mrf.mxu1 }
 0x2b2   : > { %22586 = vst [vmem:[#allocation38_spill] sm:$0xff] %v18480_v30 }
 0x2b3   : > { %v18498_v22 = vpop.f32.mrf.mxu1 }
 0x2b5   : > { %v18502_v9 = vpop.f32.mrf.mxu1 }
 0x2b6   : > { %v5078_v39 = vpop.f32.mrf.mxu0  ;;  %22591 = vst [vmem:[#allocation32_spill] sm:$0xff] %v18502_v9 }
 0x2b8   : > { %v18486_v62 = vpop.f32.mrf.mxu0 }
 0x2ba   : > { %v18488_v6 = vpop.f32.mrf.mxu0 }
 0x2bc   : > { %v18490_v33 = vpop.f32.mrf.mxu0 }
 0x2bd   : > { %22587 = vst [vmem:[#allocation24_spill] sm:$0xff] %v18490_v33 }
 0x2be   : > { %v18492_v28 = vpop.f32.mrf.mxu0 }
 0x2bf   : > { %22588 = vst [vmem:[#allocation26_spill] sm:$0xff] %v18492_v28 }
 0x2c0   : > { %v18496_v56 = vpop.f32.mrf.mxu0 }
 0x2c1   : > { %22589 = vst [vmem:[#allocation42_spill] sm:$0xff] %v18496_v56 }
 0x2c2   : > { %v18500_v18 = vpop.f32.mrf.mxu0 }
 0x2c3   : > { %22590 = vst [vmem:[#allocation28_spill] sm:$0xff] %v18500_v18 }
 0x2c4   : > { %v18504_v60 = vpop.f32.mrf.mxu0 }
 0x2c5   : > { %22592 = vst [vmem:[#allocation43_spill] sm:$0xff] %v18504_v60 }
 0x2c6   : > { %v18508_v7 = vpop.f32.mrf.mxu0 }
 0x2c7   : > { %22593 = vst [vmem:[#allocation34_spill] sm:$0xff] %v18508_v7 }
 0x2c8   : > { %v18514_v45 = vpop.f32.mrf.mxu0 }
 0x2c9   : > { %22596 = vst [vmem:[#allocation39_spill] sm:$0xff] %v18514_v45 }
 0x2ca   : > { %v18520_v18 = vpop.f32.mrf.mxu0 }
 0x2cc   : > { %v18526_v33 = vpop.f32.mrf.mxu0 }
 0x2d7   : > { %v5151_v63 = vpop.f32.mrf.mxu1 }
 0x2d9   : > { %v18506_v3 = vpop.f32.mrf.mxu1 }
 0x2db   : > { %v18510_v14 = vpop.f32.mrf.mxu1 }
 0x2dc   : > { %22594 = vst [vmem:[#allocation37_spill] sm:$0xff] %v18510_v14  ;;  %v18532_v14 = vpop.f32.mrf.mxu0 }
 0x2dd   : > { %v18512_v30 = vpop.f32.mrf.mxu1 }
 0x2de   : > { %22595 = vst [vmem:[#allocation44_spill] sm:$0xff] %v18512_v30 }
 0x2df   : > { %v18516_v56 = vpop.f32.mrf.mxu1 }
 0x2e0   : > { %22597 = vst [vmem:[#allocation69_spill] sm:$0xff] %v18516_v56  ;;  %v18542_v56 = vpop.f32.mrf.mxu0 }
 0x2e1   : > { %v18518_v28 = vpop.f32.mrf.mxu1 }
 0x2e2   : > { %22598 = vst [vmem:[#allocation70_spill] sm:$0xff] %v18518_v28  ;;  %v4793_v28 = vadd.f32 %v18230_v61, %v18187_v24  ;;  %v12872_v24 = vld [vmem:[%s22412_s4 + $0x1] ss:$2 sm:$0x3] }
 0x2e3   : > { %v18522_v5 = vpop.f32.mrf.mxu1 }
 0x2e4   : > { %22599 = vst [vmem:[#allocation71_spill] sm:$0xff] %v18522_v5  ;;  %v4803_v5 = vadd.f32 %v18236_v50, %v18222_v32  ;;  %v18557_v32 = vsub.s32 1, %v17864_v41  ;;  %v4866_v61 = vadd.f32 %v18262_v17, %v4793_v28  ;;  %v18571_v41 = vpop.f32.mrf.mxu0 }
 0x2e5   : > { %v18524_v60 = vpop.f32.mrf.mxu1 }
 0x2e6   : > { %22600 = vst [vmem:[#allocation72_spill] sm:$0xff] %v18524_v60  ;;  %v4813_v60 = vadd.f32 %v18244_v13, %v18238_v53  ;;  %22606 = vst [vmem:[#allocation78_spill] sm:$0xff] %v18557_v32  ;;  %v4876_v50 = vadd.f32 %v18282_v59, %v4803_v5  ;;  %v4935_v13 = vadd.f32 %v18338_v49, %v18252_v55 }
 0x2e7   : > { %v18528_v9 = vpop.f32.mrf.mxu1  ;;  %v4945_v55 = vadd.f32 %v18369_v58, %v18272_v12  ;;  %v4957_v49 = vadd.f32 %v18402_v15, %v18300_v46  ;;  %v5114_v46 = vpop.f32.mrf.mxu0 }
 0x2e8   : > { %22601 = vst [vmem:[#allocation73_spill] sm:$0xff] %v18528_v9  ;;  %v4886_v53 = vadd.f32 %v18302_v35, %v4813_v60  ;;  %v18577_v60 = vrot.slane %v12872_v24, %v17881_v38  ;;  %v4947_v35 = vadd.f32 %v18371_v26, %v18280_v8  ;;  %v4967_v8 = vadd.f32 %v18482_v4, %v18320_v29 }
 0x2e9   : > { %v18530_v7 = vpop.f32.mrf.mxu1  ;;  %v5018_v15 = vadd.f32 %v18440_v43, %v4945_v55  ;;  %v5030_v29 = vadd.f32 %v18465_v0, %v4957_v49  ;;  %v18637_v0 = vld [vmem:[%s22418_s10 + $0x20] sm:$0xff] }
 0x2ea   : > { %22602 = vst [vmem:[#allocation74_spill] sm:$0xff] %v18530_v7  ;;  %v4823_v7 = vadd.f32 %v18322_v42, %v18248_v51  ;;  %v4933_v51 = vadd.f32 %v18330_v2, %v18250_v10  ;;  %v4939_v10 = vadd.f32 %v18354_v34, %v4866_v61  ;;  %v4949_v2 = vadd.f32 %v18385_v31, %v4876_v50  ;;  %v22610_v50 = vld [vmem:[#allocation26_spill] sm:$0xff] }
 0x2eb   : > { %v18534_v30 = vpop.f32.mrf.mxu1  ;;  %v4959_v12 = vadd.f32 %v18404_v52, %v4886_v53  ;;  %v5008_v34 = vadd.f32 %v18423_v16, %v4935_v13  ;;  %v18614_v16 = vpop.permute.xlu1 %5497  ;;  %v22612_v13 = vld [vmem:[#allocation37_spill] sm:$0xff] }
 0x2ec   : > { %22603 = vst [vmem:[#allocation75_spill] sm:$0xff] %v18534_v30  ;;  %v4896_v42 = vadd.f32 %v18419_v47, %v4823_v7  ;;  %v4937_v30 = vadd.f32 %v18343_v40, %v18260_v44  ;;  %v5006_v17 = vadd.f32 %v18421_v11, %v4933_v51  ;;  %v18589_v44 = vrot.slane %v12872_v24, %v18557_v32  ;;  %v22608_v24 = vld [vmem:[#allocation24_spill] sm:$0xff] }
 0x2ed   : > { %v18536_v45 = vpop.f32.mrf.mxu1  ;;  %v4965_v40 = vadd.f32 %v18478_v1, %v18312_v23  ;;  %v5012_v31 = vadd.f32 %v18433_v54, %v4939_v10  ;;  %v5020_v23 = vadd.f32 %v18445_v21, %v4947_v35  ;;  %v5022_v4 = vadd.f32 %v18450_v57, %v4949_v2  ;;  %v22607_v1 = vld [vmem:[#allocation32_spill] sm:$0xff] }
 0x2ee   : > { %22604 = vst [vmem:[#allocation76_spill] sm:$0xff] %v18536_v45  ;;  %v5336_v45 = vld [vmem:[%s22412_s4] ss:$2 sm:$0x3]  ;;  %v5079_v58 = vadd.f32 %v5078_v39, %v5006_v17  ;;  %v4969_v26 = vadd.f32 %v18484_v19, %v4896_v42  ;;  %v5081_v39 = vadd.f32 %v18486_v62, %v5008_v34  ;;  %v18619_v19 = vld [vmem:[%s22418_s10 + $0x8] sm:$0xff]  ;;  %v5032_v43 = vadd.f32 %v18473_v27, %v4959_v12  ;;  %v22613_v35 = vld [vmem:[#allocation28_spill] sm:$0xff] }
 0x2ef   : > { %v18548_v9 = vpop.f32.mrf.mxu1  ;;  %v18574_v28 = vrot.slane %v5336_v45, %v17881_v38  ;;  %v18580_v7 = vrot.slane %v5336_v45, %v18557_v32  ;;  %v4955_v45 = vadd.f32 %v18400_v20, %v18292_v37  ;;  %v5010_v37 = vadd.f32 %v18428_v25, %v4937_v30  ;;  %v18609_v20 = vpop.permute.xlu0 %5487  ;;  %6444 = vperm.xlu0 %13768, %v18619_v19   ;;  %v18629_v62 = vld [vmem:[%s22418_s10] sm:$0xff]  ;;  %v22615_v12 = vld [vmem:[#allocation33_spill] sm:$0xff] }
 0x2f0   : > { %22605 = vst [vmem:[#allocation77_spill] sm:$0xff] %v18548_v9  ;;  %v5152_v52 = vadd.f32 %v5151_v63, %v5079_v58  ;;  %v5038_v63 = vadd.f32 %v18494_v48, %v4965_v40  ;;  %v5154_v5 = vadd.f32 %v18506_v3, %v5081_v39  ;;  %6439 = vperm.xlu1 %13767, %v18629_v62   ;;  %v22609_v48 = vld [vmem:[#allocation31_spill] sm:$0xff]  ;;  %v18648_v3 = vld [vmem:[%s22418_s10 + $0x10] sm:$0xff]  ;;  %v22611_v42 = vld [vmem:[#allocation42_spill] sm:$0xff] }
 0x2f1   : > { %v18567_v9 = vpop.f32.mrf.mxu1  ;;  %v5028_v54 = vadd.f32 %v18463_v36, %v4955_v45  ;;  %v5083_v25 = vadd.f32 %v18488_v6, %v5010_v37  ;;  %v5040_v27 = vadd.f32 %v18498_v22, %v4967_v8  ;;  %v5042_v30 = vadd.f32 %v22607_v1, %v4969_v26  ;;  %v22614_v45 = vld [vmem:[#allocation43_spill] sm:$0xff]  ;;  %v22616_v40 = vld [vmem:[#allocation34_spill] sm:$0xff] }
 0x2f2   : > { %v5085_v61 = vadd.f32 %v22608_v24, %v5012_v31  ;;  %v5089_v6 = vadd.f32 %v22610_v50, %v22609_v48  ;;  %v5091_v51 = vadd.f32 %v22611_v42, %v5018_v15  ;;  %v5093_v2 = vadd.f32 %v22613_v35, %v5020_v23  ;;  %v22617_v58 = vld [vmem:[#allocation39_spill] sm:$0xff]  ;;  %v22618_v31 = vld [vmem:[#allocation44_spill] sm:$0xff]  ;;  %v18662_v23 = vpop.permute.xlu1 %5502  ;;  %v22620_v1 = vld [vmem:[#allocation66_spill] sm:$0xff] }
 0x2f3   : > { %v18586_v59 = vpop.f32.mrf.mxu1  ;;  %v5156_v10 = vadd.f32 %v22612_v13, %v5083_v25  ;;  %v5095_v49 = vadd.f32 %v22614_v45, %v5022_v4  ;;  %v5099_v34 = vadd.f32 %v22616_v40, %v22615_v12  ;;  %v5101_v8 = vadd.f32 %v22617_v58, %v5028_v54  ;;  %v18657_v37 = vpop.permute.xlu0 %5492  ;;  %6459 = vperm.xlu0 %13768, %v18637_v0   ;;  %v18667_v4 = vld [vmem:[%s22418_s10 + $0x30] sm:$0xff]  ;;  %v22626_v58 = vld [vmem:[#allocation74_spill] sm:$0xff] }
 0x2f4   : > { %v5158_v15 = vadd.f32 %v22618_v31, %v5085_v61  ;;  %6449 = vperm.xlu1 %13767, %v18648_v3   ;;  %v5103_v54 = vadd.f32 %v18520_v18, %v5030_v29  ;;  %v5105_v25 = vadd.f32 %v18526_v33, %v5032_v43  ;;  %vm5460_vm0 = vcmp.lt.s32.totalorder %v22620_v1, 1  ;;  %v22621_v33 = vld [vmem:[#allocation69_spill] sm:$0xff] }
 0x2f5   : > { %v18602_v47 = vpop.f32.mrf.mxu1  ;;  %v18679_v13 = vadd.f32 %v18571_v41, %v5040_v27  ;;  %v18681_v18 = vadd.f32 %v5114_v46, %v5042_v30  ;;  %v5162_v29 = vadd.f32 %v22621_v33, %v5089_v6  ;;  %vm6000_vm1 = vcmp.lt.s32.totalorder %v22620_v1, 7  ;;  %v22625_v6 = vld [vmem:[#allocation73_spill] sm:$0xff] }
 0x2f6   : > { %v5224_v21 = vpop.f32.mrf.mxu0 }
 0x2f7   : > { %v5297_v11 = vpop.f32.mrf.mxu1  ;;  %v5225_v57 = vadd.f32 %v5224_v21, %v5152_v52  ;;  %6469 = vperm.xlu0 %13768, %v18667_v4   ;;  %v18697_v12 = vpop.permute.xlu0 %5507 }
 0x2f8   : > { %v5226_v53 = vpop.f32.mrf.mxu0 }
 0x2f9   : > { %v5299_v36 = vpop.f32.mrf.mxu1  ;;  %v5298_v55 = vadd.f32 %v5297_v11, %v5225_v57  ;;  %v5227_v17 = vadd.f32 %v5226_v53, %v5154_v5  ;;  %v22619_v5 = vld [vmem:[#allocation38_spill] sm:$0xff] }
 0x2fa   : > { %v5228_v26 = vpop.f32.mrf.mxu0  ;;  %v5109_v57 = vadd.f32 %v18532_v14, %v22619_v5  ;;  %v22622_v14 = vld [vmem:[#allocation70_spill] sm:$0xff] }
 0x2fb   : > { %v5301_v22 = vpop.f32.mrf.mxu1  ;;  %v5348_v39 = vmul.f32 %v18574_v28, %v5298_v55  ;;  %v5300_v52 = vadd.f32 %v5299_v36, %v5227_v17  ;;  %v5229_v11 = vadd.f32 %v5228_v26, %v5156_v10  ;;  %v5111_v36 = vadd.f32 %v18542_v56, %v5038_v63  ;;  %v6432_v63 = vld [vmem:[%s22418_s10 + $0x18] sm:$0xff]  ;;  %v22623_v10 = vld [vmem:[#allocation71_spill] sm:$0xff]  ;;  %v22624_v17 = vld [vmem:[#allocation72_spill] sm:$0xff] }
 0x2fc   : > { %v5230_v24 = vpop.f32.mrf.mxu0  ;;  %v5164_v43 = vadd.f32 %v22622_v14, %v5091_v51  ;;  %v5166_v55 = vadd.f32 %v22623_v10, %v5093_v2  ;;  %v5168_v41 = vadd.f32 %v22624_v17, %v5095_v49  ;;  %6454 = vperm.xlu1 %13767, %v6432_v63   ;;  %v5172_v51 = vadd.f32 %v22625_v6, %v5099_v34  ;;  %v22627_v2 = vld [vmem:[#allocation75_spill] sm:$0xff]  ;;  %v18707_v34 = vpop.permute.xlu1 %5512 }
 0x2fd   : > { %v5303_v21 = vpop.f32.mrf.mxu1  ;;  %v5377_v61 = vadd.f32 %v18577_v60, %v5348_v39  ;;  %v5349_v48 = vmul.f32 %v18580_v7, %v5300_v52  ;;  %v5302_v50 = vadd.f32 %v5301_v22, %v5229_v11  ;;  %v5231_v53 = vadd.f32 %v5230_v24, %v5158_v15  ;;  %v22628_v52 = vld [vmem:[#allocation76_spill] sm:$0xff] }
 0x2fe   : > { %v5234_v56 = vpop.f32.mrf.mxu0  ;;  %v18700_v26 = vadd.f32 %v22626_v58, %v5101_v8  ;;  %v18703_v49 = vadd.f32 %v22627_v2, %v5103_v54  ;;  %v18710_v11 = vadd.f32 %v22628_v52, %v5105_v25  ;;  %v6434_v54 = vld [vmem:[%s22418_s10 + $0x28] sm:$0xff] }
 0x2ff   : > { %v5307_v42 = vpop.f32.mrf.mxu1  ;;  %v5350_v46 = vmul.f32 %v18574_v28, %v5302_v50  ;;  %v5304_v27 = vadd.f32 %v5303_v21, %v5231_v53  ;;  %v18694_v22 = vmax.f32 %v5377_v61, 0.0  ;;  %v5378_v35 = vadd.f32 %v18589_v44, %v5349_v48  ;;  %v22629_v21 = vld [vmem:[#allocation77_spill] sm:$0xff] }
 0x300   : > { %v5235_v45 = vadd.f32 %v5234_v56, %v5162_v29  ;;  %v5236_v40 = vpop.f32.mrf.mxu0  ;;  %v18713_v5 = vadd.f32 %v22629_v21, %v5109_v57  ;;  %v22630_v48 = vmov 1   ;;  %v18720_v50 = vadd.f32 %v18567_v9, %v5111_v36  ;;  %6464 = vperm.xlu1 %13767, %v6434_v54  }
 0x301   : > { %v5309_v30 = vpop.f32.mrf.mxu1  ;;  %v5379_v31 = vadd.f32 %v18577_v60, %v5350_v46  ;;  %v5351_v15 = vmul.f32 %v18580_v7, %v5304_v27  ;;  %v5237_v61 = vadd.f32 %v5236_v40, %v5164_v43  ;;  %13769 = vset.pattern.permute.xlu0 %v22630_v48  ;;  %v18726_v57 = vmax.f32 %v5378_v35, 0.0  ;;  %v18737_v27 = vpop.permute.xlu0 %5517 }
 0x302   : > { %v5308_v24 = vadd.f32 %v5307_v42, %v5235_v45  ;;  %v5238_v8 = vpop.f32.mrf.mxu0  ;;  %6981 = vperm.xlu0 %13769, %v18629_v62   ;;  %v5442_v42 = vrot.slane %v18694_v22, 7  ;;  %v6436_v45 = vld [vmem:[%s22418_s10 + $0x38] sm:$0xff] }
 0x303   : > { %v5311_v39 = vpop.f32.mrf.mxu1  ;;  %v18722_v53 = vmax.f32 %v5379_v31, 0.0  ;;  %v5380_v25 = vadd.f32 %v18589_v44, %v5351_v15  ;;  %v5239_v33 = vadd.f32 %v5238_v8, %v5166_v55  ;;  %v5310_v43 = vadd.f32 %v5309_v30, %v5237_v61  ;;  %v18750_v31 = vpop.permute.xlu1 %5522 }
 0x304   : > { %v5352_v14 = vmul.f32 %v18574_v28, %v5308_v24  ;;  %v5240_v56 = vpop.f32.mrf.mxu0  ;;  %6474 = vperm.xlu1 %13767, %v6436_v45  }
 0x305   : > { %v5313_v29 = vpop.f32.mrf.mxu1  ;;  %v5409_v9 = vpack.c.bf16 %v18722_v53, %v18694_v22  ;;  %v22468_v36 = vrot.slane %v18722_v53, 7  ;;  %v18733_v10 = vmax.f32 %v5380_v25, 0.0  ;;  %v5312_v55 = vadd.f32 %v5311_v39, %v5239_v33 }
 0x306   : > { %v5381_v62 = vadd.f32 %v18577_v60, %v5352_v14  ;;  %v5353_v46 = vmul.f32 %v18580_v7, %v5310_v43  ;;  %v5241_v6 = vadd.f32 %v5240_v56, %v5168_v41  ;;  %v5244_v35 = vpop.f32.mrf.mxu0  ;;  %v5986_v30 = vrot.slane %v18722_v53, 1  ;;  %6993 = vperm.xlu0 %13769, %v6432_v63  }
 0x307   : > { %v5317_v17 = vpop.f32.mrf.mxu1  ;;  %v5473_v40 = vsel %vm5460_vm0, %v5442_v42, %v22468_v36  ;;  %v5354_v58 = vmul.f32 %v18574_v28, %v5312_v55  ;;  %v5245_v2 = vadd.f32 %v5244_v35, %v5172_v51  ;;  %v5984_v41 = vrot.slane %v18694_v22, 1 }
 0x308   : > { %v18755_v39 = vadd.f32 %v18586_v59, %v18679_v13  ;;  %v18757_v52 = vmax.f32 %v5381_v62, 0.0  ;;  %v5382_v21 = vadd.f32 %v18589_v44, %v5353_v46  ;;  %v5314_v24 = vadd.f32 %v5313_v29, %v5241_v6  ;;  %v5246_v61 = vpop.f32.mrf.mxu0  ;;  %13770 = vset.pattern.permute.xlu1 %v22630_v48 }
 0x309   : > { %v5319_v15 = vpop.f32.mrf.mxu1  ;;  %v5383_v8 = vadd.f32 %v18577_v60, %v5354_v58  ;;  %v5318_v51 = vadd.f32 %v5317_v17, %v5245_v2  ;;  %v5987_v25 = vrot.slane %v18733_v10, 1  ;;  %v6013_v63 = vsel %vm6000_vm1, %v5984_v41, %v5986_v30  ;;  %6985 = vperm.xlu1 %13770, %v18619_v19  }
 0x30a   : > { %v18768_v59 = vadd.f32 %v18602_v47, %v18681_v18  ;;  %v5443_v13 = vrot.slane %v18726_v57, 7  ;;  %v18771_v14 = vmax.f32 %v5382_v21, 0.0  ;;  %v5355_v29 = vmul.f32 %v18580_v7, %v5314_v24  ;;  %v5248_v43 = vpop.f32.mrf.mxu0  ;;  %7001 = vperm.xlu0 %13769, %v6434_v54   ;;  %v6023_v21 = vpop.permute.xlu1 %6022 }
 0x30b   : > { %v5321_v33 = vpop.f32.mrf.mxu1  ;;  %v5445_v56 = vrot.slane %v18733_v10, 7  ;;  %v5356_v55 = vmul.f32 %v18574_v28, %v5318_v51  ;;  %v5985_v17 = vrot.slane %v18726_v57, 1  ;;  %v5247_v62 = vadd.f32 %v5246_v61, %v18700_v26  ;;  %v6019_v26 = vpop.permute.xlu0 %6018 }
 0x30c   : > { %v18780_v47 = vmul.f32 %v18657_v37, %v5473_v40  ;;  %v5384_v6 = vadd.f32 %v18589_v44, %v5355_v29  ;;  %v5410_v35 = vpack.c.bf16 %v18733_v10, %v18726_v57  ;;  %v5250_v58 = vpop.f32.mrf.mxu0  ;;  %v18787_v2 = vmax.f32 %v5383_v8, 0.0 }
 0x30d   : > { %v5323_v46 = vpop.f32.mrf.mxu1  ;;  %v6014_v48 = vsel %vm6000_vm1, %v5985_v17, %v5987_v25  ;;  %v5320_v54 = vadd.f32 %v5319_v15, %v5247_v62  ;;  %v5249_v40 = vadd.f32 %v5248_v43, %v18703_v49  ;;  %v5385_v24 = vadd.f32 %v18577_v60, %v5356_v55  ;;  %6989 = vperm.xlu1 %13770, %v18648_v3  }
 0x30e   : > { %12949 = vmatprep.mubr.msk.bf16.mxu1 %vm5693_vm2, %v5410_v35  ;;  %v5988_v61 = vrot.slane %v18757_v52, 1  ;;  %v5989_v19 = vrot.slane %v18771_v14, 1  ;;  %v5251_v8 = vadd.f32 %v5250_v58, %v18710_v11  ;;  %v5254_v51 = vpop.f32.mrf.mxu0  ;;  %v18799_v36 = vmax.f32 %v5384_v6, 0.0  ;;  %7009 = vperm.xlu0 %13769, %v6436_v45  }
 0x30f   : > { %v5327_v29 = vpop.f32.mrf.mxu1  ;;  %v5357_v18 = vmul.f32 %v18580_v7, %v5320_v54  ;;  %v5322_v15 = vadd.f32 %v5321_v33, %v5249_v40  ;;  %5944 = vmatmul.mubr.bf16.vlgmr.msra.gmra.mxu1 %v5409_v9  ;;  %v5255_v49 = vadd.f32 %v5254_v51, %v18713_v5  ;;  %v18806_v43 = vmul.f32 %v6019_v26, %v6013_v63 }
 0x310   : > { %v6011_v55 = vsel %vm6000_vm1, %v5986_v30, %v5988_v61  ;;  %v6012_v11 = vsel %vm6000_vm1, %v5987_v25, %v5989_v19  ;;  %v5324_v62 = vadd.f32 %v5323_v46, %v5251_v8  ;;  %v5256_v6 = vpop.f32.mrf.mxu0  ;;  %v18813_v33 = vmul.f32 %v6019_v26, %v6014_v48 }
 0x311   : > { %v5386_v35 = vadd.f32 %v18589_v44, %v5357_v18  ;;  %v5358_v9 = vmul.f32 %v18574_v28, %v5322_v15  ;;  %v18817_v5 = vmul.f32 %v6023_v21, %v6011_v55  ;;  %v18819_v45 = vmul.f32 %v6023_v21, %v6012_v11  ;;  %v5329_v25 = vpop.f32.mrf.mxu1  ;;  %6997 = vperm.xlu1 %13770, %v18637_v0   ;;  %v6027_v15 = vpop.permute.xlu1 %6026 }
 0x312   : > { %v5359_v63 = vmul.f32 %v18580_v7, %v5324_v62  ;;  %v5328_v30 = vadd.f32 %v5327_v29, %v5255_v49  ;;  %v5990_v58 = vrot.slane %v18787_v2, 1  ;;  %v5258_v46 = vpop.f32.mrf.mxu0  ;;  %v18823_v54 = vmax.f32 %v5385_v24, 0.0 }
 0x313   : > { %v5387_v3 = vadd.f32 %v18577_v60, %v5358_v9  ;;  %v5991_v26 = vrot.slane %v18799_v36, 1  ;;  %v5447_v24 = vrot.slane %v18771_v14, 7  ;;  %v18837_v51 = vmax.f32 %v5386_v35, 0.0  ;;  %v5331_v9 = vpop.f32.mrf.mxu1 }
 0x314   : > { %v5388_v40 = vadd.f32 %v18589_v44, %v5359_v63  ;;  %v5360_v21 = vmul.f32 %v18574_v28, %v5328_v30  ;;  %v6009_v8 = vsel %vm6000_vm1, %v5988_v61, %v5990_v58  ;;  %v5257_v61 = vadd.f32 %v5256_v6, %v18720_v50  ;;  %v5260_v0 = vpop.f32.mrf.mxu0 }
 0x315   : > { %v18839_v29 = vmax.f32 %v5387_v3, 0.0  ;;  %v6010_v49 = vsel %vm6000_vm1, %v5989_v19, %v5991_v26  ;;  %v22469_v63 = vrot.slane %v18799_v36, 7  ;;  %v5412_v35 = vpack.c.bf16 %v18799_v36, %v18771_v14  ;;  %7005 = vperm.xlu1 %13770, %v18667_v4  }
 0x316   : > { %v18844_v11 = vmax.f32 %v5388_v40, 0.0  ;;  %v5389_v62 = vadd.f32 %v18577_v60, %v5360_v21  ;;  %v5259_v30 = vadd.f32 %v5258_v46, %v18755_v39  ;;  %v5411_v19 = vpack.c.bf16 %v18787_v2, %v18757_v52  ;;  %v6031_v21 = vpop.permute.xlu0 %6030 }
 0x317   : > { %v18854_v3 = vmul.f32 %v6027_v15, %v6009_v8  ;;  %v18856_v40 = vmul.f32 %v6027_v15, %v6010_v49  ;;  %v5330_v18 = vadd.f32 %v5329_v25, %v5257_v61  ;;  %v5992_v50 = vrot.slane %v18823_v54, 1  ;;  %12950 = vmatprep.mubr.msk.bf16.mxu1 %vm5693_vm2, %v5412_v35  ;;  %v5333_v15 = vpop.f32.mrf.mxu1 }
 0x318   : > { %v5332_v6 = vadd.f32 %v5331_v9, %v5259_v30  ;;  %v5993_v48 = vrot.slane %v18837_v51, 1  ;;  %v5261_v39 = vadd.f32 %v5260_v0, %v18768_v59  ;;  %v5994_v46 = vrot.slane %v18839_v29, 1  ;;  %5954 = vmatmul.mubr.bf16.gmra.mxu1 %v5411_v19  ;;  %v6035_v19 = vpop.permute.xlu1 %6034 }
 0x319   : > { %v18864_v55 = vmax.f32 %v5389_v62, 0.0  ;;  %v5361_v8 = vmul.f32 %v18580_v7, %v5330_v18  ;;  %v6007_v25 = vsel %vm6000_vm1, %v5990_v58, %v5992_v50  ;;  %v5995_v4 = vrot.slane %v18844_v11, 1 }
 0x31a   : > { %v5362_v49 = vmul.f32 %v18574_v28, %v5332_v6  ;;  %v6008_v61 = vsel %vm6000_vm1, %v5991_v26, %v5993_v48  ;;  %v18873_v9 = vmul.f32 %v6031_v21, %v6007_v25  ;;  %v5334_v59 = vadd.f32 %v5333_v15, %v5261_v39  ;;  %v6039_v6 = vpop.permute.xlu0 %6038 }
 0x31b   : > { %v5390_v62 = vadd.f32 %v18589_v44, %v5361_v8  ;;  %v18876_v0 = vmul.f32 %v6031_v21, %v6008_v61  ;;  %v6005_v18 = vsel %vm6000_vm1, %v5992_v50, %v5994_v46  ;;  %v6006_v58 = vsel %vm6000_vm1, %v5993_v48, %v5995_v4 }
 0x31c   : > { %v5391_v28 = vadd.f32 %v18577_v60, %v5362_v49  ;;  %v5363_v30 = vmul.f32 %v18580_v7, %v5334_v59  ;;  %v5452_v21 = vrot.slane %v18839_v29, 7  ;;  %v5414_v48 = vpack.c.bf16 %v18844_v11, %v18837_v51 }
 0x31d   : > { %v18888_v39 = vmax.f32 %v5390_v62, 0.0  ;;  %v5413_v25 = vpack.c.bf16 %v18839_v29, %v18823_v54  ;;  %v5996_v7 = vrot.slane %v18864_v55, 1  ;;  %v18900_v15 = vmul.f32 %v6035_v19, %v6005_v18 }
 0x31e   : > { %v18894_v8 = vmax.f32 %v5391_v28, 0.0  ;;  %v5392_v60 = vadd.f32 %v18589_v44, %v5363_v30  ;;  %v18902_v49 = vmul.f32 %v6035_v19, %v6006_v58  ;;  %12951 = vmatprep.mubr.msk.bf16.mxu1 %vm5693_vm2, %v5414_v48  ;;  %v5474_v44 = vsel %vm5460_vm0, %v5443_v13, %v5445_v56  ;;  %v6043_v19 = vpop.permute.xlu1 %6042  ;;  %v6047_v26 = vpop.permute.xlu0 %6046 }
 0x31f   : > { %v5997_v61 = vrot.slane %v18888_v39, 1  ;;  %v6003_v18 = vsel %vm6000_vm1, %v5994_v46, %v5996_v7  ;;  %v22631_v10 = vrot.slane %v18787_v2, 7  ;;  %v22632_v14 = vrot.slane %v18757_v52, 7  ;;  %v14662_v2 = vld [vmem:[%s22413_s5 + $0x1e0] ss:$8 sps:$4 sm:$0xff]  }
 0x320   : > { %v5456_v59 = vrot.slane %v18894_v8, 7  ;;  %v18913_v62 = vmax.f32 %v5392_v60, 0.0  ;;  %v5998_v58 = vrot.slane %v18894_v8, 1  ;;  %5964 = vmatmul.mubr.bf16.gmra.mxu1 %v5413_v25  ;;  %v18920_v30 = vmul.f32 %v6039_v6, %v6003_v18 }
 0x321   : > { %v6004_v28 = vsel %vm6000_vm1, %v5995_v4, %v5997_v61  ;;  %v5415_v48 = vpack.c.bf16 %v18894_v8, %v18864_v55  ;;  %v5470_v60 = vsel %vm5460_vm0, %v5447_v24, %v22469_v63  ;;  %v22635_v52 = vrot.slane %v18823_v54, 7 }
 0x322   : > { %v5475_v46 = vsel %vm5460_vm0, %v5456_v59, %v5442_v42  ;;  %v5457_v4 = vrot.slane %v18913_v62, 7  ;;  %v18935_v25 = vmul.f32 %v6039_v6, %v6004_v28  ;;  %v5999_v18 = vrot.slane %v18913_v62, 1 }
 0x323   : > { %v5525_v8 = vmul.f32 %v18609_v20, %v5475_v46  ;;  %v6001_v63 = vsel %vm6000_vm1, %v5996_v7, %v5998_v58  ;;  %v6015_v42 = vsel %vm6000_vm1, %v5998_v58, %v5984_v41  ;;  %v5416_v58 = vpack.c.bf16 %v18913_v62, %v18888_v39 }
 0x324   : > { %v6070_v6 = vpack.c.bf16 %v18935_v25, %v18902_v49  ;;  %v6002_v28 = vsel %vm6000_vm1, %v5997_v61, %v5999_v18  ;;  %v18951_v35 = vmul.f32 %v6043_v19, %v6001_v63  ;;  %v6016_v46 = vsel %vm6000_vm1, %v5999_v18, %v5985_v17  ;;  %v14709_v49 = vld [vmem:[%s22415_s7 + $0x114] ss:$8 sps:$4 sm:$0xff]   ;;  %v14712_v25 = vld [vmem:[%s22415_s7 + $0x104] ss:$8 sps:$4 sm:$0xff]  }
 0x325   : > { %v5541_v7 = vpack.c.bf16 %v18780_v47, %v5525_v8  ;;  %v18958_v50 = vmul.f32 %v6043_v19, %v6002_v28  ;;  %v18960_v22 = vmul.f32 %v6047_v26, %v6015_v42  ;;  %v18962_v41 = vmul.f32 %v6047_v26, %v6016_v46  ;;  %12952 = vmatprep.mubr.msk.bf16.mxu1 %vm5693_vm2, %v5416_v58 }
 0x326   : > { %v5476_v63 = vsel %vm5460_vm0, %v5457_v4, %v5443_v13  ;;  %v5528_v17 = vmul.f32 %v18657_v37, %v5474_v44  ;;  %v5472_v47 = vsel %vm5460_vm0, %v5445_v56, %v5447_v24  ;;  %v5532_v19 = vmul.f32 %v18662_v23, %v5470_v60 }
 0x327   : > { %v6071_v26 = vpack.c.bf16 %v18960_v22, %v18951_v35  ;;  %v6072_v57 = vpack.c.bf16 %v18962_v41, %v18958_v50  ;;  %v5526_v61 = vmul.f32 %v18609_v20, %v5476_v63  ;;  %v5453_v13 = vrot.slane %v18844_v11, 7  ;;  %v14704_v35 = vld [vmem:[%s22415_s7 + $0x120] ss:$8 sps:$4 sm:$0xff]   ;;  %v14706_v50 = vld [vmem:[%s22415_s7 + $0x124] ss:$8 sps:$4 sm:$0xff]  }
 0x328   : > { %v5454_v37 = vrot.slane %v18864_v55, 7  ;;  %v5469_v56 = vsel %vm5460_vm0, %v22632_v14, %v22631_v10  ;;  %v22633_v24 = vmov %v22632_v14  ;;  %v22634_v44 = vrot.slane %v18722_v53, 7  ;;  %5974 = vmatmul.mubr.bf16.gmra.mxu1 %v5415_v48  ;;  %v14659_v55 = vld [vmem:[%s22413_s5 + $0x1f0] ss:$8 sps:$4 sm:$0xff]   ;;  %v14664_v53 = vld [vmem:[%s22413_s5 + $0x1e4] ss:$8 sps:$4 sm:$0xff]  }
 0x329   : > { %v5542_v11 = vpack.c.bf16 %v5528_v17, %v5526_v61  ;;  %v5530_v60 = vmul.f32 %v18614_v16, %v5472_v47  ;;  %v5531_v8 = vmul.f32 %v18662_v23, %v5469_v56  ;;  %v5451_v42 = vrot.slane %v18837_v51, 7  ;;  %v14716_v22 = vld [vmem:[%s22415_s7 + $0x70] ss:$8 sps:$4 sm:$0xff]  }
 0x32a   : > { %v5471_v20 = vsel %vm5460_vm0, %v22634_v44, %v22633_v24  ;;  %v5465_v48 = vsel %vm5460_vm0, %v22635_v52, %v5452_v21  ;;  %v22636_v28 = vmov %v22635_v52  ;;  %v22637_v46 = vmov %v22631_v10  ;;  %v14683_v52 = vld [vmem:[%s22413_s5 + $0x230] ss:$8 sps:$4 sm:$0xff]  }
 0x32b   : > { %v5529_v18 = vmul.f32 %v18614_v16, %v5471_v20  ;;  %v5467_v16 = vsel %vm5460_vm0, %v22637_v46, %v22636_v28  ;;  %12921 = vmatprep.mubr.msk.bf16.mxu0 %vm5693_vm2, %v5542_v11  ;;  %v5544_v23 = vpack.c.bf16 %v5532_v19, %v5530_v60  ;;  %v5535_v63 = vmul.f32 %v18707_v34, %v5465_v48  ;;  %v14691_v48 = vld [vmem:[%s22413_s5 + $0x214] ss:$8 sps:$4 sm:$0xff]   ;;  %v14689_v28 = vld [vmem:[%s22413_s5 + $0x210] ss:$8 sps:$4 sm:$0xff]   ;;  %v14694_v46 = vld [vmem:[%s22413_s5 + $0x204] ss:$8 sps:$4 sm:$0xff]  }
 0x32c   : > { %v5533_v58 = vmul.f32 %v18697_v12, %v5467_v16  ;;  %5739 = vmatmul.mubr.bf16.vlgmr.msra.gmra.mxu0 %v5541_v7  ;;  %v5466_v17 = vsel %vm5460_vm0, %v5451_v42, %v5453_v13  ;;  %v5461_v54 = vsel %vm5460_vm0, %v5454_v37, %v5456_v59  ;;  %v5463_v61 = vsel %vm5460_vm0, %v5452_v21, %v5454_v37  ;;  %v14667_v7 = vld [vmem:[%s22413_s5 + $0x1d4] ss:$8 sps:$4 sm:$0xff]   ;;  %v14665_v21 = vld [vmem:[%s22413_s5 + $0x1d0] ss:$8 sps:$4 sm:$0xff]   ;;  %v14692_v16 = vld [vmem:[%s22413_s5 + $0x200] ss:$8 sps:$4 sm:$0xff]  }
 0x32d   : > { %v5543_v51 = vpack.c.bf16 %v5531_v8, %v5529_v18  ;;  %6231 = vmatpush1.bf16.msra.mxu0 %v14659_v55  ;;  %12922 = vmatprep.mubr.msk.bf16.mxu0 %vm5693_vm2, %v5544_v23  ;;  %v22638_v59 = vrot.slane %v18799_v36, 7  ;;  %v5537_v10 = vmul.f32 %v18737_v27, %v5463_v61  ;;  %v5539_v14 = vmul.f32 %v18750_v31, %v5461_v54  ;;  %v14670_v36 = vld [vmem:[%s22413_s5 + $0x1c4] ss:$8 sps:$4 sm:$0xff]   ;;  %v14713_v41 = vld [vmem:[%s22415_s7 + $0xf0] ss:$8 sps:$4 sm:$0xff]  }
 0x32e   : > { %v5545_v47 = vpack.c.bf16 %v5535_v63, %v5533_v58  ;;  %6232 = vmatprep.subr.bf16.mxu0 %v14664_v53  ;;  %v5536_v56 = vmul.f32 %v18707_v34, %v5466_v17  ;;  %v5455_v24 = vrot.slane %v18888_v39, 7  ;;  %v14673_v39 = vld [vmem:[%s22413_s5 + $0x1b4] ss:$8 sps:$4 sm:$0xff]   ;;  %v14676_v55 = vld [vmem:[%s22413_s5 + $0x1a4] ss:$8 sps:$4 sm:$0xff]   ;;  %v22639_v8 = vpack.c.bf16 %v18819_v45, %v18813_v33 }
 0x32f   : > { %v5468_v19 = vsel %vm5460_vm0, %v22638_v59, %v5451_v42  ;;  %v5547_v29 = vpack.c.bf16 %v5539_v14, %v5537_v10  ;;  %v14682_v18 = vld [vmem:[%s22413_s5 + $0x184] ss:$8 sps:$4 sm:$0xff]   ;;  %v14680_v42 = vld [vmem:[%s22413_s5 + $0x180] ss:$8 sps:$4 sm:$0xff]   ;;  %v14685_v53 = vld [vmem:[%s22413_s5 + $0x234] ss:$8 sps:$4 sm:$0xff]   ;;  %v22640_v23 = vpack.c.bf16 %v18817_v5, %v18806_v43  ;;  %v22642_v58 = vpack.c.bf16 %v18873_v9, %v18854_v3 }
 0x330   : > { %v5534_v37 = vmul.f32 %v18697_v12, %v5468_v19  ;;  %v5462_v34 = vsel %vm5460_vm0, %v5455_v24, %v5457_v4  ;;  %v14668_v12 = vld [vmem:[%s22413_s5 + $0x1c0] ss:$8 sps:$4 sm:$0xff]   ;;  %v5464_v20 = vsel %vm5460_vm0, %v5453_v13, %v5455_v24  ;;  %v14671_v4 = vld [vmem:[%s22413_s5 + $0x1b0] ss:$8 sps:$4 sm:$0xff]   ;;  %v14679_v13 = vld [vmem:[%s22413_s5 + $0x194] ss:$8 sps:$4 sm:$0xff]   ;;  %v22643_v63 = vpack.c.bf16 %v18920_v30, %v18900_v15 }
 0x331   : > { %6233 = vmatpush1.bf16.msra.mxu0 %v14662_v2  ;;  %v5540_v62 = vmul.f32 %v18750_v31, %v5462_v34  ;;  %v5538_v11 = vmul.f32 %v18737_v27, %v5464_v20  ;;  %v14674_v31 = vld [vmem:[%s22413_s5 + $0x1a0] ss:$8 sps:$4 sm:$0xff]   ;;  %v14677_v27 = vld [vmem:[%s22413_s5 + $0x190] ss:$8 sps:$4 sm:$0xff]   ;;  %v14688_v33 = vld [vmem:[%s22413_s5 + $0x224] ss:$8 sps:$4 sm:$0xff]  }
 0x332   : > { %6234 = vmatprep.subr.bf16.mxu0 %v14667_v7  ;;  %v5546_v44 = vpack.c.bf16 %v5536_v56, %v5534_v37  ;;  %v14686_v45 = vld [vmem:[%s22413_s5 + $0x220] ss:$8 sps:$4 sm:$0xff]   ;;  %v14695_v43 = vld [vmem:[%s22415_s7 + $0x150] ss:$8 sps:$4 sm:$0xff]   ;;  %v14697_v5 = vld [vmem:[%s22415_s7 + $0x154] ss:$8 sps:$4 sm:$0xff]  }
 0x333   : > { %v5548_v60 = vpack.c.bf16 %v5540_v62, %v5538_v11  ;;  %v14698_v3 = vld [vmem:[%s22415_s7 + $0x140] ss:$8 sps:$4 sm:$0xff]   ;;  %v14701_v9 = vld [vmem:[%s22415_s7 + $0x130] ss:$8 sps:$4 sm:$0xff]   ;;  %v14724_v17 = vld [vmem:[%s22415_s7 + $0x64] ss:$8 sps:$4 sm:$0xff]  }
 0x334   : > { %5749 = vmatmul.mubr.bf16.gmra.mxu0 %v5543_v51  ;;  %v22641_v51 = vpack.c.bf16 %v18876_v0, %v18856_v40  ;;  %v14700_v40 = vld [vmem:[%s22415_s7 + $0x144] ss:$8 sps:$4 sm:$0xff]   ;;  %v14703_v0 = vld [vmem:[%s22415_s7 + $0x134] ss:$8 sps:$4 sm:$0xff]   ;;  %v14707_v15 = vld [vmem:[%s22415_s7 + $0x110] ss:$8 sps:$4 sm:$0xff]  }
 0x335   : > { %6235 = vmatpush1.bf16.msra.mxu0 %v14665_v21  ;;  %12923 = vmatprep.mubr.msk.bf16.mxu0 %vm5693_vm2, %v5546_v44  ;;  %v14710_v30 = vld [vmem:[%s22415_s7 + $0x100] ss:$8 sps:$4 sm:$0xff]   ;;  %v14727_v61 = vld [vmem:[%s22415_s7 + $0x1b4] ss:$8 sps:$4 sm:$0xff]   ;;  %v14728_v7 = vld [vmem:[%s22415_s7 + $0x50] ss:$8 sps:$4 sm:$0xff]  }
 0x336   : > { %6236 = vmatprep.subr.bf16.mxu0 %v14670_v36  ;;  %v14722_v54 = vld [vmem:[%s22415_s7 + $0x60] ss:$8 sps:$4 sm:$0xff]   ;;  %v14725_v59 = vld [vmem:[%s22415_s7 + $0x1b0] ss:$8 sps:$4 sm:$0xff]   ;;  %v14736_v19 = vld [vmem:[%s22415_s7 + $0x44] ss:$8 sps:$4 sm:$0xff]  }
 0x337   : > { %v14719_v2 = vld [vmem:[%s22415_s7 + $0xe0] ss:$8 sps:$4 sm:$0xff]   ;;  %v14733_v10 = vld [vmem:[%s22415_s7 + $0x1a4] ss:$8 sps:$4 sm:$0xff]   ;;  %v14739_v21 = vld [vmem:[%s22415_s7 + $0x194] ss:$8 sps:$4 sm:$0xff]  }
 0x338   : > { %v14734_v14 = vld [vmem:[%s22415_s7 + $0x40] ss:$8 sps:$4 sm:$0xff]   ;;  %v14740_v37 = vld [vmem:[%s22415_s7 + $0x30] ss:$8 sps:$4 sm:$0xff]   ;;  %v14742_v24 = vld [vmem:[%s22415_s7 + $0x34] ss:$8 sps:$4 sm:$0xff]  }
 0x339   : > { %6237 = vmatpush1.bf16.msra.mxu0 %v14668_v12  ;;  %v14731_v56 = vld [vmem:[%s22415_s7 + $0x1a0] ss:$8 sps:$4 sm:$0xff]   ;;  %v14745_v44 = vld [vmem:[%s22415_s7 + $0x184] ss:$8 sps:$4 sm:$0xff]   ;;  %v14751_v20 = vld [vmem:[%s22415_s7 + $0x174] ss:$8 sps:$4 sm:$0xff]  }
 0x33a   : > { %6238 = vmatprep.subr.bf16.mxu0 %v14673_v39  ;;  %v14743_v36 = vld [vmem:[%s22415_s7 + $0x180] ss:$8 sps:$4 sm:$0xff]   ;;  %v14748_v12 = vld [vmem:[%s22415_s7 + $0x24] ss:$8 sps:$4 sm:$0xff]   ;;  %v14749_v39 = vld [vmem:[%s22415_s7 + $0x170] ss:$8 sps:$4 sm:$0xff]  }
 0x33b   : > { %v14746_v34 = vld [vmem:[%s22415_s7 + $0x20] ss:$8 sps:$4 sm:$0xff]   ;;  %v14752_v62 = vld [vmem:[%s22415_s7 + $0x10] ss:$8 sps:$4 sm:$0xff]   ;;  %v14757_v11 = vld [vmem:[%s22415_s7 + $0x164] ss:$8 sps:$4 sm:$0xff]  }
 0x33c   : > { %5759 = vmatmul.mubr.bf16.gmra.mxu0 %v5545_v47  ;;  %v14730_v47 = vld [vmem:[%s22415_s7 + $0x54] ss:$8 sps:$4 sm:$0xff]  }
 0x33d   : > { %6239 = vmatpush1.bf16.msra.mxu0 %v14671_v4  ;;  %12924 = vmatprep.mubr.msk.bf16.mxu0 %vm5693_vm2, %v5548_v60  ;;  %v14754_v4 = vld [vmem:[%s22415_s7 + $0x14] ss:$8 sps:$4 sm:$0xff]   ;;  %v14760_v60 = vld [vmem:[%s22415_s7 + $0x4] ss:$8 sps:$4 sm:$0xff]  }
 0x33e   : > { %6240 = vmatprep.subr.bf16.mxu0 %v14676_v55  ;;  %v14755_v55 = vld [vmem:[%s22415_s7 + $0x160] ss:$8 sps:$4 sm:$0xff]  }
 0x341   : > { %6241 = vmatpush1.bf16.msra.mxu0 %v14674_v31  ;;  %v14758_v31 = vld [vmem:[%s22415_s7] ss:$8 sps:$4 sm:$0xff]  }
 0x342   : > { %6242 = vmatprep.subr.bf16.mxu0 %v14679_v13  ;;  %v14761_v13 = vld [vmem:[%s22415_s7 + $0xd0] ss:$8 sps:$4 sm:$0xff]  }
 0x344   : > { %5769 = vmatmul.mubr.bf16.gmra.mxu0 %v5547_v29  ;;  %v14737_v29 = vld [vmem:[%s22415_s7 + $0x190] ss:$8 sps:$4 sm:$0xff]  }
 0x345   : > { %6243 = vmatpush1.bf16.msra.mxu0 %v14677_v27  ;;  %13001 = vmatprep.mubr.msk.bf16.mxu0 %vm5693_vm2, %v22639_v8  ;;  %v14763_v27 = vld [vmem:[%s22415_s7 + $0xd4] ss:$8 sps:$4 sm:$0xff]   ;;  %v14766_v8 = vld [vmem:[%s22415_s7 + $0xc4] ss:$8 sps:$4 sm:$0xff]  }
 0x346   : > { %6244 = vmatprep.subr.bf16.mxu0 %v14682_v18  ;;  %v14764_v18 = vld [vmem:[%s22415_s7 + $0xc0] ss:$8 sps:$4 sm:$0xff]  }
 0x349   : > { %6245 = vmatpush1.bf16.msra.mxu0 %v14680_v42  ;;  %v14767_v42 = vld [vmem:[%s22415_s7 + $0xb0] ss:$8 sps:$4 sm:$0xff]  }
 0x34a   : > { %6254 = vmatprep.subr.bf16.mxu0 %v14685_v53  ;;  %v14769_v53 = vld [vmem:[%s22415_s7 + $0xb4] ss:$8 sps:$4 sm:$0xff]  }
 0x34d   : > { %6255 = vmatpush2.bf16.msra.mxu0 %v14683_v52  ;;  %v14770_v52 = vld [vmem:[%s22415_s7 + $0xa0] ss:$8 sps:$4 sm:$0xff]  }
 0x34e   : > { %6256 = vmatprep.subr.bf16.mxu0 %v14688_v33  ;;  %v14772_v33 = vld [vmem:[%s22415_s7 + $0xa4] ss:$8 sps:$4 sm:$0xff]  }
 0x351   : > { %6257 = vmatpush2.bf16.msra.mxu0 %v14686_v45  ;;  %v14775_v45 = vld [vmem:[%s22415_s7 + $0x94] ss:$8 sps:$4 sm:$0xff]  }
 0x352   : > { %6258 = vmatprep.subr.bf16.mxu0 %v14691_v48  ;;  %v14773_v48 = vld [vmem:[%s22415_s7 + $0x90] ss:$8 sps:$4 sm:$0xff]  }
 0x355   : > { %6259 = vmatpush2.bf16.msra.mxu0 %v14689_v28  ;;  %v14778_v28 = vld [vmem:[%s22415_s7 + $0x84] ss:$8 sps:$4 sm:$0xff]  }
 0x356   : > { %6260 = vmatprep.subr.bf16.mxu0 %v14694_v46  ;;  %v14776_v46 = vld [vmem:[%s22415_s7 + $0x80] ss:$8 sps:$4 sm:$0xff]  }
 0x359   : > { %6261 = vmatpush2.bf16.msra.mxu0 %v14692_v16  ;;  %v14781_v16 = vld [vmem:[%s22415_s7 + $0x234] ss:$8 sps:$4 sm:$0xff]  }
 0x35a   : > { %6907 = vmatprep.subr.bf16.mxu0 %v14697_v5 }
 0x35c   : > { %6263 = vmatmul.mubr.bf16.vlgmr.msra.gmra.mxu0 %v22640_v23 }
 0x35d   : > { %13002 = vmatprep.mubr.msk.bf16.mxu0 %vm5693_vm2, %v22641_v51  ;;  %6908 = vmatpush1.bf16.msra.mxu0 %v14695_v43 }
 0x35e   : > { %6909 = vmatprep.subr.bf16.mxu0 %v14700_v40 }
 0x361   : > { %6910 = vmatpush1.bf16.msra.mxu0 %v14698_v3 }
 0x362   : > { %6911 = vmatprep.subr.bf16.mxu0 %v14703_v0 }
 0x364   : > { %6273 = vmatmul.mubr.bf16.gmra.mxu0 %v22642_v58 }
 0x365   : > { %13003 = vmatprep.mubr.msk.bf16.mxu0 %vm5693_vm2, %v6070_v6  ;;  %6912 = vmatpush1.bf16.msra.mxu0 %v14701_v9  ;;  %v14715_v6 = vld [vmem:[%s22415_s7 + $0xf4] ss:$8 sps:$4 sm:$0xff]  }
 0x366   : > { %6913 = vmatprep.subr.bf16.mxu0 %v14706_v50 }
 0x369   : > { %6914 = vmatpush1.bf16.msra.mxu0 %v14704_v35 }
 0x36a   : > { %6915 = vmatprep.subr.bf16.mxu0 %v14709_v49 }
 0x36c   : > { %6283 = vmatmul.mubr.bf16.gmra.mxu0 %v22643_v63 }
 0x36d   : > { %13004 = vmatprep.mubr.msk.bf16.mxu0 %vm5693_vm2, %v6072_v57  ;;  %6916 = vmatpush1.bf16.msra.mxu0 %v14707_v15  ;;  %v14721_v57 = vld [vmem:[%s22415_s7 + $0xe4] ss:$8 sps:$4 sm:$0xff]  }
 0x36e   : > { %6917 = vmatprep.subr.bf16.mxu0 %v14712_v25 }
 0x371   : > { %6918 = vmatpush1.bf16.msra.mxu0 %v14710_v30 }
 0x372   : > { %6919 = vmatprep.subr.bf16.mxu0 %v14715_v6 }
 0x374   : > { %6293 = vmatmul.mubr.bf16.gmra.mxu0 %v6071_v26  ;;  %v14718_v26 = vld [vmem:[%s22415_s7 + $0x74] ss:$8 sps:$4 sm:$0xff]  }
 0x375   : > { %6682 = vmatprep.subr.bf16.mxu1 %v14718_v26  ;;  %6920 = vmatpush1.bf16.msra.mxu0 %v14713_v41 }
 0x376   : > { %6683 = vmatpush1.bf16.msra.mxu1 %v14716_v22  ;;  %6921 = vmatprep.subr.bf16.mxu0 %v14721_v57  ;;  %v19325_v22 = vpop.permute.xlu1 %6439 }
 0x377   : > { %6684 = vmatprep.subr.bf16.mxu1 %v14724_v17 }
 0x379   : > { %6922 = vmatpush1.bf16.msra.mxu0 %v14719_v2 }
 0x37a   : > { %6685 = vmatpush1.bf16.msra.mxu1 %v14722_v54  ;;  %6927 = vmatprep.subr.bf16.mxu0 %v14727_v61  ;;  %v19331_v17 = vpop.permute.xlu1 %6449 }
 0x37b   : > { %6686 = vmatprep.subr.bf16.mxu1 %v14730_v47 }
 0x37d   : > { %6928 = vmatpush2.bf16.msra.mxu0 %v14725_v59  ;;  %v19339_v59 = vpop.permute.xlu0 %6444 }
 0x37e   : > { %6687 = vmatpush1.bf16.msra.mxu1 %v14728_v7  ;;  %6929 = vmatprep.subr.bf16.mxu0 %v14733_v10  ;;  %v19335_v61 = vpop.permute.xlu1 %6454 }
 0x37f   : > { %6688 = vmatprep.subr.bf16.mxu1 %v14736_v19  ;;  %v6319_v19 = vld [vmem:[%s22414_s6] ss:$2 sm:$0x3] }
 0x381   : > { %6930 = vmatpush2.bf16.msra.mxu0 %v14731_v56 }
 0x382   : > { %6689 = vmatpush1.bf16.msra.mxu1 %v14734_v14  ;;  %6931 = vmatprep.subr.bf16.mxu0 %v14739_v21 }
 0x383   : > { %6690 = vmatprep.subr.bf16.mxu1 %v14742_v24 }
 0x385   : > { %6932 = vmatpush2.bf16.msra.mxu0 %v14737_v29 }
 0x386   : > { %6691 = vmatpush1.bf16.msra.mxu1 %v14740_v37  ;;  %6933 = vmatprep.subr.bf16.mxu0 %v14745_v44  ;;  %v19345_v37 = vrot.slane %v6319_v19, %v17881_v38 }
 0x387   : > { %6692 = vmatprep.subr.bf16.mxu1 %v14748_v12 }
 0x389   : > { %6934 = vmatpush2.bf16.msra.mxu0 %v14743_v36  ;;  %v19348_v36 = vrot.slane %v6319_v19, %v18557_v32 }
 0x38a   : > { %6693 = vmatpush1.bf16.msra.mxu1 %v14746_v34  ;;  %6935 = vmatprep.subr.bf16.mxu0 %v14751_v20  ;;  %v13005_v34 = vld [vmem:[%s22414_s6 + $0x1] ss:$2 sm:$0x3]  ;;  %v19355_v20 = vpop.permute.xlu0 %6459 }
 0x38b   : > { %6694 = vmatprep.subr.bf16.mxu1 %v14754_v4 }
 0x38d   : > { %6936 = vmatpush2.bf16.msra.mxu0 %v14749_v39  ;;  %v19353_v39 = vpop.permute.xlu1 %6464 }
 0x38e   : > { %6695 = vmatpush1.bf16.msra.mxu1 %v14752_v62  ;;  %6937 = vmatprep.subr.bf16.mxu0 %v14757_v11 }
 0x38f   : > { %6696 = vmatprep.subr.bf16.mxu1 %v14760_v60 }
 0x391   : > { %6938 = vmatpush2.bf16.msra.mxu0 %v14755_v55 }
 0x392   : > { %6697 = vmatpush1.bf16.msra.mxu1 %v14758_v31  ;;  %v19359_v31 = vrot.slane %v13005_v34, %v17881_v38 }
 0x393   : > { %6702 = vmatprep.subr.bf16.mxu1 %v14763_v27  ;;  %v19363_v27 = vrot.slane %v13005_v34, %v18557_v32 }
 0x396   : > { %6703 = vmatpush2.bf16.msra.mxu1 %v14761_v13 }
 0x397   : > { %6704 = vmatprep.subr.bf16.mxu1 %v14766_v8 }
 0x39a   : > { %6705 = vmatpush2.bf16.msra.mxu1 %v14764_v18 }
 0x39b   : > { %6706 = vmatprep.subr.bf16.mxu1 %v14769_v53 }
 0x39e   : > { %6707 = vmatpush2.bf16.msra.mxu1 %v14767_v42 }
 0x39f   : > { %6708 = vmatprep.subr.bf16.mxu1 %v14772_v33 }
 0x3a2   : > { %6709 = vmatpush2.bf16.msra.mxu1 %v14770_v52 }
 0x3a3   : > { %6710 = vmatprep.subr.bf16.mxu1 %v14775_v45 }
 0x3a6   : > { %6711 = vmatpush2.bf16.msra.mxu1 %v14773_v48 }
 0x3a7   : > { %6712 = vmatprep.subr.bf16.mxu1 %v14778_v28 }
 0x3aa   : > { %6713 = vmatpush2.bf16.msra.mxu1 %v14776_v46  ;;  %v19368_v46 = vpop.permute.xlu1 %6474 }
 0x3ab   : > { %7217 = vmatprep.subr.bf16.mxu1 %v14781_v16  ;;  %v19370_v16 = vpop.permute.xlu0 %6469 }
 0x3cf   : > { %v5945_v9 = vpop.f32.mrf.mxu1 }
 0x3d1   : > { %v5947_v35 = vpop.f32.mrf.mxu1 }
 0x3d3   : > { %v5949_v15 = vpop.f32.mrf.mxu1 }
 0x3d5   : > { %v5951_v30 = vpop.f32.mrf.mxu1 }
 0x3d8   : > { %v5955_v6 = vpop.f32.mrf.mxu1 }
 0x3da   : > { %v5957_v26 = vpop.f32.mrf.mxu1 }
 0x3dc   : > { %v5959_v54 = vpop.f32.mrf.mxu1 }
 0x3de   : > { %v5961_v47 = vpop.f32.mrf.mxu1 }
 0x3e0   : > { %v5965_v56 = vpop.f32.mrf.mxu1 }
 0x3e2   : > { %v5967_v4 = vpop.f32.mrf.mxu1 }
 0x3e4   : > { %v5969_v33 = vpop.f32.mrf.mxu1 }
 0x3ec   : > { %v5740_v23 = vpop.f32.mrf.mxu0 }
 0x3ed   : > { %v5946_v10 = vadd.f32 %v5945_v9, %v5740_v23 }
 0x3ee   : > { %v5742_v51 = vpop.f32.mrf.mxu0 }
 0x3ef   : > { %v5948_v29 = vadd.f32 %v5947_v35, %v5742_v51 }
 0x3f0   : > { %v5744_v58 = vpop.f32.mrf.mxu0 }
 0x3f1   : > { %v5950_v44 = vadd.f32 %v5949_v15, %v5744_v58 }
 0x3f2   : > { %v5746_v63 = vpop.f32.mrf.mxu0 }
 0x3f3   : > { %v5952_v11 = vadd.f32 %v5951_v30, %v5746_v63 }
 0x3f4   : > { %v5750_v43 = vpop.f32.mrf.mxu0 }
 0x3f5   : > { %v5956_v53 = vadd.f32 %v5955_v6, %v5750_v43  ;;  %v5971_v6 = vpop.f32.mrf.mxu1 }
 0x3f6   : > { %v5752_v5 = vpop.f32.mrf.mxu0 }
 0x3f7   : > { %v5958_v45 = vadd.f32 %v5957_v26, %v5752_v5 }
 0x3f8   : > { %v5754_v3 = vpop.f32.mrf.mxu0 }
 0x3f9   : > { %v5960_v9 = vadd.f32 %v5959_v54, %v5754_v3 }
 0x3fa   : > { %v19315_v40 = vpop.f32.mrf.mxu0 }
 0x3fb   : > { %v5962_v26 = vadd.f32 %v5961_v47, %v19315_v40  ;;  %v19391_v40 = vpop.permute.xlu0 %6981 }
 0x3fc   : > { %v19317_v0 = vpop.f32.mrf.mxu0 }
 0x3fe   : > { %v19319_v50 = vpop.f32.mrf.mxu0 }
 0x400   : > { %v19321_v49 = vpop.f32.mrf.mxu0 }
 0x402   : > { %v19323_v25 = vpop.f32.mrf.mxu0 }
 0x404   : > { %v19327_v41 = vpop.f32.mrf.mxu0 }
 0x406   : > { %v19329_v57 = vpop.f32.mrf.mxu0 }
 0x408   : > { %v19333_v2 = vpop.f32.mrf.mxu0 }
 0x40a   : > { %v19337_v7 = vpop.f32.mrf.mxu0 }
 0x41c   : > { %v6264_v14 = vpop.f32.mrf.mxu0 }
 0x41d   : > { %v6303_v21 = vadd.f32 %v6264_v14, %v5946_v10 }
 0x41e   : > { %v6266_v24 = vpop.f32.mrf.mxu0 }
 0x41f   : > { %v6304_v12 = vadd.f32 %v6266_v24, %v5948_v29  ;;  %v6331_v60 = vmul.f32 %v19345_v37, %v6303_v21  ;;  %v5966_v24 = vadd.f32 %v5965_v56, %v19317_v0 }
 0x420   : > { %v6268_v62 = vpop.f32.mrf.mxu0 }
 0x421   : > { %v6305_v55 = vadd.f32 %v6268_v62, %v5950_v44  ;;  %v6332_v13 = vmul.f32 %v19348_v36, %v6304_v12  ;;  %v6360_v23 = vadd.f32 %v19359_v31, %v6331_v60  ;;  %v19389_v12 = vpop.permute.xlu1 %6985  ;;  %v5975_v60 = vpop.f32.mrf.mxu1 }
 0x422   : > { %v6270_v18 = vpop.f32.mrf.mxu0 }
 0x423   : > { %v6333_v8 = vmul.f32 %v19345_v37, %v6305_v55  ;;  %v6306_v42 = vadd.f32 %v6270_v18, %v5952_v11  ;;  %v6361_v51 = vadd.f32 %v19363_v27, %v6332_v13  ;;  %v19382_v29 = vmax.f32 %v6360_v23, 0.0 }
 0x424   : > { %v6274_v52 = vpop.f32.mrf.mxu0 }
 0x425   : > { %v6362_v48 = vadd.f32 %v19359_v31, %v6333_v8  ;;  %v6334_v28 = vmul.f32 %v19348_v36, %v6306_v42  ;;  %v6307_v58 = vadd.f32 %v6274_v52, %v5956_v53  ;;  %v19384_v21 = vmax.f32 %v6361_v51, 0.0 }
 0x426   : > { %v6276_v63 = vpop.f32.mrf.mxu0  ;;  %v5968_v8 = vadd.f32 %v5967_v4, %v19319_v50 }
 0x427   : > { %v6363_v43 = vadd.f32 %v19363_v27, %v6334_v28  ;;  %v6308_v35 = vadd.f32 %v6276_v63, %v5958_v45  ;;  %v19375_v15 = vmax.f32 %v6362_v48, 0.0  ;;  %v6335_v5 = vmul.f32 %v19345_v37, %v6307_v58  ;;  %v5977_v58 = vpop.f32.mrf.mxu1 }
 0x428   : > { %v6278_v30 = vpop.f32.mrf.mxu0  ;;  %v5970_v28 = vadd.f32 %v5969_v33, %v19321_v49  ;;  %v5972_v63 = vadd.f32 %v5971_v6, %v19323_v25  ;;  %v5978_v6 = vadd.f32 %v5977_v58, %v19329_v57 }
 0x429   : > { %v19379_v19 = vmax.f32 %v6363_v43, 0.0  ;;  %v6336_v10 = vmul.f32 %v19348_v36, %v6308_v35  ;;  %v6309_v14 = vadd.f32 %v6278_v30, %v5960_v9  ;;  %v6364_v3 = vadd.f32 %v19359_v31, %v6335_v5  ;;  %v6990_v35 = vpop.permute.xlu1 %6989  ;;  %v6994_v30 = vpop.permute.xlu0 %6993 }
 0x42a   : > { %v6280_v54 = vpop.f32.mrf.mxu0  ;;  %v6392_v47 = vpack.c.bf16 %v19375_v15, %v19382_v29  ;;  %v19405_v42 = vmul.f32 %v19391_v40, %v19375_v15 }
 0x42b   : > { %v6337_v44 = vmul.f32 %v19345_v37, %v6309_v14  ;;  %v6310_v34 = vadd.f32 %v6280_v54, %v5962_v26  ;;  %v19395_v62 = vmax.f32 %v6364_v3, 0.0  ;;  %v6393_v55 = vpack.c.bf16 %v19379_v19, %v19384_v21 }
 0x42c   : > { %v6284_v11 = vpop.f32.mrf.mxu0  ;;  %v6365_v0 = vadd.f32 %v19363_v27, %v6336_v10  ;;  %v5976_v10 = vadd.f32 %v5975_v60, %v19327_v41 }
 0x42d   : > { %v6366_v56 = vadd.f32 %v19359_v31, %v6337_v44  ;;  %v6338_v13 = vmul.f32 %v19348_v36, %v6310_v34  ;;  %v6311_v18 = vadd.f32 %v6284_v11, %v5966_v24  ;;  %v19409_v53 = vmul.f32 %v19389_v12, %v19395_v62  ;;  %13094 = vmatprep.mubr.msk.bf16.mxu0 %vm6669_vm3, %v6393_v55 }
 0x42e   : > { %v6286_v52 = vpop.f32.mrf.mxu0  ;;  %6940 = vmatmul.mubr.bf16.vlgmr.msra.gmra.mxu0 %v6392_v47  ;;  %v19420_v9 = vmax.f32 %v6365_v0, 0.0  ;;  %v5979_v47 = vpop.f32.mrf.mxu1 }
 0x42f   : > { %v6367_v45 = vadd.f32 %v19363_v27, %v6338_v13  ;;  %v6339_v48 = vmul.f32 %v19345_v37, %v6311_v18  ;;  %v19415_v23 = vmax.f32 %v6366_v56, 0.0  ;;  %v7028_v50 = vpack.c.bf16 %v19409_v53, %v19405_v42  ;;  %v14821_v42 = vld [vmem:[%s22420_s12 + $0x3b8] ss:$68 sps:$4 sm:$0xff]  }
 0x430   : > { %v6312_v4 = vadd.f32 %v6286_v52, %v5968_v8  ;;  %v6288_v51 = vpop.f32.mrf.mxu0  ;;  %v5980_v60 = vadd.f32 %v5979_v47, %v19333_v2  ;;  %v5981_v58 = vpop.f32.mrf.mxu1  ;;  %v14823_v53 = vld [vmem:[%s22420_s12 + $0x3bc] ss:$68 sps:$4 sm:$0xff]  }
 0x431   : > { %v6368_v43 = vadd.f32 %v19359_v31, %v6339_v48  ;;  %v19423_v5 = vmax.f32 %v6367_v45, 0.0  ;;  %v6313_v33 = vadd.f32 %v6288_v51, %v5970_v28  ;;  %v19434_v24 = vmul.f32 %v6990_v35, %v19415_v23  ;;  %v7002_v48 = vpop.permute.xlu0 %7001  ;;  %9267 = vmatprep.subr.bf16.mxu0 %v14823_v53  ;;  %v14914_v53 = vld [vmem:[%s22420_s12 + $0x448] ss:$68 sps:$4 sm:$0xff]  }
 0x432   : > { %v6340_v49 = vmul.f32 %v19348_v36, %v6312_v4  ;;  %v6290_v26 = vpop.f32.mrf.mxu0  ;;  %v6394_v57 = vpack.c.bf16 %v19415_v23, %v19395_v62  ;;  %9268 = vmatpush1.bf16.msra.mxu0 %v14821_v42  ;;  %v14913_v42 = vld [vmem:[%s22420_s12 + $0x444] ss:$68 sps:$4 sm:$0xff]  }
 0x433   : > { %v19427_v14 = vmax.f32 %v6368_v43, 0.0  ;;  %v6314_v3 = vadd.f32 %v6290_v26, %v5972_v63  ;;  %v6395_v25 = vpack.c.bf16 %v19423_v5, %v19420_v9  ;;  %v6341_v44 = vmul.f32 %v19345_v37, %v6313_v33 }
 0x434   : > { %v6369_v54 = vadd.f32 %v19363_v27, %v6340_v49  ;;  %v6294_v34 = vpop.f32.mrf.mxu0  ;;  %v19453_v28 = vmul.f32 %v6990_v35, %v19423_v5  ;;  %v6998_v49 = vpop.permute.xlu1 %6997 }
 0x435   : > { %v19438_v11 = vmul.f32 %v6994_v30, %v19427_v14  ;;  %v6342_v41 = vmul.f32 %v19348_v36, %v6314_v3  ;;  %v6315_v55 = vadd.f32 %v6294_v34, %v5976_v10  ;;  %13095 = vmatprep.mubr.msk.bf16.mxu0 %vm6669_vm3, %v6395_v25  ;;  %v6370_v56 = vadd.f32 %v19359_v31, %v6341_v44 }
 0x436   : > { %v19445_v0 = vmax.f32 %v6369_v54, 0.0  ;;  %v6296_v13 = vpop.f32.mrf.mxu0  ;;  %6950 = vmatmul.mubr.bf16.gmra.mxu0 %v6394_v57  ;;  %v5982_v10 = vadd.f32 %v5981_v58, %v19337_v7  ;;  %v7010_v57 = vpop.permute.xlu0 %7009 }
 0x437   : > { %v7030_v18 = vpack.c.bf16 %v19438_v11, %v19434_v24  ;;  %v6371_v8 = vadd.f32 %v19363_v27, %v6342_v41  ;;  %v6343_v52 = vmul.f32 %v19345_v37, %v6315_v55  ;;  %v6316_v45 = vadd.f32 %v6296_v13, %v5978_v6  ;;  %v14826_v24 = vld [vmem:[%s22420_s12 + $0x3c4] ss:$68 sps:$4 sm:$0xff]   ;;  %v14827_v11 = vld [vmem:[%s22420_s12 + $0x330] ss:$68 sps:$4 sm:$0xff]  }
 0x438   : > { %v19456_v2 = vmul.f32 %v6994_v30, %v19445_v0  ;;  %v19458_v4 = vmax.f32 %v6370_v56, 0.0  ;;  %v6298_v51 = vpop.f32.mrf.mxu0 }
 0x439   : > { %v6372_v63 = vadd.f32 %v19359_v31, %v6343_v52  ;;  %v6344_v43 = vmul.f32 %v19348_v36, %v6316_v45  ;;  %v19462_v33 = vmax.f32 %v6371_v8, 0.0  ;;  %v6317_v26 = vadd.f32 %v6298_v51, %v5980_v60 }
 0x43a   : > { %v7031_v35 = vpack.c.bf16 %v19456_v2, %v19453_v28  ;;  %v6300_v3 = vpop.f32.mrf.mxu0  ;;  %v19472_v54 = vmul.f32 %v6998_v49, %v19458_v4  ;;  %v6396_v55 = vpack.c.bf16 %v19458_v4, %v19427_v14  ;;  %v19493_v45 = vmul.f32 %v7010_v57, %v19382_v29  ;;  %v14830_v28 = vld [vmem:[%s22420_s12 + $0x338] ss:$68 sps:$4 sm:$0xff]  }
 0x43b   : > { %v19467_v30 = vmax.f32 %v6372_v63, 0.0  ;;  %v6373_v25 = vadd.f32 %v19363_v27, %v6344_v43  ;;  %v6345_v6 = vmul.f32 %v19345_v37, %v6317_v26  ;;  %v6318_v44 = vadd.f32 %v6300_v3, %v5982_v10  ;;  %v7006_v37 = vpop.permute.xlu1 %7005  ;;  %v14832_v2 = vld [vmem:[%s22420_s12 + $0x33c] ss:$68 sps:$4 sm:$0xff]  }
 0x43c   : > { %v6397_v34 = vpack.c.bf16 %v19462_v33, %v19445_v0  ;;  %v19485_v56 = vmul.f32 %v6998_v49, %v19462_v33  ;;  %v19500_v63 = vmul.f32 %v7010_v57, %v19384_v21  ;;  %v6484_v3 = vmul.f32 %v19335_v61, %v19420_v9  ;;  %v14787_v57 = vld [vmem:[%s22415_s7 + $0x214] ss:$8 sps:$4 sm:$0xff]  }
 0x43d   : > { %v6389_v47 = vmax.f32 %v6373_v25, 0.0  ;;  %v19477_v7 = vmul.f32 %v7002_v48, %v19467_v30  ;;  %v6374_v41 = vadd.f32 %v19359_v31, %v6345_v6  ;;  %v6346_v60 = vmul.f32 %v19348_v36, %v6318_v44 }
 0x43e   : > { %13096 = vmatprep.mubr.msk.bf16.mxu0 %vm6669_vm3, %v6397_v34  ;;  %v6479_v25 = vmul.f32 %v19339_v59, %v19382_v29 }
 0x43f   : > { %v19487_v13 = vmul.f32 %v7002_v48, %v6389_v47  ;;  %v7032_v8 = vpack.c.bf16 %v19477_v7, %v19472_v54  ;;  %6960 = vmatmul.mubr.bf16.gmra.mxu0 %v6396_v55  ;;  %v6390_v52 = vmax.f32 %v6374_v41, 0.0  ;;  %v6375_v31 = vadd.f32 %v19363_v27, %v6346_v60  ;;  %v14782_v55 = vld [vmem:[%s22415_s7 + $0x220] ss:$8 sps:$4 sm:$0xff]   ;;  %v14835_v54 = vld [vmem:[%s22420_s12 + $0x2ac] ss:$68 sps:$4 sm:$0xff]  }
 0x440   : > { %v6480_v27 = vmul.f32 %v19339_v59, %v19384_v21  ;;  %v14779_v21 = vld [vmem:[%s22415_s7 + $0x230] ss:$8 sps:$4 sm:$0xff]   ;;  %v14784_v59 = vld [vmem:[%s22415_s7 + $0x224] ss:$8 sps:$4 sm:$0xff]   ;;  %v6483_v60 = vmul.f32 %v19335_v61, %v19395_v62 }
 0x441   : > { %v7033_v36 = vpack.c.bf16 %v19487_v13, %v19485_v56  ;;  %v19497_v51 = vmul.f32 %v7006_v37, %v6390_v52  ;;  %v6391_v58 = vmax.f32 %v6375_v31, 0.0  ;;  %v6477_v48 = vmul.f32 %v19325_v22, %v6390_v52  ;;  %v14785_v31 = vld [vmem:[%s22415_s7 + $0x210] ss:$8 sps:$4 sm:$0xff]   ;;  %v14790_v61 = vld [vmem:[%s22415_s7 + $0x204] ss:$8 sps:$4 sm:$0xff]  }
 0x442   : > { %v6398_v6 = vpack.c.bf16 %v6390_v52, %v19467_v30  ;;  %v6481_v52 = vmul.f32 %v19331_v17, %v19375_v15  ;;  %v14793_v15 = vld [vmem:[%s22415_s7 + $0x1f4] ss:$8 sps:$4 sm:$0xff]   ;;  %v14839_v13 = vld [vmem:[%s22420_s12 + $0x220] ss:$68 sps:$4 sm:$0xff]  }
 0x443   : > { %v7034_v43 = vpack.c.bf16 %v19493_v45, %v19497_v51  ;;  %v19507_v49 = vmul.f32 %v7006_v37, %v6391_v58  ;;  %v6399_v26 = vpack.c.bf16 %v6391_v58, %v6389_v47  ;;  %v6478_v10 = vmul.f32 %v19325_v22, %v6391_v58  ;;  %v14836_v7 = vld [vmem:[%s22420_s12 + $0x2b0] ss:$68 sps:$4 sm:$0xff]   ;;  %v14842_v45 = vld [vmem:[%s22420_s12 + $0x228] ss:$68 sps:$4 sm:$0xff]   ;;  %v14845_v51 = vld [vmem:[%s22420_s12 + $0x198] ss:$68 sps:$4 sm:$0xff]  }
 0x444   : > { %v6482_v22 = vmul.f32 %v19331_v17, %v19379_v19  ;;  %v6493_v41 = vpack.c.bf16 %v6479_v25, %v6477_v48  ;;  %v6488_v37 = vmul.f32 %v19353_v39, %v19445_v0  ;;  %v6486_v58 = vmul.f32 %v19355_v20, %v19423_v5  ;;  %v14788_v17 = vld [vmem:[%s22415_s7 + $0x200] ss:$8 sps:$4 sm:$0xff]   ;;  %v14796_v25 = vld [vmem:[%s22415_s7 + $0x1e4] ss:$8 sps:$4 sm:$0xff]   ;;  %v14838_v56 = vld [vmem:[%s22420_s12 + $0x2b4] ss:$68 sps:$4 sm:$0xff]  }
 0x445   : > { %v7035_v44 = vpack.c.bf16 %v19500_v63, %v19507_v49  ;;  %13097 = vmatprep.mubr.msk.bf16.mxu0 %vm6669_vm3, %v6399_v26  ;;  %v6494_v34 = vpack.c.bf16 %v6480_v27, %v6478_v10  ;;  %v6495_v48 = vpack.c.bf16 %v6483_v60, %v6481_v52  ;;  %v6487_v5 = vmul.f32 %v19353_v39, %v19427_v14  ;;  %v14791_v26 = vld [vmem:[%s22415_s7 + $0x1f0] ss:$8 sps:$4 sm:$0xff]   ;;  %v14818_v60 = vld [vmem:[%s22415_s7 + $0x240] ss:$8 sps:$4 sm:$0xff]  }
 0x446   : > { %v6496_v29 = vpack.c.bf16 %v6484_v3, %v6482_v22  ;;  %v6498_v62 = vpack.c.bf16 %v6488_v37, %v6486_v58  ;;  %v6492_v0 = vmul.f32 %v19368_v46, %v6389_v47  ;;  %v6485_v27 = vmul.f32 %v19355_v20, %v19415_v23  ;;  %v14794_v20 = vld [vmem:[%s22415_s7 + $0x1e0] ss:$8 sps:$4 sm:$0xff]   ;;  %v14799_v23 = vld [vmem:[%s22415_s7 + $0x1d4] ss:$8 sps:$4 sm:$0xff]   ;;  %v14809_v22 = vld [vmem:[%s22415_s7 + $0x270] ss:$8 sps:$4 sm:$0xff]  }
 0x447   : > { %6970 = vmatmul.mubr.bf16.gmra.mxu0 %v6398_v6  ;;  %13062 = vmatprep.mubr.msk.bf16.mxu1 %vm6669_vm3, %v6494_v34  ;;  %v6490_v10 = vmul.f32 %v19370_v16, %v19462_v33  ;;  %v6491_v14 = vmul.f32 %v19368_v46, %v19467_v30  ;;  %v7015_v33 = vmul.f32 %v19389_v12, %v19420_v9  ;;  %v14797_v34 = vld [vmem:[%s22415_s7 + $0x1d0] ss:$8 sps:$4 sm:$0xff]   ;;  %v14802_v46 = vld [vmem:[%s22415_s7 + $0x1c4] ss:$8 sps:$4 sm:$0xff]   ;;  %v14806_v9 = vld [vmem:[%s22415_s7 + $0x280] ss:$8 sps:$4 sm:$0xff]  }
 0x448   : > { %6715 = vmatmul.mubr.bf16.vlgmr.msra.gmra.mxu1 %v6493_v41  ;;  %v6497_v3 = vpack.c.bf16 %v6487_v5, %v6485_v27  ;;  %v6489_v47 = vmul.f32 %v19370_v16, %v19458_v4  ;;  %v7013_v6 = vmul.f32 %v19391_v40, %v19379_v19  ;;  %v14800_v16 = vld [vmem:[%s22415_s7 + $0x1c0] ss:$8 sps:$4 sm:$0xff]   ;;  %v14805_v19 = vld [vmem:[%s22415_s7 + $0x294] ss:$8 sps:$4 sm:$0xff]   ;;  %v14803_v12 = vld [vmem:[%s22415_s7 + $0x290] ss:$8 sps:$4 sm:$0xff]  }
 0x449   : > { %7218 = vmatpush1.bf16.msra.mxu1 %v14779_v21  ;;  %13063 = vmatprep.mubr.msk.bf16.mxu1 %vm6669_vm3, %v6496_v29  ;;  %v6500_v39 = vpack.c.bf16 %v6492_v0, %v6490_v10  ;;  %v14808_v40 = vld [vmem:[%s22415_s7 + $0x284] ss:$8 sps:$4 sm:$0xff]   ;;  %v14811_v4 = vld [vmem:[%s22415_s7 + $0x274] ss:$8 sps:$4 sm:$0xff]  }
 0x44a   : > { %7219 = vmatprep.subr.bf16.mxu1 %v14784_v59  ;;  %v6499_v21 = vpack.c.bf16 %v6491_v14, %v6489_v47  ;;  %v7029_v30 = vpack.c.bf16 %v7015_v33, %v7013_v6  ;;  %v14814_v41 = vld [vmem:[%s22415_s7 + $0x264] ss:$8 sps:$4 sm:$0xff]   ;;  %v14812_v59 = vld [vmem:[%s22415_s7 + $0x260] ss:$8 sps:$4 sm:$0xff]   ;;  %v14817_v29 = vld [vmem:[%s22415_s7 + $0x254] ss:$8 sps:$4 sm:$0xff]  }
 0x44b   : > { %v14847_v63 = vld [vmem:[%s22420_s12 + $0x19c] ss:$68 sps:$4 sm:$0xff]   ;;  %v14850_v49 = vld [vmem:[%s22420_s12 + $0x1a4] ss:$68 sps:$4 sm:$0xff]   ;;  %v14853_v37 = vld [vmem:[%s22420_s12 + $0x114] ss:$68 sps:$4 sm:$0xff]  }
 0x44c   : > { %v14854_v52 = vld [vmem:[%s22420_s12 + $0x118] ss:$68 sps:$4 sm:$0xff]   ;;  %v14859_v58 = vld [vmem:[%s22420_s12 + $0x8c] ss:$68 sps:$4 sm:$0xff]   ;;  %v14863_v5 = vld [vmem:[%s22420_s12] ss:$68 sps:$4 sm:$0xff]  }
 0x44d   : > { %7220 = vmatpush1.bf16.msra.mxu1 %v14782_v55  ;;  %v14815_v55 = vld [vmem:[%s22415_s7 + $0x250] ss:$8 sps:$4 sm:$0xff]   ;;  %v14866_v0 = vld [vmem:[%s22420_s12 + $0x8] ss:$68 sps:$4 sm:$0xff]   ;;  %v14871_v27 = vld [vmem:[%s22420_s12 + $0x7fc] ss:$68 sps:$4 sm:$0xff]  }
 0x44e   : > { %7221 = vmatprep.subr.bf16.mxu1 %v14787_v57  ;;  %v14820_v57 = vld [vmem:[%s22415_s7 + $0x244] ss:$8 sps:$4 sm:$0xff]   ;;  %v14869_v10 = vld [vmem:[%s22420_s12 + $0x7f8] ss:$68 sps:$4 sm:$0xff]   ;;  %v14884_v6 = vld [vmem:[%s22420_s12 + $0x6f0] ss:$68 sps:$4 sm:$0xff]  }
 0x44f   : > { %v14883_v14 = vld [vmem:[%s22420_s12 + $0x6ec] ss:$68 sps:$4 sm:$0xff]   ;;  %v14886_v33 = vld [vmem:[%s22420_s12 + $0x6f4] ss:$68 sps:$4 sm:$0xff]  }
 0x450   : > { %6725 = vmatmul.mubr.bf16.gmra.mxu1 %v6495_v48  ;;  %v14862_v48 = vld [vmem:[%s22420_s12 + $0x94] ss:$68 sps:$4 sm:$0xff]   ;;  %v14881_v47 = vld [vmem:[%s22420_s12 + $0x6e8] ss:$68 sps:$4 sm:$0xff]  }
 0x451   : > { %7222 = vmatpush1.bf16.msra.mxu1 %v14785_v31  ;;  %13064 = vmatprep.mubr.msk.bf16.mxu1 %vm6669_vm3, %v6498_v62  ;;  %v14856_v31 = vld [vmem:[%s22420_s12 + $0x11c] ss:$68 sps:$4 sm:$0xff]   ;;  %v14860_v62 = vld [vmem:[%s22420_s12 + $0x90] ss:$68 sps:$4 sm:$0xff]  }
 0x452   : > { %7223 = vmatprep.subr.bf16.mxu1 %v14790_v61  ;;  %v14857_v61 = vld [vmem:[%s22420_s12 + $0x88] ss:$68 sps:$4 sm:$0xff]  }
 0x455   : > { %7224 = vmatpush1.bf16.msra.mxu1 %v14788_v17  ;;  %v14865_v17 = vld [vmem:[%s22420_s12 + $0x4] ss:$68 sps:$4 sm:$0xff]  }
 0x456   : > { %7225 = vmatprep.subr.bf16.mxu1 %v14793_v15  ;;  %v14868_v15 = vld [vmem:[%s22420_s12 + $0xc] ss:$68 sps:$4 sm:$0xff]  }
 0x458   : > { %6735 = vmatmul.mubr.bf16.gmra.mxu1 %v6497_v3  ;;  %v14872_v3 = vld [vmem:[%s22420_s12 + $0x800] ss:$68 sps:$4 sm:$0xff]  }
 0x459   : > { %7226 = vmatpush1.bf16.msra.mxu1 %v14791_v26  ;;  %13065 = vmatprep.mubr.msk.bf16.mxu1 %vm6669_vm3, %v6500_v39  ;;  %v14874_v26 = vld [vmem:[%s22420_s12 + $0x804] ss:$68 sps:$4 sm:$0xff]   ;;  %v14880_v39 = vld [vmem:[%s22420_s12 + $0x77c] ss:$68 sps:$4 sm:$0xff]  }
 0x45a   : > { %7227 = vmatprep.subr.bf16.mxu1 %v14796_v25  ;;  %v14877_v25 = vld [vmem:[%s22420_s12 + $0x774] ss:$68 sps:$4 sm:$0xff]  }
 0x45d   : > { %7228 = vmatpush1.bf16.msra.mxu1 %v14794_v20  ;;  %v14875_v20 = vld [vmem:[%s22420_s12 + $0x770] ss:$68 sps:$4 sm:$0xff]  }
 0x45e   : > { %7229 = vmatprep.subr.bf16.mxu1 %v14799_v23  ;;  %v14878_v23 = vld [vmem:[%s22420_s12 + $0x778] ss:$68 sps:$4 sm:$0xff]  }
 0x460   : > { %6745 = vmatmul.mubr.bf16.gmra.mxu1 %v6499_v21  ;;  %v14892_v21 = vld [vmem:[%s22420_s12 + $0x66c] ss:$68 sps:$4 sm:$0xff]  }
 0x461   : > { %7230 = vmatpush1.bf16.msra.mxu1 %v14797_v34  ;;  %13154 = vmatprep.mubr.msk.bf16.mxu1 %vm6669_vm3, %v7029_v30  ;;  %v14889_v34 = vld [vmem:[%s22420_s12 + $0x664] ss:$68 sps:$4 sm:$0xff]  }
 0x462   : > { %7231 = vmatprep.subr.bf16.mxu1 %v14802_v46  ;;  %v14887_v46 = vld [vmem:[%s22420_s12 + $0x660] ss:$68 sps:$4 sm:$0xff]   ;;  %v14890_v30 = vld [vmem:[%s22420_s12 + $0x668] ss:$68 sps:$4 sm:$0xff]  }
 0x465   : > { %7232 = vmatpush1.bf16.msra.mxu1 %v14800_v16  ;;  %v14893_v16 = vld [vmem:[%s22420_s12 + $0x5d8] ss:$68 sps:$4 sm:$0xff]  }
 0x466   : > { %7237 = vmatprep.subr.bf16.mxu1 %v14805_v19  ;;  %v14895_v19 = vld [vmem:[%s22420_s12 + $0x5dc] ss:$68 sps:$4 sm:$0xff]  }
 0x469   : > { %7238 = vmatpush2.bf16.msra.mxu1 %v14803_v12  ;;  %v14896_v12 = vld [vmem:[%s22420_s12 + $0x5e0] ss:$68 sps:$4 sm:$0xff]  }
 0x46a   : > { %7239 = vmatprep.subr.bf16.mxu1 %v14808_v40  ;;  %v14898_v40 = vld [vmem:[%s22420_s12 + $0x5e4] ss:$68 sps:$4 sm:$0xff]  }
 0x46d   : > { %7240 = vmatpush2.bf16.msra.mxu1 %v14806_v9  ;;  %v14899_v9 = vld [vmem:[%s22420_s12 + $0x550] ss:$68 sps:$4 sm:$0xff]  }
 0x46e   : > { %7241 = vmatprep.subr.bf16.mxu1 %v14811_v4  ;;  %v14901_v4 = vld [vmem:[%s22420_s12 + $0x554] ss:$68 sps:$4 sm:$0xff]  }
 0x471   : > { %7242 = vmatpush2.bf16.msra.mxu1 %v14809_v22  ;;  %v14902_v22 = vld [vmem:[%s22420_s12 + $0x558] ss:$68 sps:$4 sm:$0xff]  }
 0x472   : > { %7243 = vmatprep.subr.bf16.mxu1 %v14814_v41  ;;  %v14904_v41 = vld [vmem:[%s22420_s12 + $0x55c] ss:$68 sps:$4 sm:$0xff]  }
 0x475   : > { %7244 = vmatpush2.bf16.msra.mxu1 %v14812_v59  ;;  %v14907_v59 = vld [vmem:[%s22420_s12 + $0x4cc] ss:$68 sps:$4 sm:$0xff]  }
 0x476   : > { %7245 = vmatprep.subr.bf16.mxu1 %v14817_v29  ;;  %v14905_v29 = vld [vmem:[%s22420_s12 + $0x4c8] ss:$68 sps:$4 sm:$0xff]  }
 0x479   : > { %7246 = vmatpush2.bf16.msra.mxu1 %v14815_v55  ;;  %v14910_v55 = vld [vmem:[%s22420_s12 + $0x4d4] ss:$68 sps:$4 sm:$0xff]  }
 0x47a   : > { %7247 = vmatprep.subr.bf16.mxu1 %v14820_v57  ;;  %v14908_v57 = vld [vmem:[%s22420_s12 + $0x4d0] ss:$68 sps:$4 sm:$0xff]  }
 0x47d   : > { %7248 = vmatpush2.bf16.msra.mxu1 %v14818_v60  ;;  %v14911_v60 = vld [vmem:[%s22420_s12 + $0x440] ss:$68 sps:$4 sm:$0xff]  }
 0x47e   : > { %9340 = vmatprep.subr.bf16.mxu1 %v14826_v24  ;;  %v14919_v24 = vld [vmem:[%s22420_s12 + $0x3cc] ss:$68 sps:$4 sm:$0xff]  }
 0x480   : > { %7250 = vmatmul.mubr.bf16.vlgmr.msra.gmra.mxu1 %v7028_v50  ;;  %v14824_v50 = vld [vmem:[%s22420_s12 + $0x3c0] ss:$68 sps:$4 sm:$0xff]  }
 0x481   : > { %13155 = vmatprep.mubr.msk.bf16.mxu1 %vm6669_vm3, %v7031_v35  ;;  %9341 = vmatpush1.bf16.msra.mxu1 %v14824_v50  ;;  %v14833_v35 = vld [vmem:[%s22420_s12 + $0x2a8] ss:$68 sps:$4 sm:$0xff]  }
 0x482   : > { %9342 = vmatprep.subr.bf16.mxu1 %v14832_v2  ;;  %v14916_v50 = vld [vmem:[%s22420_s12 + $0x44c] ss:$68 sps:$4 sm:$0xff]  }
 0x485   : > { %9343 = vmatpush1.bf16.msra.mxu1 %v14830_v28 }
 0x486   : > { %9344 = vmatprep.subr.bf16.mxu1 %v14838_v56 }
 0x488   : > { %7260 = vmatmul.mubr.bf16.gmra.mxu1 %v7030_v18  ;;  %v14829_v18 = vld [vmem:[%s22420_s12 + $0x334] ss:$68 sps:$4 sm:$0xff]  }
 0x489   : > { %13156 = vmatprep.mubr.msk.bf16.mxu1 %vm6669_vm3, %v7033_v36  ;;  %9269 = vmatprep.subr.bf16.mxu0 %v14829_v18  ;;  %v14844_v36 = vld [vmem:[%s22420_s12 + $0x22c] ss:$68 sps:$4 sm:$0xff]  }
 0x48a   : > { %9270 = vmatpush1.bf16.msra.mxu0 %v14827_v11  ;;  %9345 = vmatpush1.bf16.msra.mxu1 %v14836_v7  ;;  %v14922_v11 = vld [vmem:[%s22420_s12 + $0x3d4] ss:$68 sps:$4 sm:$0xff]  }
 0x48b   : > { %9271 = vmatprep.subr.bf16.mxu0 %v14835_v54  ;;  %9346 = vmatprep.subr.bf16.mxu1 %v14844_v36 }
 0x48e   : > { %9272 = vmatpush1.bf16.msra.mxu0 %v14833_v35  ;;  %9347 = vmatpush1.bf16.msra.mxu1 %v14842_v45 }
 0x48f   : > { %9348 = vmatprep.subr.bf16.mxu1 %v14850_v49 }
 0x490   : > { %7270 = vmatmul.mubr.bf16.gmra.mxu1 %v7032_v8  ;;  %v14841_v8 = vld [vmem:[%s22420_s12 + $0x224] ss:$68 sps:$4 sm:$0xff]  }
 0x491   : > { %13157 = vmatprep.mubr.msk.bf16.mxu1 %vm6669_vm3, %v7035_v44  ;;  %9273 = vmatprep.subr.bf16.mxu0 %v14841_v8  ;;  %v14851_v44 = vld [vmem:[%s22420_s12 + $0x110] ss:$68 sps:$4 sm:$0xff]  }
 0x492   : > { %9274 = vmatpush1.bf16.msra.mxu0 %v14839_v13 }
 0x493   : > { %9275 = vmatprep.subr.bf16.mxu0 %v14847_v63 }
 0x496   : > { %9276 = vmatpush1.bf16.msra.mxu0 %v14845_v51 }
 0x497   : > { %9277 = vmatprep.subr.bf16.mxu0 %v14853_v37 }
 0x498   : > { %7280 = vmatmul.mubr.bf16.gmra.mxu1 %v7034_v43  ;;  %v14848_v43 = vld [vmem:[%s22420_s12 + $0x1a0] ss:$68 sps:$4 sm:$0xff]  }
 0x499   : > { %9349 = vmatpush1.bf16.msra.mxu1 %v14848_v43 }
 0x49a   : > { %9350 = vmatprep.subr.bf16.mxu1 %v14856_v31  ;;  %9278 = vmatpush1.bf16.msra.mxu0 %v14851_v44 }
 0x49b   : > { %9279 = vmatprep.subr.bf16.mxu0 %v14859_v58 }
 0x49d   : > { %9351 = vmatpush1.bf16.msra.mxu1 %v14854_v52 }
 0x49e   : > { %9352 = vmatprep.subr.bf16.mxu1 %v14862_v48  ;;  %9280 = vmatpush1.bf16.msra.mxu0 %v14857_v61 }
 0x49f   : > { %9281 = vmatprep.subr.bf16.mxu0 %v14865_v17 }
 0x4a1   : > { %9353 = vmatpush1.bf16.msra.mxu1 %v14860_v62 }
 0x4a2   : > { %9354 = vmatprep.subr.bf16.mxu1 %v14868_v15  ;;  %9282 = vmatpush1.bf16.msra.mxu0 %v14863_v5  ;;  %v7306_v15 = vld [vmem:[%s22416_s8] ss:$2 sm:$0x3] }
 0x4a3   : > { %9283 = vmatprep.subr.bf16.mxu0 %v14871_v27 }
 0x4a5   : > { %9355 = vmatpush1.bf16.msra.mxu1 %v14866_v0 }
 0x4a6   : > { %9356 = vmatprep.subr.bf16.mxu1 %v14874_v26  ;;  %9284 = vmatpush2.bf16.msra.mxu0 %v14869_v10  ;;  %v19871_v10 = vrot.slane %v7306_v15, %v18557_v32 }
 0x4a7   : > { %9285 = vmatprep.subr.bf16.mxu0 %v14877_v25  ;;  %v19874_v25 = vrot.slane %v7306_v15, %v17881_v38  ;;  %v14917_v15 = vld [vmem:[%s22420_s12 + $0x3c8] ss:$68 sps:$4 sm:$0xff]  }
 0x4a9   : > { %9357 = vmatpush2.bf16.msra.mxu1 %v14872_v3 }
 0x4aa   : > { %9358 = vmatprep.subr.bf16.mxu1 %v14880_v39  ;;  %9286 = vmatpush2.bf16.msra.mxu0 %v14875_v20 }
 0x4ab   : > { %9287 = vmatprep.subr.bf16.mxu0 %v14883_v14 }
 0x4ad   : > { %9359 = vmatpush2.bf16.msra.mxu1 %v14878_v23  ;;  %v13158_v23 = vld [vmem:[%s22416_s8 + $0x1] ss:$2 sm:$0x3] }
 0x4ae   : > { %9360 = vmatprep.subr.bf16.mxu1 %v14886_v33  ;;  %9288 = vmatpush2.bf16.msra.mxu0 %v14881_v47 }
 0x4af   : > { %9289 = vmatprep.subr.bf16.mxu0 %v14889_v34 }
 0x4b1   : > { %9361 = vmatpush2.bf16.msra.mxu1 %v14884_v6 }
 0x4b2   : > { %9362 = vmatprep.subr.bf16.mxu1 %v14892_v21  ;;  %9290 = vmatpush2.bf16.msra.mxu0 %v14887_v46  ;;  %v19881_v21 = vrot.slane %v13158_v23, %v18557_v32 }
 0x4b3   : > { %9291 = vmatprep.subr.bf16.mxu0 %v14895_v19 }
 0x4b5   : > { %9363 = vmatpush2.bf16.msra.mxu1 %v14890_v30 }
 0x4b6   : > { %9364 = vmatprep.subr.bf16.mxu1 %v14898_v40  ;;  %9292 = vmatpush2.bf16.msra.mxu0 %v14893_v16  ;;  %v19885_v16 = vrot.slane %v13158_v23, %v17881_v38 }
 0x4b7   : > { %9293 = vmatprep.subr.bf16.mxu0 %v14901_v4 }
 0x4b9   : > { %9365 = vmatpush2.bf16.msra.mxu1 %v14896_v12 }
 0x4ba   : > { %9366 = vmatprep.subr.bf16.mxu1 %v14904_v41  ;;  %9294 = vmatpush2.bf16.msra.mxu0 %v14899_v9 }
 0x4bb   : > { %9295 = vmatprep.subr.bf16.mxu0 %v14907_v59 }
 0x4bd   : > { %9367 = vmatpush2.bf16.msra.mxu1 %v14902_v22 }
 0x4be   : > { %9368 = vmatprep.subr.bf16.mxu1 %v14910_v55  ;;  %9296 = vmatpush2.bf16.msra.mxu0 %v14905_v29 }
 0x4bf   : > { %9297 = vmatprep.subr.bf16.mxu0 %v14913_v42 }
 0x4c1   : > { %9369 = vmatpush2.bf16.msra.mxu1 %v14908_v57 }
 0x4c2   : > { %9370 = vmatprep.subr.bf16.mxu1 %v14916_v50  ;;  %9298 = vmatpush2.bf16.msra.mxu0 %v14911_v60 }
 0x4c3   : > { %9413 = vmatprep.subr.bf16.mxu0 %v14919_v24 }
 0x4c5   : > { %9371 = vmatpush2.bf16.msra.mxu1 %v14914_v53 }
 0x4c6   : > { %9486 = vmatprep.subr.bf16.mxu1 %v14922_v11 }
 0x4ee   : > { %v6941_v8 = vpop.f32.mrf.mxu0 }
 0x4f0   : > { %v6943_v36 = vpop.f32.mrf.mxu0 }
 0x4f2   : > { %v6945_v63 = vpop.f32.mrf.mxu0 }
 0x4f4   : > { %v6947_v49 = vpop.f32.mrf.mxu0 }
 0x4f6   : > { %v6951_v37 = vpop.f32.mrf.mxu0 }
 0x4f8   : > { %v6953_v31 = vpop.f32.mrf.mxu0 }
 0x4fa   : > { %v6955_v48 = vpop.f32.mrf.mxu0 }
 0x4fc   : > { %v6957_v62 = vpop.f32.mrf.mxu0 }
 0x4ff   : > { %v6961_v5 = vpop.f32.mrf.mxu0 }
 0x501   : > { %v6963_v33 = vpop.f32.mrf.mxu0 }
 0x503   : > { %v6965_v9 = vpop.f32.mrf.mxu0 }
 0x505   : > { %v6967_v24 = vpop.f32.mrf.mxu0 }
 0x508   : > { %v6716_v18 = vpop.f32.mrf.mxu1 }
 0x509   : > { %v6942_v0 = vadd.f32 %v6941_v8, %v6716_v18 }
 0x50a   : > { %v6718_v28 = vpop.f32.mrf.mxu1 }
 0x50b   : > { %v6944_v26 = vadd.f32 %v6943_v36, %v6718_v28 }
 0x50c   : > { %v6720_v2 = vpop.f32.mrf.mxu1 }
 0x50d   : > { %v6946_v20 = vadd.f32 %v6945_v63, %v6720_v2 }
 0x50e   : > { %v6722_v35 = vpop.f32.mrf.mxu1 }
 0x50f   : > { %v6948_v6 = vadd.f32 %v6947_v49, %v6722_v35 }
 0x510   : > { %v6726_v54 = vpop.f32.mrf.mxu1 }
 0x511   : > { %v6952_v4 = vadd.f32 %v6951_v37, %v6726_v54 }
 0x512   : > { %v6728_v7 = vpop.f32.mrf.mxu1 }
 0x513   : > { %v6954_v41 = vadd.f32 %v6953_v31, %v6728_v7 }
 0x514   : > { %v6730_v56 = vpop.f32.mrf.mxu1 }
 0x515   : > { %v6956_v11 = vadd.f32 %v6955_v48, %v6730_v56  ;;  %v14920_v56 = vld [vmem:[%s22420_s12 + $0x3d0] ss:$68 sps:$4 sm:$0xff]  }
 0x516   : > { %v6732_v13 = vpop.f32.mrf.mxu1 }
 0x517   : > { %v6958_v2 = vadd.f32 %v6957_v62, %v6732_v13  ;;  %v6971_v13 = vpop.f32.mrf.mxu0 }
 0x518   : > { %v19851_v45 = vpop.f32.mrf.mxu1 }
 0x519   : > { %v6962_v48 = vadd.f32 %v6961_v5, %v19851_v45 }
 0x51a   : > { %v19853_v51 = vpop.f32.mrf.mxu1 }
 0x51c   : > { %v19855_v43 = vpop.f32.mrf.mxu1 }
 0x51d   : > { %v6966_v45 = vadd.f32 %v6965_v9, %v19855_v43  ;;  %v14926_v43 = vld [vmem:[%s22420_s12 + $0x348] ss:$68 sps:$4 sm:$0xff]  }
 0x51e   : > { %v19857_v44 = vpop.f32.mrf.mxu1 }
 0x520   : > { %v19859_v52 = vpop.f32.mrf.mxu1 }
 0x522   : > { %v19861_v58 = vpop.f32.mrf.mxu1 }
 0x524   : > { %v19863_v61 = vpop.f32.mrf.mxu1 }
 0x526   : > { %v19865_v17 = vpop.f32.mrf.mxu1 }
 0x540   : > { %v7251_v27 = vpop.f32.mrf.mxu1 }
 0x541   : > { %v7290_v3 = vadd.f32 %v7251_v27, %v6942_v0 }
 0x542   : > { %v7253_v39 = vpop.f32.mrf.mxu1 }
 0x543   : > { %v7291_v14 = vadd.f32 %v7253_v39, %v6944_v26  ;;  %v7318_v30 = vmul.f32 %v19874_v25, %v7290_v3  ;;  %v14925_v26 = vld [vmem:[%s22420_s12 + $0x344] ss:$68 sps:$4 sm:$0xff]   ;;  %v14928_v3 = vld [vmem:[%s22420_s12 + $0x34c] ss:$68 sps:$4 sm:$0xff]   ;;  %v6964_v39 = vadd.f32 %v6963_v33, %v19853_v51 }
 0x544   : > { %v7255_v47 = vpop.f32.mrf.mxu1 }
 0x545   : > { %v7319_v34 = vmul.f32 %v19871_v10, %v7291_v14  ;;  %v7292_v46 = vadd.f32 %v7255_v47, %v6946_v20  ;;  %v7347_v57 = vadd.f32 %v19885_v16, %v7318_v30 }
 0x546   : > { %v7257_v19 = vpop.f32.mrf.mxu1 }
 0x547   : > { %v7320_v12 = vmul.f32 %v19874_v25, %v7292_v46  ;;  %v7293_v40 = vadd.f32 %v7257_v19, %v6948_v6  ;;  %v7348_v59 = vadd.f32 %v19881_v21, %v7319_v34  ;;  %v7363_v8 = vmax.f32 %v7347_v57, 0.0  ;;  %v14923_v34 = vld [vmem:[%s22420_s12 + $0x340] ss:$68 sps:$4 sm:$0xff]   ;;  %v6973_v46 = vpop.f32.mrf.mxu0 }
 0x548   : > { %v7261_v22 = vpop.f32.mrf.mxu1 }
 0x549   : > { %v7349_v29 = vadd.f32 %v19885_v16, %v7320_v12  ;;  %v7321_v55 = vmul.f32 %v19871_v10, %v7293_v40  ;;  %v7294_v60 = vadd.f32 %v7261_v22, %v6952_v4  ;;  %v7364_v35 = vmax.f32 %v7348_v59, 0.0  ;;  %v14931_v12 = vld [vmem:[%s22420_s12 + $0x2bc] ss:$68 sps:$4 sm:$0xff]   ;;  %v14934_v40 = vld [vmem:[%s22420_s12 + $0x2c4] ss:$68 sps:$4 sm:$0xff]  }
 0x54a   : > { %v7263_v42 = vpop.f32.mrf.mxu1 }
 0x54b   : > { %v7350_v53 = vadd.f32 %v19881_v21, %v7321_v55  ;;  %v7295_v50 = vadd.f32 %v7263_v42, %v6954_v41  ;;  %v7365_v18 = vmax.f32 %v7349_v29, 0.0  ;;  %v7322_v36 = vmul.f32 %v19874_v25, %v7294_v60 }
 0x54c   : > { %v7265_v28 = vpop.f32.mrf.mxu1  ;;  %v6968_v41 = vadd.f32 %v6967_v24, %v19857_v44  ;;  %v14932_v44 = vld [vmem:[%s22420_s12 + $0x2c0] ss:$68 sps:$4 sm:$0xff]  }
 0x54d   : > { %v7366_v54 = vmax.f32 %v7350_v53, 0.0  ;;  %v7323_v7 = vmul.f32 %v19871_v10, %v7295_v50  ;;  %v7296_v63 = vadd.f32 %v7265_v28, %v6956_v11  ;;  %v19904_v62 = vpack.c.bf16 %v7365_v18, %v7363_v8  ;;  %v14929_v53 = vld [vmem:[%s22420_s12 + $0x2b8] ss:$68 sps:$4 sm:$0xff]   ;;  %v6975_v50 = vpop.f32.mrf.mxu0 }
 0x54e   : > { %v7267_v49 = vpop.f32.mrf.mxu1  ;;  %v7351_v5 = vadd.f32 %v19885_v16, %v7322_v36  ;;  %v14937_v28 = vld [vmem:[%s22420_s12 + $0x234] ss:$68 sps:$4 sm:$0xff]   ;;  %v6976_v8 = vadd.f32 %v6975_v50, %v19863_v61  ;;  %v14964_v50 = vld [vmem:[%s22420_s12 + $0x1c] ss:$68 sps:$4 sm:$0xff]  }
 0x54f   : > { %v19895_v37 = vpack.c.bf16 %v7366_v54, %v7364_v35  ;;  %v7297_v31 = vadd.f32 %v7267_v49, %v6958_v2  ;;  %v7324_v0 = vmul.f32 %v19874_v25, %v7296_v63  ;;  %v7352_v20 = vadd.f32 %v19881_v21, %v7323_v7  ;;  %v14940_v2 = vld [vmem:[%s22420_s12 + $0x23c] ss:$68 sps:$4 sm:$0xff]  }
 0x550   : > { %v7271_v27 = vpop.f32.mrf.mxu1  ;;  %v7367_v59 = vmax.f32 %v7351_v5, 0.0  ;;  %v6972_v35 = vadd.f32 %v6971_v13, %v19859_v52  ;;  %v6974_v54 = vadd.f32 %v6973_v46, %v19861_v58  ;;  %v14938_v61 = vld [vmem:[%s22420_s12 + $0x238] ss:$68 sps:$4 sm:$0xff]  }
 0x551   : > { %v7325_v23 = vmul.f32 %v19871_v10, %v7297_v31  ;;  %9299 = vmatprep.mubr.bf16.mxu0 %v19895_v37  ;;  %9372 = vmatprep.mubr.bf16.mxu1 %v19895_v37  ;;  %v7353_v14 = vadd.f32 %v19885_v16, %v7324_v0  ;;  %v7298_v33 = vadd.f32 %v7271_v27, %v6962_v48  ;;  %v7368_v9 = vmax.f32 %v7352_v20, 0.0  ;;  %v14943_v0 = vld [vmem:[%s22420_s12 + $0x1ac] ss:$68 sps:$4 sm:$0xff]   ;;  %v14946_v27 = vld [vmem:[%s22420_s12 + $0x1b4] ss:$68 sps:$4 sm:$0xff]  }
 0x552   : > { %v7273_v47 = vpop.f32.mrf.mxu1  ;;  %9300 = vmatmul.mubr.bf16.vlgmr.msra.gmra.mxu0 %v19904_v62  ;;  %9373 = vmatmul.mubr.bf16.vlgmr.msra.gmra.mxu1 %v19904_v62 }
 0x553   : > { %v7354_v51 = vadd.f32 %v19881_v21, %v7325_v23  ;;  %v7299_v6 = vadd.f32 %v7273_v47, %v6964_v39  ;;  %9414 = vmatpush1.bf16.msra.mxu0 %v14917_v15  ;;  %9487 = vmatpush1.bf16.msra.mxu1 %v14920_v56  ;;  %v7369_v30 = vmax.f32 %v7353_v14, 0.0  ;;  %v7326_v60 = vmul.f32 %v19874_v25, %v7298_v33  ;;  %v14935_v15 = vld [vmem:[%s22420_s12 + $0x230] ss:$68 sps:$4 sm:$0xff]   ;;  %v6977_v56 = vpop.f32.mrf.mxu0 }
 0x554   : > { %v7275_v19 = vpop.f32.mrf.mxu1  ;;  %9415 = vmatprep.subr.bf16.mxu0 %v14925_v26  ;;  %9488 = vmatprep.subr.bf16.mxu1 %v14928_v3  ;;  %v6978_v26 = vadd.f32 %v6977_v56, %v19865_v17  ;;  %v14941_v17 = vld [vmem:[%s22420_s12 + $0x1a8] ss:$68 sps:$4 sm:$0xff]   ;;  %v14983_v56 = vld [vmem:[%s22420_s12 + $0x670] ss:$68 sps:$4 sm:$0xff]  }
 0x555   : > { %v7370_v4 = vmax.f32 %v7354_v51, 0.0  ;;  %v7300_v22 = vadd.f32 %v7275_v19, %v6966_v45  ;;  %v7327_v29 = vmul.f32 %v19871_v10, %v7299_v6  ;;  %v19948_v24 = vpack.c.bf16 %v7369_v30, %v7367_v59  ;;  %v14949_v19 = vld [vmem:[%s22420_s12 + $0x124] ss:$68 sps:$4 sm:$0xff]  }
 0x556   : > { %v7277_v55 = vpop.f32.mrf.mxu1  ;;  %v7355_v52 = vadd.f32 %v19885_v16, %v7326_v60  ;;  %v14953_v60 = vld [vmem:[%s22420_s12 + $0x98] ss:$68 sps:$4 sm:$0xff]  }
 0x557   : > { %v19938_v57 = vpack.c.bf16 %v7370_v4, %v7368_v9  ;;  %v7328_v42 = vmul.f32 %v19874_v25, %v7300_v22  ;;  %9416 = vmatpush1.bf16.msra.mxu0 %v14923_v34  ;;  %9489 = vmatpush1.bf16.msra.mxu1 %v14926_v43  ;;  %v7301_v11 = vadd.f32 %v7277_v55, %v6968_v41  ;;  %v14944_v34 = vld [vmem:[%s22420_s12 + $0x1b0] ss:$68 sps:$4 sm:$0xff]   ;;  %v14950_v4 = vld [vmem:[%s22420_s12 + $0x128] ss:$68 sps:$4 sm:$0xff]  }
 0x558   : > { %v7281_v18 = vpop.f32.mrf.mxu1  ;;  %9417 = vmatprep.subr.bf16.mxu0 %v14931_v12  ;;  %9490 = vmatprep.subr.bf16.mxu1 %v14934_v40  ;;  %v7356_v36 = vadd.f32 %v19881_v21, %v7327_v29  ;;  %v7371_v14 = vmax.f32 %v7355_v52, 0.0  ;;  %v14952_v12 = vld [vmem:[%s22420_s12 + $0x12c] ss:$68 sps:$4 sm:$0xff]   ;;  %v14982_v52 = vld [vmem:[%s22420_s12 + $0x704] ss:$68 sps:$4 sm:$0xff]  }
 0x559   : > { %v7357_v7 = vadd.f32 %v19885_v16, %v7328_v42  ;;  %9309 = vmatprep.mubr.bf16.mxu0 %v19938_v57  ;;  %9382 = vmatprep.mubr.bf16.mxu1 %v19938_v57  ;;  %v7329_v63 = vmul.f32 %v19871_v10, %v7301_v11  ;;  %v7302_v58 = vadd.f32 %v7281_v18, %v6972_v35  ;;  %v14956_v42 = vld [vmem:[%s22420_s12 + $0xa0] ss:$68 sps:$4 sm:$0xff]   ;;  %v14959_v11 = vld [vmem:[%s22420_s12 + $0x10] ss:$68 sps:$4 sm:$0xff]   ;;  %v14962_v18 = vld [vmem:[%s22420_s12 + $0x18] ss:$68 sps:$4 sm:$0xff]  }
 0x55a   : > { %v7283_v49 = vpop.f32.mrf.mxu1  ;;  %9310 = vmatmul.mubr.bf16.gmra.mxu0 %v19948_v24  ;;  %9383 = vmatmul.mubr.bf16.gmra.mxu1 %v19948_v24  ;;  %v7372_v23 = vmax.f32 %v7356_v36, 0.0  ;;  %v14965_v35 = vld [vmem:[%s22420_s12 + $0x808] ss:$68 sps:$4 sm:$0xff]   ;;  %v14971_v36 = vld [vmem:[%s22420_s12 + $0x780] ss:$68 sps:$4 sm:$0xff]  }
 0x55b   : > { %v7303_v31 = vadd.f32 %v7283_v49, %v6974_v54  ;;  %9418 = vmatpush1.bf16.msra.mxu0 %v14929_v53  ;;  %9491 = vmatpush1.bf16.msra.mxu1 %v14932_v44  ;;  %v7358_v13 = vadd.f32 %v19881_v21, %v7329_v63  ;;  %v7373_v3 = vmax.f32 %v7357_v7, 0.0  ;;  %v7330_v47 = vmul.f32 %v19874_v25, %v7302_v58  ;;  %v14961_v44 = vld [vmem:[%s22420_s12 + $0x14] ss:$68 sps:$4 sm:$0xff]   ;;  %v14973_v7 = vld [vmem:[%s22420_s12 + $0x784] ss:$68 sps:$4 sm:$0xff]  }
 0x55c   : > { %v7285_v48 = vpop.f32.mrf.mxu1  ;;  %9419 = vmatprep.subr.bf16.mxu0 %v14937_v28  ;;  %9492 = vmatprep.subr.bf16.mxu1 %v14940_v2  ;;  %v14967_v28 = vld [vmem:[%s22420_s12 + $0x80c] ss:$68 sps:$4 sm:$0xff]   ;;  %v14970_v2 = vld [vmem:[%s22420_s12 + $0x814] ss:$68 sps:$4 sm:$0xff]   ;;  %v14979_v49 = vld [vmem:[%s22420_s12 + $0x6fc] ss:$68 sps:$4 sm:$0xff]  }
 0x55d   : > { %v7331_v39 = vmul.f32 %v19871_v10, %v7303_v31  ;;  %v7304_v20 = vadd.f32 %v7285_v48, %v6976_v8  ;;  %v7374_v45 = vmax.f32 %v7358_v13, 0.0  ;;  %v19992_v43 = vpack.c.bf16 %v7373_v3, %v7371_v14  ;;  %v14968_v54 = vld [vmem:[%s22420_s12 + $0x810] ss:$68 sps:$4 sm:$0xff]   ;;  %v14974_v63 = vld [vmem:[%s22420_s12 + $0x788] ss:$68 sps:$4 sm:$0xff]  }
 0x55e   : > { %v7287_v5 = vpop.f32.mrf.mxu1  ;;  %v7359_v40 = vadd.f32 %v19885_v16, %v7330_v47  ;;  %v14976_v8 = vld [vmem:[%s22420_s12 + $0x78c] ss:$68 sps:$4 sm:$0xff]   ;;  %v14977_v58 = vld [vmem:[%s22420_s12 + $0x6f8] ss:$68 sps:$4 sm:$0xff]   ;;  %v14980_v31 = vld [vmem:[%s22420_s12 + $0x700] ss:$68 sps:$4 sm:$0xff]  }
 0x55f   : > { %v7332_v51 = vmul.f32 %v19874_v25, %v7304_v20  ;;  %v7305_v33 = vadd.f32 %v7287_v5, %v6978_v26  ;;  %9420 = vmatpush1.bf16.msra.mxu0 %v14935_v15  ;;  %9493 = vmatpush1.bf16.msra.mxu1 %v14938_v61  ;;  %v19984_v6 = vpack.c.bf16 %v7374_v45, %v7372_v23  ;;  %v14985_v15 = vld [vmem:[%s22420_s12 + $0x674] ss:$68 sps:$4 sm:$0xff]   ;;  %v14988_v61 = vld [vmem:[%s22420_s12 + $0x67c] ss:$68 sps:$4 sm:$0xff]   ;;  %v14991_v48 = vld [vmem:[%s22420_s12 + $0x5ec] ss:$68 sps:$4 sm:$0xff]  }
 0x560   : > { %9421 = vmatprep.subr.bf16.mxu0 %v14943_v0  ;;  %9494 = vmatprep.subr.bf16.mxu1 %v14946_v27  ;;  %v7360_v46 = vadd.f32 %v19881_v21, %v7331_v39  ;;  %v7375_v29 = vmax.f32 %v7359_v40, 0.0  ;;  %v14986_v13 = vld [vmem:[%s22420_s12 + $0x678] ss:$68 sps:$4 sm:$0xff]   ;;  %v14989_v27 = vld [vmem:[%s22420_s12 + $0x5e8] ss:$68 sps:$4 sm:$0xff]  }
 0x561   : > { %v7361_v25 = vadd.f32 %v19885_v16, %v7332_v51  ;;  %v7333_v30 = vmul.f32 %v19871_v10, %v7305_v33  ;;  %9319 = vmatprep.mubr.bf16.mxu0 %v19984_v6  ;;  %9392 = vmatprep.mubr.bf16.mxu1 %v19984_v6  ;;  %v14947_v10 = vld [vmem:[%s22420_s12 + $0x120] ss:$68 sps:$4 sm:$0xff]   ;;  %v14994_v0 = vld [vmem:[%s22420_s12 + $0x5f4] ss:$68 sps:$4 sm:$0xff]   ;;  %v15000_v39 = vld [vmem:[%s22420_s12 + $0x56c] ss:$68 sps:$4 sm:$0xff]  }
 0x562   : > { %9320 = vmatmul.mubr.bf16.gmra.mxu0 %v19992_v43  ;;  %9393 = vmatmul.mubr.bf16.gmra.mxu1 %v19992_v43  ;;  %v7376_v22 = vmax.f32 %v7360_v46, 0.0  ;;  %v14958_v16 = vld [vmem:[%s22420_s12 + $0xa4] ss:$68 sps:$4 sm:$0xff]   ;;  %v14992_v26 = vld [vmem:[%s22420_s12 + $0x5f0] ss:$68 sps:$4 sm:$0xff]  }
 0x563   : > { %v7362_v9 = vadd.f32 %v19881_v21, %v7333_v30  ;;  %9422 = vmatpush1.bf16.msra.mxu0 %v14941_v17  ;;  %9495 = vmatpush1.bf16.msra.mxu1 %v14944_v34  ;;  %v7377_v41 = vmax.f32 %v7361_v25, 0.0  ;;  %v14955_v21 = vld [vmem:[%s22420_s12 + $0x9c] ss:$68 sps:$4 sm:$0xff]   ;;  %v14997_v3 = vld [vmem:[%s22420_s12 + $0x564] ss:$68 sps:$4 sm:$0xff]  }
 0x564   : > { %9423 = vmatprep.subr.bf16.mxu0 %v14949_v19  ;;  %9496 = vmatprep.subr.bf16.mxu1 %v14952_v12  ;;  %v14995_v20 = vld [vmem:[%s22420_s12 + $0x560] ss:$68 sps:$4 sm:$0xff]   ;;  %v14998_v23 = vld [vmem:[%s22420_s12 + $0x568] ss:$68 sps:$4 sm:$0xff]   ;;  %v15001_v14 = vld [vmem:[%s22420_s12 + $0x4d8] ss:$68 sps:$4 sm:$0xff]  }
 0x565   : > { %v7378_v59 = vmax.f32 %v7362_v9, 0.0  ;;  %v20029_v53 = vpack.c.bf16 %v7377_v41, %v7375_v29  ;;  %v15003_v45 = vld [vmem:[%s22420_s12 + $0x4dc] ss:$68 sps:$4 sm:$0xff]   ;;  %v15006_v5 = vld [vmem:[%s22420_s12 + $0x4e4] ss:$68 sps:$4 sm:$0xff]  }
 0x566   : > { %v15004_v47 = vld [vmem:[%s22420_s12 + $0x4e0] ss:$68 sps:$4 sm:$0xff]   ;;  %v15009_v51 = vld [vmem:[%s22420_s12 + $0x454] ss:$68 sps:$4 sm:$0xff]   ;;  %v15025_v41 = vld [vmem:[%s22420_s12 + $0x2c8] ss:$68 sps:$4 sm:$0xff]  }
 0x567   : > { %v20021_v55 = vpack.c.bf16 %v7378_v59, %v7376_v22  ;;  %9424 = vmatpush1.bf16.msra.mxu0 %v14947_v10  ;;  %9497 = vmatpush1.bf16.msra.mxu1 %v14950_v4  ;;  %v15012_v33 = vld [vmem:[%s22420_s12 + $0x45c] ss:$68 sps:$4 sm:$0xff]   ;;  %v15007_v17 = vld [vmem:[%s22420_s12 + $0x450] ss:$68 sps:$4 sm:$0xff]   ;;  %v15018_v25 = vld [vmem:[%s22420_s12 + $0x3e4] ss:$68 sps:$4 sm:$0xff]  }
 0x568   : > { %9425 = vmatprep.subr.bf16.mxu0 %v14955_v21  ;;  %9498 = vmatprep.subr.bf16.mxu1 %v14958_v16  ;;  %v15010_v34 = vld [vmem:[%s22420_s12 + $0x458] ss:$68 sps:$4 sm:$0xff]   ;;  %v15016_v19 = vld [vmem:[%s22420_s12 + $0x3e0] ss:$68 sps:$4 sm:$0xff]   ;;  %v15019_v9 = vld [vmem:[%s22420_s12 + $0x350] ss:$68 sps:$4 sm:$0xff]  }
 0x569   : > { %9329 = vmatprep.mubr.bf16.mxu0 %v20021_v55  ;;  %9402 = vmatprep.mubr.bf16.mxu1 %v20021_v55  ;;  %v15015_v46 = vld [vmem:[%s22420_s12 + $0x3dc] ss:$68 sps:$4 sm:$0xff]   ;;  %v15021_v12 = vld [vmem:[%s22420_s12 + $0x354] ss:$68 sps:$4 sm:$0xff]   ;;  %v15027_v4 = vld [vmem:[%s22420_s12 + $0x2cc] ss:$68 sps:$4 sm:$0xff]  }
 0x56a   : > { %9330 = vmatmul.mubr.bf16.gmra.mxu0 %v20029_v53  ;;  %9403 = vmatmul.mubr.bf16.gmra.mxu1 %v20029_v53  ;;  %v15013_v30 = vld [vmem:[%s22420_s12 + $0x3d8] ss:$68 sps:$4 sm:$0xff]   ;;  %v15028_v59 = vld [vmem:[%s22420_s12 + $0x2d0] ss:$68 sps:$4 sm:$0xff]   ;;  %v15033_v21 = vld [vmem:[%s22420_s12 + $0x244] ss:$68 sps:$4 sm:$0xff]  }
 0x56b   : > { %9426 = vmatpush1.bf16.msra.mxu0 %v14953_v60  ;;  %9499 = vmatpush1.bf16.msra.mxu1 %v14956_v42  ;;  %v15024_v40 = vld [vmem:[%s22420_s12 + $0x35c] ss:$68 sps:$4 sm:$0xff]   ;;  %v15030_v22 = vld [vmem:[%s22420_s12 + $0x2d4] ss:$68 sps:$4 sm:$0xff]   ;;  %v15036_v16 = vld [vmem:[%s22420_s12 + $0x24c] ss:$68 sps:$4 sm:$0xff]  }
 0x56c   : > { %9445 = vmatprep.mubr.bf16.mxu0 %v19895_v37  ;;  %9518 = vmatprep.mubr.bf16.mxu1 %v19895_v37  ;;  %v15022_v10 = vld [vmem:[%s22420_s12 + $0x358] ss:$68 sps:$4 sm:$0xff]   ;;  %v15031_v29 = vld [vmem:[%s22420_s12 + $0x240] ss:$68 sps:$4 sm:$0xff]   ;;  %v15034_v60 = vld [vmem:[%s22420_s12 + $0x248] ss:$68 sps:$4 sm:$0xff]  }
 0x56d   : > { %9427 = vmatprep.subr.bf16.mxu0 %v14961_v44  ;;  %9500 = vmatprep.subr.bf16.mxu1 %v14964_v50  ;;  %v15039_v42 = vld [vmem:[%s22420_s12 + $0x1bc] ss:$68 sps:$4 sm:$0xff]   ;;  %v15042_v44 = vld [vmem:[%s22420_s12 + $0x1c4] ss:$68 sps:$4 sm:$0xff]  }
 0x56e   : > { %v15037_v50 = vld [vmem:[%s22420_s12 + $0x1b8] ss:$68 sps:$4 sm:$0xff]  }
 0x56f   : > { %9428 = vmatpush1.bf16.msra.mxu0 %v14959_v11  ;;  %9501 = vmatpush1.bf16.msra.mxu1 %v14962_v18  ;;  %v15040_v11 = vld [vmem:[%s22420_s12 + $0x1c0] ss:$68 sps:$4 sm:$0xff]   ;;  %v15045_v18 = vld [vmem:[%s22420_s12 + $0x134] ss:$68 sps:$4 sm:$0xff]  }
 0x570   : > { %9429 = vmatprep.subr.bf16.mxu0 %v14967_v28  ;;  %9502 = vmatprep.subr.bf16.mxu1 %v14970_v2  ;;  %v15048_v28 = vld [vmem:[%s22420_s12 + $0x13c] ss:$68 sps:$4 sm:$0xff]   ;;  %v15043_v2 = vld [vmem:[%s22420_s12 + $0x130] ss:$68 sps:$4 sm:$0xff]  }
 0x573   : > { %9430 = vmatpush2.bf16.msra.mxu0 %v14965_v35  ;;  %9503 = vmatpush2.bf16.msra.mxu1 %v14968_v54  ;;  %v15046_v35 = vld [vmem:[%s22420_s12 + $0x138] ss:$68 sps:$4 sm:$0xff]   ;;  %v15051_v54 = vld [vmem:[%s22420_s12 + $0xac] ss:$68 sps:$4 sm:$0xff]  }
 0x574   : > { %9431 = vmatprep.subr.bf16.mxu0 %v14973_v7  ;;  %9504 = vmatprep.subr.bf16.mxu1 %v14976_v8  ;;  %v15054_v7 = vld [vmem:[%s22420_s12 + $0xb4] ss:$68 sps:$4 sm:$0xff]   ;;  %v15049_v8 = vld [vmem:[%s22420_s12 + $0xa8] ss:$68 sps:$4 sm:$0xff]  }
 0x577   : > { %9432 = vmatpush2.bf16.msra.mxu0 %v14971_v36  ;;  %9505 = vmatpush2.bf16.msra.mxu1 %v14974_v63  ;;  %v15052_v36 = vld [vmem:[%s22420_s12 + $0xb0] ss:$68 sps:$4 sm:$0xff]   ;;  %v15057_v63 = vld [vmem:[%s22420_s12 + $0x24] ss:$68 sps:$4 sm:$0xff]  }
 0x578   : > { %9433 = vmatprep.subr.bf16.mxu0 %v14979_v49  ;;  %9506 = vmatprep.subr.bf16.mxu1 %v14982_v52  ;;  %v15060_v49 = vld [vmem:[%s22420_s12 + $0x2c] ss:$68 sps:$4 sm:$0xff]   ;;  %v15055_v52 = vld [vmem:[%s22420_s12 + $0x20] ss:$68 sps:$4 sm:$0xff]  }
 0x57b   : > { %9434 = vmatpush2.bf16.msra.mxu0 %v14977_v58  ;;  %9507 = vmatpush2.bf16.msra.mxu1 %v14980_v31  ;;  %v15058_v58 = vld [vmem:[%s22420_s12 + $0x28] ss:$68 sps:$4 sm:$0xff]   ;;  %v15063_v31 = vld [vmem:[%s22420_s12 + $0x81c] ss:$68 sps:$4 sm:$0xff]  }
 0x57c   : > { %9435 = vmatprep.subr.bf16.mxu0 %v14985_v15  ;;  %9508 = vmatprep.subr.bf16.mxu1 %v14988_v61  ;;  %v15066_v15 = vld [vmem:[%s22420_s12 + $0x824] ss:$68 sps:$4 sm:$0xff]   ;;  %v15061_v61 = vld [vmem:[%s22420_s12 + $0x818] ss:$68 sps:$4 sm:$0xff]  }
 0x57f   : > { %9436 = vmatpush2.bf16.msra.mxu0 %v14983_v56  ;;  %9509 = vmatpush2.bf16.msra.mxu1 %v14986_v13  ;;  %v15064_v56 = vld [vmem:[%s22420_s12 + $0x820] ss:$68 sps:$4 sm:$0xff]   ;;  %v15069_v13 = vld [vmem:[%s22420_s12 + $0x794] ss:$68 sps:$4 sm:$0xff]  }
 0x580   : > { %9437 = vmatprep.subr.bf16.mxu0 %v14991_v48  ;;  %9510 = vmatprep.subr.bf16.mxu1 %v14994_v0  ;;  %v15072_v48 = vld [vmem:[%s22420_s12 + $0x79c] ss:$68 sps:$4 sm:$0xff]   ;;  %v15067_v0 = vld [vmem:[%s22420_s12 + $0x790] ss:$68 sps:$4 sm:$0xff]  }
 0x583   : > { %9438 = vmatpush2.bf16.msra.mxu0 %v14989_v27  ;;  %9511 = vmatpush2.bf16.msra.mxu1 %v14992_v26  ;;  %v15070_v27 = vld [vmem:[%s22420_s12 + $0x798] ss:$68 sps:$4 sm:$0xff]   ;;  %v15075_v26 = vld [vmem:[%s22420_s12 + $0x70c] ss:$68 sps:$4 sm:$0xff]  }
 0x584   : > { %9439 = vmatprep.subr.bf16.mxu0 %v14997_v3  ;;  %9512 = vmatprep.subr.bf16.mxu1 %v15000_v39  ;;  %v15078_v3 = vld [vmem:[%s22420_s12 + $0x714] ss:$68 sps:$4 sm:$0xff]   ;;  %v15073_v39 = vld [vmem:[%s22420_s12 + $0x708] ss:$68 sps:$4 sm:$0xff]  }
 0x587   : > { %9440 = vmatpush2.bf16.msra.mxu0 %v14995_v20  ;;  %9513 = vmatpush2.bf16.msra.mxu1 %v14998_v23  ;;  %v15076_v20 = vld [vmem:[%s22420_s12 + $0x710] ss:$68 sps:$4 sm:$0xff]   ;;  %v15081_v23 = vld [vmem:[%s22420_s12 + $0x684] ss:$68 sps:$4 sm:$0xff]  }
 0x588   : > { %9441 = vmatprep.subr.bf16.mxu0 %v15003_v45  ;;  %9514 = vmatprep.subr.bf16.mxu1 %v15006_v5  ;;  %v15084_v45 = vld [vmem:[%s22420_s12 + $0x68c] ss:$68 sps:$4 sm:$0xff]   ;;  %v15079_v5 = vld [vmem:[%s22420_s12 + $0x680] ss:$68 sps:$4 sm:$0xff]  }
 0x58b   : > { %9442 = vmatpush2.bf16.msra.mxu0 %v15001_v14  ;;  %9515 = vmatpush2.bf16.msra.mxu1 %v15004_v47  ;;  %v15082_v14 = vld [vmem:[%s22420_s12 + $0x688] ss:$68 sps:$4 sm:$0xff]   ;;  %v15087_v47 = vld [vmem:[%s22420_s12 + $0x5fc] ss:$68 sps:$4 sm:$0xff]  }
 0x58c   : > { %9443 = vmatprep.subr.bf16.mxu0 %v15009_v51  ;;  %9516 = vmatprep.subr.bf16.mxu1 %v15012_v33  ;;  %v15090_v51 = vld [vmem:[%s22420_s12 + $0x604] ss:$68 sps:$4 sm:$0xff]   ;;  %v15085_v33 = vld [vmem:[%s22420_s12 + $0x5f8] ss:$68 sps:$4 sm:$0xff]  }
 0x58f   : > { %9444 = vmatpush2.bf16.msra.mxu0 %v15007_v17  ;;  %9517 = vmatpush2.bf16.msra.mxu1 %v15010_v34  ;;  %v15088_v17 = vld [vmem:[%s22420_s12 + $0x600] ss:$68 sps:$4 sm:$0xff]   ;;  %v15093_v34 = vld [vmem:[%s22420_s12 + $0x574] ss:$68 sps:$4 sm:$0xff]  }
 0x590   : > { %9559 = vmatprep.subr.bf16.mxu0 %v15015_v46  ;;  %9632 = vmatprep.subr.bf16.mxu1 %v15018_v25  ;;  %v15096_v46 = vld [vmem:[%s22420_s12 + $0x57c] ss:$68 sps:$4 sm:$0xff]   ;;  %v15091_v25 = vld [vmem:[%s22420_s12 + $0x570] ss:$68 sps:$4 sm:$0xff]  }
 0x592   : > { %9446 = vmatmul.mubr.bf16.vlgmr.msra.gmra.mxu0 %v19904_v62  ;;  %9519 = vmatmul.mubr.bf16.vlgmr.msra.gmra.mxu1 %v19904_v62 }
 0x593   : > { %9455 = vmatprep.mubr.bf16.mxu0 %v19938_v57  ;;  %9528 = vmatprep.mubr.bf16.mxu1 %v19938_v57 }
 0x594   : > { %9560 = vmatpush1.bf16.msra.mxu0 %v15013_v30  ;;  %9633 = vmatpush1.bf16.msra.mxu1 %v15016_v19  ;;  %v15094_v30 = vld [vmem:[%s22420_s12 + $0x578] ss:$68 sps:$4 sm:$0xff]   ;;  %v15099_v19 = vld [vmem:[%s22420_s12 + $0x4ec] ss:$68 sps:$4 sm:$0xff]  }
 0x595   : > { %9561 = vmatprep.subr.bf16.mxu0 %v15021_v12  ;;  %9634 = vmatprep.subr.bf16.mxu1 %v15024_v40  ;;  %v15102_v12 = vld [vmem:[%s22420_s12 + $0x4f4] ss:$68 sps:$4 sm:$0xff]   ;;  %v15097_v40 = vld [vmem:[%s22420_s12 + $0x4e8] ss:$68 sps:$4 sm:$0xff]  }
 0x598   : > { %9562 = vmatpush1.bf16.msra.mxu0 %v15019_v9  ;;  %9635 = vmatpush1.bf16.msra.mxu1 %v15022_v10  ;;  %v15100_v9 = vld [vmem:[%s22420_s12 + $0x4f0] ss:$68 sps:$4 sm:$0xff]   ;;  %v15105_v10 = vld [vmem:[%s22420_s12 + $0x464] ss:$68 sps:$4 sm:$0xff]  }
 0x599   : > { %9563 = vmatprep.subr.bf16.mxu0 %v15027_v4  ;;  %9636 = vmatprep.subr.bf16.mxu1 %v15030_v22  ;;  %v15108_v4 = vld [vmem:[%s22420_s12 + $0x46c] ss:$68 sps:$4 sm:$0xff]   ;;  %v15103_v22 = vld [vmem:[%s22420_s12 + $0x460] ss:$68 sps:$4 sm:$0xff]  }
 0x59a   : > { %9456 = vmatmul.mubr.bf16.gmra.mxu0 %v19948_v24  ;;  %9529 = vmatmul.mubr.bf16.gmra.mxu1 %v19948_v24 }
 0x59b   : > { %9465 = vmatprep.mubr.bf16.mxu0 %v19984_v6  ;;  %9538 = vmatprep.mubr.bf16.mxu1 %v19984_v6 }
 0x59c   : > { %9564 = vmatpush1.bf16.msra.mxu0 %v15025_v41  ;;  %9637 = vmatpush1.bf16.msra.mxu1 %v15028_v59  ;;  %v15106_v41 = vld [vmem:[%s22420_s12 + $0x468] ss:$68 sps:$4 sm:$0xff]  }
 0x59d   : > { %9565 = vmatprep.subr.bf16.mxu0 %v15033_v21  ;;  %9638 = vmatprep.subr.bf16.mxu1 %v15036_v16  ;;  %v15111_v59 = vld [vmem:[%s22420_s12 + $0x3ec] ss:$68 sps:$4 sm:$0xff]   ;;  %v15114_v21 = vld [vmem:[%s22420_s12 + $0x3f4] ss:$68 sps:$4 sm:$0xff]  }
 0x59e   : > { %v15109_v16 = vld [vmem:[%s22420_s12 + $0x3e8] ss:$68 sps:$4 sm:$0xff]  }
 0x5a0   : > { %9566 = vmatpush1.bf16.msra.mxu0 %v15031_v29  ;;  %9639 = vmatpush1.bf16.msra.mxu1 %v15034_v60  ;;  %v15112_v29 = vld [vmem:[%s22420_s12 + $0x3f0] ss:$68 sps:$4 sm:$0xff]   ;;  %v15117_v60 = vld [vmem:[%s22420_s12 + $0x364] ss:$68 sps:$4 sm:$0xff]  }
 0x5a1   : > { %9567 = vmatprep.subr.bf16.mxu0 %v15039_v42  ;;  %9640 = vmatprep.subr.bf16.mxu1 %v15042_v44  ;;  %v15120_v42 = vld [vmem:[%s22420_s12 + $0x36c] ss:$68 sps:$4 sm:$0xff]   ;;  %v15115_v44 = vld [vmem:[%s22420_s12 + $0x360] ss:$68 sps:$4 sm:$0xff]  }
 0x5a2   : > { %9466 = vmatmul.mubr.bf16.gmra.mxu0 %v19992_v43  ;;  %9539 = vmatmul.mubr.bf16.gmra.mxu1 %v19992_v43 }
 0x5a3   : > { %9475 = vmatprep.mubr.bf16.mxu0 %v20021_v55  ;;  %9548 = vmatprep.mubr.bf16.mxu1 %v20021_v55 }
 0x5a4   : > { %9568 = vmatpush1.bf16.msra.mxu0 %v15037_v50  ;;  %9641 = vmatpush1.bf16.msra.mxu1 %v15040_v11  ;;  %v15118_v50 = vld [vmem:[%s22420_s12 + $0x368] ss:$68 sps:$4 sm:$0xff]   ;;  %v15123_v11 = vld [vmem:[%s22420_s12 + $0x2dc] ss:$68 sps:$4 sm:$0xff]  }
 0x5a5   : > { %9569 = vmatprep.subr.bf16.mxu0 %v15045_v18  ;;  %9642 = vmatprep.subr.bf16.mxu1 %v15048_v28  ;;  %v15126_v18 = vld [vmem:[%s22420_s12 + $0x2e4] ss:$68 sps:$4 sm:$0xff]   ;;  %v15121_v28 = vld [vmem:[%s22420_s12 + $0x2d8] ss:$68 sps:$4 sm:$0xff]  }
 0x5a8   : > { %9570 = vmatpush1.bf16.msra.mxu0 %v15043_v2  ;;  %9643 = vmatpush1.bf16.msra.mxu1 %v15046_v35  ;;  %v15124_v2 = vld [vmem:[%s22420_s12 + $0x2e0] ss:$68 sps:$4 sm:$0xff]   ;;  %v15129_v35 = vld [vmem:[%s22420_s12 + $0x254] ss:$68 sps:$4 sm:$0xff]  }
 0x5a9   : > { %9571 = vmatprep.subr.bf16.mxu0 %v15051_v54  ;;  %9644 = vmatprep.subr.bf16.mxu1 %v15054_v7  ;;  %v15132_v54 = vld [vmem:[%s22420_s12 + $0x25c] ss:$68 sps:$4 sm:$0xff]   ;;  %v15127_v7 = vld [vmem:[%s22420_s12 + $0x250] ss:$68 sps:$4 sm:$0xff]  }
 0x5aa   : > { %9476 = vmatmul.mubr.bf16.gmra.mxu0 %v20029_v53  ;;  %9549 = vmatmul.mubr.bf16.gmra.mxu1 %v20029_v53 }
 0x5ab   : > { %9591 = vmatprep.mubr.bf16.mxu0 %v19895_v37  ;;  %9664 = vmatprep.mubr.bf16.mxu1 %v19895_v37 }
 0x5ac   : > { %9572 = vmatpush1.bf16.msra.mxu0 %v15049_v8  ;;  %9645 = vmatpush1.bf16.msra.mxu1 %v15052_v36  ;;  %v15130_v8 = vld [vmem:[%s22420_s12 + $0x258] ss:$68 sps:$4 sm:$0xff]   ;;  %v15135_v36 = vld [vmem:[%s22420_s12 + $0x1cc] ss:$68 sps:$4 sm:$0xff]  }
 0x5ad   : > { %9573 = vmatprep.subr.bf16.mxu0 %v15057_v63  ;;  %9646 = vmatprep.subr.bf16.mxu1 %v15060_v49  ;;  %v15138_v63 = vld [vmem:[%s22420_s12 + $0x1d4] ss:$68 sps:$4 sm:$0xff]   ;;  %v15133_v49 = vld [vmem:[%s22420_s12 + $0x1c8] ss:$68 sps:$4 sm:$0xff]  }
 0x5b0   : > { %9574 = vmatpush1.bf16.msra.mxu0 %v15055_v52  ;;  %9647 = vmatpush1.bf16.msra.mxu1 %v15058_v58  ;;  %v15136_v52 = vld [vmem:[%s22420_s12 + $0x1d0] ss:$68 sps:$4 sm:$0xff]   ;;  %v15141_v58 = vld [vmem:[%s22420_s12 + $0x144] ss:$68 sps:$4 sm:$0xff]  }
 0x5b1   : > { %9575 = vmatprep.subr.bf16.mxu0 %v15063_v31  ;;  %9648 = vmatprep.subr.bf16.mxu1 %v15066_v15  ;;  %v15144_v31 = vld [vmem:[%s22420_s12 + $0x14c] ss:$68 sps:$4 sm:$0xff]   ;;  %v15139_v15 = vld [vmem:[%s22420_s12 + $0x140] ss:$68 sps:$4 sm:$0xff]  }
 0x5b4   : > { %9576 = vmatpush2.bf16.msra.mxu0 %v15061_v61  ;;  %9649 = vmatpush2.bf16.msra.mxu1 %v15064_v56  ;;  %v15142_v61 = vld [vmem:[%s22420_s12 + $0x148] ss:$68 sps:$4 sm:$0xff]   ;;  %v15147_v56 = vld [vmem:[%s22420_s12 + $0xbc] ss:$68 sps:$4 sm:$0xff]  }
 0x5b5   : > { %9577 = vmatprep.subr.bf16.mxu0 %v15069_v13  ;;  %9650 = vmatprep.subr.bf16.mxu1 %v15072_v48  ;;  %v15150_v13 = vld [vmem:[%s22420_s12 + $0xc4] ss:$68 sps:$4 sm:$0xff]   ;;  %v15145_v48 = vld [vmem:[%s22420_s12 + $0xb8] ss:$68 sps:$4 sm:$0xff]  }
 0x5b8   : > { %9578 = vmatpush2.bf16.msra.mxu0 %v15067_v0  ;;  %9651 = vmatpush2.bf16.msra.mxu1 %v15070_v27  ;;  %v15148_v0 = vld [vmem:[%s22420_s12 + $0xc0] ss:$68 sps:$4 sm:$0xff]   ;;  %v15153_v27 = vld [vmem:[%s22420_s12 + $0x34] ss:$68 sps:$4 sm:$0xff]  }
 0x5b9   : > { %9579 = vmatprep.subr.bf16.mxu0 %v15075_v26  ;;  %9652 = vmatprep.subr.bf16.mxu1 %v15078_v3  ;;  %v15156_v26 = vld [vmem:[%s22420_s12 + $0x3c] ss:$68 sps:$4 sm:$0xff]   ;;  %v15151_v3 = vld [vmem:[%s22420_s12 + $0x30] ss:$68 sps:$4 sm:$0xff]  }
 0x5bc   : > { %9580 = vmatpush2.bf16.msra.mxu0 %v15073_v39  ;;  %9653 = vmatpush2.bf16.msra.mxu1 %v15076_v20  ;;  %v15154_v39 = vld [vmem:[%s22420_s12 + $0x38] ss:$68 sps:$4 sm:$0xff]   ;;  %v15159_v20 = vld [vmem:[%s22420_s12 + $0x82c] ss:$68 sps:$4 sm:$0xff]  }
 0x5bd   : > { %9581 = vmatprep.subr.bf16.mxu0 %v15081_v23  ;;  %9654 = vmatprep.subr.bf16.mxu1 %v15084_v45  ;;  %v15162_v23 = vld [vmem:[%s22420_s12 + $0x834] ss:$68 sps:$4 sm:$0xff]   ;;  %v15157_v45 = vld [vmem:[%s22420_s12 + $0x828] ss:$68 sps:$4 sm:$0xff]  }
 0x5c0   : > { %9582 = vmatpush2.bf16.msra.mxu0 %v15079_v5  ;;  %9655 = vmatpush2.bf16.msra.mxu1 %v15082_v14  ;;  %v15160_v5 = vld [vmem:[%s22420_s12 + $0x830] ss:$68 sps:$4 sm:$0xff]   ;;  %v15165_v14 = vld [vmem:[%s22420_s12 + $0x7a4] ss:$68 sps:$4 sm:$0xff]  }
 0x5c1   : > { %9583 = vmatprep.subr.bf16.mxu0 %v15087_v47  ;;  %9656 = vmatprep.subr.bf16.mxu1 %v15090_v51  ;;  %v15168_v47 = vld [vmem:[%s22420_s12 + $0x7ac] ss:$68 sps:$4 sm:$0xff]   ;;  %v15163_v51 = vld [vmem:[%s22420_s12 + $0x7a0] ss:$68 sps:$4 sm:$0xff]  }
 0x5c4   : > { %9584 = vmatpush2.bf16.msra.mxu0 %v15085_v33  ;;  %9657 = vmatpush2.bf16.msra.mxu1 %v15088_v17  ;;  %v15166_v33 = vld [vmem:[%s22420_s12 + $0x7a8] ss:$68 sps:$4 sm:$0xff]   ;;  %v15171_v17 = vld [vmem:[%s22420_s12 + $0x71c] ss:$68 sps:$4 sm:$0xff]  }
 0x5c5   : > { %9585 = vmatprep.subr.bf16.mxu0 %v15093_v34  ;;  %9658 = vmatprep.subr.bf16.mxu1 %v15096_v46  ;;  %v15174_v34 = vld [vmem:[%s22420_s12 + $0x724] ss:$68 sps:$4 sm:$0xff]   ;;  %v15169_v46 = vld [vmem:[%s22420_s12 + $0x718] ss:$68 sps:$4 sm:$0xff]  }
 0x5c8   : > { %9586 = vmatpush2.bf16.msra.mxu0 %v15091_v25  ;;  %9659 = vmatpush2.bf16.msra.mxu1 %v15094_v30  ;;  %v15172_v25 = vld [vmem:[%s22420_s12 + $0x720] ss:$68 sps:$4 sm:$0xff]   ;;  %v15177_v30 = vld [vmem:[%s22420_s12 + $0x694] ss:$68 sps:$4 sm:$0xff]  }
 0x5c9   : > { %9587 = vmatprep.subr.bf16.mxu0 %v15099_v19  ;;  %9660 = vmatprep.subr.bf16.mxu1 %v15102_v12  ;;  %v15180_v19 = vld [vmem:[%s22420_s12 + $0x69c] ss:$68 sps:$4 sm:$0xff]   ;;  %v15175_v12 = vld [vmem:[%s22420_s12 + $0x690] ss:$68 sps:$4 sm:$0xff]  }
 0x5cc   : > { %9588 = vmatpush2.bf16.msra.mxu0 %v15097_v40  ;;  %9661 = vmatpush2.bf16.msra.mxu1 %v15100_v9  ;;  %v15178_v40 = vld [vmem:[%s22420_s12 + $0x698] ss:$68 sps:$4 sm:$0xff]   ;;  %v15183_v9 = vld [vmem:[%s22420_s12 + $0x60c] ss:$68 sps:$4 sm:$0xff]  }
 0x5cd   : > { %9589 = vmatprep.subr.bf16.mxu0 %v15105_v10  ;;  %9662 = vmatprep.subr.bf16.mxu1 %v15108_v4  ;;  %v15186_v10 = vld [vmem:[%s22420_s12 + $0x614] ss:$68 sps:$4 sm:$0xff]   ;;  %v15181_v4 = vld [vmem:[%s22420_s12 + $0x608] ss:$68 sps:$4 sm:$0xff]  }
 0x5d0   : > { %9590 = vmatpush2.bf16.msra.mxu0 %v15103_v22  ;;  %9663 = vmatpush2.bf16.msra.mxu1 %v15106_v41  ;;  %v15184_v22 = vld [vmem:[%s22420_s12 + $0x610] ss:$68 sps:$4 sm:$0xff]   ;;  %v15189_v41 = vld [vmem:[%s22420_s12 + $0x584] ss:$68 sps:$4 sm:$0xff]  }
 0x5d1   : > { %9705 = vmatprep.subr.bf16.mxu0 %v15111_v59  ;;  %9778 = vmatprep.subr.bf16.mxu1 %v15114_v21  ;;  %v15192_v59 = vld [vmem:[%s22420_s12 + $0x58c] ss:$68 sps:$4 sm:$0xff]   ;;  %v15187_v21 = vld [vmem:[%s22420_s12 + $0x580] ss:$68 sps:$4 sm:$0xff]  }
 0x5d3   : > { %9592 = vmatmul.mubr.bf16.vlgmr.msra.gmra.mxu0 %v19904_v62  ;;  %9665 = vmatmul.mubr.bf16.vlgmr.msra.gmra.mxu1 %v19904_v62 }
 0x5d4   : > { %9601 = vmatprep.mubr.bf16.mxu0 %v19938_v57  ;;  %9674 = vmatprep.mubr.bf16.mxu1 %v19938_v57 }
 0x5d5   : > { %9706 = vmatpush1.bf16.msra.mxu0 %v15109_v16  ;;  %9779 = vmatpush1.bf16.msra.mxu1 %v15112_v29  ;;  %v15190_v16 = vld [vmem:[%s22420_s12 + $0x588] ss:$68 sps:$4 sm:$0xff]   ;;  %v15195_v29 = vld [vmem:[%s22420_s12 + $0x4fc] ss:$68 sps:$4 sm:$0xff]  }
 0x5d6   : > { %9707 = vmatprep.subr.bf16.mxu0 %v15117_v60  ;;  %9780 = vmatprep.subr.bf16.mxu1 %v15120_v42  ;;  %v15198_v60 = vld [vmem:[%s22420_s12 + $0x504] ss:$68 sps:$4 sm:$0xff]   ;;  %v22644_v42 = vld [vmem:[#allocation29_spill] sm:$0xff] }
 0x5d9   : > { %9708 = vmatpush1.bf16.msra.mxu0 %v15115_v44  ;;  %9781 = vmatpush1.bf16.msra.mxu1 %v15118_v50  ;;  %v22645_v44 = vld [vmem:[#allocation30_spill] sm:$0xff] }
 0x5da   : > { %9709 = vmatprep.subr.bf16.mxu0 %v15123_v11  ;;  %9782 = vmatprep.subr.bf16.mxu1 %v15126_v18  ;;  %v2423_v50 = vadd.f32 %v22645_v44, %v22644_v42  ;;  %v22646_v11 = vld [vmem:[#allocation47_spill] sm:$0xff]  ;;  %v15522_v42 = vld [vmem:[%s22410_s2 + $0x1] ss:$2 sm:$0x3] }
 0x5db   : > { %9602 = vmatmul.mubr.bf16.gmra.mxu0 %v19948_v24  ;;  %9675 = vmatmul.mubr.bf16.gmra.mxu1 %v19948_v24  ;;  %v20655_v44 = vrot.slane %v15522_v42, %v18557_v32  ;;  %v22666_v42 = vld [vmem:[#allocation46_spill] sm:$0xff] }
 0x5dc   : > { %9611 = vmatprep.mubr.bf16.mxu0 %v19984_v6  ;;  %9684 = vmatprep.mubr.bf16.mxu1 %v19984_v6  ;;  %v2496_v18 = vadd.f32 %v22646_v11, %v2423_v50  ;;  %v22656_v50 = vld [vmem:[#allocation49_spill] sm:$0xff] }
 0x5dd   : > { %9710 = vmatpush1.bf16.msra.mxu0 %v15121_v28  ;;  %9783 = vmatpush1.bf16.msra.mxu1 %v15124_v2  ;;  %v15193_v28 = vld [vmem:[%s22420_s12 + $0x4f8] ss:$68 sps:$4 sm:$0xff]   ;;  %v15196_v2 = vld [vmem:[%s22420_s12 + $0x500] ss:$68 sps:$4 sm:$0xff]  }
 0x5de   : > { %9711 = vmatprep.subr.bf16.mxu0 %v15129_v35  ;;  %9784 = vmatprep.subr.bf16.mxu1 %v15132_v54  ;;  %v15201_v35 = vld [vmem:[%s22420_s12 + $0x474] ss:$68 sps:$4 sm:$0xff]   ;;  %v15204_v54 = vld [vmem:[%s22420_s12 + $0x47c] ss:$68 sps:$4 sm:$0xff]  }
 0x5e1   : > { %9712 = vmatpush1.bf16.msra.mxu0 %v15127_v7  ;;  %9785 = vmatpush1.bf16.msra.mxu1 %v15130_v8  ;;  %v22647_v7 = vld [vmem:[#allocation48_spill] sm:$0xff] }
 0x5e2   : > { %9713 = vmatprep.subr.bf16.mxu0 %v15135_v36  ;;  %9786 = vmatprep.subr.bf16.mxu1 %v15138_v63  ;;  %v2569_v8 = vadd.f32 %v22647_v7, %v2496_v18  ;;  %v15199_v36 = vld [vmem:[%s22420_s12 + $0x470] ss:$68 sps:$4 sm:$0xff]   ;;  %v15202_v63 = vld [vmem:[%s22420_s12 + $0x478] ss:$68 sps:$4 sm:$0xff]  }
 0x5e3   : > { %9612 = vmatmul.mubr.bf16.gmra.mxu0 %v19992_v43  ;;  %9685 = vmatmul.mubr.bf16.gmra.mxu1 %v19992_v43  ;;  %v15230_v7 = vld [vmem:[%s22420_s12 + $0x590] ss:$68 sps:$4 sm:$0xff]  }
 0x5e4   : > { %9621 = vmatprep.mubr.bf16.mxu0 %v20021_v55  ;;  %9694 = vmatprep.mubr.bf16.mxu1 %v20021_v55 }
 0x5e5   : > { %9714 = vmatpush1.bf16.msra.mxu0 %v15133_v49  ;;  %9787 = vmatpush1.bf16.msra.mxu1 %v15136_v52  ;;  %v15205_v49 = vld [vmem:[%s22420_s12 + $0x838] ss:$68 sps:$4 sm:$0xff]  }
 0x5e6   : > { %9715 = vmatprep.subr.bf16.mxu0 %v15141_v58  ;;  %9788 = vmatprep.subr.bf16.mxu1 %v15144_v31  ;;  %v15208_v52 = vld [vmem:[%s22419_s11 + $0x3bc] ss:$68 sps:$4 sm:$0xff]   ;;  %v22648_v58 = vld [vmem:[#allocation55_spill] sm:$0xff] }
 0x5e7   : > { %v2642_v31 = vadd.f32 %v22648_v58, %v2569_v8  ;;  %v15233_v8 = vld [vmem:[%s22419_s11 + $0x114] ss:$68 sps:$4 sm:$0xff]  }
 0x5e9   : > { %9716 = vmatpush1.bf16.msra.mxu0 %v15139_v15  ;;  %9789 = vmatpush1.bf16.msra.mxu1 %v15142_v61  ;;  %v15206_v15 = vld [vmem:[%s22419_s11 + $0x3b8] ss:$68 sps:$4 sm:$0xff]  }
 0x5ea   : > { %9717 = vmatprep.subr.bf16.mxu0 %v15147_v56  ;;  %9790 = vmatprep.subr.bf16.mxu1 %v15150_v13  ;;  %v15209_v61 = vld [vmem:[%s22420_s12 + $0x3f8] ss:$68 sps:$4 sm:$0xff]   ;;  %v22649_v56 = vld [vmem:[#allocation56_spill] sm:$0xff] }
 0x5eb   : > { %9622 = vmatmul.mubr.bf16.gmra.mxu0 %v20029_v53  ;;  %9695 = vmatmul.mubr.bf16.gmra.mxu1 %v20029_v53  ;;  %v2715_v13 = vadd.f32 %v22649_v56, %v2642_v31  ;;  %v15231_v31 = vld [vmem:[%s22419_s11 + $0x110] ss:$68 sps:$4 sm:$0xff]   ;;  %v15235_v56 = vld [vmem:[%s22420_s12 + $0x508] ss:$68 sps:$4 sm:$0xff]  }
 0x5ec   : > { %9737 = vmatprep.mubr.bf16.mxu0 %v19895_v37  ;;  %9810 = vmatprep.mubr.bf16.mxu1 %v19895_v37 }
 0x5ed   : > { %9718 = vmatpush1.bf16.msra.mxu0 %v15145_v48  ;;  %9791 = vmatpush1.bf16.msra.mxu1 %v15148_v0  ;;  %v15210_v48 = vld [vmem:[%s22420_s12 + $0x7b0] ss:$68 sps:$4 sm:$0xff]  }
 0x5ee   : > { %9719 = vmatprep.subr.bf16.mxu0 %v15153_v27  ;;  %9792 = vmatprep.subr.bf16.mxu1 %v15156_v26  ;;  %v15213_v0 = vld [vmem:[%s22419_s11 + $0x334] ss:$68 sps:$4 sm:$0xff]   ;;  %v22650_v27 = vld [vmem:[#allocation63_spill] sm:$0xff] }
 0x5ef   : > { %v2788_v26 = vadd.f32 %v22650_v27, %v2715_v13  ;;  %v15238_v13 = vld [vmem:[%s22419_s11 + $0x8c] ss:$68 sps:$4 sm:$0xff]  }
 0x5f1   : > { %9720 = vmatpush1.bf16.msra.mxu0 %v15151_v3  ;;  %9793 = vmatpush1.bf16.msra.mxu1 %v15154_v39  ;;  %v15211_v3 = vld [vmem:[%s22419_s11 + $0x330] ss:$68 sps:$4 sm:$0xff]  }
 0x5f2   : > { %9721 = vmatprep.subr.bf16.mxu0 %v15159_v20  ;;  %9794 = vmatprep.subr.bf16.mxu1 %v15162_v23  ;;  %v15214_v39 = vld [vmem:[%s22420_s12 + $0x370] ss:$68 sps:$4 sm:$0xff]   ;;  %v15215_v20 = vld [vmem:[%s22420_s12 + $0x728] ss:$68 sps:$4 sm:$0xff]  }
 0x5f3   : > { %v15218_v23 = vld [vmem:[%s22419_s11 + $0x2ac] ss:$68 sps:$4 sm:$0xff]  }
 0x5f5   : > { %9722 = vmatpush2.bf16.msra.mxu0 %v15157_v45  ;;  %9795 = vmatpush2.bf16.msra.mxu1 %v15160_v5  ;;  %v22651_v45 = vld [vmem:[#allocation64_spill] sm:$0xff] }
 0x5f6   : > { %9723 = vmatprep.subr.bf16.mxu0 %v15165_v14  ;;  %9796 = vmatprep.subr.bf16.mxu1 %v15168_v47  ;;  %v2861_v5 = vadd.f32 %v22651_v45, %v2788_v26  ;;  %v22660_v26 = vld [vmem:[#allocation57_spill] sm:$0xff] }
 0x5f9   : > { %9724 = vmatpush2.bf16.msra.mxu0 %v15163_v51  ;;  %9797 = vmatpush2.bf16.msra.mxu1 %v15166_v33  ;;  %v15216_v51 = vld [vmem:[%s22419_s11 + $0x2a8] ss:$68 sps:$4 sm:$0xff]  }
 0x5fa   : > { %9725 = vmatprep.subr.bf16.mxu0 %v15171_v17  ;;  %9798 = vmatprep.subr.bf16.mxu1 %v15174_v34  ;;  %v15219_v33 = vld [vmem:[%s22420_s12 + $0x2e8] ss:$68 sps:$4 sm:$0xff]  }
 0x5fb   : > { %v22652_v17 = vld [vmem:[#allocation11_spill] sm:$0xff] }
 0x5fc   : > { %v2934_v34 = vadd.f32 %v22652_v17, %v2861_v5 }
 0x5fd   : > { %9726 = vmatpush2.bf16.msra.mxu0 %v15169_v46  ;;  %9799 = vmatpush2.bf16.msra.mxu1 %v15172_v25  ;;  %v15220_v46 = vld [vmem:[%s22420_s12 + $0x6a0] ss:$68 sps:$4 sm:$0xff]  }
 0x5fe   : > { %9727 = vmatprep.subr.bf16.mxu0 %v15177_v30  ;;  %9800 = vmatprep.subr.bf16.mxu1 %v15180_v19  ;;  %v15223_v25 = vld [vmem:[%s22419_s11 + $0x224] ss:$68 sps:$4 sm:$0xff]   ;;  %v15521_v30 = vld [vmem:[%s22410_s2] ss:$2 sm:$0x3] }
 0x5ff   : > { %v20626_v19 = vrot.slane %v15521_v30, %v18557_v32 }
 0x601   : > { %9728 = vmatpush2.bf16.msra.mxu0 %v15175_v12  ;;  %9801 = vmatpush2.bf16.msra.mxu1 %v15178_v40 }
 0x602   : > { %9729 = vmatprep.subr.bf16.mxu0 %v15183_v9  ;;  %9802 = vmatprep.subr.bf16.mxu1 %v15186_v10  ;;  %v15221_v9 = vld [vmem:[%s22419_s11 + $0x220] ss:$68 sps:$4 sm:$0xff]  }
 0x603   : > { %v15224_v10 = vld [vmem:[%s22420_s12 + $0x260] ss:$68 sps:$4 sm:$0xff]  }
 0x605   : > { %9730 = vmatpush2.bf16.msra.mxu0 %v15181_v4  ;;  %9803 = vmatpush2.bf16.msra.mxu1 %v15184_v22  ;;  %v2981_v4 = vmul.f32 %v20626_v19, %v2934_v34  ;;  %v15225_v22 = vld [vmem:[%s22420_s12 + $0x618] ss:$68 sps:$4 sm:$0xff]   ;;  %v15240_v34 = vld [vmem:[%s22420_s12 + $0x480] ss:$68 sps:$4 sm:$0xff]  }
 0x606   : > { %9731 = vmatprep.subr.bf16.mxu0 %v15189_v41  ;;  %9804 = vmatprep.subr.bf16.mxu1 %v15192_v59  ;;  %v15228_v41 = vld [vmem:[%s22419_s11 + $0x19c] ss:$68 sps:$4 sm:$0xff]   ;;  %v22653_v59 = vld [vmem:[#allocation35_spill] sm:$0xff] }
 0x609   : > { %9732 = vmatpush2.bf16.msra.mxu0 %v15187_v21  ;;  %9805 = vmatpush2.bf16.msra.mxu1 %v15190_v16  ;;  %v22654_v21 = vld [vmem:[#allocation36_spill] sm:$0xff] }
 0x60a   : > { %9733 = vmatprep.subr.bf16.mxu0 %v15195_v29  ;;  %9806 = vmatprep.subr.bf16.mxu1 %v15198_v60  ;;  %v2433_v16 = vadd.f32 %v22654_v21, %v22653_v59  ;;  %v22655_v29 = vld [vmem:[#allocation10_spill] sm:$0xff] }
 0x60b   : > { %v2979_v60 = vmul.f32 %v20626_v19, %v22655_v29  ;;  %v15241_v21 = vld [vmem:[%s22419_s11] ss:$68 sps:$4 sm:$0xff]  }
 0x60c   : > { %v2506_v11 = vadd.f32 %v22656_v50, %v2433_v16  ;;  %v15247_v16 = vld [vmem:[%s22419_s11 + $0x5dc] ss:$68 sps:$4 sm:$0xff]   ;;  %v15250_v29 = vld [vmem:[%s22419_s11 + $0x3c4] ss:$68 sps:$4 sm:$0xff]  }
 0x60d   : > { %9734 = vmatpush2.bf16.msra.mxu0 %v15193_v28  ;;  %9807 = vmatpush2.bf16.msra.mxu1 %v15196_v2  ;;  %v15226_v2 = vld [vmem:[%s22419_s11 + $0x198] ss:$68 sps:$4 sm:$0xff]  }
 0x60e   : > { %9735 = vmatprep.subr.bf16.mxu0 %v15201_v35  ;;  %9808 = vmatprep.subr.bf16.mxu1 %v15204_v54  ;;  %v15229_v35 = vld [vmem:[%s22420_s12 + $0x1d8] ss:$68 sps:$4 sm:$0xff]   ;;  %v3010_v54 = vadd.f32 %v20655_v44, %v2981_v4 }
 0x60f   : > { %v22664_v4 = vld [vmem:[#allocation13_spill] sm:$0xff] }
 0x611   : > { %9736 = vmatpush2.bf16.msra.mxu0 %v15199_v36  ;;  %9809 = vmatpush2.bf16.msra.mxu1 %v15202_v63  ;;  %v3008_v36 = vadd.f32 %v20655_v44, %v2979_v60  ;;  %v22657_v63 = vld [vmem:[#allocation50_spill] sm:$0xff]  ;;  %v22665_v60 = vld [vmem:[#allocation45_spill] sm:$0xff] }
 0x612   : > { %13677 = vmatprep.subr.bf16.mxu0 %v15205_v49  ;;  %10960 = vmatprep.subr.bf16.mxu1 %v15208_v52  ;;  %v20603_v14 = vpop.f32.mrf.mxu0  ;;  %v20605_v47 = vpop.f32.mrf.mxu1  ;;  %v2579_v49 = vadd.f32 %v22657_v63, %v2506_v11  ;;  %v2453_v50 = vadd.f32 %v22666_v42, %v22665_v60  ;;  %v22667_v11 = vld [vmem:[#allocation59_spill] sm:$0xff]  ;;  %v22677_v60 = vld [vmem:[#allocation62_spill] sm:$0xff] }
 0x614   : > { %9738 = vmatmul.mubr.bf16.vlgmr.msra.gmra.mxu0 %v19904_v62  ;;  %9811 = vmatmul.mubr.bf16.vlgmr.msra.gmra.mxu1 %v19904_v62  ;;  %v20630_v12 = vpop.f32.mrf.mxu0  ;;  %v20632_v40 = vpop.f32.mrf.mxu1 }
 0x615   : > { %9747 = vmatprep.mubr.bf16.mxu0 %v19938_v57  ;;  %9820 = vmatprep.mubr.bf16.mxu1 %v19938_v57 }
 0x616   : > { %13678 = vmatpush3.bf16.msra.mxu0 %v15209_v61  ;;  %10961 = vmatpush1.bf16.msra.mxu1 %v15206_v15  ;;  %v20658_v18 = vpop.f32.mrf.mxu0  ;;  %v20660_v28 = vpop.f32.mrf.mxu1  ;;  %v15234_v15 = vld [vmem:[%s22420_s12 + $0x150] ss:$68 sps:$4 sm:$0xff]   ;;  %v3026_v61 = vmax.f32 %v3010_v54, 0.0 }
 0x617   : > { %13679 = vmatprep.subr.bf16.mxu0 %v15210_v48  ;;  %10962 = vmatprep.subr.bf16.mxu1 %v15213_v0  ;;  %v22658_v48 = vld [vmem:[#allocation40_spill] sm:$0xff]  ;;  %v22659_v0 = vld [vmem:[#allocation41_spill] sm:$0xff] }
 0x618   : > { %v20681_v52 = vpop.f32.mrf.mxu0  ;;  %v20683_v58 = vpop.f32.mrf.mxu1  ;;  %v2443_v27 = vadd.f32 %v22659_v0, %v22658_v48  ;;  %v15256_v0 = vld [vmem:[%s22419_s11 + $0x33c] ss:$68 sps:$4 sm:$0xff]  }
 0x61a   : > { %13680 = vmatpush3.bf16.msra.mxu0 %v15214_v39  ;;  %10963 = vmatpush1.bf16.msra.mxu1 %v15211_v3  ;;  %v2652_v3 = vadd.f32 %v22660_v26, %v2579_v49  ;;  %v3024_v39 = vmax.f32 %v3008_v36, 0.0  ;;  %v20701_v45 = vpop.f32.mrf.mxu0  ;;  %v20703_v5 = vpop.f32.mrf.mxu1  ;;  %v15245_v49 = vld [vmem:[%s22419_s11 + $0x5d8] ss:$68 sps:$4 sm:$0xff]  }
 0x61b   : > { %13681 = vmatprep.subr.bf16.mxu0 %v15215_v20  ;;  %10964 = vmatprep.subr.bf16.mxu1 %v15218_v23  ;;  %v22661_v20 = vld [vmem:[#allocation51_spill] sm:$0xff] }
 0x61c   : > { %9748 = vmatmul.mubr.bf16.gmra.mxu0 %v19948_v24  ;;  %9821 = vmatmul.mubr.bf16.gmra.mxu1 %v19948_v24  ;;  %v2516_v23 = vadd.f32 %v22661_v20, %v2443_v27  ;;  %v20711_v17 = vpack.c.bf16 %v3026_v61, %v3024_v39  ;;  %v20729_v59 = vpop.f32.mrf.mxu1  ;;  %v22670_v61 = vld [vmem:[#allocation60_spill] sm:$0xff]  ;;  %v22672_v27 = vld [vmem:[#allocation54_spill] sm:$0xff] }
 0x61d   : > { %9757 = vmatprep.mubr.bf16.mxu0 %v19984_v6  ;;  %9830 = vmatprep.mubr.bf16.mxu1 %v19984_v6 }
 0x61e   : > { %13682 = vmatpush3.bf16.msra.mxu0 %v15219_v33  ;;  %10965 = vmatpush1.bf16.msra.mxu1 %v15216_v51  ;;  %v15236_v51 = vld [vmem:[%s22419_s11 + $0x88] ss:$68 sps:$4 sm:$0xff]   ;;  %v20750_v63 = vpop.f32.mrf.mxu1 }
 0x61f   : > { %13683 = vmatprep.subr.bf16.mxu0 %v15220_v46  ;;  %10966 = vmatprep.subr.bf16.mxu1 %v15223_v25  ;;  %v15239_v33 = vld [vmem:[%s22420_s12 + $0xc8] ss:$68 sps:$4 sm:$0xff]   ;;  %v22662_v25 = vld [vmem:[#allocation58_spill] sm:$0xff] }
 0x620   : > { %v15243_v46 = vld [vmem:[%s22419_s11 + $0x4] ss:$68 sps:$4 sm:$0xff]   ;;  %v2725_v30 = vadd.f32 %v22662_v25, %v2652_v3 }
 0x621   : > { %v22673_v3 = vld [vmem:[#allocation15_spill] sm:$0xff] }
 0x622   : > { %13684 = vmatpush3.bf16.msra.mxu0 %v15224_v10  ;;  %10967 = vmatpush1.bf16.msra.mxu1 %v15221_v9  ;;  %v22663_v9 = vld [vmem:[#allocation52_spill] sm:$0xff] }
 0x623   : > { %13685 = vmatprep.subr.bf16.mxu0 %v15225_v22  ;;  %10968 = vmatprep.subr.bf16.mxu1 %v15228_v41  ;;  %v2589_v10 = vadd.f32 %v22663_v9, %v2516_v23  ;;  %v2798_v22 = vadd.f32 %v22664_v4, %v2725_v30  ;;  %v20727_v41 = vpop.f32.mrf.mxu0  ;;  %v20771_v23 = vpop.f32.mrf.mxu1  ;;  %v22675_v30 = vld [vmem:[#allocation17_spill] sm:$0xff] }
 0x624   : > { %9758 = vmatmul.mubr.bf16.gmra.mxu0 %v19992_v43  ;;  %9831 = vmatmul.mubr.bf16.gmra.mxu1 %v19992_v43 }
 0x625   : > { %9767 = vmatprep.mubr.bf16.mxu0 %v20021_v55  ;;  %9840 = vmatprep.mubr.bf16.mxu1 %v20021_v55  ;;  %v20748_v36 = vpop.f32.mrf.mxu0 }
 0x626   : > { %13686 = vmatpush3.bf16.msra.mxu0 %v15229_v35  ;;  %10969 = vmatpush1.bf16.msra.mxu1 %v15226_v2  ;;  %v2662_v2 = vadd.f32 %v22667_v11, %v2589_v10  ;;  %v22668_v35 = vld [vmem:[#allocation53_spill] sm:$0xff]  ;;  %v22676_v10 = vld [vmem:[#allocation12_spill] sm:$0xff] }
 0x627   : > { %13687 = vmatprep.subr.bf16.mxu0 %v15230_v7  ;;  %10970 = vmatprep.subr.bf16.mxu1 %v15233_v8  ;;  %v2526_v54 = vadd.f32 %v22668_v35, %v2453_v50  ;;  %v22669_v7 = vld [vmem:[#allocation65_spill] sm:$0xff]  ;;  %v20769_v20 = vpop.f32.mrf.mxu0  ;;  %v2983_v4 = vmul.f32 %v20626_v19, %v22676_v10  ;;  %v22678_v11 = vld [vmem:[#allocation68_spill] sm:$0xff]  ;;  %v22683_v10 = vld [vmem:[#allocation14_spill] sm:$0xff] }
 0x628   : > { %v2871_v8 = vadd.f32 %v22669_v7, %v2798_v22  ;;  %v15268_v35 = vld [vmem:[%s22419_s11 + $0x22c] ss:$68 sps:$4 sm:$0xff]  }
 0x629   : > { %v2599_v26 = vadd.f32 %v22672_v27, %v2526_v54  ;;  %v20791_v22 = vpop.f32.mrf.mxu0  ;;  %v22679_v54 = vld [vmem:[#allocation21_spill] sm:$0xff] }
 0x62a   : > { %13688 = vmatpush3.bf16.msra.mxu0 %v15234_v15  ;;  %10971 = vmatpush1.bf16.msra.mxu1 %v15231_v31  ;;  %v15248_v31 = vld [vmem:[%s22419_s11 + $0x3c0] ss:$68 sps:$4 sm:$0xff]   ;;  %v15253_v15 = vld [vmem:[%s22419_s11 + $0x554] ss:$68 sps:$4 sm:$0xff]  }
 0x62b   : > { %13689 = vmatprep.subr.bf16.mxu0 %v15235_v56  ;;  %10972 = vmatprep.subr.bf16.mxu1 %v15238_v13  ;;  %v2735_v56 = vadd.f32 %v22670_v61, %v2662_v2  ;;  %v22671_v13 = vld [vmem:[#allocation67_spill] sm:$0xff] }
 0x62c   : > { %9768 = vmatmul.mubr.bf16.gmra.mxu0 %v20029_v53  ;;  %9841 = vmatmul.mubr.bf16.gmra.mxu1 %v20029_v53  ;;  %v2944_v48 = vadd.f32 %v22671_v13, %v2871_v8  ;;  %v3012_v8 = vadd.f32 %v20655_v44, %v2983_v4  ;;  %v15274_v61 = vld [vmem:[%s22419_s11 + $0x3cc] ss:$68 sps:$4 sm:$0xff]  }
 0x62d   : > { %9883 = vmatprep.mubr.bf16.mxu0 %v19895_v37  ;;  %13635 = vmatprep.mubr.msk.bf16.mxu1 %vm5693_vm2, %v20711_v17  ;;  %v15244_v37 = vld [vmem:[%s22420_s12 + $0x40] ss:$68 sps:$4 sm:$0xff]   ;;  %v2808_v39 = vadd.f32 %v22673_v3, %v2735_v56 }
 0x62e   : > { %13690 = vmatpush3.bf16.msra.mxu0 %v15239_v33  ;;  %10973 = vmatpush1.bf16.msra.mxu1 %v15236_v51  ;;  %v15251_v51 = vld [vmem:[%s22419_s11 + $0x550] ss:$68 sps:$4 sm:$0xff]   ;;  %v2985_v25 = vmul.f32 %v20626_v19, %v2944_v48  ;;  %v22680_v48 = vld [vmem:[#allocation23_spill] sm:$0xff]  ;;  %v3028_v27 = vmax.f32 %v3012_v8, 0.0 }
 0x62f   : > { %13691 = vmatprep.subr.bf16.mxu0 %v15240_v34  ;;  %10974 = vmatprep.subr.bf16.mxu1 %v15243_v46  ;;  %v15259_v33 = vld [vmem:[%s22419_s11 + $0x4cc] ss:$68 sps:$4 sm:$0xff]   ;;  %v22674_v34 = vld [vmem:[#allocation61_spill] sm:$0xff]  ;;  %v2881_v9 = vadd.f32 %v22675_v30, %v2808_v39 }
 0x630   : > { %v2672_v46 = vadd.f32 %v22674_v34, %v2599_v26  ;;  %v3014_v50 = vadd.f32 %v20655_v44, %v2985_v25  ;;  %v22681_v26 = vld [vmem:[#allocation16_spill] sm:$0xff]  ;;  %v22682_v25 = vld [vmem:[#allocation27_spill] sm:$0xff]  ;;  %v15277_v30 = vld [vmem:[%s22419_s11 + $0x11c] ss:$68 sps:$4 sm:$0xff]  }
 0x631   : > { %v2954_v2 = vadd.f32 %v22678_v11, %v2881_v9  ;;  %v2987_v3 = vmul.f32 %v20626_v19, %v22681_v26  ;;  %v15280_v9 = vld [vmem:[%s22419_s11 + $0x344] ss:$68 sps:$4 sm:$0xff]   ;;  %v15281_v8 = vld [vmem:[%s22419_s11 + $0x90] ss:$68 sps:$4 sm:$0xff]  }
 0x632   : > { %13692 = vmatpush3.bf16.msra.mxu0 %v15244_v37  ;;  %10975 = vmatpush1.bf16.msra.mxu1 %v15241_v21  ;;  %v20793_v21 = vpop.f32.mrf.mxu1  ;;  %v15257_v37 = vld [vmem:[%s22419_s11 + $0x4c8] ss:$68 sps:$4 sm:$0xff]   ;;  %v2745_v42 = vadd.f32 %v22677_v60, %v2672_v46  ;;  %v3030_v56 = vmax.f32 %v3014_v50, 0.0  ;;  %v15286_v50 = vld [vmem:[%s22419_s11 + $0x2bc] ss:$68 sps:$4 sm:$0xff]  }
 0x633   : > { %10984 = vmatprep.subr.bf16.mxu1 %v15247_v16  ;;  %11033 = vmatprep.subr.bf16.mxu0 %v15250_v29  ;;  %v15260_v16 = vld [vmem:[%s22419_s11 + $0x2b0] ss:$68 sps:$4 sm:$0xff]   ;;  %v15265_v29 = vld [vmem:[%s22419_s11 + $0x444] ss:$68 sps:$4 sm:$0xff]   ;;  %v2989_v13 = vmul.f32 %v20626_v19, %v2954_v2  ;;  %v3016_v4 = vadd.f32 %v20655_v44, %v2987_v3 }
 0x634   : > { %v2818_v7 = vadd.f32 %v22679_v54, %v2745_v42  ;;  %v20844_v34 = vpack.c.bf16 %v3030_v56, %v3028_v27  ;;  %v22684_v2 = vld [vmem:[#allocation20_spill] sm:$0xff]  ;;  %v15295_v26 = vld [vmem:[%s22419_s11 + $0x5e4] ss:$68 sps:$4 sm:$0xff]  }
 0x635   : > { %9884 = vmatmul.mubr.bf16.vlgmr.msra.gmra.mxu0 %v19904_v62  ;;  %v15254_v62 = vld [vmem:[%s22419_s11 + $0x338] ss:$68 sps:$4 sm:$0xff]   ;;  %v3018_v46 = vadd.f32 %v20655_v44, %v2989_v13  ;;  %v3032_v11 = vmax.f32 %v3016_v4, 0.0  ;;  %v22685_v13 = vld [vmem:[#allocation18_spill] sm:$0xff]  ;;  %v15298_v3 = vld [vmem:[%s22419_s11 + $0x1ac] ss:$68 sps:$4 sm:$0xff]  }
 0x636   : > { %9891 = vmatprep.mubr.bf16.mxu0 %v19938_v57  ;;  %10985 = vmatpush2.bf16.msra.mxu1 %v15245_v49  ;;  %v15262_v57 = vld [vmem:[%s22419_s11 + $0x2b4] ss:$68 sps:$4 sm:$0xff]   ;;  %v20813_v49 = vpop.f32.mrf.mxu0  ;;  %v15304_v4 = vld [vmem:[%s22419_s11 + $0x124] ss:$68 sps:$4 sm:$0xff]  }
 0x637   : > { %11034 = vmatpush1.bf16.msra.mxu0 %v15248_v31  ;;  %10986 = vmatprep.subr.bf16.mxu1 %v15253_v15  ;;  %v20815_v31 = vpop.f32.mrf.mxu1  ;;  %v15263_v15 = vld [vmem:[%s22419_s11 + $0x440] ss:$68 sps:$4 sm:$0xff]   ;;  %v3034_v60 = vmax.f32 %v3018_v46, 0.0  ;;  %v15292_v56 = vld [vmem:[%s22419_s11 + $0x234] ss:$68 sps:$4 sm:$0xff]  }
 0x638   : > { %11035 = vmatprep.subr.bf16.mxu0 %v15256_v0  ;;  %v2891_v0 = vadd.f32 %v22680_v48, %v2818_v7  ;;  %v20834_v39 = vpop.f32.mrf.mxu0 }
 0x63a   : > { %10987 = vmatpush2.bf16.msra.mxu1 %v15251_v51  ;;  %v20836_v51 = vpop.f32.mrf.mxu1 }
 0x63b   : > { %11036 = vmatpush1.bf16.msra.mxu0 %v15254_v62  ;;  %10988 = vmatprep.subr.bf16.mxu1 %v15259_v33  ;;  %v15269_v62 = vld [vmem:[%s22419_s11 + $0x1a0] ss:$68 sps:$4 sm:$0xff]   ;;  %v15272_v33 = vld [vmem:[%s22419_s11 + $0x3c8] ss:$68 sps:$4 sm:$0xff]  }
 0x63c   : > { %11037 = vmatprep.subr.bf16.mxu0 %v15262_v57  ;;  %v2964_v57 = vadd.f32 %v22682_v25, %v2891_v0  ;;  %v15293_v25 = vld [vmem:[%s22419_s11 + $0x5e0] ss:$68 sps:$4 sm:$0xff]  }
 0x63d   : > { %9892 = vmatmul.mubr.bf16.gmra.mxu0 %v19948_v24  ;;  %v15266_v24 = vld [vmem:[%s22419_s11 + $0x228] ss:$68 sps:$4 sm:$0xff]  }
 0x63e   : > { %9899 = vmatprep.mubr.bf16.mxu0 %v19984_v6  ;;  %10989 = vmatpush2.bf16.msra.mxu1 %v15257_v37  ;;  %v15271_v6 = vld [vmem:[%s22419_s11 + $0x1a4] ss:$68 sps:$4 sm:$0xff]   ;;  %v20857_v37 = vpop.f32.mrf.mxu0  ;;  %v2993_v42 = vmul.f32 %v20626_v19, %v2964_v57 }
 0x63f   : > { %11038 = vmatpush1.bf16.msra.mxu0 %v15260_v16  ;;  %10990 = vmatprep.subr.bf16.mxu1 %v15265_v29  ;;  %v20859_v16 = vpop.f32.mrf.mxu1  ;;  %v15275_v29 = vld [vmem:[%s22419_s11 + $0x118] ss:$68 sps:$4 sm:$0xff]   ;;  %v15296_v57 = vld [vmem:[%s22419_s11 + $0x1a8] ss:$68 sps:$4 sm:$0xff]  }
 0x640   : > { %11039 = vmatprep.subr.bf16.mxu0 %v15268_v35  ;;  %v2991_v35 = vmul.f32 %v20626_v19, %v22684_v2  ;;  %v20879_v54 = vpop.f32.mrf.mxu0  ;;  %v15289_v19 = vld [vmem:[%s22419_s11 + $0xc] ss:$68 sps:$4 sm:$0xff]   ;;  %v15307_v2 = vld [vmem:[%s22419_s11 + $0x4d4] ss:$68 sps:$4 sm:$0xff]  }
 0x641   : > { %v20881_v7 = vpop.f32.mrf.mxu1 }
 0x642   : > { %10991 = vmatpush2.bf16.msra.mxu1 %v15263_v15  ;;  %v15284_v15 = vld [vmem:[%s22419_s11 + $0x2b8] ss:$68 sps:$4 sm:$0xff]   ;;  %v20901_v48 = vpop.f32.mrf.mxu0 }
 0x643   : > { %11040 = vmatpush1.bf16.msra.mxu0 %v15266_v24  ;;  %11106 = vmatprep.subr.bf16.mxu1 %v15274_v61  ;;  %v20889_v24 = vpack.c.bf16 %v3034_v60, %v3032_v11  ;;  %v3022_v61 = vadd.f32 %v20655_v44, %v2993_v42  ;;  %v20903_v0 = vpop.f32.mrf.mxu1  ;;  %v15299_v42 = vld [vmem:[%s22419_s11 + $0x558] ss:$68 sps:$4 sm:$0xff]  }
 0x644   : > { %11041 = vmatprep.subr.bf16.mxu0 %v15271_v6  ;;  %v3020_v6 = vadd.f32 %v20655_v44, %v2991_v35  ;;  %v15290_v44 = vld [vmem:[%s22419_s11 + $0x230] ss:$68 sps:$4 sm:$0xff]   ;;  %v15310_v35 = vld [vmem:[%s22419_s11 + $0x9c] ss:$68 sps:$4 sm:$0xff]  }
 0x645   : > { %9900 = vmatmul.mubr.bf16.gmra.mxu0 %v19992_v43  ;;  %10993 = vmatmul.mubr.bf16.vlgmr.msra.gmra.mxu1 %v22683_v10  ;;  %v15278_v43 = vld [vmem:[%s22419_s11 + $0x340] ss:$68 sps:$4 sm:$0xff]   ;;  %v3038_v27 = vmax.f32 %v3022_v61, 0.0  ;;  %v20923_v46 = vpop.f32.mrf.mxu1 }
 0x646   : > { %9907 = vmatprep.mubr.bf16.mxu0 %v20021_v55  ;;  %13636 = vmatprep.mubr.msk.bf16.mxu1 %vm5693_vm2, %v20844_v34  ;;  %v15283_v55 = vld [vmem:[%s22419_s11 + $0x94] ss:$68 sps:$4 sm:$0xff]  }
 0x647   : > { %11042 = vmatpush1.bf16.msra.mxu0 %v15269_v62  ;;  %11107 = vmatpush1.bf16.msra.mxu1 %v15272_v33  ;;  %v3036_v62 = vmax.f32 %v3020_v6, 0.0  ;;  %v20921_v33 = vpop.f32.mrf.mxu0  ;;  %v20942_v60 = vpop.f32.mrf.mxu1  ;;  %v15316_v6 = vld [vmem:[%s22419_s11 + $0x14] ss:$68 sps:$4 sm:$0xff]  }
 0x648   : > { %11043 = vmatprep.subr.bf16.mxu0 %v15277_v30  ;;  %11108 = vmatprep.subr.bf16.mxu1 %v15280_v9  ;;  %v15301_v9 = vld [vmem:[%s22419_s11 + $0x55c] ss:$68 sps:$4 sm:$0xff]  }
 0x649   : > { %v20931_v30 = vpack.c.bf16 %v3038_v27, %v3036_v62  ;;  %v15314_v27 = vld [vmem:[%s22419_s11 + $0x10] ss:$68 sps:$4 sm:$0xff]  }
 0x64a   : > { %v15319_v62 = vld [vmem:[%s22419_s11 + $0x5ec] ss:$68 sps:$4 sm:$0xff]  }
 0x64b   : > { %11044 = vmatpush1.bf16.msra.mxu0 %v15275_v29  ;;  %11109 = vmatpush1.bf16.msra.mxu1 %v15278_v43  ;;  %v22686_v29 = vld [vmem:[#allocation22_spill] sm:$0xff]  ;;  %v20940_v43 = vpop.f32.mrf.mxu0 }
 0x64c   : > { %11045 = vmatprep.subr.bf16.mxu0 %v15283_v55  ;;  %11110 = vmatprep.subr.bf16.mxu1 %v15286_v50  ;;  %v15302_v55 = vld [vmem:[%s22419_s11 + $0x120] ss:$68 sps:$4 sm:$0xff]  }
 0x64d   : > { %9908 = vmatmul.mubr.bf16.gmra.mxu0 %v20029_v53  ;;  %11003 = vmatmul.mubr.bf16.gmra.mxu1 %v22685_v13  ;;  %v15287_v53 = vld [vmem:[%s22419_s11 + $0x8] ss:$68 sps:$4 sm:$0xff]  }
 0x64e   : > { %13637 = vmatprep.mubr.msk.bf16.mxu1 %vm5693_vm2, %v20889_v24  ;;  %13639 = vmatprep.mubr.msk.bf16.mxu0 %vm5693_vm2, %v20711_v17 }
 0x64f   : > { %11046 = vmatpush1.bf16.msra.mxu0 %v15281_v8  ;;  %11111 = vmatpush1.bf16.msra.mxu1 %v15284_v15  ;;  %v15305_v8 = vld [vmem:[%s22419_s11 + $0x4d0] ss:$68 sps:$4 sm:$0xff]   ;;  %v15308_v15 = vld [vmem:[%s22419_s11 + $0x98] ss:$68 sps:$4 sm:$0xff]  }
 0x650   : > { %11047 = vmatprep.subr.bf16.mxu0 %v15289_v19  ;;  %11112 = vmatprep.subr.bf16.mxu1 %v15292_v56  ;;  %v15313_v56 = vld [vmem:[%s22419_s11 + $0x44c] ss:$68 sps:$4 sm:$0xff]  }
 0x652   : > { %v20952_v50 = vpop.f32.mrf.mxu0  ;;  %v20954_v11 = vpop.f32.mrf.mxu1 }
 0x653   : > { %11048 = vmatpush1.bf16.msra.mxu0 %v15287_v53  ;;  %11113 = vmatpush1.bf16.msra.mxu1 %v15290_v44  ;;  %22687 = vst [vmem:[#allocation32_spill] sm:$0xff] %v20954_v11  ;;  %v22689_v53 = vld [vmem:[#allocation25_spill] sm:$0xff]  ;;  %v15311_v44 = vld [vmem:[%s22419_s11 + $0x448] ss:$68 sps:$4 sm:$0xff]  }
 0x654   : > { %11057 = vmatprep.subr.bf16.mxu0 %v15295_v26  ;;  %11114 = vmatprep.subr.bf16.mxu1 %v15298_v3  ;;  %v20968_v61 = vpop.f32.mrf.mxu0  ;;  %v20970_v19 = vpop.f32.mrf.mxu1  ;;  %v15379_v11 = vld [vmem:[%s22419_s11 + $0x4e4] ss:$68 sps:$4 sm:$0xff]  }
 0x655   : > { %11013 = vmatmul.mubr.bf16.gmra.mxu1 %v22686_v29  ;;  %22688 = vst [vmem:[#allocation24_spill] sm:$0xff] %v20970_v19  ;;  %v15365_v19 = vld [vmem:[%s22419_s11 + $0x5f0] ss:$68 sps:$4 sm:$0xff]  }
 0x656   : > { %13638 = vmatprep.mubr.msk.bf16.mxu1 %vm5693_vm2, %v20931_v30  ;;  %v20987_v26 = vpop.f32.mrf.mxu0  ;;  %v20989_v3 = vpop.f32.mrf.mxu1 }
 0x657   : > { %11058 = vmatpush2.bf16.msra.mxu0 %v15293_v25  ;;  %11115 = vmatpush1.bf16.msra.mxu1 %v15296_v57  ;;  %22690 = vst [vmem:[#allocation31_spill] sm:$0xff] %v20989_v3  ;;  %v15322_v25 = vld [vmem:[%s22419_s11 + $0x3d4] ss:$68 sps:$4 sm:$0xff]   ;;  %v15317_v57 = vld [vmem:[%s22419_s11 + $0x5e8] ss:$68 sps:$4 sm:$0xff]  }
 0x658   : > { %11059 = vmatprep.subr.bf16.mxu0 %v15301_v9  ;;  %11116 = vmatprep.subr.bf16.mxu1 %v15304_v4  ;;  %v21000_v9 = vpop.f32.mrf.mxu0  ;;  %v21002_v4 = vpop.f32.mrf.mxu1  ;;  %v15367_v3 = vld [vmem:[%s22419_s11 + $0x5f4] ss:$68 sps:$4 sm:$0xff]  }
 0x659   : > { %22691 = vst [vmem:[#allocation26_spill] sm:$0xff] %v21002_v4  ;;  %v15353_v4 = vld [vmem:[%s22419_s11 + $0xa0] ss:$68 sps:$4 sm:$0xff]  }
 0x65b   : > { %11060 = vmatpush2.bf16.msra.mxu0 %v15299_v42  ;;  %11117 = vmatpush1.bf16.msra.mxu1 %v15302_v55  ;;  %v15320_v42 = vld [vmem:[%s22419_s11 + $0x3d0] ss:$68 sps:$4 sm:$0xff]   ;;  %v15325_v55 = vld [vmem:[%s22419_s11 + $0x564] ss:$68 sps:$4 sm:$0xff]  }
 0x65c   : > { %11061 = vmatprep.subr.bf16.mxu0 %v15307_v2  ;;  %11118 = vmatprep.subr.bf16.mxu1 %v15310_v35  ;;  %v15328_v2 = vld [vmem:[%s22419_s11 + $0x34c] ss:$68 sps:$4 sm:$0xff]   ;;  %v15323_v35 = vld [vmem:[%s22419_s11 + $0x560] ss:$68 sps:$4 sm:$0xff]  }
 0x65d   : > { %11023 = vmatmul.mubr.bf16.gmra.mxu1 %v22689_v53 }
 0x65e   : > { %13643 = vmatprep.mubr.msk.bf16.mxu1 %vm5693_vm2, %v20711_v17 }
 0x65f   : > { %11062 = vmatpush2.bf16.msra.mxu0 %v15305_v8  ;;  %11119 = vmatpush1.bf16.msra.mxu1 %v15308_v15  ;;  %v21019_v8 = vpop.f32.mrf.mxu0  ;;  %v21021_v15 = vpop.f32.mrf.mxu1 }
 0x660   : > { %11063 = vmatprep.subr.bf16.mxu0 %v15313_v56  ;;  %11120 = vmatprep.subr.bf16.mxu1 %v15316_v6  ;;  %22692 = vst [vmem:[#allocation42_spill] sm:$0xff] %v21021_v15  ;;  %v15326_v56 = vld [vmem:[%s22419_s11 + $0x348] ss:$68 sps:$4 sm:$0xff]   ;;  %v15331_v6 = vld [vmem:[%s22419_s11 + $0x4dc] ss:$68 sps:$4 sm:$0xff]  }
 0x663   : > { %11064 = vmatpush2.bf16.msra.mxu0 %v15311_v44  ;;  %11121 = vmatpush1.bf16.msra.mxu1 %v15314_v27  ;;  %v15334_v44 = vld [vmem:[%s22419_s11 + $0x2c4] ss:$68 sps:$4 sm:$0xff]   ;;  %v15329_v27 = vld [vmem:[%s22419_s11 + $0x4d8] ss:$68 sps:$4 sm:$0xff]  }
 0x664   : > { %11130 = vmatprep.subr.bf16.mxu1 %v15319_v62  ;;  %11179 = vmatprep.subr.bf16.mxu0 %v15322_v25  ;;  %v21035_v62 = vpop.f32.mrf.mxu0  ;;  %v21037_v25 = vpop.f32.mrf.mxu1 }
 0x665   : > { %22693 = vst [vmem:[#allocation37_spill] sm:$0xff] %v21037_v25 }
 0x666   : > { %11066 = vmatmul.mubr.bf16.vlgmr.msra.gmra.mxu0 %v22683_v10 }
 0x667   : > { %13640 = vmatprep.mubr.msk.bf16.mxu0 %vm5693_vm2, %v20844_v34  ;;  %11131 = vmatpush2.bf16.msra.mxu1 %v15317_v57  ;;  %v15332_v57 = vld [vmem:[%s22419_s11 + $0x2c0] ss:$68 sps:$4 sm:$0xff]  }
 0x668   : > { %11180 = vmatpush1.bf16.msra.mxu0 %v15320_v42  ;;  %11132 = vmatprep.subr.bf16.mxu1 %v15325_v55  ;;  %v15337_v42 = vld [vmem:[%s22419_s11 + $0x454] ss:$68 sps:$4 sm:$0xff]   ;;  %v15340_v55 = vld [vmem:[%s22419_s11 + $0x23c] ss:$68 sps:$4 sm:$0xff]  }
 0x669   : > { %11181 = vmatprep.subr.bf16.mxu0 %v15328_v2  ;;  %v15335_v2 = vld [vmem:[%s22419_s11 + $0x450] ss:$68 sps:$4 sm:$0xff]  }
 0x66b   : > { %11133 = vmatpush2.bf16.msra.mxu1 %v15323_v35  ;;  %v21054_v35 = vpop.f32.mrf.mxu0 }
 0x66c   : > { %11182 = vmatpush1.bf16.msra.mxu0 %v15326_v56  ;;  %11134 = vmatprep.subr.bf16.mxu1 %v15331_v6  ;;  %v21056_v56 = vpop.f32.mrf.mxu1  ;;  %v15338_v6 = vld [vmem:[%s22419_s11 + $0x238] ss:$68 sps:$4 sm:$0xff]  }
 0x66d   : > { %11183 = vmatprep.subr.bf16.mxu0 %v15334_v44  ;;  %22694 = vst [vmem:[#allocation28_spill] sm:$0xff] %v21056_v56  ;;  %v15346_v44 = vld [vmem:[%s22419_s11 + $0x3dc] ss:$68 sps:$4 sm:$0xff]   ;;  %v21067_v25 = vpop.f32.mrf.mxu0  ;;  %v15355_v56 = vld [vmem:[%s22419_s11 + $0xa4] ss:$68 sps:$4 sm:$0xff]  }
 0x66e   : > { %11076 = vmatmul.mubr.bf16.gmra.mxu0 %v22685_v13  ;;  %22695 = vst [vmem:[#allocation43_spill] sm:$0xff] %v21067_v25  ;;  %v21069_v15 = vpop.f32.mrf.mxu1 }
 0x66f   : > { %13641 = vmatprep.mubr.msk.bf16.mxu0 %vm5693_vm2, %v20889_v24  ;;  %11135 = vmatpush2.bf16.msra.mxu1 %v15329_v27  ;;  %v15343_v27 = vld [vmem:[%s22419_s11 + $0x1b4] ss:$68 sps:$4 sm:$0xff]   ;;  %22696 = vst [vmem:[#allocation33_spill] sm:$0xff] %v21069_v15 }
 0x670   : > { %11184 = vmatpush1.bf16.msra.mxu0 %v15332_v57  ;;  %11136 = vmatprep.subr.bf16.mxu1 %v15337_v42  ;;  %v15341_v57 = vld [vmem:[%s22419_s11 + $0x1b0] ss:$68 sps:$4 sm:$0xff]   ;;  %v15344_v42 = vld [vmem:[%s22419_s11 + $0x3d8] ss:$68 sps:$4 sm:$0xff]  }
 0x671   : > { %11185 = vmatprep.subr.bf16.mxu0 %v15340_v55  ;;  %v15349_v55 = vld [vmem:[%s22419_s11 + $0x12c] ss:$68 sps:$4 sm:$0xff]  }
 0x672   : > { %v15350_v15 = vld [vmem:[%s22419_s11 + $0x350] ss:$68 sps:$4 sm:$0xff]  }
 0x673   : > { %11137 = vmatpush2.bf16.msra.mxu1 %v15335_v2  ;;  %v15352_v2 = vld [vmem:[%s22419_s11 + $0x354] ss:$68 sps:$4 sm:$0xff]  }
 0x674   : > { %11186 = vmatpush1.bf16.msra.mxu0 %v15338_v6  ;;  %11252 = vmatprep.subr.bf16.mxu1 %v15346_v44  ;;  %v21089_v6 = vpop.f32.mrf.mxu0  ;;  %v21091_v44 = vpop.f32.mrf.mxu1 }
 0x675   : > { %11187 = vmatprep.subr.bf16.mxu0 %v15343_v27  ;;  %22697 = vst [vmem:[#allocation34_spill] sm:$0xff] %v21089_v6  ;;  %22698 = vst [vmem:[#allocation39_spill] sm:$0xff] %v21091_v44  ;;  %v15347_v27 = vld [vmem:[%s22419_s11 + $0x128] ss:$68 sps:$4 sm:$0xff]  }
 0x676   : > { %11086 = vmatmul.mubr.bf16.gmra.mxu0 %v22686_v29  ;;  %11139 = vmatmul.mubr.bf16.vlgmr.msra.gmra.mxu1 %v22683_v10  ;;  %v15358_v44 = vld [vmem:[%s22419_s11 + $0x2cc] ss:$68 sps:$4 sm:$0xff]  }
 0x677   : > { %13642 = vmatprep.mubr.msk.bf16.mxu0 %vm5693_vm2, %v20931_v30  ;;  %13644 = vmatprep.mubr.msk.bf16.mxu1 %vm5693_vm2, %v20844_v34 }
 0x678   : > { %11188 = vmatpush1.bf16.msra.mxu0 %v15341_v57  ;;  %11253 = vmatpush1.bf16.msra.mxu1 %v15344_v42  ;;  %v21105_v57 = vpop.f32.mrf.mxu0  ;;  %v21107_v42 = vpop.f32.mrf.mxu1 }
 0x679   : > { %11189 = vmatprep.subr.bf16.mxu0 %v15349_v55  ;;  %11254 = vmatprep.subr.bf16.mxu1 %v15352_v2  ;;  %22699 = vst [vmem:[#allocation44_spill] sm:$0xff] %v21105_v57  ;;  %22700 = vst [vmem:[#allocation38_spill] sm:$0xff] %v21107_v42  ;;  %v15356_v55 = vld [vmem:[%s22419_s11 + $0x2c8] ss:$68 sps:$4 sm:$0xff]   ;;  %v15361_v2 = vld [vmem:[%s22419_s11 + $0x1c] ss:$68 sps:$4 sm:$0xff]  }
 0x67a   : > { %v15364_v42 = vld [vmem:[%s22419_s11 + $0x244] ss:$68 sps:$4 sm:$0xff]  }
 0x67c   : > { %11190 = vmatpush1.bf16.msra.mxu0 %v15347_v27  ;;  %11255 = vmatpush1.bf16.msra.mxu1 %v15350_v15  ;;  %v21127_v15 = vpop.f32.mrf.mxu0  ;;  %v15362_v27 = vld [vmem:[%s22419_s11 + $0x240] ss:$68 sps:$4 sm:$0xff]  }
 0x67d   : > { %11191 = vmatprep.subr.bf16.mxu0 %v15355_v56  ;;  %11256 = vmatprep.subr.bf16.mxu1 %v15358_v44  ;;  %22701 = vst [vmem:[#allocation66_spill] sm:$0xff] %v21127_v15  ;;  %v21129_v56 = vpop.f32.mrf.mxu1  ;;  %v15359_v44 = vld [vmem:[%s22419_s11 + $0x18] ss:$68 sps:$4 sm:$0xff]   ;;  %v15523_v15 = vld [vmem:[%s15985_s29] sm:$0xff] }
 0x67e   : > { %11096 = vmatmul.mubr.bf16.gmra.mxu0 %v22689_v53  ;;  %11149 = vmatmul.mubr.bf16.gmra.mxu1 %v22685_v13  ;;  %22702 = vst [vmem:[#allocation69_spill] sm:$0xff] %v21129_v56  ;;  %v15370_v56 = vld [vmem:[%s22419_s11 + $0x1bc] ss:$68 sps:$4 sm:$0xff]  }
 0x67f   : > { %13645 = vmatprep.mubr.msk.bf16.mxu1 %vm5693_vm2, %v20889_v24  ;;  %13647 = vmatprep.mubr.msk.bf16.mxu0 %vm5693_vm2, %v20711_v17 }
 0x680   : > { %11192 = vmatpush1.bf16.msra.mxu0 %v15353_v4  ;;  %11257 = vmatpush1.bf16.msra.mxu1 %v15356_v55  ;;  %v21143_v4 = vpop.f32.mrf.mxu0  ;;  %v21145_v55 = vpop.f32.mrf.mxu1 }
 0x681   : > { %11193 = vmatprep.subr.bf16.mxu0 %v15361_v2  ;;  %11258 = vmatprep.subr.bf16.mxu1 %v15364_v42  ;;  %22703 = vst [vmem:[#allocation70_spill] sm:$0xff] %v21143_v4  ;;  %22704 = vst [vmem:[#allocation71_spill] sm:$0xff] %v21145_v55  ;;  %v15368_v42 = vld [vmem:[%s22419_s11 + $0x1b8] ss:$68 sps:$4 sm:$0xff]   ;;  %v15373_v2 = vld [vmem:[%s22419_s11 + $0x56c] ss:$68 sps:$4 sm:$0xff]  }
 0x682   : > { %v15376_v55 = vld [vmem:[%s22419_s11 + $0x134] ss:$68 sps:$4 sm:$0xff]  }
 0x684   : > { %11194 = vmatpush1.bf16.msra.mxu0 %v15359_v44  ;;  %11259 = vmatpush1.bf16.msra.mxu1 %v15362_v27  ;;  %v21162_v44 = vpop.f32.mrf.mxu0  ;;  %v21164_v27 = vpop.f32.mrf.mxu1 }
 0x685   : > { %11203 = vmatprep.subr.bf16.mxu0 %v15367_v3  ;;  %11260 = vmatprep.subr.bf16.mxu1 %v15370_v56  ;;  %22705 = vst [vmem:[#allocation72_spill] sm:$0xff] %v21162_v44  ;;  %22706 = vst [vmem:[#allocation73_spill] sm:$0xff] %v21164_v27  ;;  %v15371_v3 = vld [vmem:[%s22419_s11 + $0x568] ss:$68 sps:$4 sm:$0xff]   ;;  %v15374_v56 = vld [vmem:[%s22419_s11 + $0x130] ss:$68 sps:$4 sm:$0xff]  }
 0x686   : > { %11159 = vmatmul.mubr.bf16.gmra.mxu1 %v22686_v29  ;;  %v15382_v27 = vld [vmem:[%s22419_s11 + $0xac] ss:$68 sps:$4 sm:$0xff]   ;;  %v15377_v44 = vld [vmem:[%s22419_s11 + $0x4e0] ss:$68 sps:$4 sm:$0xff]  }
 0x687   : > { %13646 = vmatprep.mubr.msk.bf16.mxu1 %vm5693_vm2, %v20931_v30 }
 0x688   : > { %11204 = vmatpush2.bf16.msra.mxu0 %v15365_v19  ;;  %11261 = vmatpush1.bf16.msra.mxu1 %v15368_v42  ;;  %v21178_v19 = vpop.f32.mrf.mxu0  ;;  %v21180_v42 = vpop.f32.mrf.mxu1 }
 0x689   : > { %11205 = vmatprep.subr.bf16.mxu0 %v15373_v2  ;;  %11262 = vmatprep.subr.bf16.mxu1 %v15376_v55  ;;  %22707 = vst [vmem:[#allocation74_spill] sm:$0xff] %v21178_v19  ;;  %22708 = vst [vmem:[#allocation75_spill] sm:$0xff] %v21180_v42  ;;  %v15380_v55 = vld [vmem:[%s22419_s11 + $0xa8] ss:$68 sps:$4 sm:$0xff]   ;;  %v15385_v2 = vld [vmem:[%s22419_s11 + $0x45c] ss:$68 sps:$4 sm:$0xff]  }
 0x68a   : > { %v15388_v42 = vld [vmem:[%s22419_s11 + $0x24] ss:$68 sps:$4 sm:$0xff]   ;;  %v15391_v19 = vld [vmem:[%s22419_s11 + $0x5fc] ss:$68 sps:$4 sm:$0xff]  }
 0x68c   : > { %11206 = vmatpush2.bf16.msra.mxu0 %v15371_v3  ;;  %11263 = vmatpush1.bf16.msra.mxu1 %v15374_v56  ;;  %v21197_v3 = vpop.f32.mrf.mxu0  ;;  %v21199_v56 = vpop.f32.mrf.mxu1 }
 0x68d   : > { %11207 = vmatprep.subr.bf16.mxu0 %v15379_v11  ;;  %11264 = vmatprep.subr.bf16.mxu1 %v15382_v27  ;;  %22709 = vst [vmem:[#allocation76_spill] sm:$0xff] %v21197_v3  ;;  %22710 = vst [vmem:[#allocation77_spill] sm:$0xff] %v21199_v56  ;;  %v15383_v11 = vld [vmem:[%s22419_s11 + $0x458] ss:$68 sps:$4 sm:$0xff]   ;;  %v15386_v27 = vld [vmem:[%s22419_s11 + $0x20] ss:$68 sps:$4 sm:$0xff]  }
 0x68e   : > { %11169 = vmatmul.mubr.bf16.gmra.mxu1 %v22689_v53  ;;  %v15394_v56 = vld [vmem:[%s22419_s11 + $0x3e4] ss:$68 sps:$4 sm:$0xff]   ;;  %v15389_v3 = vld [vmem:[%s22419_s11 + $0x5f8] ss:$68 sps:$4 sm:$0xff]  }
 0x68f   : > { %13651 = vmatprep.mubr.msk.bf16.mxu1 %vm5693_vm2, %v20711_v17 }
 0x690   : > { %11208 = vmatpush2.bf16.msra.mxu0 %v15377_v44  ;;  %11265 = vmatpush1.bf16.msra.mxu1 %v15380_v55  ;;  %v21213_v44 = vpop.f32.mrf.mxu0  ;;  %v21215_v55 = vpop.f32.mrf.mxu1 }
 0x691   : > { %11209 = vmatprep.subr.bf16.mxu0 %v15385_v2  ;;  %11266 = vmatprep.subr.bf16.mxu1 %v15388_v42  ;;  %22711 = vst [vmem:[#allocation29_spill] sm:$0xff] %v21213_v44  ;;  %22712 = vst [vmem:[#allocation30_spill] sm:$0xff] %v21215_v55  ;;  %v15392_v42 = vld [vmem:[%s22419_s11 + $0x3e0] ss:$68 sps:$4 sm:$0xff]   ;;  %v15397_v2 = vld [vmem:[%s22419_s11 + $0x574] ss:$68 sps:$4 sm:$0xff]  }
 0x693   : > { %v21226_v4 = vpop.f32.mrf.mxu0  ;;  %v21228_v44 = vpop.f32.mrf.mxu1 }
 0x694   : > { %11210 = vmatpush2.bf16.msra.mxu0 %v15383_v11  ;;  %11267 = vmatpush1.bf16.msra.mxu1 %v15386_v27  ;;  %22713 = vst [vmem:[#allocation47_spill] sm:$0xff] %v21226_v4  ;;  %22714 = vst [vmem:[#allocation48_spill] sm:$0xff] %v21228_v44  ;;  %v15400_v11 = vld [vmem:[%s22419_s11 + $0x35c] ss:$68 sps:$4 sm:$0xff]   ;;  %v15403_v27 = vld [vmem:[%s22419_s11 + $0x4ec] ss:$68 sps:$4 sm:$0xff]  }
 0x695   : > { %11276 = vmatprep.subr.bf16.mxu1 %v15391_v19  ;;  %11325 = vmatprep.subr.bf16.mxu0 %v15394_v56  ;;  %v15395_v19 = vld [vmem:[%s22419_s11 + $0x570] ss:$68 sps:$4 sm:$0xff]   ;;  %v15398_v56 = vld [vmem:[%s22419_s11 + $0x358] ss:$68 sps:$4 sm:$0xff]   ;;  %v21245_v44 = vpop.f32.mrf.mxu0  ;;  %v21247_v55 = vpop.f32.mrf.mxu1 }
 0x696   : > { %22715 = vst [vmem:[#allocation55_spill] sm:$0xff] %v21245_v44  ;;  %22716 = vst [vmem:[#allocation56_spill] sm:$0xff] %v21247_v55  ;;  %v15409_v55 = vld [vmem:[%s22419_s11 + $0x464] ss:$68 sps:$4 sm:$0xff]  }
 0x697   : > { %11212 = vmatmul.mubr.bf16.vlgmr.msra.gmra.mxu0 %v22683_v10  ;;  %v21263_v44 = vpop.f32.mrf.mxu1 }
 0x698   : > { %13648 = vmatprep.mubr.msk.bf16.mxu0 %vm5693_vm2, %v20844_v34  ;;  %11277 = vmatpush2.bf16.msra.mxu1 %v15389_v3  ;;  %v15406_v3 = vld [vmem:[%s22419_s11 + $0x2d4] ss:$68 sps:$4 sm:$0xff]   ;;  %22718 = vst [vmem:[#allocation64_spill] sm:$0xff] %v21263_v44 }
 0x699   : > { %11326 = vmatpush1.bf16.msra.mxu0 %v15392_v42  ;;  %11278 = vmatprep.subr.bf16.mxu1 %v15397_v2  ;;  %v15401_v42 = vld [vmem:[%s22419_s11 + $0x4e8] ss:$68 sps:$4 sm:$0xff]   ;;  %v15404_v2 = vld [vmem:[%s22419_s11 + $0x2d0] ss:$68 sps:$4 sm:$0xff]  }
 0x69a   : > { %11327 = vmatprep.subr.bf16.mxu0 %v15400_v11  ;;  %v21261_v11 = vpop.f32.mrf.mxu0 }
 0x69b   : > { %22717 = vst [vmem:[#allocation63_spill] sm:$0xff] %v21261_v11  ;;  %v21282_v11 = vpop.f32.mrf.mxu1 }
 0x69c   : > { %11279 = vmatpush2.bf16.msra.mxu1 %v15395_v19  ;;  %v15412_v19 = vld [vmem:[%s22419_s11 + $0x24c] ss:$68 sps:$4 sm:$0xff]   ;;  %v21280_v44 = vpop.f32.mrf.mxu0  ;;  %22720 = vst [vmem:[#allocation35_spill] sm:$0xff] %v21282_v11  ;;  %v15427_v11 = vld [vmem:[%s22419_s11 + $0xb4] ss:$68 sps:$4 sm:$0xff]  }
 0x69d   : > { %11328 = vmatpush1.bf16.msra.mxu0 %v15398_v56  ;;  %11280 = vmatprep.subr.bf16.mxu1 %v15403_v27  ;;  %v15407_v56 = vld [vmem:[%s22419_s11 + $0x460] ss:$68 sps:$4 sm:$0xff]   ;;  %v15410_v27 = vld [vmem:[%s22419_s11 + $0x248] ss:$68 sps:$4 sm:$0xff]   ;;  %22719 = vst [vmem:[#allocation11_spill] sm:$0xff] %v21280_v44  ;;  %v21295_v44 = vpop.f32.mrf.mxu1 }
 0x69e   : > { %11329 = vmatprep.subr.bf16.mxu0 %v15406_v3  ;;  %v15418_v3 = vld [vmem:[%s22419_s11 + $0x3ec] ss:$68 sps:$4 sm:$0xff]   ;;  %v21293_v4 = vpop.f32.mrf.mxu0  ;;  %22722 = vst [vmem:[#allocation10_spill] sm:$0xff] %v21295_v44 }
 0x69f   : > { %11222 = vmatmul.mubr.bf16.gmra.mxu0 %v22685_v13  ;;  %22721 = vst [vmem:[#allocation36_spill] sm:$0xff] %v21293_v4  ;;  %v21317_v44 = vpop.f32.mrf.mxu1 }
 0x6a0   : > { %13649 = vmatprep.mubr.msk.bf16.mxu0 %vm5693_vm2, %v20889_v24  ;;  %11281 = vmatpush2.bf16.msra.mxu1 %v15401_v42  ;;  %v15415_v42 = vld [vmem:[%s22419_s11 + $0x1c4] ss:$68 sps:$4 sm:$0xff]   ;;  %22724 = vst [vmem:[#allocation50_spill] sm:$0xff] %v21317_v44  ;;  %v15428_v44 = vld [vmem:[%s22419_s11 + $0x2d8] ss:$68 sps:$4 sm:$0xff]  }
 0x6a1   : > { %11330 = vmatpush1.bf16.msra.mxu0 %v15404_v2  ;;  %11282 = vmatprep.subr.bf16.mxu1 %v15409_v55  ;;  %v15413_v55 = vld [vmem:[%s22419_s11 + $0x1c0] ss:$68 sps:$4 sm:$0xff]   ;;  %v15416_v2 = vld [vmem:[%s22419_s11 + $0x3e8] ss:$68 sps:$4 sm:$0xff]  }
 0x6a2   : > { %11331 = vmatprep.subr.bf16.mxu0 %v15412_v19  ;;  %v15421_v19 = vld [vmem:[%s22419_s11 + $0x13c] ss:$68 sps:$4 sm:$0xff]  }
 0x6a4   : > { %11283 = vmatpush2.bf16.msra.mxu1 %v15407_v56  ;;  %v15424_v56 = vld [vmem:[%s22419_s11 + $0x364] ss:$68 sps:$4 sm:$0xff]  }
 0x6a5   : > { %11332 = vmatpush1.bf16.msra.mxu0 %v15410_v27  ;;  %11398 = vmatprep.subr.bf16.mxu1 %v15418_v3  ;;  %v15419_v27 = vld [vmem:[%s22419_s11 + $0x138] ss:$68 sps:$4 sm:$0xff]   ;;  %v15422_v3 = vld [vmem:[%s22419_s11 + $0x360] ss:$68 sps:$4 sm:$0xff]  }
 0x6a6   : > { %11333 = vmatprep.subr.bf16.mxu0 %v15415_v42  ;;  %v21315_v42 = vpop.f32.mrf.mxu0 }
 0x6a7   : > { %11232 = vmatmul.mubr.bf16.gmra.mxu0 %v22686_v29  ;;  %11285 = vmatmul.mubr.bf16.vlgmr.msra.gmra.mxu1 %v22683_v10  ;;  %22723 = vst [vmem:[#allocation49_spill] sm:$0xff] %v21315_v42  ;;  %v15433_v42 = vld [vmem:[%s22419_s11 + $0x2c] ss:$68 sps:$4 sm:$0xff]  }
 0x6a8   : > { %13650 = vmatprep.mubr.msk.bf16.mxu0 %vm5693_vm2, %v20931_v30  ;;  %13652 = vmatprep.mubr.msk.bf16.mxu1 %vm5693_vm2, %v20844_v34 }
 0x6a9   : > { %11334 = vmatpush1.bf16.msra.mxu0 %v15413_v55  ;;  %11399 = vmatpush1.bf16.msra.mxu1 %v15416_v2  ;;  %v15430_v55 = vld [vmem:[%s22419_s11 + $0x2dc] ss:$68 sps:$4 sm:$0xff]   ;;  %v15425_v2 = vld [vmem:[%s22419_s11 + $0xb0] ss:$68 sps:$4 sm:$0xff]  }
 0x6aa   : > { %11335 = vmatprep.subr.bf16.mxu0 %v15421_v19  ;;  %11400 = vmatprep.subr.bf16.mxu1 %v15424_v56  ;;  %v21331_v19 = vpop.f32.mrf.mxu0  ;;  %v21333_v56 = vpop.f32.mrf.mxu1 }
 0x6ab   : > { %22725 = vst [vmem:[#allocation40_spill] sm:$0xff] %v21331_v19  ;;  %22726 = vst [vmem:[#allocation41_spill] sm:$0xff] %v21333_v56  ;;  %v15439_v19 = vld [vmem:[%s22419_s11 + $0x604] ss:$68 sps:$4 sm:$0xff]  }
 0x6ac   : > { %v21355_v56 = vpop.f32.mrf.mxu1 }
 0x6ad   : > { %11336 = vmatpush1.bf16.msra.mxu0 %v15419_v27  ;;  %11401 = vmatpush1.bf16.msra.mxu1 %v15422_v3  ;;  %v15436_v27 = vld [vmem:[%s22419_s11 + $0x254] ss:$68 sps:$4 sm:$0xff]   ;;  %22728 = vst [vmem:[#allocation51_spill] sm:$0xff] %v21355_v56  ;;  %v15440_v56 = vld [vmem:[%s22419_s11 + $0x1c8] ss:$68 sps:$4 sm:$0xff]  }
 0x6ae   : > { %11337 = vmatprep.subr.bf16.mxu0 %v15427_v11  ;;  %11402 = vmatprep.subr.bf16.mxu1 %v15430_v55  ;;  %v15431_v11 = vld [vmem:[%s22419_s11 + $0x28] ss:$68 sps:$4 sm:$0xff]   ;;  %v15434_v3 = vld [vmem:[%s22419_s11 + $0x250] ss:$68 sps:$4 sm:$0xff]   ;;  %v21353_v55 = vpop.f32.mrf.mxu0 }
 0x6af   : > { %11242 = vmatmul.mubr.bf16.gmra.mxu0 %v22689_v53  ;;  %11295 = vmatmul.mubr.bf16.gmra.mxu1 %v22685_v13  ;;  %22727 = vst [vmem:[#allocation57_spill] sm:$0xff] %v21353_v55  ;;  %v15445_v55 = vld [vmem:[%s22419_s11 + $0x57c] ss:$68 sps:$4 sm:$0xff]  }
 0x6b0   : > { %13653 = vmatprep.mubr.msk.bf16.mxu1 %vm5693_vm2, %v20889_v24  ;;  %13655 = vmatprep.mubr.msk.bf16.mxu0 %vm5693_vm2, %v20711_v17 }
 0x6b1   : > { %11338 = vmatpush1.bf16.msra.mxu0 %v15425_v2  ;;  %11403 = vmatpush1.bf16.msra.mxu1 %v15428_v44  ;;  %v15442_v44 = vld [vmem:[%s22419_s11 + $0x1cc] ss:$68 sps:$4 sm:$0xff]   ;;  %v15437_v2 = vld [vmem:[%s22419_s11 + $0x600] ss:$68 sps:$4 sm:$0xff]  }
 0x6b2   : > { %11339 = vmatprep.subr.bf16.mxu0 %v15433_v42  ;;  %11404 = vmatprep.subr.bf16.mxu1 %v15436_v27  ;;  %v21369_v42 = vpop.f32.mrf.mxu0  ;;  %v21371_v27 = vpop.f32.mrf.mxu1 }
 0x6b3   : > { %22729 = vst [vmem:[#allocation58_spill] sm:$0xff] %v21369_v42  ;;  %22730 = vst [vmem:[#allocation52_spill] sm:$0xff] %v21371_v27  ;;  %v15451_v42 = vld [vmem:[%s22419_s11 + $0x4f4] ss:$68 sps:$4 sm:$0xff]  }
 0x6b4   : > { %v21390_v27 = vpop.f32.mrf.mxu1 }
 0x6b5   : > { %11340 = vmatpush1.bf16.msra.mxu0 %v15431_v11  ;;  %11405 = vmatpush1.bf16.msra.mxu1 %v15434_v3  ;;  %v15448_v11 = vld [vmem:[%s22419_s11 + $0x144] ss:$68 sps:$4 sm:$0xff]   ;;  %22732 = vst [vmem:[#allocation45_spill] sm:$0xff] %v21390_v27  ;;  %v15452_v27 = vld [vmem:[%s22419_s11 + $0xb8] ss:$68 sps:$4 sm:$0xff]  }
 0x6b6   : > { %11349 = vmatprep.subr.bf16.mxu0 %v15439_v19  ;;  %11406 = vmatprep.subr.bf16.mxu1 %v15442_v44  ;;  %v15443_v19 = vld [vmem:[%s22419_s11 + $0x578] ss:$68 sps:$4 sm:$0xff]   ;;  %v15446_v3 = vld [vmem:[%s22419_s11 + $0x140] ss:$68 sps:$4 sm:$0xff]   ;;  %v21388_v44 = vpop.f32.mrf.mxu0 }
 0x6b7   : > { %11305 = vmatmul.mubr.bf16.gmra.mxu1 %v22686_v29  ;;  %22731 = vst [vmem:[#allocation13_spill] sm:$0xff] %v21388_v44  ;;  %v15457_v44 = vld [vmem:[%s22419_s11 + $0x46c] ss:$68 sps:$4 sm:$0xff]  }
 0x6b8   : > { %13654 = vmatprep.mubr.msk.bf16.mxu1 %vm5693_vm2, %v20931_v30 }
 0x6b9   : > { %11350 = vmatpush2.bf16.msra.mxu0 %v15437_v2  ;;  %11407 = vmatpush1.bf16.msra.mxu1 %v15440_v56  ;;  %v15454_v56 = vld [vmem:[%s22419_s11 + $0xbc] ss:$68 sps:$4 sm:$0xff]   ;;  %v15449_v2 = vld [vmem:[%s22419_s11 + $0x4f0] ss:$68 sps:$4 sm:$0xff]  }
 0x6ba   : > { %11351 = vmatprep.subr.bf16.mxu0 %v15445_v55  ;;  %11408 = vmatprep.subr.bf16.mxu1 %v15448_v11  ;;  %v21404_v55 = vpop.f32.mrf.mxu0  ;;  %v21406_v11 = vpop.f32.mrf.mxu1 }
 0x6bb   : > { %22733 = vst [vmem:[#allocation46_spill] sm:$0xff] %v21404_v55  ;;  %22734 = vst [vmem:[#allocation59_spill] sm:$0xff] %v21406_v11  ;;  %v15463_v55 = vld [vmem:[%s22419_s11 + $0x60c] ss:$68 sps:$4 sm:$0xff]  }
 0x6bc   : > { %v21425_v11 = vpop.f32.mrf.mxu1 }
 0x6bd   : > { %11352 = vmatpush2.bf16.msra.mxu0 %v15443_v19  ;;  %11409 = vmatpush1.bf16.msra.mxu1 %v15446_v3  ;;  %v15460_v19 = vld [vmem:[%s22419_s11 + $0x34] ss:$68 sps:$4 sm:$0xff]   ;;  %22736 = vst [vmem:[#allocation65_spill] sm:$0xff] %v21425_v11  ;;  %v15475_v11 = vld [vmem:[%s22419_s11 + $0x4fc] ss:$68 sps:$4 sm:$0xff]  }
 0x6be   : > { %11353 = vmatprep.subr.bf16.mxu0 %v15451_v42  ;;  %11410 = vmatprep.subr.bf16.mxu1 %v15454_v56  ;;  %v15455_v42 = vld [vmem:[%s22419_s11 + $0x468] ss:$68 sps:$4 sm:$0xff]   ;;  %v15458_v3 = vld [vmem:[%s22419_s11 + $0x30] ss:$68 sps:$4 sm:$0xff]   ;;  %v21423_v56 = vpop.f32.mrf.mxu0 }
 0x6bf   : > { %11315 = vmatmul.mubr.bf16.gmra.mxu1 %v22689_v53  ;;  %22735 = vst [vmem:[#allocation53_spill] sm:$0xff] %v21423_v56  ;;  %v21438_v56 = vpop.f32.mrf.mxu1 }
 0x6c0   : > { %13659 = vmatprep.mubr.msk.bf16.mxu1 %vm5693_vm2, %v20711_v17  ;;  %v21436_v4 = vpop.f32.mrf.mxu0  ;;  %22738 = vst [vmem:[#allocation67_spill] sm:$0xff] %v21438_v56  ;;  %v15470_v56 = vld [vmem:[%s22419_s11 + $0x368] ss:$68 sps:$4 sm:$0xff]  }
 0x6c1   : > { %11354 = vmatpush2.bf16.msra.mxu0 %v15449_v2  ;;  %11411 = vmatpush1.bf16.msra.mxu1 %v15452_v27  ;;  %v15466_v27 = vld [vmem:[%s22419_s11 + $0x3f4] ss:$68 sps:$4 sm:$0xff]   ;;  %v15461_v2 = vld [vmem:[%s22419_s11 + $0x608] ss:$68 sps:$4 sm:$0xff]   ;;  %22737 = vst [vmem:[#allocation60_spill] sm:$0xff] %v21436_v4 }
 0x6c2   : > { %11355 = vmatprep.subr.bf16.mxu0 %v15457_v44  ;;  %11412 = vmatprep.subr.bf16.mxu1 %v15460_v19  ;;  %v15464_v44 = vld [vmem:[%s22419_s11 + $0x3f0] ss:$68 sps:$4 sm:$0xff]   ;;  %v15469_v19 = vld [vmem:[%s22419_s11 + $0x584] ss:$68 sps:$4 sm:$0xff]  }
 0x6c5   : > { %11356 = vmatpush2.bf16.msra.mxu0 %v15455_v42  ;;  %11413 = vmatpush1.bf16.msra.mxu1 %v15458_v3  ;;  %v15472_v42 = vld [vmem:[%s22419_s11 + $0x36c] ss:$68 sps:$4 sm:$0xff]   ;;  %v21455_v3 = vpop.f32.mrf.mxu0 }
 0x6c6   : > { %11422 = vmatprep.subr.bf16.mxu1 %v15463_v55  ;;  %11471 = vmatprep.subr.bf16.mxu0 %v15466_v27  ;;  %v15467_v55 = vld [vmem:[%s22419_s11 + $0x580] ss:$68 sps:$4 sm:$0xff]   ;;  %22739 = vst [vmem:[#allocation54_spill] sm:$0xff] %v21455_v3  ;;  %v21457_v27 = vpop.f32.mrf.mxu1 }
 0x6c7   : > { %22740 = vst [vmem:[#allocation15_spill] sm:$0xff] %v21457_v27  ;;  %v15473_v27 = vld [vmem:[%s22419_s11 + $0x4f8] ss:$68 sps:$4 sm:$0xff]   ;;  %v15476_v3 = vld [vmem:[%s22419_s11 + $0x2e0] ss:$68 sps:$4 sm:$0xff]  }
 0x6c8   : > { %11358 = vmatmul.mubr.bf16.vlgmr.msra.gmra.mxu0 %v22683_v10 }
 0x6c9   : > { %13656 = vmatprep.mubr.msk.bf16.mxu0 %vm5693_vm2, %v20844_v34  ;;  %11423 = vmatpush2.bf16.msra.mxu1 %v15461_v2  ;;  %v15478_v2 = vld [vmem:[%s22419_s11 + $0x2e4] ss:$68 sps:$4 sm:$0xff]  }
 0x6ca   : > { %11472 = vmatpush1.bf16.msra.mxu0 %v15464_v44  ;;  %11424 = vmatprep.subr.bf16.mxu1 %v15469_v19  ;;  %v21471_v44 = vpop.f32.mrf.mxu0  ;;  %v21473_v19 = vpop.f32.mrf.mxu1 }
 0x6cb   : > { %11473 = vmatprep.subr.bf16.mxu0 %v15472_v42  ;;  %22741 = vst [vmem:[#allocation61_spill] sm:$0xff] %v21471_v44  ;;  %22742 = vst [vmem:[#allocation17_spill] sm:$0xff] %v21473_v19  ;;  %v15481_v42 = vld [vmem:[%s22419_s11 + $0x474] ss:$68 sps:$4 sm:$0xff]  }
 0x6cc   : > { %v21492_v19 = vpop.f32.mrf.mxu1  ;;  %v15487_v44 = vld [vmem:[%s22419_s11 + $0x1d4] ss:$68 sps:$4 sm:$0xff]  }
 0x6cd   : > { %11425 = vmatpush2.bf16.msra.mxu1 %v15467_v55  ;;  %v15484_v55 = vld [vmem:[%s22419_s11 + $0x25c] ss:$68 sps:$4 sm:$0xff]   ;;  %22744 = vst [vmem:[#allocation62_spill] sm:$0xff] %v21492_v19 }
 0x6ce   : > { %11474 = vmatpush1.bf16.msra.mxu0 %v15470_v56  ;;  %11426 = vmatprep.subr.bf16.mxu1 %v15475_v11  ;;  %v15479_v11 = vld [vmem:[%s22419_s11 + $0x470] ss:$68 sps:$4 sm:$0xff]   ;;  %v21490_v56 = vpop.f32.mrf.mxu0 }
 0x6cf   : > { %11475 = vmatprep.subr.bf16.mxu0 %v15478_v2  ;;  %22743 = vst [vmem:[#allocation12_spill] sm:$0xff] %v21490_v56  ;;  %v15482_v2 = vld [vmem:[%s22419_s11 + $0x258] ss:$68 sps:$4 sm:$0xff]  }
 0x6d0   : > { %11368 = vmatmul.mubr.bf16.gmra.mxu0 %v22685_v13 }
 0x6d1   : > { %13657 = vmatprep.mubr.msk.bf16.mxu0 %vm5693_vm2, %v20889_v24  ;;  %11427 = vmatpush2.bf16.msra.mxu1 %v15473_v27 }
 0x6d2   : > { %11476 = vmatpush1.bf16.msra.mxu0 %v15476_v3  ;;  %11428 = vmatprep.subr.bf16.mxu1 %v15481_v42  ;;  %v15485_v3 = vld [vmem:[%s22419_s11 + $0x1d0] ss:$68 sps:$4 sm:$0xff]   ;;  %v22747_v42 = vmov 0  }
 0x6d3   : > { %11477 = vmatprep.subr.bf16.mxu0 %v15484_v55  ;;  %v15488_v55 = vld [vmem:[%s22419_s11 + $0x3f8] ss:$68 sps:$4 sm:$0xff]  }
 0x6d4   : > { %v21500_v27 = vpop.f32.mrf.mxu0  ;;  %v21502_v4 = vpop.f32.mrf.mxu1 }
 0x6d5   : > { %22745 = vst [vmem:[#allocation68_spill] sm:$0xff] %v21500_v27  ;;  %22746 = vst [vmem:[#allocation21_spill] sm:$0xff] %v21502_v4  ;;  %11429 = vmatpush2.bf16.msra.mxu1 %v15479_v11  ;;  %v15491_v11 = vld [vmem:[%s22419_s11 + $0x14c] ss:$68 sps:$4 sm:$0xff]   ;;  %v15493_v27 = vld [vmem:[%s22419_s11 + $0xc0] ss:$68 sps:$4 sm:$0xff]  }
 0x6d6   : > { %11478 = vmatpush1.bf16.msra.mxu0 %v15482_v2  ;;  %11544 = vmatprep.subr.bf16.mxu1 %v22747_v42  ;;  %v21511_v19 = vpop.f32.mrf.mxu0  ;;  %v21513_v56 = vpop.f32.mrf.mxu1 }
 0x6d7   : > { %22748 = vst [vmem:[#allocation23_spill] sm:$0xff] %v21511_v19  ;;  %22749 = vst [vmem:[#allocation16_spill] sm:$0xff] %v21513_v56  ;;  %11479 = vmatprep.subr.bf16.mxu0 %v15487_v44  ;;  %v15489_v44 = vld [vmem:[%s22419_s11 + $0x148] ss:$68 sps:$4 sm:$0xff]   ;;  %v15492_v56 = vld [vmem:[%s22419_s11 + $0x370] ss:$68 sps:$4 sm:$0xff]  }
 0x6d8   : > { %11378 = vmatmul.mubr.bf16.gmra.mxu0 %v22686_v29  ;;  %11431 = vmatmul.mubr.bf16.vlgmr.msra.gmra.mxu1 %v22683_v10  ;;  %v21520_v2 = vpop.f32.mrf.mxu0  ;;  %v21522_v4 = vpop.f32.mrf.mxu1 }
 0x6d9   : > { %22750 = vst [vmem:[#allocation27_spill] sm:$0xff] %v21520_v2  ;;  %22751 = vst [vmem:[#allocation14_spill] sm:$0xff] %v21522_v4  ;;  %13658 = vmatprep.mubr.msk.bf16.mxu0 %vm5693_vm2, %v20931_v30  ;;  %13660 = vmatprep.mubr.msk.bf16.mxu1 %vm5693_vm2, %v20844_v34 }
 0x6da   : > { %11480 = vmatpush1.bf16.msra.mxu0 %v15485_v3  ;;  %11545 = vmatpush1.bf16.msra.mxu1 %v15488_v55  ;;  %v21534_v19 = vpop.f32.mrf.mxu0  ;;  %v21536_v2 = vpop.f32.mrf.mxu1  ;;  %v15495_v3 = vld [vmem:[%s22419_s11 + $0xc4] ss:$68 sps:$4 sm:$0xff]  }
 0x6db   : > { %22752 = vst [vmem:[#allocation20_spill] sm:$0xff] %v21534_v19  ;;  %22753 = vst [vmem:[#allocation18_spill] sm:$0xff] %v21536_v2  ;;  %11481 = vmatprep.subr.bf16.mxu0 %v15491_v11  ;;  %11546 = vmatprep.subr.bf16.mxu1 %v22747_v42  ;;  %v15496_v11 = vld [vmem:[%s22419_s11 + $0x2e8] ss:$68 sps:$4 sm:$0xff]  }
 0x6dc   : > { %v21542_v55 = vpop.f32.mrf.mxu0  ;;  %v21544_v4 = vpop.f32.mrf.mxu1 }
 0x6dd   : > { %22754 = vst [vmem:[#allocation22_spill] sm:$0xff] %v21542_v55  ;;  %22755 = vst [vmem:[#allocation25_spill] sm:$0xff] %v21544_v4 }
 0x6de   : > { %11482 = vmatpush1.bf16.msra.mxu0 %v15489_v44  ;;  %11547 = vmatpush1.bf16.msra.mxu1 %v15492_v56  ;;  %v21552_v2 = vpop.f32.mrf.mxu0  ;;  %v21554_v19 = vpop.f32.mrf.mxu1  ;;  %v15499_v44 = vld [vmem:[%s22419_s11 + $0x3c] ss:$68 sps:$4 sm:$0xff]  }
 0x6df   : > { %22756 = vst [vmem:[#allocation79_spill] sm:$0xff] %v21552_v2  ;;  %22757 = vst [vmem:[#allocation80_spill] sm:$0xff] %v21554_v19  ;;  %11483 = vmatprep.subr.bf16.mxu0 %v15495_v3  ;;  %11548 = vmatprep.subr.bf16.mxu1 %v22747_v42  ;;  %v15497_v3 = vld [vmem:[%s22419_s11 + $0x38] ss:$68 sps:$4 sm:$0xff]   ;;  %v15500_v19 = vld [vmem:[%s22419_s11 + $0x260] ss:$68 sps:$4 sm:$0xff]  }
 0x6e0   : > { %11388 = vmatmul.mubr.bf16.gmra.mxu0 %v22689_v53  ;;  %11441 = vmatmul.mubr.bf16.gmra.mxu1 %v22685_v13  ;;  %v21562_v56 = vpop.f32.mrf.mxu0  ;;  %v21564_v4 = vpop.f32.mrf.mxu1 }
 0x6e1   : > { %22758 = vst [vmem:[#allocation81_spill] sm:$0xff] %v21562_v56  ;;  %22759 = vst [vmem:[#allocation82_spill] sm:$0xff] %v21564_v4  ;;  %13661 = vmatprep.mubr.msk.bf16.mxu1 %vm5693_vm2, %v20889_v24  ;;  %13663 = vmatprep.mubr.msk.bf16.mxu0 %vm5693_vm2, %v20711_v17  ;;  %v15501_v56 = vld [vmem:[%s22419_s11 + $0x610] ss:$68 sps:$4 sm:$0xff]  }
 0x6e2   : > { %11484 = vmatpush1.bf16.msra.mxu0 %v15493_v27  ;;  %11549 = vmatpush1.bf16.msra.mxu1 %v15496_v11  ;;  %v21576_v2 = vpop.f32.mrf.mxu0  ;;  %v21579_v4 = vpop.f32.mrf.mxu1  ;;  %v15503_v27 = vld [vmem:[%s22419_s11 + $0x614] ss:$68 sps:$4 sm:$0xff]  }
 0x6e3   : > { %22760 = vst [vmem:[#allocation83_spill] sm:$0xff] %v21576_v2  ;;  %11485 = vmatprep.subr.bf16.mxu0 %v15499_v44  ;;  %11550 = vmatprep.subr.bf16.mxu1 %v22747_v42  ;;  %22761 = vst [vmem:[#allocation84_spill] sm:$0xff] %v21579_v4  ;;  %v15504_v44 = vld [vmem:[%s22419_s11 + $0x1d8] ss:$68 sps:$4 sm:$0xff]  }
 0x6e4   : > { %v21584_v11 = vpop.f32.mrf.mxu0  ;;  %v21594_v55 = vpop.f32.mrf.mxu1 }
 0x6e5   : > { %22762 = vst [vmem:[#allocation85_spill] sm:$0xff] %v21584_v11  ;;  %22764 = vst [vmem:[#allocation87_spill] sm:$0xff] %v21594_v55  ;;  %v15505_v55 = vld [vmem:[%s22419_s11 + $0x588] ss:$68 sps:$4 sm:$0xff]  }
 0x6e6   : > { %11486 = vmatpush1.bf16.msra.mxu0 %v15497_v3  ;;  %11551 = vmatpush1.bf16.msra.mxu1 %v15500_v19  ;;  %v21592_v2 = vpop.f32.mrf.mxu0  ;;  %v15507_v3 = vld [vmem:[%s22419_s11 + $0x58c] ss:$68 sps:$4 sm:$0xff]  }
 0x6e7   : > { %22763 = vst [vmem:[#allocation86_spill] sm:$0xff] %v21592_v2  ;;  %11495 = vmatprep.subr.bf16.mxu0 %v15503_v27  ;;  %11552 = vmatprep.subr.bf16.mxu1 %v22747_v42  ;;  %v15508_v27 = vld [vmem:[%s22419_s11 + $0x150] ss:$68 sps:$4 sm:$0xff]   ;;  %v21613_v2 = vpop.f32.mrf.mxu1 }
 0x6e8   : > { %11451 = vmatmul.mubr.bf16.gmra.mxu1 %v22686_v29  ;;  %v21601_v19 = vpop.f32.mrf.mxu0  ;;  %22767 = vst [vmem:[#allocation90_spill] sm:$0xff] %v21613_v2 }
 0x6e9   : > { %22765 = vst [vmem:[#allocation88_spill] sm:$0xff] %v21601_v19  ;;  %13662 = vmatprep.mubr.msk.bf16.mxu1 %vm5693_vm2, %v20931_v30  ;;  %v15509_v19 = vld [vmem:[%s22419_s11 + $0x500] ss:$68 sps:$4 sm:$0xff]  }
 0x6ea   : > { %11496 = vmatpush2.bf16.msra.mxu0 %v15501_v56  ;;  %11553 = vmatpush1.bf16.msra.mxu1 %v15504_v44  ;;  %v21611_v4 = vpop.f32.mrf.mxu0  ;;  %v15511_v56 = vld [vmem:[%s22419_s11 + $0x504] ss:$68 sps:$4 sm:$0xff]  }
 0x6eb   : > { %22766 = vst [vmem:[#allocation89_spill] sm:$0xff] %v21611_v4  ;;  %11497 = vmatprep.subr.bf16.mxu0 %v15507_v3  ;;  %11554 = vmatprep.subr.bf16.mxu1 %v22747_v42  ;;  %v15512_v4 = vld [vmem:[%s22419_s11 + $0xc8] ss:$68 sps:$4 sm:$0xff]   ;;  %v21629_v3 = vpop.f32.mrf.mxu1 }
 0x6ec   : > { %v21619_v44 = vpop.f32.mrf.mxu0  ;;  %22770 = vst [vmem:[#allocation93_spill] sm:$0xff] %v21629_v3  ;;  %v15513_v3 = vld [vmem:[%s22419_s11 + $0x478] ss:$68 sps:$4 sm:$0xff]  }
 0x6ed   : > { %22768 = vst [vmem:[#allocation91_spill] sm:$0xff] %v21619_v44  ;;  %v21648_v44 = vpop.f32.mrf.mxu1 }
 0x6ee   : > { %11498 = vmatpush2.bf16.msra.mxu0 %v15505_v55  ;;  %11555 = vmatpush1.bf16.msra.mxu1 %v15508_v27  ;;  %v21627_v2 = vpop.f32.mrf.mxu0  ;;  %v15515_v55 = vld [vmem:[%s22419_s11 + $0x47c] ss:$68 sps:$4 sm:$0xff]   ;;  %22773 = vst [vmem:[#allocation96_spill] sm:$0xff] %v21648_v44 }
 0x6ef   : > { %22769 = vst [vmem:[#allocation92_spill] sm:$0xff] %v21627_v2  ;;  %11499 = vmatprep.subr.bf16.mxu0 %v15511_v56  ;;  %11556 = vmatprep.subr.bf16.mxu1 %v22747_v42  ;;  %v15516_v56 = vld [vmem:[%s22419_s11 + $0x40] ss:$68 sps:$4 sm:$0xff]  }
 0x6f0   : > { %11461 = vmatmul.mubr.bf16.gmra.mxu1 %v22689_v53  ;;  %v21636_v27 = vpop.f32.mrf.mxu0 }
 0x6f1   : > { %22771 = vst [vmem:[#allocation94_spill] sm:$0xff] %v21636_v27  ;;  %13667 = vmatprep.mubr.msk.bf16.mxu1 %vm5693_vm2, %v20711_v17  ;;  %v15517_v17 = vld [vmem:[%s22419_s11 + $0x618] ss:$68 sps:$4 sm:$0xff]  }
 0x6f2   : > { %11500 = vmatpush2.bf16.msra.mxu0 %v15509_v19  ;;  %11557 = vmatpush1.bf16.msra.mxu1 %v15512_v4  ;;  %v21646_v2 = vpop.f32.mrf.mxu0  ;;  %v21654_v4 = vpop.f32.mrf.mxu1 }
 0x6f3   : > { %22772 = vst [vmem:[#allocation95_spill] sm:$0xff] %v21646_v2  ;;  %11501 = vmatprep.subr.bf16.mxu0 %v15515_v55  ;;  %11558 = vmatprep.subr.bf16.mxu1 %v22747_v42  ;;  %22774 = vst [vmem:[#allocation97_spill] sm:$0xff] %v21654_v4 }
 0x6f4   : > { %v21665_v55 = vpop.f32.mrf.mxu1 }
 0x6f5   : > { %v13693_v27 = vpop.f32.mrf.mxu0  ;;  %22776 = vst [vmem:[#allocation99_spill] sm:$0xff] %v21665_v55 }
 0x6f6   : > { %11502 = vmatpush2.bf16.msra.mxu0 %v15513_v3  ;;  %11559 = vmatpush1.bf16.msra.mxu1 %v15516_v56  ;;  %v15518_v3 = vld [vmem:[%s22419_s11 + $0x590] ss:$68 sps:$4 sm:$0xff]  }
 0x6f7   : > { %11568 = vmatprep.subr.bf16.mxu1 %v22747_v42  ;;  %v13694_v19 = vpop.f32.mrf.mxu0 }
 0x6f8   : > { %v21657_v11 = vadd.f32 %v13694_v19, %v13693_v27  ;;  %v15519_v19 = vld [vmem:[%s22419_s11 + $0x508] ss:$68 sps:$4 sm:$0xff]  }
 0x6f9   : > { %11504 = vmatmul.mubr.bf16.vlgmr.msra.gmra.mxu0 %v22683_v10  ;;  %v13696_v44 = vpop.f32.mrf.mxu0 }
 0x6fa   : > { %22775 = vst [vmem:[#allocation98_spill] sm:$0xff] %v21657_v11  ;;  %13664 = vmatprep.mubr.msk.bf16.mxu0 %vm5693_vm2, %v20844_v34  ;;  %11569 = vmatpush2.bf16.msra.mxu1 %v15517_v17  ;;  %v21673_v11 = vpop.f32.mrf.mxu1 }
 0x6fb   : > { %11570 = vmatprep.subr.bf16.mxu1 %v22747_v42  ;;  %v13697_v56 = vpop.f32.mrf.mxu0  ;;  %22778 = vst [vmem:[#allocation101_spill] sm:$0xff] %v21673_v11 }
 0x6fc   : > { %v21668_v4 = vadd.f32 %v13697_v56, %v13696_v44  ;;  %v15520_v44 = vld [vmem:[%s22419_s11 + $0x480] ss:$68 sps:$4 sm:$0xff]  }
 0x6fd   : > { %v13699_v27 = vpop.f32.mrf.mxu0 }
 0x6fe   : > { %22777 = vst [vmem:[#allocation100_spill] sm:$0xff] %v21668_v4  ;;  %11571 = vmatpush2.bf16.msra.mxu1 %v15518_v3  ;;  %v21684_v3 = vpop.f32.mrf.mxu1 }
 0x6ff   : > { %11572 = vmatprep.subr.bf16.mxu1 %v22747_v42  ;;  %v13700_v17 = vpop.f32.mrf.mxu0  ;;  %22780 = vst [vmem:[#allocation103_spill] sm:$0xff] %v21684_v3 }
 0x700   : > { %v21676_v2 = vadd.f32 %v13700_v17, %v13699_v27  ;;  %v21690_v27 = vld [vmem:[%s22421_s13] sm:$0xff] }
 0x701   : > { %11514 = vmatmul.mubr.bf16.gmra.mxu0 %v22685_v13  ;;  %v13702_v55 = vpop.f32.mrf.mxu0  ;;  %v21698_v4 = vrot.slane %v21690_v27, %v17881_v38 }
 0x702   : > { %22779 = vst [vmem:[#allocation102_spill] sm:$0xff] %v21676_v2  ;;  %13665 = vmatprep.mubr.msk.bf16.mxu0 %vm5693_vm2, %v20889_v24  ;;  %11573 = vmatpush2.bf16.msra.mxu1 %v15519_v19 }
 0x703   : > { %11574 = vmatprep.subr.bf16.mxu1 %v22747_v42  ;;  %v13703_v56 = vpop.f32.mrf.mxu0 }
 0x704   : > { %v21692_v17 = vadd.f32 %v13703_v56, %v13702_v55 }
 0x705   : > { %v13705_v11 = vpop.f32.mrf.mxu0  ;;  %v10994_v19 = vpop.f32.mrf.mxu1 }
 0x706   : > { %22781 = vst [vmem:[#allocation104_spill] sm:$0xff] %v21692_v17  ;;  %11575 = vmatpush2.bf16.msra.mxu1 %v15520_v44  ;;  %v10995_v2 = vadd.f32 %v10994_v19, %v20603_v14  ;;  %v21708_v44 = vrot.slane %v21690_v27, %v18557_v32 }
 0x707   : > { %v13706_v42 = vpop.f32.mrf.mxu0  ;;  %v10996_v3 = vpop.f32.mrf.mxu1 }
 0x708   : > { %v11609_v57 = vadd.f32 %v15523_v15, %v10995_v2  ;;  %v21703_v6 = vadd.f32 %v13706_v42, %v13705_v11  ;;  %v10997_v55 = vadd.f32 %v10996_v3, %v20630_v12  ;;  %v15524_v12 = vld [vmem:[%s15985_s29 + $0x8] sm:$0xff] }
 0x709   : > { %11524 = vmatmul.mubr.bf16.gmra.mxu0 %v22686_v29  ;;  %11577 = vmatmul.mubr.bf16.vlgmr.msra.gmra.mxu1 %v22683_v10  ;;  %v13708_v14 = vpop.f32.mrf.mxu0  ;;  %v10998_v56 = vpop.f32.mrf.mxu1 }
 0x70a   : > { %22782 = vst [vmem:[#allocation105_spill] sm:$0xff] %v21703_v6  ;;  %v11836_v19 = vadd.f32 %v21698_v4, %v11609_v57  ;;  %13666 = vmatprep.mubr.msk.bf16.mxu0 %vm5693_vm2, %v20931_v30  ;;  %13668 = vmatprep.mubr.msk.bf16.mxu1 %vm5693_vm2, %v20844_v34  ;;  %v11610_v15 = vadd.f32 %v15524_v12, %v10997_v55  ;;  %v15525_v6 = vld [vmem:[%s15985_s29 + $0x88] sm:$0xff]  ;;  %v15527_v12 = vld [vmem:[%s15985_s29 + $0x110] sm:$0xff] }
 0x70b   : > { %v10999_v2 = vadd.f32 %v10998_v56, %v20658_v18  ;;  %v13709_v11 = vpop.f32.mrf.mxu0  ;;  %v11000_v3 = vpop.f32.mrf.mxu1  ;;  %v15526_v56 = vld [vmem:[%s15985_s29 + $0x90] sm:$0xff] }
 0x70c   : > { %v11972_v42 = vmax.f32 %v11836_v19, 0.0  ;;  %v11837_v10 = vadd.f32 %v21708_v44, %v11610_v15  ;;  %v21721_v57 = vadd.f32 %v13709_v11, %v13708_v14  ;;  %v11001_v32 = vadd.f32 %v11000_v3, %v20681_v52 }
 0x70d   : > { %v11626_v17 = vadd.f32 %v15525_v6, %v10999_v2  ;;  %v13711_v38 = vpop.f32.mrf.mxu0  ;;  %v11004_v25 = vpop.f32.mrf.mxu1 }
 0x70e   : > { %12108 = vst [vmem:[%s21724_s26] sm:$0xff] %v11972_v42  ;;  %v11973_v18 = vmax.f32 %v11837_v10, 0.0  ;;  %v11005_v55 = vadd.f32 %v11004_v25, %v20701_v45  ;;  %v11627_v6 = vadd.f32 %v15526_v56, %v11001_v32 }
 0x70f   : > { %v11853_v34 = vadd.f32 %v21698_v4, %v11626_v17  ;;  %v13712_v19 = vpop.f32.mrf.mxu0  ;;  %v11006_v14 = vpop.f32.mrf.mxu1 }
 0x710   : > { %12109 = vst [vmem:[%s21724_s26 + $0x8] sm:$0xff] %v11973_v18  ;;  %v11643_v15 = vadd.f32 %v15527_v12, %v11005_v55  ;;  %v21732_v2 = vadd.f32 %v13712_v19, %v13711_v38  ;;  %v11007_v11 = vadd.f32 %v11006_v14, %v20727_v41  ;;  %v11854_v3 = vadd.f32 %v21708_v44, %v11627_v6  ;;  %v15528_v38 = vld [vmem:[%s15985_s29 + $0x118] sm:$0xff]  ;;  %v15530_v12 = vld [vmem:[%s15985_s29 + $0x1a0] sm:$0xff] }
 0x711   : > { %v11989_v52 = vmax.f32 %v11853_v34, 0.0  ;;  %11534 = vmatmul.mubr.bf16.gmra.mxu0 %v22689_v53  ;;  %11585 = vmatmul.mubr.bf16.gmra.mxu1 %v22685_v13  ;;  %v13714_v45 = vpop.f32.mrf.mxu0  ;;  %v11008_v32 = vpop.f32.mrf.mxu1  ;;  %v15529_v55 = vld [vmem:[%s15985_s29 + $0x198] sm:$0xff] }
 0x712   : > { %v11870_v25 = vadd.f32 %v21698_v4, %v11643_v15  ;;  %13669 = vmatprep.mubr.msk.bf16.mxu1 %vm5693_vm2, %v20889_v24  ;;  %v11644_v17 = vadd.f32 %v15528_v38, %v11007_v11  ;;  %v11009_v41 = vadd.f32 %v11008_v32, %v20748_v36  ;;  %v11990_v42 = vmax.f32 %v11854_v3, 0.0  ;;  %v15531_v32 = vld [vmem:[%s15985_s29 + $0x220] sm:$0xff] }
 0x713   : > { %12125 = vst [vmem:[%s21724_s26 + $0x88] sm:$0xff] %v11989_v52  ;;  %v13715_v10 = vpop.f32.mrf.mxu0  ;;  %v11010_v18 = vpop.f32.mrf.mxu1 }
 0x714   : > { %v12006_v13 = vmax.f32 %v11870_v25, 0.0  ;;  %v11871_v34 = vadd.f32 %v21708_v44, %v11644_v17  ;;  %v11660_v56 = vadd.f32 %v15529_v55, %v11009_v41  ;;  %v21746_v6 = vadd.f32 %v13715_v10, %v13714_v45  ;;  %12126 = vst [vmem:[%s21724_s26 + $0x90] sm:$0xff] %v11990_v42  ;;  %v15532_v17 = vld [vmem:[%s15985_s29 + $0x228] sm:$0xff] }
 0x715   : > { %v11011_v24 = vadd.f32 %v11010_v18, %v20769_v20  ;;  %v11014_v19 = vpop.f32.mrf.mxu1 }
 0x716   : > { %12142 = vst [vmem:[%s21724_s26 + $0x110] sm:$0xff] %v12006_v13  ;;  %v12007_v36 = vmax.f32 %v11871_v34, 0.0  ;;  %v11887_v14 = vadd.f32 %v21698_v4, %v11660_v56  ;;  %v11015_v52 = vadd.f32 %v11014_v19, %v20791_v22 }
 0x717   : > { %v11661_v15 = vadd.f32 %v15530_v12, %v11011_v24  ;;  %v11016_v11 = vpop.f32.mrf.mxu1 }
 0x718   : > { %12143 = vst [vmem:[%s21724_s26 + $0x118] sm:$0xff] %v12007_v36  ;;  %v12023_v3 = vmax.f32 %v11887_v14, 0.0  ;;  %v11677_v45 = vadd.f32 %v15531_v32, %v11015_v52  ;;  %v11017_v25 = vadd.f32 %v11016_v11, %v20813_v49 }
 0x719   : > { %v11888_v20 = vadd.f32 %v21708_v44, %v11661_v15  ;;  %11593 = vmatmul.mubr.bf16.gmra.mxu1 %v22686_v29  ;;  %v11018_v38 = vpop.f32.mrf.mxu1  ;;  %v15533_v29 = vld [vmem:[%s15985_s29 + $0x2a8] sm:$0xff]  ;;  %v15535_v15 = vld [vmem:[%s15985_s29 + $0x330] sm:$0xff] }
 0x71a   : > { %12159 = vst [vmem:[%s21724_s26 + $0x198] sm:$0xff] %v12023_v3  ;;  %v11904_v22 = vadd.f32 %v21698_v4, %v11677_v45  ;;  %13670 = vmatprep.mubr.msk.bf16.mxu1 %vm5693_vm2, %v20931_v30  ;;  %v11678_v41 = vadd.f32 %v15532_v17, %v11017_v25  ;;  %v11019_v42 = vadd.f32 %v11018_v38, %v20834_v39  ;;  %v15534_v39 = vld [vmem:[%s15985_s29 + $0x2b0] sm:$0xff] }
 0x71b   : > { %v12024_v10 = vmax.f32 %v11888_v20, 0.0  ;;  %v11020_v49 = vpop.f32.mrf.mxu1 }
 0x71c   : > { %v12040_v18 = vmax.f32 %v11904_v22, 0.0  ;;  %v11905_v13 = vadd.f32 %v21708_v44, %v11678_v41  ;;  %v11694_v34 = vadd.f32 %v15533_v29, %v11019_v42  ;;  %v11021_v55 = vadd.f32 %v11020_v49, %v20857_v37 }
 0x71d   : > { %12160 = vst [vmem:[%s21724_s26 + $0x1a0] sm:$0xff] %v12024_v10  ;;  %v11024_v56 = vpop.f32.mrf.mxu1  ;;  %v11761_v22 = vsub.s32 2, %v22620_v1  ;;  %v11765_v10 = vsub.s32 3, %v22620_v1 }
 0x71e   : > { %12176 = vst [vmem:[%s21724_s26 + $0x220] sm:$0xff] %v12040_v18  ;;  %v12041_v30 = vmax.f32 %v11905_v13, 0.0  ;;  %v11921_v24 = vadd.f32 %v21698_v4, %v11694_v34  ;;  %v11695_v19 = vadd.f32 %v15534_v39, %v11021_v55  ;;  %v11025_v36 = vadd.f32 %v11024_v56, %v20879_v54  ;;  %v15536_v54 = vld [vmem:[%s15985_s29 + $0x338] sm:$0xff]  ;;  %v15538_v18 = vld [vmem:[%s15985_s29 + $0x3c0] sm:$0xff] }
 0x71f   : > { %v11026_v14 = vpop.f32.mrf.mxu1  ;;  %v21795_v55 = vrot.slane %v21690_v27, %v11761_v22 }
 0x720   : > { %12177 = vst [vmem:[%s21724_s26 + $0x228] sm:$0xff] %v12041_v30  ;;  %v12057_v52 = vmax.f32 %v11921_v24, 0.0  ;;  %v11922_v12 = vadd.f32 %v21708_v44, %v11695_v19  ;;  %v11711_v37 = vadd.f32 %v15535_v15, %v11025_v36  ;;  %v11027_v11 = vadd.f32 %v11026_v14, %v20901_v48  ;;  %v15539_v24 = vld [vmem:[%s15985_s29 + $0x10] sm:$0xff] }
 0x721   : > { %11601 = vmatmul.mubr.bf16.gmra.mxu1 %v22689_v53  ;;  %v11028_v3 = vpop.f32.mrf.mxu1  ;;  %v15537_v53 = vld [vmem:[%s15985_s29 + $0x3b8] sm:$0xff] }
 0x722   : > { %12193 = vst [vmem:[%s21724_s26 + $0x2a8] sm:$0xff] %v12057_v52  ;;  %v12058_v32 = vmax.f32 %v11922_v12, 0.0  ;;  %v11938_v45 = vadd.f32 %v21698_v4, %v11711_v37  ;;  %v11712_v25 = vadd.f32 %v15536_v54, %v11027_v11  ;;  %v11029_v20 = vadd.f32 %v11028_v3, %v20921_v33  ;;  %v15540_v52 = vld [vmem:[%s15985_s29 + $0x18] sm:$0xff] }
 0x723   : > { %v11030_v38 = vpop.f32.mrf.mxu1  ;;  %v15541_v11 = vld [vmem:[%s15985_s29 + $0x98] sm:$0xff] }
 0x724   : > { %12194 = vst [vmem:[%s21724_s26 + $0x2b0] sm:$0xff] %v12058_v32  ;;  %v12074_v17 = vmax.f32 %v11938_v45, 0.0  ;;  %v11939_v48 = vadd.f32 %v21708_v44, %v11712_v25  ;;  %v11728_v41 = vadd.f32 %v15537_v53, %v11029_v20  ;;  %v11031_v42 = vadd.f32 %v11030_v38, %v20940_v43  ;;  %v15542_v20 = vld [vmem:[%s15985_s29 + $0xa0] sm:$0xff] }
 0x726   : > { %12210 = vst [vmem:[%s21724_s26 + $0x330] sm:$0xff] %v12074_v17  ;;  %v12075_v49 = vmax.f32 %v11939_v48, 0.0  ;;  %v11955_v33 = vadd.f32 %v21698_v4, %v11728_v41  ;;  %v11729_v13 = vadd.f32 %v15538_v18, %v11031_v42  ;;  %v11067_v29 = vpop.f32.mrf.mxu0  ;;  %v15543_v41 = vld [vmem:[%s15985_s29 + $0x120] sm:$0xff] }
 0x727   : > { %v11068_v34 = vadd.f32 %v11067_v29, %v20605_v47  ;;  %v21804_v47 = vrot.slane %v21690_v27, %v11765_v10 }
 0x728   : > { %12211 = vst [vmem:[%s21724_s26 + $0x338] sm:$0xff] %v12075_v49  ;;  %v12091_v43 = vmax.f32 %v11955_v33, 0.0  ;;  %v11956_v56 = vadd.f32 %v21708_v44, %v11729_v13  ;;  %v11069_v30 = vpop.f32.mrf.mxu0  ;;  %v15544_v13 = vld [vmem:[%s15985_s29 + $0x128] sm:$0xff] }
 0x729   : > { %v11611_v4 = vadd.f32 %v15539_v24, %v11068_v34  ;;  %v11070_v39 = vadd.f32 %v11069_v30, %v20632_v40  ;;  %v15545_v24 = vld [vmem:[%s15985_s29 + $0x1a8] sm:$0xff] }
 0x72a   : > { %12227 = vst [vmem:[%s21724_s26 + $0x3b8] sm:$0xff] %v12091_v43  ;;  %v12092_v19 = vmax.f32 %v11956_v56, 0.0  ;;  %v11071_v36 = vpop.f32.mrf.mxu0  ;;  %v11769_v43 = vsub.s32 4, %v22620_v1 }
 0x72b   : > { %v11838_v14 = vadd.f32 %v21795_v55, %v11611_v4  ;;  %v11612_v44 = vadd.f32 %v15540_v52, %v11070_v39  ;;  %v11072_v12 = vadd.f32 %v11071_v36, %v20660_v28  ;;  %v11773_v36 = vsub.s32 5, %v22620_v1  ;;  %v15546_v52 = vld [vmem:[%s15985_s29 + $0x1b0] sm:$0xff] }
 0x72c   : > { %12228 = vst [vmem:[%s21724_s26 + $0x3c0] sm:$0xff] %v12092_v19  ;;  %v11073_v15 = vpop.f32.mrf.mxu0 }
 0x72d   : > { %v11974_v40 = vmax.f32 %v11838_v14, 0.0  ;;  %v11839_v37 = vadd.f32 %v21804_v47, %v11612_v44  ;;  %v11628_v3 = vadd.f32 %v15541_v11, %v11072_v12  ;;  %v11074_v32 = vadd.f32 %v11073_v15, %v20683_v58 }
 0x72e   : > { %v11077_v45 = vpop.f32.mrf.mxu0 }
 0x72f   : > { %12110 = vst [vmem:[%s21724_s26 + $0x10] sm:$0xff] %v11974_v40  ;;  %v11975_v54 = vmax.f32 %v11839_v37, 0.0  ;;  %v11855_v25 = vadd.f32 %v21795_v55, %v11628_v3  ;;  %v11629_v28 = vadd.f32 %v15542_v20, %v11074_v32  ;;  %v11078_v38 = vadd.f32 %v11077_v45, %v20703_v5  ;;  %v15547_v32 = vld [vmem:[%s15985_s29 + $0x230] sm:$0xff] }
 0x730   : > { %v11079_v17 = vpop.f32.mrf.mxu0  ;;  %v21851_v20 = vrot.slane %v21690_v27, %v11773_v36 }
 0x731   : > { %12111 = vst [vmem:[%s21724_s26 + $0x18] sm:$0xff] %v11975_v54  ;;  %v11991_v48 = vmax.f32 %v11855_v25, 0.0  ;;  %v11856_v53 = vadd.f32 %v21804_v47, %v11629_v28  ;;  %v11645_v58 = vadd.f32 %v15543_v41, %v11078_v38  ;;  %v11080_v42 = vadd.f32 %v11079_v17, %v20729_v59  ;;  %v15548_v54 = vld [vmem:[%s15985_s29 + $0x20] sm:$0xff] }
 0x732   : > { %v11081_v49 = vpop.f32.mrf.mxu0 }
 0x733   : > { %12127 = vst [vmem:[%s21724_s26 + $0x98] sm:$0xff] %v11991_v48  ;;  %v11992_v33 = vmax.f32 %v11856_v53, 0.0  ;;  %v11872_v18 = vadd.f32 %v21795_v55, %v11645_v58  ;;  %v11646_v29 = vadd.f32 %v15544_v13, %v11080_v42  ;;  %v11082_v5 = vadd.f32 %v11081_v49, %v20750_v63  ;;  %v15549_v53 = vld [vmem:[%s15985_s29 + $0x238] sm:$0xff]  ;;  %v15550_v58 = vld [vmem:[%s15985_s29 + $0x28] sm:$0xff] }
 0x734   : > { %v11083_v34 = vpop.f32.mrf.mxu0 }
 0x735   : > { %12128 = vst [vmem:[%s21724_s26 + $0xa0] sm:$0xff] %v11992_v33  ;;  %v12008_v56 = vmax.f32 %v11872_v18, 0.0  ;;  %v11873_v30 = vadd.f32 %v21804_v47, %v11646_v29  ;;  %v11662_v59 = vadd.f32 %v15545_v24, %v11082_v5  ;;  %v11084_v4 = vadd.f32 %v11083_v34, %v20771_v23  ;;  %v15551_v5 = vld [vmem:[%s15985_s29 + $0x2b8] sm:$0xff]  ;;  %v15552_v24 = vld [vmem:[%s15985_s29 + $0xa8] sm:$0xff] }
 0x736   : > { %v11087_v39 = vpop.f32.mrf.mxu0  ;;  %v11140_v19 = vpop.f32.mrf.mxu1  ;;  %v21840_v23 = vrot.slane %v21690_v27, %v11769_v43 }
 0x737   : > { %12144 = vst [vmem:[%s21724_s26 + $0x120] sm:$0xff] %v12008_v56  ;;  %v12009_v63 = vmax.f32 %v11873_v30, 0.0  ;;  %v11889_v14 = vadd.f32 %v21795_v55, %v11662_v59  ;;  %v11663_v44 = vadd.f32 %v15546_v52, %v11084_v4  ;;  %v11088_v12 = vadd.f32 %v11087_v39, %v20793_v21 }
 0x738   : > { %v11141_v15 = vadd.f32 %v11140_v19, %v20952_v50  ;;  %v11089_v40 = vpop.f32.mrf.mxu0  ;;  %v11142_v37 = vpop.f32.mrf.mxu1 }
 0x739   : > { %12145 = vst [vmem:[%s21724_s26 + $0x128] sm:$0xff] %v12009_v63  ;;  %v12025_v11 = vmax.f32 %v11889_v14, 0.0  ;;  %v11890_v3 = vadd.f32 %v21804_v47, %v11663_v44  ;;  %v11679_v45 = vadd.f32 %v15547_v32, %v11088_v12  ;;  %v11090_v21 = vadd.f32 %v11089_v40, %v20815_v31  ;;  %v15553_v14 = vld [vmem:[%s15985_s29 + $0x2c0] sm:$0xff] }
 0x73a   : > { %v11613_v50 = vadd.f32 %v15548_v54, %v11141_v15  ;;  %v11143_v25 = vadd.f32 %v11142_v37, %v20968_v61  ;;  %v11091_v28 = vpop.f32.mrf.mxu0  ;;  %v11144_v38 = vpop.f32.mrf.mxu1  ;;  %v15554_v15 = vld [vmem:[%s15985_s29 + $0xb0] sm:$0xff] }
 0x73b   : > { %12161 = vst [vmem:[%s21724_s26 + $0x1a8] sm:$0xff] %v12025_v11  ;;  %v12026_v17 = vmax.f32 %v11890_v3, 0.0  ;;  %v11906_v48 = vadd.f32 %v21795_v55, %v11679_v45  ;;  %v11680_v41 = vadd.f32 %v15549_v53, %v11090_v21  ;;  %v11092_v31 = vadd.f32 %v11091_v28, %v20836_v51  ;;  %v15555_v45 = vld [vmem:[%s15985_s29 + $0x340] sm:$0xff] }
 0x73c   : > { %v11840_v61 = vadd.f32 %v21840_v23, %v11613_v50  ;;  %v11614_v42 = vadd.f32 %v15550_v58, %v11143_v25  ;;  %v11145_v49 = vadd.f32 %v11144_v38, %v20987_v26  ;;  %v11093_v33 = vpop.f32.mrf.mxu0  ;;  %v11146_v18 = vpop.f32.mrf.mxu1  ;;  %v15556_v25 = vld [vmem:[%s15985_s29 + $0x130] sm:$0xff] }
 0x73d   : > { %12162 = vst [vmem:[%s21724_s26 + $0x1b0] sm:$0xff] %v12026_v17  ;;  %v12042_v13 = vmax.f32 %v11906_v48, 0.0  ;;  %v11907_v29 = vadd.f32 %v21804_v47, %v11680_v41  ;;  %v11696_v34 = vadd.f32 %v15551_v5, %v11092_v31  ;;  %v11094_v56 = vadd.f32 %v11093_v33, %v20859_v16  ;;  %v15557_v41 = vld [vmem:[%s15985_s29 + $0x348] sm:$0xff] }
 0x73e   : > { %v11976_v51 = vmax.f32 %v11840_v61, 0.0  ;;  %v11841_v30 = vadd.f32 %v21851_v20, %v11614_v42  ;;  %v11630_v59 = vadd.f32 %v15552_v24, %v11145_v49  ;;  %v11147_v26 = vadd.f32 %v11146_v18, %v21000_v9  ;;  %v11097_v4 = vpop.f32.mrf.mxu0  ;;  %v11150_v39 = vpop.f32.mrf.mxu1  ;;  %v15558_v42 = vld [vmem:[%s15985_s29 + $0x138] sm:$0xff]  ;;  %v15559_v5 = vld [vmem:[%s15985_s29 + $0x3c8] sm:$0xff] }
 0x73f   : > { %12178 = vst [vmem:[%s21724_s26 + $0x230] sm:$0xff] %v12042_v13  ;;  %v12043_v19 = vmax.f32 %v11907_v29, 0.0  ;;  %v11923_v63 = vadd.f32 %v21795_v55, %v11696_v34  ;;  %v11697_v52 = vadd.f32 %v15553_v14, %v11094_v56  ;;  %v11098_v16 = vadd.f32 %v11097_v4, %v20881_v7  ;;  %v22783_v24 = vld [vmem:[#allocation43_spill] sm:$0xff] }
 0x740   : > { %12112 = vst [vmem:[%s21724_s26 + $0x20] sm:$0xff] %v11976_v51  ;;  %v11977_v44 = vmax.f32 %v11841_v30, 0.0  ;;  %v11857_v12 = vadd.f32 %v21840_v23, %v11630_v59  ;;  %v11631_v9 = vadd.f32 %v15554_v15, %v11147_v26  ;;  %v11151_v40 = vadd.f32 %v11150_v39, %v21019_v8  ;;  %v11099_v37 = vpop.f32.mrf.mxu0  ;;  %v11152_v11 = vpop.f32.mrf.mxu1  ;;  %v15560_v30 = vld [vmem:[%s15985_s29 + $0x1b8] sm:$0xff] }
 0x741   : > { %12179 = vst [vmem:[%s21724_s26 + $0x238] sm:$0xff] %v12043_v19  ;;  %v12059_v3 = vmax.f32 %v11923_v63, 0.0  ;;  %v11924_v32 = vadd.f32 %v21804_v47, %v11697_v52  ;;  %v11713_v21 = vadd.f32 %v15555_v45, %v11098_v16  ;;  %v11100_v7 = vadd.f32 %v11099_v37, %v20903_v0  ;;  %v15561_v19 = vld [vmem:[%s15985_s29 + $0x3d0] sm:$0xff] }
 0x742   : > { %12113 = vst [vmem:[%s21724_s26 + $0x28] sm:$0xff] %v11977_v44  ;;  %v11993_v54 = vmax.f32 %v11857_v12, 0.0  ;;  %v11858_v50 = vadd.f32 %v21851_v20, %v11631_v9  ;;  %v11647_v8 = vadd.f32 %v15556_v25, %v11151_v40  ;;  %v11153_v28 = vadd.f32 %v11152_v11, %v21035_v62  ;;  %v11101_v38 = vpop.f32.mrf.mxu0  ;;  %v11154_v17 = vpop.f32.mrf.mxu1  ;;  %v15562_v44 = vld [vmem:[%s15985_s29 + $0x1c0] sm:$0xff]  ;;  %v22785_v11 = vld [vmem:[#allocation44_spill] sm:$0xff] }
 0x743   : > { %12195 = vst [vmem:[%s21724_s26 + $0x2b8] sm:$0xff] %v12059_v3  ;;  %v12060_v48 = vmax.f32 %v11924_v32, 0.0  ;;  %v11940_v53 = vadd.f32 %v21795_v55, %v11713_v21  ;;  %v11714_v31 = vadd.f32 %v15557_v41, %v11100_v7  ;;  %v11102_v0 = vadd.f32 %v11101_v38, %v20923_v46 }
 0x744   : > { %12129 = vst [vmem:[%s21724_s26 + $0xa8] sm:$0xff] %v11993_v54  ;;  %v11994_v61 = vmax.f32 %v11858_v50, 0.0  ;;  %v11874_v58 = vadd.f32 %v21840_v23, %v11647_v8  ;;  %v11648_v62 = vadd.f32 %v15558_v42, %v11153_v28  ;;  %v11155_v49 = vadd.f32 %v11154_v17, %v21054_v35  ;;  %v11103_v33 = vpop.f32.mrf.mxu0  ;;  %v11156_v18 = vpop.f32.mrf.mxu1  ;;  %v15564_v50 = vld [vmem:[%s15985_s29 + $0x248] sm:$0xff] }
 0x745   : > { %12196 = vst [vmem:[%s21724_s26 + $0x2c0] sm:$0xff] %v12060_v48  ;;  %v12076_v13 = vmax.f32 %v11940_v53, 0.0  ;;  %v11941_v29 = vadd.f32 %v21804_v47, %v11714_v31  ;;  %v11730_v46 = vadd.f32 %v15559_v5, %v11102_v0  ;;  %v11104_v34 = vadd.f32 %v11103_v33, %v20942_v60  ;;  %v22784_v60 = vld [vmem:[#allocation34_spill] sm:$0xff]  ;;  %v15565_v53 = vld [vmem:[%s15985_s29 + $0x2c8] sm:$0xff]  ;;  %v22788_v33 = vld [vmem:[#allocation72_spill] sm:$0xff] }
 0x746   : > { %12130 = vst [vmem:[%s21724_s26 + $0xb0] sm:$0xff] %v11994_v61  ;;  %v12010_v56 = vmax.f32 %v11874_v58, 0.0  ;;  %v11875_v51 = vadd.f32 %v21851_v20, %v11648_v62  ;;  %v11664_v35 = vadd.f32 %v15560_v30, %v11155_v49  ;;  %v11157_v59 = vadd.f32 %v11156_v18, %v22783_v24  ;;  %v11160_v26 = vpop.f32.mrf.mxu1  ;;  %v22787_v31 = vld [vmem:[#allocation70_spill] sm:$0xff]  ;;  %v15566_v62 = vld [vmem:[%s15985_s29 + $0x2d0] sm:$0xff] }
 0x747   : > { %12212 = vst [vmem:[%s21724_s26 + $0x340] sm:$0xff] %v12076_v13  ;;  %v12077_v4 = vmax.f32 %v11941_v29, 0.0  ;;  %v11957_v39 = vadd.f32 %v21795_v55, %v11730_v46  ;;  %v11731_v63 = vadd.f32 %v15561_v19, %v11104_v34  ;;  %v11161_v14 = vadd.f32 %v11160_v26, %v22784_v60  ;;  %v15563_v55 = vld [vmem:[%s15985_s29 + $0x240] sm:$0xff]  ;;  %v15567_v46 = vld [vmem:[%s15985_s29 + $0x350] sm:$0xff] }
 0x748   : > { %12146 = vst [vmem:[%s21724_s26 + $0x130] sm:$0xff] %v12010_v56  ;;  %v12011_v52 = vmax.f32 %v11875_v51, 0.0  ;;  %v11891_v16 = vadd.f32 %v21840_v23, %v11664_v35  ;;  %v11665_v12 = vadd.f32 %v15562_v44, %v11157_v59  ;;  %v11162_v15 = vpop.f32.mrf.mxu1  ;;  %v22789_v56 = vld [vmem:[#allocation74_spill] sm:$0xff]  ;;  %v15568_v59 = vld [vmem:[%s15985_s29 + $0x358] sm:$0xff] }
 0x749   : > { %12213 = vst [vmem:[%s21724_s26 + $0x348] sm:$0xff] %v12077_v4  ;;  %v12093_v9 = vmax.f32 %v11957_v39, 0.0  ;;  %v11958_v40 = vadd.f32 %v21804_v47, %v11731_v63  ;;  %v11681_v37 = vadd.f32 %v15563_v55, %v11161_v14  ;;  %v11163_v3 = vadd.f32 %v11162_v15, %v22785_v11  ;;  %v22786_v47 = vld [vmem:[#allocation66_spill] sm:$0xff]  ;;  %v22790_v4 = vld [vmem:[#allocation76_spill] sm:$0xff]  ;;  %v22791_v44 = vld [vmem:[#allocation29_spill] sm:$0xff] }
 0x74a   : > { %12147 = vst [vmem:[%s21724_s26 + $0x138] sm:$0xff] %v12011_v52  ;;  %v12027_v32 = vmax.f32 %v11891_v16, 0.0  ;;  %v11892_v45 = vadd.f32 %v21851_v20, %v11665_v12  ;;  %v11164_v21 = vpop.f32.mrf.mxu1  ;;  %v11777_v63 = vsub.s32 6, %v22620_v1  ;;  %v15569_v52 = vld [vmem:[%s15985_s29 + $0x3d8] sm:$0xff]  ;;  %v11781_v15 = vsub.s32 7, %v22620_v1  ;;  %v15570_v55 = vld [vmem:[%s15985_s29 + $0x3e0] sm:$0xff] }
 0x74b   : > { %12229 = vst [vmem:[%s21724_s26 + $0x3c8] sm:$0xff] %v12093_v9  ;;  %v12094_v7 = vmax.f32 %v11958_v40, 0.0  ;;  %v11908_v54 = vadd.f32 %v21840_v23, %v11681_v37  ;;  %v11682_v25 = vadd.f32 %v15564_v50, %v11163_v3  ;;  %v11165_v8 = vadd.f32 %v11164_v21, %v22786_v47  ;;  %v22792_v3 = vld [vmem:[#allocation32_spill] sm:$0xff] }
 0x74c   : > { %12163 = vst [vmem:[%s21724_s26 + $0x1b8] sm:$0xff] %v12027_v32  ;;  %v12028_v28 = vmax.f32 %v11892_v45, 0.0  ;;  %v11166_v38 = vpop.f32.mrf.mxu1  ;;  %v21947_v45 = vrot.slane %v21690_v27, %v11777_v63  ;;  %v15571_v50 = vld [vmem:[%s15985_s29 + $0x30] sm:$0xff] }
 0x74d   : > { %12230 = vst [vmem:[%s21724_s26 + $0x3d0] sm:$0xff] %v12094_v7  ;;  %v12044_v17 = vmax.f32 %v11908_v54, 0.0  ;;  %v11909_v48 = vadd.f32 %v21851_v20, %v11682_v25  ;;  %v11698_v41 = vadd.f32 %v15565_v53, %v11165_v8  ;;  %v11167_v0 = vadd.f32 %v11166_v38, %v22787_v31  ;;  %v22793_v25 = vld [vmem:[#allocation24_spill] sm:$0xff]  ;;  %v22794_v53 = vld [vmem:[#allocation31_spill] sm:$0xff] }
 0x74e   : > { %12164 = vst [vmem:[%s21724_s26 + $0x1c0] sm:$0xff] %v12028_v28  ;;  %v11170_v61 = vpop.f32.mrf.mxu1  ;;  %v21956_v8 = vrot.slane %v21690_v27, %v11781_v15  ;;  %v15573_v27 = vld [vmem:[%s15985_s29 + $0xb8] sm:$0xff] }
 0x74f   : > { %12180 = vst [vmem:[%s21724_s26 + $0x240] sm:$0xff] %v12044_v17  ;;  %v12045_v58 = vmax.f32 %v11909_v48, 0.0  ;;  %v11925_v42 = vadd.f32 %v21840_v23, %v11698_v41  ;;  %v11699_v49 = vadd.f32 %v15566_v62, %v11167_v0  ;;  %v11171_v18 = vadd.f32 %v11170_v61, %v22788_v33  ;;  %v15572_v48 = vld [vmem:[%s15985_s29 + $0x38] sm:$0xff] }
 0x750   : > { %v11172_v13 = vpop.f32.mrf.mxu1 }
 0x751   : > { %12181 = vst [vmem:[%s21724_s26 + $0x248] sm:$0xff] %v12045_v58  ;;  %v12061_v29 = vmax.f32 %v11925_v42, 0.0  ;;  %v11926_v5 = vadd.f32 %v21851_v20, %v11699_v49  ;;  %v11715_v34 = vadd.f32 %v15567_v46, %v11171_v18  ;;  %v11173_v51 = vadd.f32 %v11172_v13, %v22789_v56  ;;  %v22795_v42 = vld [vmem:[#allocation26_spill] sm:$0xff] }
 0x752   : > { %v11174_v30 = vpop.f32.mrf.mxu1  ;;  %v15574_v13 = vld [vmem:[%s15985_s29 + $0xc0] sm:$0xff] }
 0x753   : > { %12197 = vst [vmem:[%s21724_s26 + $0x2c8] sm:$0xff] %v12061_v29  ;;  %v12062_v35 = vmax.f32 %v11926_v5, 0.0  ;;  %v11942_v24 = vadd.f32 %v21840_v23, %v11715_v34  ;;  %v11716_v26 = vadd.f32 %v15568_v59, %v11173_v51  ;;  %v11175_v39 = vadd.f32 %v11174_v30, %v22790_v4  ;;  %v22796_v5 = vld [vmem:[#allocation42_spill] sm:$0xff] }
 0x754   : > { %v11176_v19 = vpop.f32.mrf.mxu1  ;;  %v15575_v30 = vld [vmem:[%s15985_s29 + $0x140] sm:$0xff] }
 0x755   : > { %12198 = vst [vmem:[%s21724_s26 + $0x2d0] sm:$0xff] %v12062_v35  ;;  %v12078_v60 = vmax.f32 %v11942_v24, 0.0  ;;  %v11943_v14 = vadd.f32 %v21851_v20, %v11716_v26  ;;  %v11732_v16 = vadd.f32 %v15569_v52, %v11175_v39  ;;  %v11177_v12 = vadd.f32 %v11176_v19, %v22791_v44  ;;  %v22797_v24 = vld [vmem:[#allocation37_spill] sm:$0xff]  ;;  %v15576_v19 = vld [vmem:[%s15985_s29 + $0x148] sm:$0xff] }
 0x757   : > { %12214 = vst [vmem:[%s21724_s26 + $0x350] sm:$0xff] %v12078_v60  ;;  %v12079_v9 = vmax.f32 %v11943_v14, 0.0  ;;  %v11959_v40 = vadd.f32 %v21840_v23, %v11732_v16  ;;  %v11733_v37 = vadd.f32 %v15570_v55, %v11177_v12  ;;  %v11213_v11 = vpop.f32.mrf.mxu0  ;;  %v22798_v14 = vld [vmem:[#allocation28_spill] sm:$0xff]  ;;  %v22799_v55 = vld [vmem:[#allocation33_spill] sm:$0xff] }
 0x758   : > { %v11214_v32 = vadd.f32 %v11213_v11, %v22792_v3  ;;  %v21985_v11 = vld [vmem:[%s22421_s13 + $0x8] sm:$0xff] }
 0x759   : > { %12215 = vst [vmem:[%s21724_s26 + $0x358] sm:$0xff] %v12079_v9  ;;  %v12095_v21 = vmax.f32 %v11959_v40, 0.0  ;;  %v11960_v7 = vadd.f32 %v21851_v20, %v11733_v37  ;;  %v11215_v54 = vpop.f32.mrf.mxu0  ;;  %v15577_v9 = vld [vmem:[%s15985_s29 + $0x1c8] sm:$0xff] }
 0x75a   : > { %v11615_v23 = vadd.f32 %v15571_v50, %v11214_v32  ;;  %v11216_v47 = vadd.f32 %v11215_v54, %v22793_v25  ;;  %v15578_v54 = vld [vmem:[%s15985_s29 + $0x1d0] sm:$0xff] }
 0x75b   : > { %12231 = vst [vmem:[%s21724_s26 + $0x3d8] sm:$0xff] %v12095_v21  ;;  %v12096_v28 = vmax.f32 %v11960_v7, 0.0  ;;  %v11217_v38 = vpop.f32.mrf.mxu0 }
 0x75c   : > { %v11842_v17 = vadd.f32 %v21947_v45, %v11615_v23  ;;  %v11616_v20 = vadd.f32 %v15572_v48, %v11216_v47  ;;  %v11218_v41 = vadd.f32 %v11217_v38, %v22794_v53  ;;  %v22800_v23 = vld [vmem:[#allocation39_spill] sm:$0xff] }
 0x75d   : > { %12232 = vst [vmem:[%s21724_s26 + $0x3e0] sm:$0xff] %v12096_v28  ;;  %v11219_v31 = vpop.f32.mrf.mxu0  ;;  %v22801_v47 = vld [vmem:[#allocation47_spill] sm:$0xff] }
 0x75e   : > { %v11978_v0 = vmax.f32 %v11842_v17, 0.0  ;;  %v11843_v61 = vadd.f32 %v21956_v8, %v11616_v20  ;;  %v11632_v58 = vadd.f32 %v15573_v27, %v11218_v41  ;;  %v11220_v62 = vadd.f32 %v11219_v31, %v22795_v42  ;;  %v22802_v38 = vld [vmem:[#allocation19_spill] sm:$0xff]  ;;  %v15579_v31 = vld [vmem:[%s15985_s29 + $0x250] sm:$0xff] }
 0x75f   : > { %v11223_v49 = vpop.f32.mrf.mxu0  ;;  %v21994_v17 = vrot.slane %v21985_v11, %v22802_v38 }
 0x760   : > { %12114 = vst [vmem:[%s21724_s26 + $0x30] sm:$0xff] %v11978_v0  ;;  %v11979_v33 = vmax.f32 %v11843_v61, 0.0  ;;  %v11859_v18 = vadd.f32 %v21947_v45, %v11632_v58  ;;  %v11633_v29 = vadd.f32 %v15574_v13, %v11220_v62  ;;  %v11224_v46 = vadd.f32 %v11223_v49, %v22796_v5  ;;  %v22803_v61 = vld [vmem:[#allocation38_spill] sm:$0xff]  ;;  %v22804_v62 = vld [vmem:[#allocation55_spill] sm:$0xff] }
 0x761   : > { %v11225_v34 = vpop.f32.mrf.mxu0  ;;  %v15580_v58 = vld [vmem:[%s15985_s29 + $0x40] sm:$0xff] }
 0x762   : > { %12115 = vst [vmem:[%s21724_s26 + $0x38] sm:$0xff] %v11979_v33  ;;  %v11995_v56 = vmax.f32 %v11859_v18, 0.0  ;;  %v11860_v51 = vadd.f32 %v21956_v8, %v11633_v29  ;;  %v11649_v35 = vadd.f32 %v15575_v30, %v11224_v46  ;;  %v11226_v59 = vadd.f32 %v11225_v34, %v22797_v24  ;;  %v22805_v33 = vld [vmem:[#allocation78_spill] sm:$0xff]  ;;  %v15581_v34 = vld [vmem:[%s15985_s29 + $0x258] sm:$0xff]  ;;  %v15582_v24 = vld [vmem:[%s15985_s29 + $0x48] sm:$0xff] }
 0x763   : > { %v11227_v26 = vpop.f32.mrf.mxu0  ;;  %v22004_v18 = vrot.slane %v21985_v11, %v22805_v33 }
 0x764   : > { %12131 = vst [vmem:[%s21724_s26 + $0xb8] sm:$0xff] %v11995_v56  ;;  %v11996_v4 = vmax.f32 %v11860_v51, 0.0  ;;  %v11876_v39 = vadd.f32 %v21947_v45, %v11649_v35  ;;  %v11650_v60 = vadd.f32 %v15576_v19, %v11226_v59  ;;  %v11228_v52 = vadd.f32 %v11227_v26, %v22798_v14  ;;  %v22806_v51 = vld [vmem:[#allocation69_spill] sm:$0xff]  ;;  %v22807_v26 = vld [vmem:[#allocation63_spill] sm:$0xff] }
 0x765   : > { %v11229_v16 = vpop.f32.mrf.mxu0 }
 0x766   : > { %12132 = vst [vmem:[%s21724_s26 + $0xc0] sm:$0xff] %v11996_v4  ;;  %v12012_v44 = vmax.f32 %v11876_v39, 0.0  ;;  %v11877_v12 = vadd.f32 %v21956_v8, %v11650_v60  ;;  %v11666_v40 = vadd.f32 %v15577_v9, %v11228_v52  ;;  %v11230_v37 = vadd.f32 %v11229_v16, %v22799_v55  ;;  %v15583_v52 = vld [vmem:[%s15985_s29 + $0x2d8] sm:$0xff]  ;;  %v15584_v55 = vld [vmem:[%s15985_s29 + $0xc8] sm:$0xff] }
 0x767   : > { %v11233_v3 = vpop.f32.mrf.mxu0  ;;  %v11286_v32 = vpop.f32.mrf.mxu1 }
 0x768   : > { %12148 = vst [vmem:[%s21724_s26 + $0x140] sm:$0xff] %v12012_v44  ;;  %v12013_v21 = vmax.f32 %v11877_v12, 0.0  ;;  %v11893_v7 = vadd.f32 %v21947_v45, %v11666_v40  ;;  %v11667_v50 = vadd.f32 %v15578_v54, %v11230_v37  ;;  %v11234_v25 = vadd.f32 %v11233_v3, %v22800_v23  ;;  %v22808_v44 = vld [vmem:[#allocation71_spill] sm:$0xff]  ;;  %v15585_v23 = vld [vmem:[%s15985_s29 + $0x2e0] sm:$0xff] }
 0x769   : > { %v11287_v28 = vadd.f32 %v11286_v32, %v22801_v47  ;;  %v11235_v48 = vpop.f32.mrf.mxu0  ;;  %v11288_v20 = vpop.f32.mrf.mxu1  ;;  %v22809_v3 = vld [vmem:[#allocation11_spill] sm:$0xff]  ;;  %v22810_v47 = vld [vmem:[#allocation73_spill] sm:$0xff] }
 0x76a   : > { %12149 = vst [vmem:[%s21724_s26 + $0x148] sm:$0xff] %v12013_v21  ;;  %v12029_v53 = vmax.f32 %v11893_v7, 0.0  ;;  %v11894_v41 = vadd.f32 %v21956_v8, %v11667_v50  ;;  %v11683_v0 = vadd.f32 %v15579_v31, %v11234_v25  ;;  %v11236_v27 = vadd.f32 %v11235_v48, %v22803_v61 }
 0x76b   : > { %v11617_v42 = vadd.f32 %v15580_v58, %v11287_v28  ;;  %v11289_v49 = vadd.f32 %v11288_v20, %v22804_v62  ;;  %v11237_v13 = vpop.f32.mrf.mxu0  ;;  %v11290_v29 = vpop.f32.mrf.mxu1  ;;  %v15586_v20 = vld [vmem:[%s15985_s29 + $0xd0] sm:$0xff] }
 0x76c   : > { %12165 = vst [vmem:[%s21724_s26 + $0x1c8] sm:$0xff] %v12029_v53  ;;  %v12030_v5 = vmax.f32 %v11894_v41, 0.0  ;;  %v11910_v46 = vadd.f32 %v21947_v45, %v11683_v0  ;;  %v11684_v56 = vadd.f32 %v15581_v34, %v11236_v27  ;;  %v11238_v30 = vadd.f32 %v11237_v13, %v22806_v51  ;;  %v22811_v41 = vld [vmem:[#allocation36_spill] sm:$0xff]  ;;  %v22813_v34 = vld [vmem:[#allocation49_spill] sm:$0xff] }
 0x76d   : > { %v11844_v35 = vadd.f32 %v21994_v17, %v11617_v42  ;;  %v11618_v59 = vadd.f32 %v15582_v24, %v11289_v49  ;;  %v11291_v4 = vadd.f32 %v11290_v29, %v22807_v26  ;;  %v11239_v39 = vpop.f32.mrf.mxu0  ;;  %v11292_v19 = vpop.f32.mrf.mxu1  ;;  %v15587_v42 = vld [vmem:[%s15985_s29 + $0x360] sm:$0xff]  ;;  %v22812_v49 = vld [vmem:[#allocation75_spill] sm:$0xff] }
 0x76e   : > { %12166 = vst [vmem:[%s21724_s26 + $0x1d0] sm:$0xff] %v12030_v5  ;;  %v12046_v60 = vmax.f32 %v11910_v46, 0.0  ;;  %v11911_v14 = vadd.f32 %v21956_v8, %v11684_v56  ;;  %v11700_v16 = vadd.f32 %v15583_v52, %v11238_v30  ;;  %v11240_v12 = vadd.f32 %v11239_v39, %v22808_v44  ;;  %v15588_v5 = vld [vmem:[%s15985_s29 + $0x150] sm:$0xff] }
 0x76f   : > { %v11980_v9 = vmax.f32 %v11844_v35, 0.0  ;;  %v11845_v40 = vadd.f32 %v22004_v18, %v11618_v59  ;;  %v11634_v37 = vadd.f32 %v15584_v55, %v11291_v4  ;;  %v11293_v32 = vadd.f32 %v11292_v19, %v22809_v3  ;;  %v11243_v21 = vpop.f32.mrf.mxu0  ;;  %v11296_v7 = vpop.f32.mrf.mxu1  ;;  %v15589_v59 = vld [vmem:[%s15985_s29 + $0x368] sm:$0xff]  ;;  %v22814_v4 = vld [vmem:[#allocation77_spill] sm:$0xff] }
 0x770   : > { %12182 = vst [vmem:[%s21724_s26 + $0x250] sm:$0xff] %v12046_v60  ;;  %v12047_v54 = vmax.f32 %v11911_v14, 0.0  ;;  %v11927_v50 = vadd.f32 %v21947_v45, %v11700_v16  ;;  %v11701_v25 = vadd.f32 %v15585_v23, %v11240_v12  ;;  %v11244_v28 = vadd.f32 %v11243_v21, %v22810_v47  ;;  %v15590_v14 = vld [vmem:[%s15985_s29 + $0x158] sm:$0xff]  ;;  %v22815_v16 = vld [vmem:[#allocation40_spill] sm:$0xff] }
 0x771   : > { %12116 = vst [vmem:[%s21724_s26 + $0x40] sm:$0xff] %v11980_v9  ;;  %v11981_v38 = vmax.f32 %v11845_v40, 0.0  ;;  %v11861_v48 = vadd.f32 %v21994_v17, %v11634_v37  ;;  %v11635_v53 = vadd.f32 %v15586_v20, %v11293_v32  ;;  %v11297_v31 = vadd.f32 %v11296_v7, %v22811_v41  ;;  %v11245_v0 = vpop.f32.mrf.mxu0  ;;  %v11298_v61 = vpop.f32.mrf.mxu1  ;;  %v15591_v37 = vld [vmem:[%s15985_s29 + $0x3e8] sm:$0xff]  ;;  %v22816_v32 = vld [vmem:[#allocation30_spill] sm:$0xff]  ;;  %v15593_v20 = vld [vmem:[%s15985_s29 + $0x3f0] sm:$0xff] }
 0x772   : > { %12183 = vst [vmem:[%s21724_s26 + $0x258] sm:$0xff] %v12047_v54  ;;  %v12063_v27 = vmax.f32 %v11927_v50, 0.0  ;;  %v11928_v58 = vadd.f32 %v21956_v8, %v11701_v25  ;;  %v11717_v62 = vadd.f32 %v15587_v42, %v11244_v28  ;;  %v11246_v33 = vadd.f32 %v11245_v0, %v22812_v49  ;;  %v15592_v50 = vld [vmem:[%s15985_s29 + $0x1d8] sm:$0xff]  ;;  %v22818_v41 = vld [vmem:[#allocation58_spill] sm:$0xff] }
 0x773   : > { %12117 = vst [vmem:[%s21724_s26 + $0x48] sm:$0xff] %v11981_v38  ;;  %v11997_v13 = vmax.f32 %v11861_v48, 0.0  ;;  %v11862_v29 = vadd.f32 %v22004_v18, %v11635_v53  ;;  %v11651_v46 = vadd.f32 %v15588_v5, %v11297_v31  ;;  %v11299_v56 = vadd.f32 %v11298_v61, %v22813_v34  ;;  %v11247_v51 = vpop.f32.mrf.mxu0  ;;  %v11300_v30 = vpop.f32.mrf.mxu1  ;;  %v22817_v25 = vld [vmem:[#allocation57_spill] sm:$0xff] }
 0x774   : > { %12199 = vst [vmem:[%s21724_s26 + $0x2d8] sm:$0xff] %v12063_v27  ;;  %v12064_v35 = vmax.f32 %v11928_v58, 0.0  ;;  %v11944_v24 = vadd.f32 %v21947_v45, %v11717_v62  ;;  %v11718_v26 = vadd.f32 %v15589_v59, %v11246_v33  ;;  %v11248_v39 = vadd.f32 %v11247_v51, %v22814_v4  ;;  %v15594_v27 = vld [vmem:[%s15985_s29 + $0x1e0] sm:$0xff] }
 0x775   : > { %12133 = vst [vmem:[%s21724_s26 + $0xc8] sm:$0xff] %v11997_v13  ;;  %v11998_v19 = vmax.f32 %v11862_v29, 0.0  ;;  %v11878_v60 = vadd.f32 %v21994_v17, %v11651_v46  ;;  %v11652_v52 = vadd.f32 %v15590_v14, %v11299_v56  ;;  %v11301_v44 = vadd.f32 %v11300_v30, %v22815_v16  ;;  %v11249_v12 = vpop.f32.mrf.mxu0  ;;  %v11302_v9 = vpop.f32.mrf.mxu1  ;;  %v22819_v13 = vld [vmem:[#allocation13_spill] sm:$0xff]  ;;  %v15596_v30 = vld [vmem:[%s15985_s29 + $0x268] sm:$0xff] }
 0x776   : > { %12200 = vst [vmem:[%s21724_s26 + $0x2e0] sm:$0xff] %v12064_v35  ;;  %v12080_v40 = vmax.f32 %v11944_v24, 0.0  ;;  %v11945_v55 = vadd.f32 %v21956_v8, %v11718_v26  ;;  %v11734_v3 = vadd.f32 %v15591_v37, %v11248_v39  ;;  %v11250_v21 = vadd.f32 %v11249_v12, %v22816_v32  ;;  %v22821_v14 = vld [vmem:[#allocation53_spill] sm:$0xff] }
 0x777   : > { %12134 = vst [vmem:[%s21724_s26 + $0xd0] sm:$0xff] %v11998_v19  ;;  %v12014_v7 = vmax.f32 %v11878_v60, 0.0  ;;  %v11879_v54 = vadd.f32 %v22004_v18, %v11652_v52  ;;  %v11668_v23 = vadd.f32 %v15592_v50, %v11301_v44  ;;  %v11303_v47 = vadd.f32 %v11302_v9, %v22817_v25  ;;  %v11306_v28 = vpop.f32.mrf.mxu1  ;;  %v15597_v19 = vld [vmem:[%s15985_s29 + $0x2e8] sm:$0xff]  ;;  %v15598_v9 = vld [vmem:[%s15985_s29 + $0x2f0] sm:$0xff]  ;;  %v22823_v50 = vld [vmem:[#allocation54_spill] sm:$0xff] }
 0x778   : > { %12216 = vst [vmem:[%s21724_s26 + $0x360] sm:$0xff] %v12080_v40  ;;  %v12081_v38 = vmax.f32 %v11945_v55, 0.0  ;;  %v11961_v48 = vadd.f32 %v21947_v45, %v11734_v3  ;;  %v11735_v53 = vadd.f32 %v15593_v20, %v11250_v21  ;;  %v11307_v31 = vadd.f32 %v11306_v28, %v22818_v41  ;;  %v15595_v45 = vld [vmem:[%s15985_s29 + $0x260] sm:$0xff]  ;;  %v22822_v55 = vld [vmem:[#allocation60_spill] sm:$0xff]  ;;  %v22824_v20 = vld [vmem:[#allocation61_spill] sm:$0xff] }
 0x779   : > { %12150 = vst [vmem:[%s21724_s26 + $0x150] sm:$0xff] %v12014_v7  ;;  %v12015_v0 = vmax.f32 %v11879_v54, 0.0  ;;  %v11895_v61 = vadd.f32 %v21994_v17, %v11668_v23  ;;  %v11669_v58 = vadd.f32 %v15594_v27, %v11303_v47  ;;  %v11308_v42 = vpop.f32.mrf.mxu1  ;;  %v15599_v7 = vld [vmem:[%s15985_s29 + $0x370] sm:$0xff] }
 0x77a   : > { %12217 = vst [vmem:[%s21724_s26 + $0x368] sm:$0xff] %v12081_v38  ;;  %v12097_v62 = vmax.f32 %v11961_v48, 0.0  ;;  %v11962_v49 = vadd.f32 %v21956_v8, %v11735_v53  ;;  %v11685_v33 = vadd.f32 %v15595_v45, %v11307_v31  ;;  %v11309_v29 = vadd.f32 %v11308_v42, %v22819_v13  ;;  %v22820_v8 = vld [vmem:[#allocation46_spill] sm:$0xff]  ;;  %v15600_v38 = vld [vmem:[%s15985_s29 + $0x378] sm:$0xff] }
 0x77b   : > { %12151 = vst [vmem:[%s21724_s26 + $0x158] sm:$0xff] %v12015_v0  ;;  %v12031_v5 = vmax.f32 %v11895_v61, 0.0  ;;  %v11896_v46 = vadd.f32 %v22004_v18, %v11669_v58  ;;  %v11310_v34 = vpop.f32.mrf.mxu1  ;;  %v15601_v61 = vld [vmem:[%s15985_s29 + $0x3f8] sm:$0xff]  ;;  %v22825_v58 = vld [vmem:[#allocation12_spill] sm:$0xff]  ;;  %v15602_v45 = vld [vmem:[%s15985_s29 + $0x400] sm:$0xff] }
 0x77c   : > { %12233 = vst [vmem:[%s21724_s26 + $0x3e8] sm:$0xff] %v12097_v62  ;;  %v12098_v56 = vmax.f32 %v11962_v49, 0.0  ;;  %v11912_v51 = vadd.f32 %v21994_v17, %v11685_v33  ;;  %v11686_v35 = vadd.f32 %v15596_v30, %v11309_v29  ;;  %v11311_v24 = vadd.f32 %v11310_v34, %v22820_v8  ;;  %v22826_v29 = vld [vmem:[#allocation48_spill] sm:$0xff] }
 0x77d   : > { %12167 = vst [vmem:[%s21724_s26 + $0x1d8] sm:$0xff] %v12031_v5  ;;  %v12032_v59 = vmax.f32 %v11896_v46, 0.0  ;;  %v11312_v26 = vpop.f32.mrf.mxu1  ;;  %v22098_v46 = vrot.slane %v21985_v11, %v11761_v22  ;;  %v15603_v30 = vld [vmem:[%s15985_s29 + $0x50] sm:$0xff] }
 0x77e   : > { %12234 = vst [vmem:[%s21724_s26 + $0x3f0] sm:$0xff] %v12098_v56  ;;  %v12048_v4 = vmax.f32 %v11912_v51, 0.0  ;;  %v11913_v39 = vadd.f32 %v22004_v18, %v11686_v35  ;;  %v11702_v60 = vadd.f32 %v15597_v19, %v11311_v24  ;;  %v11313_v52 = vadd.f32 %v11312_v26, %v22821_v14  ;;  %v22827_v35 = vld [vmem:[#allocation56_spill] sm:$0xff] }
 0x77f   : > { %12168 = vst [vmem:[%s21724_s26 + $0x1e0] sm:$0xff] %v12032_v59  ;;  %v11316_v16 = vpop.f32.mrf.mxu1  ;;  %v22107_v24 = vrot.slane %v21985_v11, %v11765_v10  ;;  %v15605_v10 = vld [vmem:[%s15985_s29 + $0xd8] sm:$0xff] }
 0x780   : > { %12184 = vst [vmem:[%s21724_s26 + $0x260] sm:$0xff] %v12048_v4  ;;  %v12049_v44 = vmax.f32 %v11913_v39, 0.0  ;;  %v11929_v12 = vadd.f32 %v21994_v17, %v11702_v60  ;;  %v11703_v40 = vadd.f32 %v15598_v9, %v11313_v52  ;;  %v11317_v37 = vadd.f32 %v11316_v16, %v22822_v55  ;;  %v15604_v4 = vld [vmem:[%s15985_s29 + $0x58] sm:$0xff]  ;;  %v22828_v39 = vld [vmem:[#allocation64_spill] sm:$0xff] }
 0x781   : > { %v11318_v3 = vpop.f32.mrf.mxu1 }
 0x782   : > { %12185 = vst [vmem:[%s21724_s26 + $0x268] sm:$0xff] %v12049_v44  ;;  %v12065_v32 = vmax.f32 %v11929_v12, 0.0  ;;  %v11930_v21 = vadd.f32 %v22004_v18, %v11703_v40  ;;  %v11719_v54 = vadd.f32 %v15599_v7, %v11317_v37  ;;  %v11319_v23 = vadd.f32 %v11318_v3, %v22823_v50  ;;  %v22829_v44 = vld [vmem:[#allocation35_spill] sm:$0xff]  ;;  %v15606_v37 = vld [vmem:[%s15985_s29 + $0xe0] sm:$0xff] }
 0x783   : > { %v11320_v25 = vpop.f32.mrf.mxu1 }
 0x784   : > { %12201 = vst [vmem:[%s21724_s26 + $0x2e8] sm:$0xff] %v12065_v32  ;;  %v12066_v47 = vmax.f32 %v11930_v21, 0.0  ;;  %v11946_v28 = vadd.f32 %v21994_v17, %v11719_v54  ;;  %v11720_v48 = vadd.f32 %v15600_v38, %v11319_v23  ;;  %v11321_v53 = vadd.f32 %v11320_v25, %v22824_v20  ;;  %v22830_v32 = vld [vmem:[#allocation10_spill] sm:$0xff] }
 0x785   : > { %v11322_v41 = vpop.f32.mrf.mxu1  ;;  %v15607_v23 = vld [vmem:[%s15985_s29 + $0x160] sm:$0xff] }
 0x786   : > { %12202 = vst [vmem:[%s21724_s26 + $0x2f0] sm:$0xff] %v12066_v47  ;;  %v12082_v31 = vmax.f32 %v11946_v28, 0.0  ;;  %v11947_v0 = vadd.f32 %v22004_v18, %v11720_v48  ;;  %v11736_v27 = vadd.f32 %v15601_v61, %v11321_v53  ;;  %v11323_v42 = vadd.f32 %v11322_v41, %v22825_v58  ;;  %v22831_v47 = vld [vmem:[#allocation50_spill] sm:$0xff]  ;;  %v15608_v53 = vld [vmem:[%s15985_s29 + $0x168] sm:$0xff] }
 0x788   : > { %12218 = vst [vmem:[%s21724_s26 + $0x370] sm:$0xff] %v12082_v31  ;;  %v12083_v62 = vmax.f32 %v11947_v0, 0.0  ;;  %v11963_v49 = vadd.f32 %v21994_v17, %v11736_v27  ;;  %v11737_v33 = vadd.f32 %v15602_v45, %v11323_v42  ;;  %v11359_v13 = vpop.f32.mrf.mxu0  ;;  %v22832_v31 = vld [vmem:[#allocation41_spill] sm:$0xff]  ;;  %v15609_v42 = vld [vmem:[%s15985_s29 + $0x1e8] sm:$0xff] }
 0x789   : > { %v11360_v5 = vadd.f32 %v11359_v13, %v22826_v29 }
 0x78a   : > { %12219 = vst [vmem:[%s21724_s26 + $0x378] sm:$0xff] %v12083_v62  ;;  %v12099_v34 = vmax.f32 %v11963_v49, 0.0  ;;  %v11964_v56 = vadd.f32 %v22004_v18, %v11737_v33  ;;  %v11361_v51 = vpop.f32.mrf.mxu0  ;;  %v22833_v49 = vld [vmem:[#allocation51_spill] sm:$0xff] }
 0x78b   : > { %v11619_v17 = vadd.f32 %v15603_v30, %v11360_v5  ;;  %v11362_v8 = vadd.f32 %v11361_v51, %v22827_v35  ;;  %v22834_v51 = vld [vmem:[#allocation52_spill] sm:$0xff] }
 0x78c   : > { %12235 = vst [vmem:[%s21724_s26 + $0x3f8] sm:$0xff] %v12099_v34  ;;  %v12100_v22 = vmax.f32 %v11964_v56, 0.0  ;;  %v11363_v59 = vpop.f32.mrf.mxu0  ;;  %v15610_v34 = vld [vmem:[%s15985_s29 + $0x1f0] sm:$0xff] }
 0x78d   : > { %v11846_v26 = vadd.f32 %v22098_v46, %v11619_v17  ;;  %v11620_v18 = vadd.f32 %v15604_v4, %v11362_v8  ;;  %v11364_v19 = vadd.f32 %v11363_v59, %v22828_v39  ;;  %v22835_v17 = vld [vmem:[#allocation68_spill] sm:$0xff]  ;;  %v22141_v8 = vrot.slane %v21985_v11, %v11769_v43 }
 0x78e   : > { %12236 = vst [vmem:[%s21724_s26 + $0x400] sm:$0xff] %v12100_v22  ;;  %v11365_v60 = vpop.f32.mrf.mxu0  ;;  %v22152_v43 = vrot.slane %v21985_v11, %v11773_v36 }
 0x78f   : > { %v11982_v14 = vmax.f32 %v11846_v26, 0.0  ;;  %v11847_v52 = vadd.f32 %v22107_v24, %v11620_v18  ;;  %v11636_v16 = vadd.f32 %v15605_v10, %v11364_v19  ;;  %v11366_v12 = vadd.f32 %v11365_v60, %v22829_v44  ;;  %v15611_v18 = vld [vmem:[%s15985_s29 + $0x270] sm:$0xff]  ;;  %v22836_v19 = vld [vmem:[#allocation45_spill] sm:$0xff]  ;;  %v22837_v10 = vld [vmem:[#allocation23_spill] sm:$0xff] }
 0x790   : > { %v11369_v9 = vpop.f32.mrf.mxu0 }
 0x791   : > { %12118 = vst [vmem:[%s21724_s26 + $0x50] sm:$0xff] %v11982_v14  ;;  %v11983_v40 = vmax.f32 %v11847_v52, 0.0  ;;  %v11863_v55 = vadd.f32 %v22098_v46, %v11636_v16  ;;  %v11637_v3 = vadd.f32 %v15606_v37, %v11366_v12  ;;  %v11370_v21 = vadd.f32 %v11369_v9, %v22830_v32  ;;  %v15612_v14 = vld [vmem:[%s15985_s29 + $0x60] sm:$0xff] }
 0x792   : > { %v11371_v7 = vpop.f32.mrf.mxu0 }
 0x793   : > { %12119 = vst [vmem:[%s21724_s26 + $0x58] sm:$0xff] %v11983_v40  ;;  %v11999_v54 = vmax.f32 %v11863_v55, 0.0  ;;  %v11864_v50 = vadd.f32 %v22107_v24, %v11637_v3  ;;  %v11653_v25 = vadd.f32 %v15607_v23, %v11370_v21  ;;  %v11372_v28 = vadd.f32 %v11371_v7, %v22831_v47  ;;  %v15613_v55 = vld [vmem:[%s15985_s29 + $0x278] sm:$0xff]  ;;  %v22838_v3 = vld [vmem:[#allocation59_spill] sm:$0xff] }
 0x794   : > { %v11373_v38 = vpop.f32.mrf.mxu0  ;;  %v15614_v7 = vld [vmem:[%s15985_s29 + $0x68] sm:$0xff] }
 0x795   : > { %12135 = vst [vmem:[%s21724_s26 + $0xd8] sm:$0xff] %v11999_v54  ;;  %v12000_v48 = vmax.f32 %v11864_v50, 0.0  ;;  %v11880_v20 = vadd.f32 %v22098_v46, %v11653_v25  ;;  %v11654_v41 = vadd.f32 %v15608_v53, %v11372_v28  ;;  %v11374_v0 = vadd.f32 %v11373_v38, %v22832_v31  ;;  %v22839_v50 = vld [vmem:[#allocation27_spill] sm:$0xff]  ;;  %v15615_v38 = vld [vmem:[%s15985_s29 + $0x2f8] sm:$0xff] }
 0x796   : > { %v11375_v61 = vpop.f32.mrf.mxu0 }
 0x797   : > { %12136 = vst [vmem:[%s21724_s26 + $0xe0] sm:$0xff] %v12000_v48  ;;  %v12016_v27 = vmax.f32 %v11880_v20, 0.0  ;;  %v11881_v58 = vadd.f32 %v22107_v24, %v11654_v41  ;;  %v11670_v62 = vadd.f32 %v15609_v42, %v11374_v0  ;;  %v11376_v45 = vadd.f32 %v11375_v61, %v22833_v49  ;;  %v22840_v20 = vld [vmem:[#allocation65_spill] sm:$0xff]  ;;  %v15616_v0 = vld [vmem:[%s15985_s29 + $0xe8] sm:$0xff] }
 0x798   : > { %v11379_v33 = vpop.f32.mrf.mxu0  ;;  %v11432_v13 = vpop.f32.mrf.mxu1 }
 0x799   : > { %12152 = vst [vmem:[%s21724_s26 + $0x160] sm:$0xff] %v12016_v27  ;;  %v12017_v29 = vmax.f32 %v11881_v58, 0.0  ;;  %v11897_v5 = vadd.f32 %v22098_v46, %v11670_v62  ;;  %v11671_v56 = vadd.f32 %v15610_v34, %v11376_v45  ;;  %v11380_v30 = vadd.f32 %v11379_v33, %v22834_v51  ;;  %v22841_v27 = vld [vmem:[#allocation20_spill] sm:$0xff]  ;;  %v15617_v33 = vld [vmem:[%s15985_s29 + $0x300] sm:$0xff] }
 0x79a   : > { %v11433_v35 = vadd.f32 %v11432_v13, %v22835_v17  ;;  %v11381_v22 = vpop.f32.mrf.mxu0  ;;  %v11434_v59 = vpop.f32.mrf.mxu1  ;;  %v15618_v51 = vld [vmem:[%s15985_s29 + $0xf0] sm:$0xff]  ;;  %v22843_v17 = vld [vmem:[#allocation22_spill] sm:$0xff] }
 0x79b   : > { %12153 = vst [vmem:[%s21724_s26 + $0x168] sm:$0xff] %v12017_v29  ;;  %v12033_v26 = vmax.f32 %v11897_v5, 0.0  ;;  %v11898_v4 = vadd.f32 %v22107_v24, %v11671_v56  ;;  %v11687_v39 = vadd.f32 %v15611_v18, %v11380_v30  ;;  %v11382_v60 = vadd.f32 %v11381_v22, %v22836_v19  ;;  %v22842_v29 = vld [vmem:[#allocation67_spill] sm:$0xff]  ;;  %v15619_v18 = vld [vmem:[%s15985_s29 + $0x380] sm:$0xff] }
 0x79c   : > { %v11621_v52 = vadd.f32 %v15612_v14, %v11433_v35  ;;  %v11435_v16 = vadd.f32 %v11434_v59, %v22837_v10  ;;  %v11383_v44 = vpop.f32.mrf.mxu0  ;;  %v11436_v12 = vpop.f32.mrf.mxu1  ;;  %v22844_v19 = vld [vmem:[#allocation15_spill] sm:$0xff]  ;;  %v15620_v10 = vld [vmem:[%s15985_s29 + $0x170] sm:$0xff] }
 0x79d   : > { %12169 = vst [vmem:[%s21724_s26 + $0x1e8] sm:$0xff] %v12033_v26  ;;  %v12034_v9 = vmax.f32 %v11898_v4, 0.0  ;;  %v11914_v40 = vadd.f32 %v22098_v46, %v11687_v39  ;;  %v11688_v37 = vadd.f32 %v15613_v55, %v11382_v60  ;;  %v11384_v32 = vadd.f32 %v11383_v44, %v22838_v3  ;;  %v22845_v44 = vld [vmem:[#allocation79_spill] sm:$0xff] }
 0x79e   : > { %v11848_v21 = vadd.f32 %v22141_v8, %v11621_v52  ;;  %v11622_v54 = vadd.f32 %v15614_v7, %v11435_v16  ;;  %v11437_v23 = vadd.f32 %v11436_v12, %v22839_v50  ;;  %v11385_v36 = vpop.f32.mrf.mxu0  ;;  %v11438_v25 = vpop.f32.mrf.mxu1  ;;  %v15621_v3 = vld [vmem:[%s15985_s29 + $0x388] sm:$0xff] }
 0x79f   : > { %12170 = vst [vmem:[%s21724_s26 + $0x1f0] sm:$0xff] %v12034_v9  ;;  %v12050_v47 = vmax.f32 %v11914_v40, 0.0  ;;  %v11915_v28 = vadd.f32 %v22107_v24, %v11688_v37  ;;  %v11704_v48 = vadd.f32 %v15615_v38, %v11384_v32  ;;  %v11386_v53 = vadd.f32 %v11385_v36, %v22840_v20 }
 0x7a0   : > { %v11984_v41 = vmax.f32 %v11848_v21, 0.0  ;;  %v11849_v31 = vadd.f32 %v22152_v43, %v11622_v54  ;;  %v11638_v61 = vadd.f32 %v15616_v0, %v11437_v23  ;;  %v11439_v58 = vadd.f32 %v11438_v25, %v22841_v27  ;;  %v11389_v42 = vpop.f32.mrf.mxu0  ;;  %v11442_v62 = vpop.f32.mrf.mxu1  ;;  %v22846_v21 = vld [vmem:[#allocation17_spill] sm:$0xff] }
 0x7a1   : > { %12186 = vst [vmem:[%s21724_s26 + $0x270] sm:$0xff] %v12050_v47  ;;  %v12051_v49 = vmax.f32 %v11915_v28, 0.0  ;;  %v11931_v45 = vadd.f32 %v22098_v46, %v11704_v48  ;;  %v11705_v13 = vadd.f32 %v15617_v33, %v11386_v53  ;;  %v11390_v5 = vadd.f32 %v11389_v42, %v22842_v29  ;;  %v15622_v23 = vld [vmem:[%s15985_s29 + $0x178] sm:$0xff]  ;;  %v15623_v53 = vld [vmem:[%s15985_s29 + $0x408] sm:$0xff]  ;;  %v15625_v29 = vld [vmem:[%s15985_s29 + $0x410] sm:$0xff] }
 0x7a2   : > { %12120 = vst [vmem:[%s21724_s26 + $0x60] sm:$0xff] %v11984_v41  ;;  %v11985_v34 = vmax.f32 %v11849_v31, 0.0  ;;  %v11865_v56 = vadd.f32 %v22141_v8, %v11638_v61  ;;  %v11639_v30 = vadd.f32 %v15618_v51, %v11439_v58  ;;  %v11443_v35 = vadd.f32 %v11442_v62, %v22843_v17  ;;  %v11391_v22 = vpop.f32.mrf.mxu0  ;;  %v11444_v59 = vpop.f32.mrf.mxu1  ;;  %v22847_v25 = vld [vmem:[#allocation81_spill] sm:$0xff]  ;;  %v22848_v31 = vld [vmem:[#allocation62_spill] sm:$0xff]  ;;  %v22849_v62 = vld [vmem:[#allocation83_spill] sm:$0xff] }
 0x7a3   : > { %12187 = vst [vmem:[%s21724_s26 + $0x278] sm:$0xff] %v12051_v49  ;;  %v12067_v26 = vmax.f32 %v11931_v45, 0.0  ;;  %v11932_v4 = vadd.f32 %v22107_v24, %v11705_v13  ;;  %v11721_v39 = vadd.f32 %v15619_v18, %v11390_v5  ;;  %v11392_v60 = vadd.f32 %v11391_v22, %v22844_v19  ;;  %v15624_v58 = vld [vmem:[%s15985_s29 + $0x1f8] sm:$0xff]  ;;  %v15626_v17 = vld [vmem:[%s15985_s29 + $0x200] sm:$0xff] }
 0x7a4   : > { %12121 = vst [vmem:[%s21724_s26 + $0x68] sm:$0xff] %v11985_v34  ;;  %v12001_v14 = vmax.f32 %v11865_v56, 0.0  ;;  %v11866_v52 = vadd.f32 %v22152_v43, %v11639_v30  ;;  %v11655_v16 = vadd.f32 %v15620_v10, %v11443_v35  ;;  %v11445_v12 = vadd.f32 %v11444_v59, %v22845_v44  ;;  %v11393_v9 = vpop.f32.mrf.mxu0  ;;  %v11446_v40 = vpop.f32.mrf.mxu1  ;;  %v22850_v34 = vld [vmem:[#allocation85_spill] sm:$0xff]  ;;  %v22851_v18 = vld [vmem:[#allocation86_spill] sm:$0xff] }
 0x7a5   : > { %12203 = vst [vmem:[%s21724_s26 + $0x2f8] sm:$0xff] %v12067_v26  ;;  %v12068_v55 = vmax.f32 %v11932_v4, 0.0  ;;  %v11948_v37 = vadd.f32 %v22098_v46, %v11721_v39  ;;  %v11722_v32 = vadd.f32 %v15621_v3, %v11392_v60  ;;  %v11394_v7 = vadd.f32 %v11393_v9, %v22846_v21  ;;  %v15629_v3 = vld [vmem:[%s15985_s29 + $0x308] sm:$0xff]  ;;  %v22853_v21 = vld [vmem:[#allocation89_spill] sm:$0xff] }
 0x7a6   : > { %12137 = vst [vmem:[%s21724_s26 + $0xe8] sm:$0xff] %v12001_v14  ;;  %v12002_v54 = vmax.f32 %v11866_v52, 0.0  ;;  %v11882_v50 = vadd.f32 %v22141_v8, %v11655_v16  ;;  %v11656_v36 = vadd.f32 %v15622_v23, %v11445_v12  ;;  %v11447_v47 = vadd.f32 %v11446_v40, %v22847_v25  ;;  %v11395_v28 = vpop.f32.mrf.mxu0  ;;  %v11448_v38 = vpop.f32.mrf.mxu1  ;;  %v15628_v16 = vld [vmem:[%s15985_s29 + $0x288] sm:$0xff] }
 0x7a7   : > { %12204 = vst [vmem:[%s21724_s26 + $0x300] sm:$0xff] %v12068_v55  ;;  %v12084_v48 = vmax.f32 %v11948_v37, 0.0  ;;  %v11949_v20 = vadd.f32 %v22107_v24, %v11722_v32  ;;  %v11738_v41 = vadd.f32 %v15623_v53, %v11394_v7  ;;  %v11396_v0 = vadd.f32 %v11395_v28, %v22848_v31  ;;  %v15631_v53 = vld [vmem:[%s15985_s29 + $0x390] sm:$0xff] }
 0x7a8   : > { %12138 = vst [vmem:[%s21724_s26 + $0xf0] sm:$0xff] %v12002_v54  ;;  %v12018_v61 = vmax.f32 %v11882_v50, 0.0  ;;  %v11883_v27 = vadd.f32 %v22152_v43, %v11656_v36  ;;  %v11672_v42 = vadd.f32 %v15624_v58, %v11447_v47  ;;  %v11449_v49 = vadd.f32 %v11448_v38, %v22849_v62  ;;  %v11452_v45 = vpop.f32.mrf.mxu1  ;;  %v15630_v36 = vld [vmem:[%s15985_s29 + $0x310] sm:$0xff]  ;;  %v22854_v47 = vld [vmem:[#allocation91_spill] sm:$0xff] }
 0x7a9   : > { %12220 = vst [vmem:[%s21724_s26 + $0x380] sm:$0xff] %v12084_v48  ;;  %v12085_v33 = vmax.f32 %v11949_v20, 0.0  ;;  %v11965_v13 = vadd.f32 %v22098_v46, %v11738_v41  ;;  %v11739_v5 = vadd.f32 %v15625_v29, %v11396_v0  ;;  %v11453_v56 = vadd.f32 %v11452_v45, %v22850_v34  ;;  %v15627_v46 = vld [vmem:[%s15985_s29 + $0x280] sm:$0xff]  ;;  %v22855_v31 = vld [vmem:[#allocation92_spill] sm:$0xff] }
 0x7aa   : > { %12154 = vst [vmem:[%s21724_s26 + $0x170] sm:$0xff] %v12018_v61  ;;  %v12019_v51 = vmax.f32 %v11883_v27, 0.0  ;;  %v11899_v30 = vadd.f32 %v22141_v8, %v11672_v42  ;;  %v11673_v35 = vadd.f32 %v15626_v17, %v11449_v49  ;;  %v11454_v22 = vpop.f32.mrf.mxu1  ;;  %v15632_v42 = vld [vmem:[%s15985_s29 + $0x398] sm:$0xff]  ;;  %v22856_v49 = vld [vmem:[#allocation94_spill] sm:$0xff] }
 0x7ab   : > { %12221 = vst [vmem:[%s21724_s26 + $0x388] sm:$0xff] %v12085_v33  ;;  %v12101_v59 = vmax.f32 %v11965_v13, 0.0  ;;  %v11966_v26 = vadd.f32 %v22107_v24, %v11739_v5  ;;  %v11689_v4 = vadd.f32 %v15627_v46, %v11453_v56  ;;  %v11455_v39 = vadd.f32 %v11454_v22, %v22851_v18  ;;  %v22852_v24 = vld [vmem:[#allocation88_spill] sm:$0xff]  ;;  %v15633_v5 = vld [vmem:[%s15985_s29 + $0x418] sm:$0xff]  ;;  %v22857_v56 = vld [vmem:[#allocation95_spill] sm:$0xff] }
 0x7ac   : > { %12155 = vst [vmem:[%s21724_s26 + $0x178] sm:$0xff] %v12019_v51  ;;  %v12035_v19 = vmax.f32 %v11899_v30, 0.0  ;;  %v11900_v60 = vadd.f32 %v22152_v43, %v11673_v35  ;;  %v11456_v14 = vpop.f32.mrf.mxu1  ;;  %v15634_v35 = vld [vmem:[%s15985_s29 + $0x420] sm:$0xff] }
 0x7ad   : > { %12237 = vst [vmem:[%s21724_s26 + $0x408] sm:$0xff] %v12101_v59  ;;  %v12102_v52 = vmax.f32 %v11966_v26, 0.0  ;;  %v11916_v10 = vadd.f32 %v22141_v8, %v11689_v4  ;;  %v11690_v44 = vadd.f32 %v15628_v16, %v11455_v39  ;;  %v11457_v12 = vadd.f32 %v11456_v14, %v22852_v24  ;;  %v22858_v26 = vld [vmem:[#allocation21_spill] sm:$0xff]  ;;  %v22859_v14 = vld [vmem:[#allocation16_spill] sm:$0xff] }
 0x7ae   : > { %12171 = vst [vmem:[%s21724_s26 + $0x1f8] sm:$0xff] %v12035_v19  ;;  %v12036_v9 = vmax.f32 %v11900_v60, 0.0  ;;  %v11458_v40 = vpop.f32.mrf.mxu1  ;;  %v22246_v4 = vrot.slane %v21985_v11, %v11777_v63  ;;  %v15635_v60 = vld [vmem:[%s15985_s29 + $0x70] sm:$0xff]  ;;  %v15636_v24 = vld [vmem:[%s15985_s29 + $0x78] sm:$0xff] }
 0x7af   : > { %12238 = vst [vmem:[%s21724_s26 + $0x410] sm:$0xff] %v12102_v52  ;;  %v12052_v55 = vmax.f32 %v11916_v10, 0.0  ;;  %v11917_v37 = vadd.f32 %v22152_v43, %v11690_v44  ;;  %v11706_v32 = vadd.f32 %v15629_v3, %v11457_v12  ;;  %v11459_v7 = vadd.f32 %v11458_v40, %v22853_v21  ;;  %v22860_v12 = vld [vmem:[#allocation14_spill] sm:$0xff] }
 0x7b0   : > { %12172 = vst [vmem:[%s21724_s26 + $0x200] sm:$0xff] %v12036_v9  ;;  %v11462_v54 = vpop.f32.mrf.mxu1  ;;  %v22255_v10 = vrot.slane %v21985_v11, %v11781_v15  ;;  %v15637_v15 = vld [vmem:[%s15985_s29 + $0xf8] sm:$0xff] }
 0x7b1   : > { %12188 = vst [vmem:[%s21724_s26 + $0x280] sm:$0xff] %v12052_v55  ;;  %v12053_v50 = vmax.f32 %v11917_v37, 0.0  ;;  %v11933_v23 = vadd.f32 %v22141_v8, %v11706_v32  ;;  %v11707_v25 = vadd.f32 %v15630_v36, %v11459_v7  ;;  %v11463_v28 = vadd.f32 %v11462_v54, %v22854_v47  ;;  %v22861_v37 = vld [vmem:[#allocation18_spill] sm:$0xff] }
 0x7b2   : > { %v11464_v38 = vpop.f32.mrf.mxu1  ;;  %v15638_v54 = vld [vmem:[%s15985_s29 + $0x100] sm:$0xff] }
 0x7b3   : > { %12189 = vst [vmem:[%s21724_s26 + $0x288] sm:$0xff] %v12053_v50  ;;  %v12069_v48 = vmax.f32 %v11933_v23, 0.0  ;;  %v11934_v20 = vadd.f32 %v22152_v43, %v11707_v25  ;;  %v11723_v41 = vadd.f32 %v15631_v53, %v11463_v28  ;;  %v11465_v0 = vadd.f32 %v11464_v38, %v22855_v31  ;;  %v22862_v23 = vld [vmem:[#allocation25_spill] sm:$0xff]  ;;  %v15639_v38 = vld [vmem:[%s15985_s29 + $0x180] sm:$0xff] }
 0x7b4   : > { %v11466_v61 = vpop.f32.mrf.mxu1 }
 0x7b5   : > { %12205 = vst [vmem:[%s21724_s26 + $0x308] sm:$0xff] %v12069_v48  ;;  %v12070_v27 = vmax.f32 %v11934_v20, 0.0  ;;  %v11950_v58 = vadd.f32 %v22141_v8, %v11723_v41  ;;  %v11724_v62 = vadd.f32 %v15632_v42, %v11465_v0  ;;  %v11467_v45 = vadd.f32 %v11466_v61, %v22856_v49  ;;  %v22863_v20 = vld [vmem:[#allocation80_spill] sm:$0xff]  ;;  %v15640_v61 = vld [vmem:[%s15985_s29 + $0x188] sm:$0xff] }
 0x7b6   : > { %v11468_v33 = vpop.f32.mrf.mxu1 }
 0x7b7   : > { %12206 = vst [vmem:[%s21724_s26 + $0x310] sm:$0xff] %v12070_v27  ;;  %v12086_v13 = vmax.f32 %v11950_v58, 0.0  ;;  %v11951_v29 = vadd.f32 %v22152_v43, %v11724_v62  ;;  %v11740_v34 = vadd.f32 %v15633_v5, %v11467_v45  ;;  %v11469_v51 = vadd.f32 %v11468_v33, %v22857_v56  ;;  %v22864_v58 = vld [vmem:[#allocation82_spill] sm:$0xff]  ;;  %v15641_v33 = vld [vmem:[%s15985_s29 + $0x208] sm:$0xff] }
 0x7b9   : > { %12222 = vst [vmem:[%s21724_s26 + $0x390] sm:$0xff] %v12086_v13  ;;  %v12087_v30 = vmax.f32 %v11951_v29, 0.0  ;;  %v11967_v17 = vadd.f32 %v22141_v8, %v11740_v34  ;;  %v11741_v22 = vadd.f32 %v15634_v35, %v11469_v51  ;;  %v11505_v59 = vpop.f32.mrf.mxu0  ;;  %v22865_v29 = vld [vmem:[#allocation84_spill] sm:$0xff] }
 0x7ba   : > { %v11506_v46 = vadd.f32 %v11505_v59, %v22858_v26  ;;  %v22867_v26 = vld [vmem:[#allocation98_spill] sm:$0xff] }
 0x7bb   : > { %12223 = vst [vmem:[%s21724_s26 + $0x398] sm:$0xff] %v12087_v30  ;;  %v12103_v18 = vmax.f32 %v11967_v17, 0.0  ;;  %v11968_v39 = vadd.f32 %v22152_v43, %v11741_v22  ;;  %v11507_v19 = vpop.f32.mrf.mxu0  ;;  %v15642_v17 = vld [vmem:[%s15985_s29 + $0x210] sm:$0xff]  ;;  %v22866_v22 = vld [vmem:[#allocation87_spill] sm:$0xff] }
 0x7bc   : > { %v11623_v8 = vadd.f32 %v15635_v60, %v11506_v46  ;;  %v11508_v52 = vadd.f32 %v11507_v19, %v22859_v14 }
 0x7bd   : > { %12239 = vst [vmem:[%s21724_s26 + $0x418] sm:$0xff] %v12103_v18  ;;  %v12104_v63 = vmax.f32 %v11968_v39, 0.0  ;;  %v11509_v16 = vpop.f32.mrf.mxu0 }
 0x7be   : > { %v11850_v44 = vadd.f32 %v22246_v4, %v11623_v8  ;;  %v11624_v43 = vadd.f32 %v15636_v24, %v11508_v52  ;;  %v11510_v9 = vadd.f32 %v11509_v16, %v22860_v12  ;;  %v15643_v8 = vld [vmem:[%s15985_s29 + $0x290] sm:$0xff] }
 0x7bf   : > { %12240 = vst [vmem:[%s21724_s26 + $0x420] sm:$0xff] %v12104_v63  ;;  %v11511_v40 = vpop.f32.mrf.mxu0  ;;  %v22292_v52 = vld [vmem:[%s22421_s13 + $0x10] ss:$0 sm:$0xff]  ;;  %v22868_v63 = vld [vmem:[#allocation90_spill] sm:$0xff] }
 0x7c0   : > { %v11986_v55 = vmax.f32 %v11850_v44, 0.0  ;;  %v11851_v1 = vadd.f32 %v22255_v10, %v11624_v43  ;;  %v11640_v11 = vadd.f32 %v15637_v15, %v11510_v9  ;;  %v11512_v3 = vadd.f32 %v11511_v40, %v22861_v37  ;;  %v15644_v44 = vld [vmem:[%s15985_s29 + $0x80] sm:$0xff]  ;;  %v22869_v15 = vld [vmem:[#allocation93_spill] sm:$0xff] }
 0x7c1   : > { %v11515_v32 = vpop.f32.mrf.mxu0 }
 0x7c2   : > { %12122 = vst [vmem:[%s21724_s26 + $0x70] sm:$0xff] %v11986_v55  ;;  %v11987_v21 = vmax.f32 %v11851_v1, 0.0  ;;  %v11867_v7 = vadd.f32 %v22246_v4, %v11640_v11  ;;  %v11641_v50 = vadd.f32 %v15638_v54, %v11512_v3  ;;  %v11516_v36 = vadd.f32 %v11515_v32, %v22862_v23  ;;  %v15645_v55 = vld [vmem:[%s15985_s29 + $0x298] sm:$0xff]  ;;  %v22870_v3 = vld [vmem:[#allocation100_spill] sm:$0xff] }
 0x7c3   : > { %v11517_v25 = vpop.f32.mrf.mxu0  ;;  %v15646_v23 = vld [vmem:[%s15985_s29 + $0x318] sm:$0xff] }
 0x7c4   : > { %12123 = vst [vmem:[%s21724_s26 + $0x78] sm:$0xff] %v11987_v21  ;;  %v12003_v47 = vmax.f32 %v11867_v7, 0.0  ;;  %v11868_v28 = vadd.f32 %v22255_v10, %v11641_v50  ;;  %v11657_v48 = vadd.f32 %v15639_v38, %v11516_v36  ;;  %v11518_v53 = vadd.f32 %v11517_v25, %v22863_v20  ;;  %v22871_v25 = vld [vmem:[#allocation96_spill] sm:$0xff]  ;;  %v15647_v38 = vld [vmem:[%s15985_s29 + $0x108] sm:$0xff] }
 0x7c5   : > { %v11519_v41 = vpop.f32.mrf.mxu0 }
 0x7c6   : > { %12139 = vst [vmem:[%s21724_s26 + $0xf8] sm:$0xff] %v12003_v47  ;;  %v12004_v31 = vmax.f32 %v11868_v28, 0.0  ;;  %v11884_v0 = vadd.f32 %v22246_v4, %v11657_v48  ;;  %v11658_v27 = vadd.f32 %v15640_v61, %v11518_v53  ;;  %v11520_v42 = vadd.f32 %v11519_v41, %v22864_v58 }
 0x7c7   : > { %v11521_v62 = vpop.f32.mrf.mxu0 }
 0x7c8   : > { %12140 = vst [vmem:[%s21724_s26 + $0x100] sm:$0xff] %v12004_v31  ;;  %v12020_v49 = vmax.f32 %v11884_v0, 0.0  ;;  %v11885_v45 = vadd.f32 %v22255_v10, %v11658_v27  ;;  %v11674_v13 = vadd.f32 %v15641_v33, %v11520_v42  ;;  %v11522_v5 = vadd.f32 %v11521_v62, %v22865_v29  ;;  %v15648_v0 = vld [vmem:[%s15985_s29 + $0x320] sm:$0xff]  ;;  %v22872_v27 = vld [vmem:[#allocation97_spill] sm:$0xff] }
 0x7c9   : > { %v11525_v34 = vpop.f32.mrf.mxu0  ;;  %v11578_v56 = vpop.f32.mrf.mxu1  ;;  %v22873_v62 = vld [vmem:[#allocation102_spill] sm:$0xff] }
 0x7ca   : > { %12156 = vst [vmem:[%s21724_s26 + $0x180] sm:$0xff] %v12020_v49  ;;  %v12021_v51 = vmax.f32 %v11885_v45, 0.0  ;;  %v11901_v30 = vadd.f32 %v22246_v4, %v11674_v13  ;;  %v11675_v35 = vadd.f32 %v15642_v17, %v11522_v5  ;;  %v11526_v59 = vadd.f32 %v11525_v34, %v22866_v22  ;;  %v15649_v5 = vld [vmem:[%s15985_s29 + $0x3a0] sm:$0xff]  ;;  %v15650_v17 = vld [vmem:[%s15985_s29 + $0x190] sm:$0xff] }
 0x7cb   : > { %v11579_v46 = vadd.f32 %v22867_v26, %v11578_v56  ;;  %v11527_v18 = vpop.f32.mrf.mxu0  ;;  %v11580_v39 = vpop.f32.mrf.mxu1  ;;  %v22874_v56 = vld [vmem:[#allocation99_spill] sm:$0xff] }
 0x7cc   : > { %12157 = vst [vmem:[%s21724_s26 + $0x188] sm:$0xff] %v12021_v51  ;;  %v12037_v19 = vmax.f32 %v11901_v30, 0.0  ;;  %v11902_v60 = vadd.f32 %v22255_v10, %v11675_v35  ;;  %v11691_v14 = vadd.f32 %v15643_v8, %v11526_v59  ;;  %v11528_v16 = vadd.f32 %v11527_v18, %v22868_v63  ;;  %v15651_v18 = vld [vmem:[%s15985_s29 + $0x3a8] sm:$0xff] }
 0x7cd   : > { %v11625_v24 = vadd.f32 %v15644_v44, %v11579_v46  ;;  %v11529_v43 = vpop.f32.mrf.mxu0  ;;  %v11581_v12 = vpop.f32.mrf.mxu1 }
 0x7ce   : > { %12173 = vst [vmem:[%s21724_s26 + $0x208] sm:$0xff] %v12037_v19  ;;  %v12038_v9 = vmax.f32 %v11902_v60, 0.0  ;;  %v11918_v40 = vadd.f32 %v22246_v4, %v11691_v14  ;;  %v11692_v1 = vadd.f32 %v15645_v55, %v11528_v16  ;;  %v11530_v11 = vadd.f32 %v11529_v43, %v22869_v15  ;;  %v22875_v19 = vld [vmem:[#allocation101_spill] sm:$0xff]  ;;  %v22876_v14 = vld [vmem:[#allocation104_spill] sm:$0xff] }
 0x7cf   : > { %v11852_v37 = vadd.f32 %v22292_v52, %v11625_v24  ;;  %v11582_v32 = vadd.f32 %v22870_v3, %v11581_v12  ;;  %v11531_v21 = vpop.f32.mrf.mxu0  ;;  %v11583_v7 = vpop.f32.mrf.mxu1  ;;  %v15652_v12 = vld [vmem:[%s15985_s29 + $0x428] sm:$0xff]  ;;  %v15653_v15 = vld [vmem:[%s15985_s29 + $0x218] sm:$0xff] }
 0x7d0   : > { %12174 = vst [vmem:[%s21724_s26 + $0x210] sm:$0xff] %v12038_v9  ;;  %v12054_v54 = vmax.f32 %v11918_v40, 0.0  ;;  %v11919_v50 = vadd.f32 %v22255_v10, %v11692_v1  ;;  %v11708_v36 = vadd.f32 %v15646_v23, %v11530_v11  ;;  %v11532_v47 = vadd.f32 %v11531_v21, %v22871_v25  ;;  %v22877_v40 = vld [vmem:[#allocation103_spill] sm:$0xff]  ;;  %v15654_v21 = vld [vmem:[%s15985_s29 + $0x430] sm:$0xff] }
 0x7d1   : > { %v11988_v28 = vmax.f32 %v11852_v37, 0.0  ;;  %v11642_v48 = vadd.f32 %v15647_v38, %v11582_v32  ;;  %v11535_v20 = vpop.f32.mrf.mxu0  ;;  %v11586_v53 = vpop.f32.mrf.mxu1 }
 0x7d2   : > { %12190 = vst [vmem:[%s21724_s26 + $0x290] sm:$0xff] %v12054_v54  ;;  %v12055_v41 = vmax.f32 %v11919_v50, 0.0  ;;  %v11935_v31 = vadd.f32 %v22246_v4, %v11708_v36  ;;  %v11709_v61 = vadd.f32 %v15648_v0, %v11532_v47  ;;  %v11536_v58 = vadd.f32 %v11535_v20, %v22872_v27  ;;  %v22878_v54 = vld [vmem:[#allocation105_spill] sm:$0xff] }
 0x7d3   : > { %12124 = vst [vmem:[%s21724_s26 + $0x80] sm:$0xff] %v11988_v28  ;;  %v11869_v42 = vadd.f32 %v22292_v52, %v11642_v48  ;;  %v11587_v49 = vadd.f32 %v22873_v62, %v11586_v53  ;;  %v11537_v45 = vpop.f32.mrf.mxu0  ;;  %v11588_v33 = vpop.f32.mrf.mxu1  ;;  %v15655_v28 = vld [vmem:[%s15985_s29 + $0x2a0] sm:$0xff] }
 0x7d4   : > { %12191 = vst [vmem:[%s21724_s26 + $0x298] sm:$0xff] %v12055_v41  ;;  %v12071_v13 = vmax.f32 %v11935_v31, 0.0  ;;  %v11936_v29 = vadd.f32 %v22255_v10, %v11709_v61  ;;  %v11725_v34 = vadd.f32 %v15649_v5, %v11536_v58  ;;  %v11538_v51 = vadd.f32 %v11537_v45, %v22874_v56  ;;  %v15656_v61 = vld [vmem:[%s15985_s29 + $0x328] sm:$0xff]  ;;  %v15658_v56 = vld [vmem:[%s15985_s29 + $0x438] sm:$0xff] }
 0x7d5   : > { %v12005_v30 = vmax.f32 %v11869_v42, 0.0  ;;  %v11659_v35 = vadd.f32 %v15650_v17, %v11587_v49  ;;  %v11539_v22 = vpop.f32.mrf.mxu0  ;;  %v11589_v59 = vpop.f32.mrf.mxu1 }
 0x7d6   : > { %12207 = vst [vmem:[%s21724_s26 + $0x318] sm:$0xff] %v12071_v13  ;;  %v12072_v26 = vmax.f32 %v11936_v29, 0.0  ;;  %v11952_v46 = vadd.f32 %v22246_v4, %v11725_v34  ;;  %v11726_v39 = vadd.f32 %v15651_v18, %v11538_v51  ;;  %v11540_v60 = vadd.f32 %v11539_v22, %v22875_v19 }
 0x7d7   : > { %12141 = vst [vmem:[%s21724_s26 + $0x108] sm:$0xff] %v12005_v30  ;;  %v11886_v8 = vadd.f32 %v22292_v52, %v11659_v35  ;;  %v11590_v63 = vadd.f32 %v22876_v14, %v11589_v59  ;;  %v11541_v16 = vpop.f32.mrf.mxu0  ;;  %v11591_v44 = vpop.f32.mrf.mxu1 }
 0x7d8   : > { %12208 = vst [vmem:[%s21724_s26 + $0x320] sm:$0xff] %v12072_v26  ;;  %v12088_v24 = vmax.f32 %v11952_v46, 0.0  ;;  %v11953_v43 = vadd.f32 %v22255_v10, %v11726_v39  ;;  %v11742_v9 = vadd.f32 %v15652_v12, %v11540_v60  ;;  %v11542_v55 = vadd.f32 %v11541_v16, %v22877_v40 }
 0x7d9   : > { %v12022_v1 = vmax.f32 %v11886_v8, 0.0  ;;  %v11676_v11 = vadd.f32 %v15653_v15, %v11590_v63  ;;  %v11594_v37 = vpop.f32.mrf.mxu1 }
 0x7da   : > { %12224 = vst [vmem:[%s21724_s26 + $0x3a0] sm:$0xff] %v12088_v24  ;;  %v12089_v3 = vmax.f32 %v11953_v43, 0.0  ;;  %v11969_v32 = vadd.f32 %v22246_v4, %v11742_v9  ;;  %v11743_v7 = vadd.f32 %v15654_v21, %v11542_v55  ;;  %v11595_v50 = vadd.f32 %v22878_v54, %v11594_v37 }
 0x7db   : > { %12158 = vst [vmem:[%s21724_s26 + $0x190] sm:$0xff] %v12022_v1  ;;  %v11903_v23 = vadd.f32 %v22292_v52, %v11676_v11  ;;  %v11596_v36 = vpop.f32.mrf.mxu1 }
 0x7dc   : > { %12225 = vst [vmem:[%s21724_s26 + $0x3a8] sm:$0xff] %v12089_v3  ;;  %v12105_v25 = vmax.f32 %v11969_v32, 0.0  ;;  %v11970_v47 = vadd.f32 %v22255_v10, %v11743_v7  ;;  %v11693_v38 = vadd.f32 %v15655_v28, %v11595_v50 }
 0x7dd   : > { %v12039_v48 = vmax.f32 %v11903_v23, 0.0  ;;  %v11597_v4 = vpop.f32.mrf.mxu1 }
 0x7de   : > { %12241 = vst [vmem:[%s21724_s26 + $0x428] sm:$0xff] %v12105_v25  ;;  %v12106_v20 = vmax.f32 %v11970_v47, 0.0  ;;  %v11920_v53 = vadd.f32 %v22292_v52, %v11693_v38  ;;  %v11598_v41 = vadd.f32 %v21721_v57, %v11597_v4  ;;  %v15657_v57 = vld [vmem:[%s15985_s29 + $0x3b0] sm:$0xff]  ;;  %s15659_s29 = scalar_lea.vmem %s22363_s22, 17408 }
 0x7df   : > { %12175 = vst [vmem:[%s21724_s26 + $0x218] sm:$0xff] %v12039_v48  ;;  %v11599_v31 = vpop.f32.mrf.mxu1  ;;  %p15660_p11 = scmp.ne.s32.totalorder %s22363_s22, %s15659_s29  ;;  %p15667_p1 = scmp.lt.s32.totalorder %s15665_s18, %s15659_s29 }
 0x7e0   : > { %12242 = vst [vmem:[%s21724_s26 + $0x430] sm:$0xff] %v12106_v20  ;;  %v12056_v0 = vmax.f32 %v11920_v53, 0.0  ;;  %v11710_v10 = vadd.f32 %v15656_v61, %v11598_v41 }
 0x7e1   : > { %v11602_v27 = vpop.f32.mrf.mxu1  ;;  %p15661_p12 = pnand %p15660_p11, %p15839_p5  ;;  %p15668_p2 = por %p15667_p1, %p15666_p0 }
 0x7e2   : > { %12192 = vst [vmem:[%s21724_s26 + $0x2a0] sm:$0xff] %v12056_v0  ;;  %v11937_v58 = vadd.f32 %v22292_v52, %v11710_v10  ;;  %v11603_v42 = vadd.f32 %v21732_v2, %v11602_v27 }
 0x7e3   : > { %v11604_v62 = vpop.f32.mrf.mxu1  ;;  %p15662_p13 = pneg %p15661_p12 }
 0x7e4   : > { %v12073_v49 = vmax.f32 %v11937_v58, 0.0  ;;  %v11727_v45 = vadd.f32 %v15657_v57, %v11603_v42 }
 0x7e5   : > { %v11605_v33 = vpop.f32.mrf.mxu1  ;;  %p15669_p3 = pnand %p15668_p2, %p15662_p13 }
 0x7e6   : > { %12209 = vst [vmem:[%s21724_s26 + $0x328] sm:$0xff] %v12073_v49  ;;  %v11954_v13 = vadd.f32 %v22292_v52, %v11727_v45  ;;  %v11606_v29 = vadd.f32 %v21746_v6, %v11605_v33 }
 0x7e7   : > { %v11607_v5 = vpop.f32.mrf.mxu1 }
 0x7e8   : > { %v12090_v34 = vmax.f32 %v11954_v13, 0.0  ;;  %v11744_v51 = vadd.f32 %v15658_v56, %v11606_v29 }
 0x7ea   : > { %12226 = vst [vmem:[%s21724_s26 + $0x3b0] sm:$0xff] %v12090_v34  ;;  %v11971_v2 = vadd.f32 %v22292_v52, %v11744_v51 }
 0x7ec   : > { %v12107_v30 = vmax.f32 %v11971_v2, 0.0 }
 0x7ee   : > { %12243 = vst [vmem:[%s21724_s26 + $0x438] sm:$0xff] %v12107_v30 }
 0x7ef   : > { %15672 = shalt.err (!%p15669_p3)
}
 0x7f0   : > { %s15673_s19 = scalar_lea.hbm %s22361_s24, 17408  ;;  %s15677_s25 = scalar_lea.hbm %s22422_s14, 34816 }
 0x7f1   : > { %p15674_p4 = scmp.ne.s32.totalorder %s22361_s24, %s15673_s19  ;;  %p15678_p9 = scmp.lt.s32.totalorder %s22361_s24, %s22422_s14 }
 0x7f2   : > { %p15679_p10 = scmp.lt.s32.totalorder %s15677_s25, %s15673_s19 }
 0x7f3   : > { %p15675_p7 = pnand %p15674_p4, %p15839_p5 }
 0x7f4   : > { %p15680_p11 = por %p15679_p10, %p15678_p9 }
 0x7f5   : > { %p15676_p8 = pneg %p15675_p7 }
 0x7f7   : > { %p15681_p12 = pnand %p15680_p11, %p15676_p8 }
 0x7f9   : > { %15684 = shalt.err (!%p15681_p12)
}
 0x7fa   : > { %s15724_s29 = smov 2176   ;;  %s15725_s27 = smov 136  }
 0x7fb   : > { %13720 = dma.vmem_to_hbm [thread:$0]  (%p15839_p5), %s22363_s22, 17408, %s22361_s24, %s22368_s17, %s15724_s29, %s15724_s29, %s15725_s27  }
 0x7fc PF: > { %s22879_s28 = sld [smem:[#allocation5_spill]]  ;;  %p13726_p13 = scmp.ge.s32.totalorder %s15719_s16, 2 }
 0x7fe   : > { %p13723_p0 = pnand %p13726_p13, %p15843_p6 }
 0x800   : > { %p13724_p1 = pneg %p13723_p0 }
 0x802   : > { %s12274_s26 = sand.u32 1, %s22879_s28  }
 0x803   : > { %s12275_s19 = scalar_lea.sflag [#allocation3], %s12274_s26 }
 0x804   : > { %15702 = dma.done.wait (%p13724_p1), %s12275_s19, 17408  }
 0x805   : > { %15704 = vsyncadd (%p13724_p1), %s12275_s19, 4294949888  ;;  %s22881_s16 = sld [smem:[#allocation7_spill]]  ;;  %s22884_s29 = smov %s15711_s30 }
 0x806   : > { %s22882_s20 = sld [smem:[#allocation6_spill]] }
 0x807   : > { %s22883_s15 = sld [smem:[#allocation8_spill]] }
 0x80b   : > { %p24_p2 = scmp.ge.s32.totalorder %s22881_s16, 4  }
 0x80c   : > { %s22885_s30 = smov %s22882_s20 }
 0x80d   :  { %26 = sbr.rel (!%p24_p2) target bundleno = 3 (0x3), region = 119 }
 0x812   :  { %12280 = vsyncpa [#allocation3], 1 }
 0x813   :  { %12282 = vsyncpa [#allocation3 + $0x1], 1 }

</bundles_post_ra>
